<compile_context>
chip_gen: v7x
topology: tpu7x:2x2x1
jax: 0.10.0
libtpu: 0.0.40
codegen_flags: <defaults>
</compile_context>

<pallas_src>
import functools

import jax
import jax.numpy as jnp
from jax.experimental import pallas as pl
from jax.experimental.pallas import tpu as pltpu


def _round_up(x, m):
    return (x + m - 1) // m * m


@functools.lru_cache(maxsize=None)
def _vmem_limit():
    """Chip-aware scoped-VMEM limit: leave headroom on 64 MiB parts."""
    cap = None
    try:
        info = pltpu.get_tpu_info()
        cap = int(getattr(info, "vmem_capacity_bytes", 0)) or None
    except Exception:
        cap = None
    if cap is None:
        try:
            kind = jax.devices()[0].device_kind.lower()
        except Exception:
            kind = ""
        if ("v4" in kind) or ("v5" in kind) or ("v6" in kind):
            cap = 128 * 1024 * 1024
        else:
            cap = 64 * 1024 * 1024
    return min(cap * 3 // 4, 100 * 1024 * 1024)


def _compiler_params(par_axes=1):
    return pltpu.CompilerParams(
        dimension_semantics=("parallel",) * par_axes,
        vmem_limit_bytes=_vmem_limit())


def _pick_tm(M, K, N, a_bytes):
    """Biggest M-tile that fits a conservative VMEM budget (no forced split)."""
    budget = max(2 * 1024 * 1024, _vmem_limit() // 3)
    tm = 512
    while tm > 8 and (2 * tm * K * a_bytes + 2 * tm * N * 4 + K * N * 2) > budget:
        tm //= 2
    return max(8, min(tm, _round_up(M, 8)))


# ----------------------------------------------------------------------------
# Pallas kernels
# ----------------------------------------------------------------------------
def _mm_kernel(*refs, prologue, epilogue, bias, relu_out):
    """o = [relu]( [relu(a*s_in+t_in)] @ b [*s_out+t_out] [+ bias] )."""
    it = iter(refs)
    a_ref = next(it)
    sin_ref = next(it) if prologue else None
    tin_ref = next(it) if prologue else None
    b_ref = next(it)
    sout_ref = next(it) if epilogue else None
    tout_ref = next(it) if epilogue else None
    bias_ref = next(it) if bias else None
    o_ref = next(it)

    a = a_ref[...]
    if prologue:                                  # fused pre-activation BN+ReLU
        a = jnp.maximum(a * sin_ref[...] + tin_ref[...], 0.0)
    acc = jnp.dot(a.astype(jnp.bfloat16), b_ref[...],
                  preferred_element_type=jnp.float32)
    if epilogue:                                  # fused post-conv BN
        acc = acc * sout_ref[...] + tout_ref[...]
    if bias:
        acc = acc + bias_ref[...]
    if relu_out:
        acc = jnp.maximum(acc, 0.0)
    o_ref[...] = acc.astype(o_ref.dtype)


def _conv3x3_kernel(x_ref, w_ref, o_ref, *, H, W, Wpad, G):
    """Direct 3x3 s1 p1 conv on an already-activated, zero-padded image.

    x_ref: (1, H+3, Wpad, C) bf16 (top pad 1, bottom pad 2, left pad 1,
           right pad >=1, Wpad % 8 == 0)
    w_ref: (3, C, 3G) bf16 — w_ref[dj][:, di*G:(di+1)*G] = tap (di, dj)
    o_ref: (1, H, W, G)

    The 3 row taps are folded into the weight's N dim (wider MXU), the column
    shift dj is realized as one flat-row slice per dj, and the 9 partials are
    accumulated in a local f32 value written exactly once.
    """
    C = x_ref.shape[-1]
    rows = (H + 2) * Wpad
    xf = x_ref[0].reshape((H + 3) * Wpad, C)
    acc = None
    for dj in range(3):
        xs = xf[dj:dj + rows, :]                              # flat column shift
        y = jnp.dot(xs.astype(jnp.bfloat16), w_ref[dj],
                    preferred_element_type=jnp.float32)       # (rows, 3G)
        y = y.reshape(H + 2, Wpad, 3 * G)
        for di in range(3):
            p = y[di:di + H, :, di * G:(di + 1) * G]          # row tap (aligned)
            acc = p if acc is None else acc + p
    o_ref[0] = acc[:, :W, :].astype(o_ref.dtype)


def _maxpool_kernel(x_ref, o_ref, *, Ho, Wo, C):
    """3x3 / stride 2 / pad 1 max-pool on a zero-padded, (W,2C)-packed map.

    x_ref: (1, Ho+1, 2, Wo+1, 2C) — padded (2Ho+2, 2Wo+2, C) reshaped so the
    even/odd column pair sits on lanes [0:C]/[C:2C] (free XLA reshape).
    Input is post-ReLU (>= 0), so zero padding is max-neutral."""
    x = x_ref[0]
    r0 = x[:, 0]                                   # rows 2i   : (Ho+1, Wo+1, 2C)
    r1 = x[:, 1]                                   # rows 2i+1
    v = jnp.maximum(jnp.maximum(r0[:Ho], r1[:Ho]), r0[1:Ho + 1])
    m = jnp.maximum(jnp.maximum(v[:, :Wo, :C], v[:, :Wo, C:]),
                    v[:, 1:Wo + 1, :C])
    o_ref[0] = m.astype(o_ref.dtype)


def _bn_relu_avgpool_kernel(x_ref, s_ref, t_ref, o_ref, *, C):
    """Fused BN + ReLU + 2x2/s2 average pool (transition prologue)."""
    x = x_ref[0].astype(jnp.float32)               # (Ho, 2, Wo, 2C)
    x = jnp.maximum(x * s_ref[0] + t_ref[0], 0.0)
    v = x[:, 0] + x[:, 1]                          # (Ho, Wo, 2C)
    o_ref[0] = ((v[:, :, :C] + v[:, :, C:]) * 0.25).astype(o_ref.dtype)


def _head_kernel(x_ref, s_ref, t_ref, w1_ref, b1_ref, w2_ref, b2_ref, o_ref):
    """norm5 + ReLU + global-avg-pool + Linear(F,1000) + Linear(1000,ncls)."""
    x = x_ref[...].astype(jnp.float32)             # (B, H*W, C)
    x = jnp.maximum(x * s_ref[...] + t_ref[...], 0.0)
    feat = jnp.mean(x, axis=1)                     # (B, C)
    h = jnp.dot(feat.astype(jnp.bfloat16), w1_ref[...],
                preferred_element_type=jnp.float32) + b1_ref[...]
    o = jnp.dot(h.astype(jnp.bfloat16), w2_ref[...],
                preferred_element_type=jnp.float32) + b2_ref[...]
    o_ref[...] = o


# ----------------------------------------------------------------------------
# Pallas wrappers
# ----------------------------------------------------------------------------
def pallas_matmul(a, b, *, pre_scale=None, pre_shift=None,
                  post_scale=None, post_shift=None, bias=None,
                  relu_out=False, out_dtype=jnp.float32):
    """Fused (BN+ReLU) -> matmul -> (BN[/bias][/ReLU]); b is pre-cast bf16.

    Single-shot over K/N; grid tiles M only and the ragged last block (if any)
    is masked by Pallas — no pad / slice HBM round trips."""
    M, K = a.shape
    Kb, N = b.shape
    assert K == Kb
    tm = _pick_tm(M, K, N, a.dtype.itemsize)

    prologue = pre_scale is not None
    epilogue = post_scale is not None
    has_bias = bias is not None

    operands = [a]
    in_specs = [pl.BlockSpec((tm, K), lambda i: (i, 0))]
    if prologue:
        operands += [pre_scale.reshape(1, K).astype(jnp.float32),
                     pre_shift.reshape(1, K).astype(jnp.float32)]
        in_specs += [pl.BlockSpec((1, K), lambda i: (0, 0))] * 2
    operands.append(b)
    in_specs.append(pl.BlockSpec((K, N), lambda i: (0, 0)))
    if epilogue:
        operands += [post_scale.reshape(1, N).astype(jnp.float32),
                     post_shift.reshape(1, N).astype(jnp.float32)]
        in_specs += [pl.BlockSpec((1, N), lambda i: (0, 0))] * 2
    if has_bias:
        operands.append(bias.reshape(1, N).astype(jnp.float32))
        in_specs.append(pl.BlockSpec((1, N), lambda i: (0, 0)))

    kernel = functools.partial(_mm_kernel, prologue=prologue, epilogue=epilogue,
                               bias=has_bias, relu_out=relu_out)
    return pl.pallas_call(
        kernel,
        out_shape=jax.ShapeDtypeStruct((M, N), out_dtype),
        grid=(pl.cdiv(M, tm),),
        in_specs=in_specs,
        out_specs=pl.BlockSpec((tm, N), lambda i: (i, 0)),
        compiler_params=_compiler_params(),
    )(*operands)


def conv3x3_direct(x_act, w3):
    """3x3/stride1/pad1 conv; x_act (B,H,W,C) is already BN+ReLU-activated
    (zero halo padding therefore matches PyTorch BN->ReLU->Conv(pad=1))."""
    B, H, W, C = x_act.shape
    G = w3.shape[-1] // 3
    Wpad = _round_up(W + 2, 8)              # keep the in-kernel flatten aligned
    xp = jnp.pad(x_act, ((0, 0), (1, 2), (1, Wpad - W - 1), (0, 0)))
    return pl.pallas_call(
        functools.partial(_conv3x3_kernel, H=H, W=W, Wpad=Wpad, G=G),
        out_shape=jax.ShapeDtypeStruct((B, H, W, G), x_act.dtype),
        grid=(B,),
        in_specs=[pl.BlockSpec((1, H + 3, Wpad, C), lambda b: (b, 0, 0, 0)),
                  pl.BlockSpec((3, C, 3 * G), lambda b: (0, 0, 0))],
        out_specs=pl.BlockSpec((1, H, W, G), lambda b: (b, 0, 0, 0)),
        compiler_params=_compiler_params(),
    )(xp, w3)


def maxpool_3x3_s2_p1(x):
    """Direct 3x3/s2/p1 max-pool (input assumed >= 0, i.e. post-ReLU)."""
    B, H, W, C = x.shape
    assert H % 2 == 0 and W % 2 == 0
    Ho, Wo = H // 2, W // 2
    xp = jnp.pad(x, ((0, 0), (1, 1), (1, 1), (0, 0)))        # zeros: max-neutral
    xr = xp.reshape(B, Ho + 1, 2, Wo + 1, 2 * C)              # free metadata op
    return pl.pallas_call(
        functools.partial(_maxpool_kernel, Ho=Ho, Wo=Wo, C=C),
        out_shape=jax.ShapeDtypeStruct((B, Ho, Wo, C), x.dtype),
        grid=(B,),
        in_specs=[pl.BlockSpec((1, Ho + 1, 2, Wo + 1, 2 * C),
                               lambda b: (b, 0, 0, 0, 0))],
        out_specs=pl.BlockSpec((1, Ho, Wo, C), lambda b: (b, 0, 0, 0)),
        compiler_params=_compiler_params(),
    )(xr)


def bn_relu_avgpool2x2(x, scale2, shift2):
    """Fused BN + ReLU + AvgPool2x2 (scale2/shift2 are channel params tiled
    to 2C to match the even/odd column lane packing)."""
    B, H, W, C = x.shape
    assert H % 2 == 0 and W % 2 == 0
    Ho, Wo = H // 2, W // 2
    xr = x.reshape(B, Ho, 2, Wo, 2 * C)                       # free metadata op
    return pl.pallas_call(
        functools.partial(_bn_relu_avgpool_kernel, C=C),
        out_shape=jax.ShapeDtypeStruct((B, Ho, Wo, C), jnp.bfloat16),
        grid=(B,),
        in_specs=[pl.BlockSpec((1, Ho, 2, Wo, 2 * C), lambda b: (b, 0, 0, 0, 0)),
                  pl.BlockSpec((1, 1, 1, 2 * C), lambda b: (0, 0, 0, 0)),
                  pl.BlockSpec((1, 1, 1, 2 * C), lambda b: (0, 0, 0, 0))],
        out_specs=pl.BlockSpec((1, Ho, Wo, C), lambda b: (b, 0, 0, 0)),
        compiler_params=_compiler_params(),
    )(xr, scale2, shift2)


def classifier_head(x3, s, t, w1, b1, w2, b2):
    """(B, H*W, C) -> (B, ncls): norm5+ReLU+GAP+fc1(+b)+fc2(+b), one kernel."""
    B, HW, C = x3.shape
    ncls = w2.shape[1]
    return pl.pallas_call(
        _head_kernel,
        out_shape=jax.ShapeDtypeStruct((B, ncls), jnp.float32),
        compiler_params=pltpu.CompilerParams(vmem_limit_bytes=_vmem_limit()),
    )(x3, s.reshape(1, 1, C), t.reshape(1, 1, C),
      w1, b1.reshape(1, -1), w2, b2.reshape(1, -1))


# ----------------------------------------------------------------------------
# JAX glue (im2col only for the 7x7 stem conv)
# ----------------------------------------------------------------------------
def _im2col(x, k, stride, pad):
    """x: (B,H,W,C) -> (B,Ho,Wo,k*k*C), patch order (kh,kw) slow, C fast."""
    B, H, W, C = x.shape
    xp = jnp.pad(x, ((0, 0), (pad, pad), (pad, pad), (0, 0)))
    Ho = (H + 2 * pad - k) // stride + 1
    Wo = (W + 2 * pad - k) // stride + 1
    cols = []
    for i in range(k):
        for j in range(k):
            cols.append(jax.lax.slice(
                xp, (0, i, j, 0),
                (B, i + (Ho - 1) * stride + 1, j + (Wo - 1) * stride + 1, C),
                (1, stride, stride, 1)))
    return jnp.concatenate(cols, axis=-1), Ho, Wo


def _fold_bn(bn, eps=1e-5):
    scale = bn["gamma"] / jnp.sqrt(bn["var"] + eps)
    shift = bn["beta"] - bn["mean"] * scale
    return scale, shift


# ----------------------------------------------------------------------------
# Model: densenet201_femoral (DenseNet -> Linear(F,1000) -> Linear(1000,ncls))
# ----------------------------------------------------------------------------
GROWTH = 8
INIT_FEAT = 16
BN_SIZE = 4
BLOCKS = (2, 2, 4, 2)       # reduced; real densenet201 is (6, 12, 48, 32)
NUM_CLASSES = 4


def init_params(key, num_classes=NUM_CLASSES):
    keys = iter(jax.random.split(key, 512))

    def nkey():
        return next(keys)

    def conv_w(kin, kout):
        return jax.random.normal(nkey(), (kin, kout), jnp.float32) * (kin ** -0.5)

    def bn_p(c):
        return dict(
            gamma=1.0 + 0.1 * jax.random.normal(nkey(), (c,), jnp.float32),
            beta=0.1 * jax.random.normal(nkey(), (c,), jnp.float32),
            mean=0.1 * jax.random.normal(nkey(), (c,), jnp.float32),
            var=1.0 + 0.1 * jax.random.uniform(nkey(), (c,), jnp.float32),
        )

    params = {"conv0_w": conv_w(7 * 7 * 3, INIT_FEAT), "norm0": bn_p(INIT_FEAT),
              "blocks": [], "trans": []}
    c = INIT_FEAT
    for bi, n_layers in enumerate(BLOCKS):
        layers = []
        for _ in range(n_layers):
            layers.append(dict(
                norm1=bn_p(c),
                conv1_w=conv_w(c, BN_SIZE * GROWTH),
                norm2=bn_p(BN_SIZE * GROWTH),
                conv2_w=conv_w(9 * BN_SIZE * GROWTH, GROWTH),
            ))
            c += GROWTH
        params["blocks"].append(layers)
        if bi != len(BLOCKS) - 1:
            params["trans"].append(dict(norm=bn_p(c), conv_w=conv_w(c, c // 2)))
            c = c // 2
    params["norm5"] = bn_p(c)
    params["fc1_w"] = conv_w(c, 1000)                       # densenet.classifier
    params["fc1_b"] = 0.01 * jax.random.normal(nkey(), (1000,), jnp.float32)
    params["fc2_w"] = conv_w(1000, num_classes)             # self.classifier
    params["fc2_b"] = 0.01 * jax.random.normal(nkey(), (num_classes,), jnp.float32)
    return params


def prepare_params(params):
    """One-time inference prep: fold BN, cast to bf16, pad 1x1 weights/BN to
    the dense block's final channel count, fold the 3x3 row taps into N."""
    prep = {"conv0_w": params["conv0_w"].astype(jnp.bfloat16)}
    prep["norm0_s"], prep["norm0_t"] = _fold_bn(params["norm0"])
    prep["blocks"] = []
    for layers in params["blocks"]:
        c0 = layers[0]["conv1_w"].shape[0]
        c_fin = c0 + len(layers) * GROWTH
        pls = []
        c = c0
        for lp in layers:
            s1, t1 = _fold_bn(lp["norm1"])
            pad = c_fin - c
            s1 = jnp.concatenate([s1, jnp.ones((pad,), jnp.float32)])
            t1 = jnp.concatenate([t1, jnp.zeros((pad,), jnp.float32)])
            w1 = jnp.concatenate(
                [lp["conv1_w"],
                 jnp.zeros((pad, lp["conv1_w"].shape[1]), jnp.float32)], axis=0)
            s2, t2 = _fold_bn(lp["norm2"])
            c_mid = lp["conv1_w"].shape[1]
            w9 = lp["conv2_w"].reshape(3, 3, c_mid, GROWTH)          # (di,dj,C,G)
            w3 = jnp.transpose(w9, (1, 2, 0, 3)).reshape(3, c_mid, 3 * GROWTH)
            pls.append(dict(n1_s=s1, n1_t=t1,
                            conv1_w=w1.astype(jnp.bfloat16),
                            n2_s=s2, n2_t=t2,
                            conv2_w=w3.astype(jnp.bfloat16)))
            c += GROWTH
        prep["blocks"].append(pls)
    prep["trans"] = []
    for tp in params["trans"]:
        s, t = _fold_bn(tp["norm"])
        prep["trans"].append(dict(
            n_s2=jnp.concatenate([s, s]).reshape(1, 1, 1, -1),
            n_t2=jnp.concatenate([t, t]).reshape(1, 1, 1, -1),
            conv_w=tp["conv_w"].astype(jnp.bfloat16)))
    prep["norm5_s"], prep["norm5_t"] = _fold_bn(params["norm5"])
    prep["fc1_w"] = params["fc1_w"].astype(jnp.bfloat16)
    prep["fc1_b"] = params["fc1_b"]
    prep["fc2_w"] = params["fc2_w"].astype(jnp.bfloat16)
    prep["fc2_b"] = params["fc2_b"]
    return prep


@jax.jit
def forward(prep, x_nchw):
    # NCHW (PyTorch) -> NHWC bf16 (TPU lane-friendly)
    x = jnp.transpose(x_nchw, (0, 2, 3, 1)).astype(jnp.bfloat16)
    B = x.shape[0]

    # Stem: conv0 (7x7 s2 p3) fused with norm0+relu0, then maxpool 3x3 s2 p1.
    patches, Ho, Wo = _im2col(x, 7, 2, 3)
    y = pallas_matmul(patches.reshape(B * Ho * Wo, -1), prep["conv0_w"],
                      post_scale=prep["norm0_s"], post_shift=prep["norm0_t"],
                      relu_out=True, out_dtype=jnp.bfloat16)
    x = maxpool_3x3_s2_p1(y.reshape(B, Ho, Wo, -1))

    nb = len(prep["blocks"])
    for bi, layers in enumerate(prep["blocks"]):
        Bb, H, W, c0 = x.shape
        c_fin = c0 + len(layers) * GROWTH
        # Preallocated bf16 concat buffer; each dense layer writes its growth
        # channels into its own slice.  The 1x1 kernels read the whole buffer
        # (their weights are zero-padded past the valid channel count), so no
        # per-layer channel-prefix copy is needed.
        buf = jnp.zeros((Bb, H, W, c_fin), jnp.bfloat16)
        buf = jax.lax.dynamic_update_slice(buf, x, (0, 0, 0, 0))
        c = c0
        for lp in layers:
            a = buf.reshape(Bb * H * W, c_fin)
            yb = pallas_matmul(a, lp["conv1_w"],
                               pre_scale=lp["n1_s"], pre_shift=lp["n1_t"],
                               post_scale=lp["n2_s"], post_shift=lp["n2_t"],
                               relu_out=True, out_dtype=jnp.bfloat16)
            ynew = conv3x3_direct(yb.reshape(Bb, H, W, -1), lp["conv2_w"])
            buf = jax.lax.dynamic_update_slice(buf, ynew, (0, 0, 0, c))
            c += GROWTH
        x = buf
        if bi != nb - 1:
            tp = prep["trans"][bi]
            # AvgPool2x2 commutes with the 1x1 conv, so pool first (fused with
            # BN+ReLU) and run the transition matmul on the 4x smaller tensor.
            xp = bn_relu_avgpool2x2(x, tp["n_s2"], tp["n_t2"])
            Bb, Hh, Ww, cc = xp.shape
            y = pallas_matmul(xp.reshape(Bb * Hh * Ww, cc), tp["conv_w"],
                              out_dtype=jnp.bfloat16)
            x = y.reshape(Bb, Hh, Ww, -1)

    # norm5 + ReLU + global average pool + both classifier GEMMs in one kernel
    Bb, H, W, C = x.shape
    out = classifier_head(x.reshape(Bb, H * W, C),
                          prep["norm5_s"], prep["norm5_t"],
                          prep["fc1_w"], prep["fc1_b"],
                          prep["fc2_w"], prep["fc2_b"])
    return out


if __name__ == "__main__":
    key = jax.random.PRNGKey(0)
    pkey, xkey = jax.random.split(key)
    params = init_params(pkey, num_classes=NUM_CLASSES)
    prep = prepare_params(params)
    x = jax.random.normal(xkey, (2, 3, 64, 64), jnp.float32)   # small NCHW batch
    out = forward(prep, x)
    out = jax.block_until_ready(out)
    assert out.shape == (2, NUM_CLASSES)
    assert bool(jnp.all(jnp.isfinite(out)))
    print("KERNEL_OK")
</pallas_src>

<mosaic_0001>
module attributes {stable_mosaic.version = 11 : i64} {
  func.func @_mm_kernel(%arg0: i32, %arg1: memref<512x147xbf16, #tpu.memory_space<vmem>>, %arg2: memref<147x16xbf16, #tpu.memory_space<vmem>>, %arg3: memref<1x16xf32, #tpu.memory_space<vmem>>, %arg4: memref<1x16xf32, #tpu.memory_space<vmem>>, %arg5: memref<512x16xbf16, #tpu.memory_space<vmem>>) attributes {dimension_semantics = [#tpu.dimension_semantics<parallel>], iteration_bounds = array<i64: 4>, scalar_prefetch = 0 : i64, scratch_operands = 0 : i64, tpu.core_type = #tpu.core_type<tc>, window_params = [{transform_indices = @transform_0, window_bounds = array<i64: 512, 147>}, {pipeline_mode = #tpu.pipeline_mode<synchronous>, transform_indices = @transform_1, window_bounds = array<i64: 147, 16>}, {pipeline_mode = #tpu.pipeline_mode<synchronous>, transform_indices = @transform_2, window_bounds = array<i64: 1, 16>}, {pipeline_mode = #tpu.pipeline_mode<synchronous>, transform_indices = @transform_3, window_bounds = array<i64: 1, 16>}, {transform_indices = @transform_4, window_bounds = array<i64: 512, 16>}]} {
    %c0 = arith.constant 0 : index
    %c0_0 = arith.constant 0 : index
    %0 = vector.load %arg1[%c0, %c0_0] : memref<512x147xbf16, #tpu.memory_space<vmem>>, vector<512x147xbf16>
    %c0_1 = arith.constant 0 : index
    %c0_2 = arith.constant 0 : index
    %1 = vector.load %arg2[%c0_1, %c0_2] : memref<147x16xbf16, #tpu.memory_space<vmem>>, vector<147x16xbf16>
    %cst = arith.constant dense<0.000000e+00> : vector<512x16xf32>
    %2 = tpu.matmul %0, %1, %cst {dimension_numbers = #tpu.dot_dimension_numbers<[1], [0], [0], [1], [0, 0, 1, 1], [], []>} : vector<512x147xbf16>, vector<147x16xbf16>, vector<512x16xf32> -> vector<512x16xf32>
    %c0_3 = arith.constant 0 : index
    %c0_4 = arith.constant 0 : index
    %3 = vector.load %arg3[%c0_3, %c0_4] : memref<1x16xf32, #tpu.memory_space<vmem>>, vector<1x16xf32>
    %4 = vector.broadcast %3 : vector<1x16xf32> to vector<512x16xf32>
    %5 = arith.mulf %2, %4 : vector<512x16xf32>
    %c0_5 = arith.constant 0 : index
    %c0_6 = arith.constant 0 : index
    %6 = vector.load %arg4[%c0_5, %c0_6] : memref<1x16xf32, #tpu.memory_space<vmem>>, vector<1x16xf32>
    %7 = vector.broadcast %6 : vector<1x16xf32> to vector<512x16xf32>
    %8 = arith.addf %5, %7 : vector<512x16xf32>
    %cst_7 = arith.constant 0.000000e+00 : f32
    %9 = vector.broadcast %cst_7 : f32 to vector<512x16xf32>
    %10 = arith.maximumf %8, %9 : vector<512x16xf32>
    %11 = arith.truncf %10 : vector<512x16xf32> to vector<512x16xbf16>
    %c0_8 = arith.constant 0 : index
    %c0_9 = arith.constant 0 : index
    %12 = vector.load %arg5[%c0_8, %c0_9] : memref<512x16xbf16, #tpu.memory_space<vmem>>, vector<512x16xbf16>
    tpu.vector_store %arg5[%c0_8, %c0_9], %11 {strides = array<i32>} : memref<512x16xbf16, #tpu.memory_space<vmem>>, vector<512x16xbf16>,
    return
  }
  func.func @transform_0(%arg0: i32) -> (i32, i32) {
    %c0_i32 = arith.constant 0 : i32
    %c0_i32_0 = arith.constant 0 : i32
    return %arg0, %c0_i32 : i32, i32
  }
  func.func @transform_1(%arg0: i32) -> (i32, i32) {
    %c0_i32 = arith.constant 0 : i32
    %c0_i32_0 = arith.constant 0 : i32
    %c0_i32_1 = arith.constant 0 : i32
    return %c0_i32, %c0_i32_0 : i32, i32
  }
  func.func @transform_2(%arg0: i32) -> (i32, i32) {
    %c0_i32 = arith.constant 0 : i32
    %c0_i32_0 = arith.constant 0 : i32
    %c0_i32_1 = arith.constant 0 : i32
    return %c0_i32, %c0_i32_0 : i32, i32
  }
  func.func @transform_3(%arg0: i32) -> (i32, i32) {
    %c0_i32 = arith.constant 0 : i32
    %c0_i32_0 = arith.constant 0 : i32
    %c0_i32_1 = arith.constant 0 : i32
    return %c0_i32, %c0_i32_0 : i32, i32
  }
  func.func @transform_4(%arg0: i32) -> (i32, i32) {
    %c0_i32 = arith.constant 0 : i32
    %c0_i32_0 = arith.constant 0 : i32
    return %arg0, %c0_i32 : i32, i32
  }
}

module attributes {stable_mosaic.version = 11 : i64} {
  func.func @_maxpool_kernel(%arg0: i32, %arg1: memref<1x17x2x17x32xbf16, #tpu.memory_space<vmem>>, %arg2: memref<1x16x16x16xbf16, #tpu.memory_space<vmem>>) attributes {dimension_semantics = [#tpu.dimension_semantics<parallel>], iteration_bounds = array<i64: 2>, scalar_prefetch = 0 : i64, scratch_operands = 0 : i64, tpu.core_type = #tpu.core_type<tc>, window_params = [{transform_indices = @transform_0, window_bounds = array<i64: 1, 17, 2, 17, 32>}, {transform_indices = @transform_1, window_bounds = array<i64: 1, 16, 16, 16>}]} {
    %c0 = arith.constant 0 : index
    %c0_0 = arith.constant 0 : index
    %c0_1 = arith.constant 0 : index
    %c0_2 = arith.constant 0 : index
    %c0_3 = arith.constant 0 : index
    %0 = vector.load %arg1[%c0, %c0_0, %c0_1, %c0_2, %c0_3] : memref<1x17x2x17x32xbf16, #tpu.memory_space<vmem>>, vector<1x17x2x17x32xbf16>
    %1 = vector.shape_cast %0 : vector<1x17x2x17x32xbf16> to vector<17x2x17x32xbf16>
    %2 = vector.extract_strided_slice %1 {offsets = [0, 0, 0, 0], sizes = [17, 1, 17, 32], strides = [1, 1, 1, 1]} : vector<17x2x17x32xbf16> to vector<17x1x17x32xbf16>
    %3 = vector.shape_cast %2 : vector<17x1x17x32xbf16> to vector<17x17x32xbf16>
    %4 = vector.extract_strided_slice %1 {offsets = [0, 1, 0, 0], sizes = [17, 1, 17, 32], strides = [1, 1, 1, 1]} : vector<17x2x17x32xbf16> to vector<17x1x17x32xbf16>
    %5 = vector.shape_cast %4 : vector<17x1x17x32xbf16> to vector<17x17x32xbf16>
    %6 = vector.extract_strided_slice %3 {offsets = [0, 0, 0], sizes = [16, 17, 32], strides = [1, 1, 1]} : vector<17x17x32xbf16> to vector<16x17x32xbf16>
    %7 = vector.extract_strided_slice %5 {offsets = [0, 0, 0], sizes = [16, 17, 32], strides = [1, 1, 1]} : vector<17x17x32xbf16> to vector<16x17x32xbf16>
    %8 = arith.maximumf %6, %7 : vector<16x17x32xbf16>
    %9 = vector.extract_strided_slice %3 {offsets = [1, 0, 0], sizes = [16, 17, 32], strides = [1, 1, 1]} : vector<17x17x32xbf16> to vector<16x17x32xbf16>
    %10 = arith.maximumf %8, %9 : vector<16x17x32xbf16>
    %11 = vector.extract_strided_slice %10 {offsets = [0, 0, 0], sizes = [16, 16, 16], strides = [1, 1, 1]} : vector<16x17x32xbf16> to vector<16x16x16xbf16>
    %12 = vector.extract_strided_slice %10 {offsets = [0, 0, 16], sizes = [16, 16, 16], strides = [1, 1, 1]} : vector<16x17x32xbf16> to vector<16x16x16xbf16>
    %13 = arith.maximumf %11, %12 : vector<16x16x16xbf16>
    %14 = vector.extract_strided_slice %10 {offsets = [0, 1, 0], sizes = [16, 16, 16], strides = [1, 1, 1]} : vector<16x17x32xbf16> to vector<16x16x16xbf16>
    %15 = arith.maximumf %13, %14 : vector<16x16x16xbf16>
    %c0_4 = arith.constant 0 : index
    %c0_5 = arith.constant 0 : index
    %c0_6 = arith.constant 0 : index
    %c0_7 = arith.constant 0 : index
    %16 = vector.load %arg2[%c0_4, %c0_5, %c0_6, %c0_7] : memref<1x16x16x16xbf16, #tpu.memory_space<vmem>>, vector<1x16x16x16xbf16>
    %17 = vector.shape_cast %16 : vector<1x16x16x16xbf16> to vector<16x16x16xbf16>
    %18 = vector.shape_cast %15 : vector<16x16x16xbf16> to vector<1x16x16x16xbf16>
    tpu.vector_store %arg2[%c0_4, %c0_5, %c0_6, %c0_7], %18 {strides = array<i32>} : memref<1x16x16x16xbf16, #tpu.memory_space<vmem>>, vector<1x16x16x16xbf16>,
    return
  }
  func.func @transform_0(%arg0: i32) -> (i32, i32, i32, i32, i32) {
    %c0_i32 = arith.constant 0 : i32
    %c0_i32_0 = arith.constant 0 : i32
    %c0_i32_1 = arith.constant 0 : i32
    %c0_i32_2 = arith.constant 0 : i32
    %c0_i32_3 = arith.constant 0 : i32
    return %arg0, %c0_i32, %c0_i32_0, %c0_i32_1, %c0_i32_2 : i32, i32, i32, i32, i32
  }
  func.func @transform_1(%arg0: i32) -> (i32, i32, i32, i32) {
    %c0_i32 = arith.constant 0 : i32
    %c0_i32_0 = arith.constant 0 : i32
    %c0_i32_1 = arith.constant 0 : i32
    %c0_i32_2 = arith.constant 0 : i32
    return %arg0, %c0_i32, %c0_i32_0, %c0_i32_1 : i32, i32, i32, i32
  }
}

module attributes {stable_mosaic.version = 11 : i64} {
  func.func @_mm_kernel(%arg0: i32, %arg1: memref<512x32xbf16, #tpu.memory_space<vmem>>, %arg2: memref<1x32xf32, #tpu.memory_space<vmem>>, %arg3: memref<1x32xf32, #tpu.memory_space<vmem>>, %arg4: memref<32x32xbf16, #tpu.memory_space<vmem>>, %arg5: memref<1x32xf32, #tpu.memory_space<vmem>>, %arg6: memref<1x32xf32, #tpu.memory_space<vmem>>, %arg7: memref<512x32xbf16, #tpu.memory_space<vmem>>) attributes {dimension_semantics = [#tpu.dimension_semantics<parallel>], iteration_bounds = array<i64: 1>, scalar_prefetch = 0 : i64, scratch_operands = 0 : i64, tpu.core_type = #tpu.core_type<tc>, window_params = [{transform_indices = @transform_0, window_bounds = array<i64: 512, 32>}, {pipeline_mode = #tpu.pipeline_mode<synchronous>, transform_indices = @transform_1, window_bounds = array<i64: 1, 32>}, {pipeline_mode = #tpu.pipeline_mode<synchronous>, transform_indices = @transform_2, window_bounds = array<i64: 1, 32>}, {pipeline_mode = #tpu.pipeline_mode<synchronous>, transform_indices = @transform_3, window_bounds = array<i64: 32, 32>}, {pipeline_mode = #tpu.pipeline_mode<synchronous>, transform_indices = @transform_4, window_bounds = array<i64: 1, 32>}, {pipeline_mode = #tpu.pipeline_mode<synchronous>, transform_indices = @transform_5, window_bounds = array<i64: 1, 32>}, {transform_indices = @transform_6, window_bounds = array<i64: 512, 32>}]} {
    %c0 = arith.constant 0 : index
    %c0_0 = arith.constant 0 : index
    %0 = vector.load %arg1[%c0, %c0_0] : memref<512x32xbf16, #tpu.memory_space<vmem>>, vector<512x32xbf16>
    %c0_1 = arith.constant 0 : index
    %c0_2 = arith.constant 0 : index
    %1 = vector.load %arg2[%c0_1, %c0_2] : memref<1x32xf32, #tpu.memory_space<vmem>>, vector<1x32xf32>
    %2 = arith.extf %0 : vector<512x32xbf16> to vector<512x32xf32>
    %3 = vector.broadcast %1 : vector<1x32xf32> to vector<512x32xf32>
    %4 = arith.mulf %2, %3 : vector<512x32xf32>
    %c0_3 = arith.constant 0 : index
    %c0_4 = arith.constant 0 : index
    %5 = vector.load %arg3[%c0_3, %c0_4] : memref<1x32xf32, #tpu.memory_space<vmem>>, vector<1x32xf32>
    %6 = vector.broadcast %5 : vector<1x32xf32> to vector<512x32xf32>
    %7 = arith.addf %4, %6 : vector<512x32xf32>
    %cst = arith.constant 0.000000e+00 : f32
    %8 = vector.broadcast %cst : f32 to vector<512x32xf32>
    %9 = arith.maximumf %7, %8 : vector<512x32xf32>
    %10 = arith.truncf %9 : vector<512x32xf32> to vector<512x32xbf16>
    %c0_5 = arith.constant 0 : index
    %c0_6 = arith.constant 0 : index
    %11 = vector.load %arg4[%c0_5, %c0_6] : memref<32x32xbf16, #tpu.memory_space<vmem>>, vector<32x32xbf16>
    %cst_7 = arith.constant dense<0.000000e+00> : vector<512x32xf32>
    %12 = tpu.matmul %10, %11, %cst_7 {dimension_numbers = #tpu.dot_dimension_numbers<[1], [0], [0], [1], [0, 0, 1, 1], [], []>} : vector<512x32xbf16>, vector<32x32xbf16>, vector<512x32xf32> -> vector<512x32xf32>
    %c0_8 = arith.constant 0 : index
    %c0_9 = arith.constant 0 : index
    %13 = vector.load %arg5[%c0_8, %c0_9] : memref<1x32xf32, #tpu.memory_space<vmem>>, vector<1x32xf32>
    %14 = vector.broadcast %13 : vector<1x32xf32> to vector<512x32xf32>
    %15 = arith.mulf %12, %14 : vector<512x32xf32>
    %c0_10 = arith.constant 0 : index
    %c0_11 = arith.constant 0 : index
    %16 = vector.load %arg6[%c0_10, %c0_11] : memref<1x32xf32, #tpu.memory_space<vmem>>, vector<1x32xf32>
    %17 = vector.broadcast %16 : vector<1x32xf32> to vector<512x32xf32>
    %18 = arith.addf %15, %17 : vector<512x32xf32>
    %cst_12 = arith.constant 0.000000e+00 : f32
    %19 = vector.broadcast %cst_12 : f32 to vector<512x32xf32>
    %20 = arith.maximumf %18, %19 : vector<512x32xf32>
    %21 = arith.truncf %20 : vector<512x32xf32> to vector<512x32xbf16>
    %c0_13 = arith.constant 0 : index
    %c0_14 = arith.constant 0 : index
    %22 = vector.load %arg7[%c0_13, %c0_14] : memref<512x32xbf16, #tpu.memory_space<vmem>>, vector<512x32xbf16>
    tpu.vector_store %arg7[%c0_13, %c0_14], %21 {strides = array<i32>} : memref<512x32xbf16, #tpu.memory_space<vmem>>, vector<512x32xbf16>,
    return
  }
  func.func @transform_0(%arg0: i32) -> (i32, i32) {
    %c0_i32 = arith.constant 0 : i32
    %c0_i32_0 = arith.constant 0 : i32
    return %arg0, %c0_i32 : i32, i32
  }
  func.func @transform_1(%arg0: i32) -> (i32, i32) {
    %c0_i32 = arith.constant 0 : i32
    %c0_i32_0 = arith.constant 0 : i32
    %c0_i32_1 = arith.constant 0 : i32
    return %c0_i32, %c0_i32_0 : i32, i32
  }
  func.func @transform_2(%arg0: i32) -> (i32, i32) {
    %c0_i32 = arith.constant 0 : i32
    %c0_i32_0 = arith.constant 0 : i32
    %c0_i32_1 = arith.constant 0 : i32
    return %c0_i32, %c0_i32_0 : i32, i32
  }
  func.func @transform_3(%arg0: i32) -> (i32, i32) {
    %c0_i32 = arith.constant 0 : i32
    %c0_i32_0 = arith.constant 0 : i32
    %c0_i32_1 = arith.constant 0 : i32
    return %c0_i32, %c0_i32_0 : i32, i32
  }
  func.func @transform_4(%arg0: i32) -> (i32, i32) {
    %c0_i32 = arith.constant 0 : i32
    %c0_i32_0 = arith.constant 0 : i32
    %c0_i32_1 = arith.constant 0 : i32
    return %c0_i32, %c0_i32_0 : i32, i32
  }
  func.func @transform_5(%arg0: i32) -> (i32, i32) {
    %c0_i32 = arith.constant 0 : i32
    %c0_i32_0 = arith.constant 0 : i32
    %c0_i32_1 = arith.constant 0 : i32
    return %c0_i32, %c0_i32_0 : i32, i32
  }
  func.func @transform_6(%arg0: i32) -> (i32, i32) {
    %c0_i32 = arith.constant 0 : i32
    %c0_i32_0 = arith.constant 0 : i32
    return %arg0, %c0_i32 : i32, i32
  }
}

module attributes {stable_mosaic.version = 11 : i64} {
  func.func @_conv3x3_kernel(%arg0: i32, %arg1: memref<1x19x24x32xbf16, #tpu.memory_space<vmem>>, %arg2: memref<3x32x24xbf16, #tpu.memory_space<vmem>>, %arg3: memref<1x16x16x8xbf16, #tpu.memory_space<vmem>>) attributes {dimension_semantics = [#tpu.dimension_semantics<parallel>], iteration_bounds = array<i64: 2>, scalar_prefetch = 0 : i64, scratch_operands = 0 : i64, tpu.core_type = #tpu.core_type<tc>, window_params = [{transform_indices = @transform_0, window_bounds = array<i64: 1, 19, 24, 32>}, {pipeline_mode = #tpu.pipeline_mode<synchronous>, transform_indices = @transform_1, window_bounds = array<i64: 3, 32, 24>}, {transform_indices = @transform_2, window_bounds = array<i64: 1, 16, 16, 8>}]} {
    %c0 = arith.constant 0 : index
    %c0_0 = arith.constant 0 : index
    %c0_1 = arith.constant 0 : index
    %c0_2 = arith.constant 0 : index
    %0 = vector.load %arg1[%c0, %c0_0, %c0_1, %c0_2] : memref<1x19x24x32xbf16, #tpu.memory_space<vmem>>, vector<1x19x24x32xbf16>
    %1 = vector.shape_cast %0 : vector<1x19x24x32xbf16> to vector<19x24x32xbf16>
    %2 = vector.shape_cast %1 : vector<19x24x32xbf16> to vector<456x32xbf16>
    %3 = vector.extract_strided_slice %2 {offsets = [0, 0], sizes = [432, 32], strides = [1, 1]} : vector<456x32xbf16> to vector<432x32xbf16>
    %c0_3 = arith.constant 0 : index
    %c0_4 = arith.constant 0 : index
    %c0_5 = arith.constant 0 : index
    %4 = vector.load %arg2[%c0_3, %c0_4, %c0_5] : memref<3x32x24xbf16, #tpu.memory_space<vmem>>, vector<1x32x24xbf16>
    %5 = vector.shape_cast %4 : vector<1x32x24xbf16> to vector<32x24xbf16>
    %cst = arith.constant dense<0.000000e+00> : vector<432x24xf32>
    %6 = tpu.matmul %3, %5, %cst {dimension_numbers = #tpu.dot_dimension_numbers<[1], [0], [0], [1], [0, 0, 1, 1], [], []>} : vector<432x32xbf16>, vector<32x24xbf16>, vector<432x24xf32> -> vector<432x24xf32>
    %7 = vector.shape_cast %6 : vector<432x24xf32> to vector<18x24x24xf32>
    %8 = vector.extract_strided_slice %7 {offsets = [0, 0, 0], sizes = [16, 24, 8], strides = [1, 1, 1]} : vector<18x24x24xf32> to vector<16x24x8xf32>
    %9 = vector.extract_strided_slice %7 {offsets = [1, 0, 8], sizes = [16, 24, 8], strides = [1, 1, 1]} : vector<18x24x24xf32> to vector<16x24x8xf32>
    %10 = arith.addf %8, %9 : vector<16x24x8xf32>
    %11 = vector.extract_strided_slice %7 {offsets = [2, 0, 16], sizes = [16, 24, 8], strides = [1, 1, 1]} : vector<18x24x24xf32> to vector<16x24x8xf32>
    %12 = arith.addf %10, %11 : vector<16x24x8xf32>
    %13 = vector.extract_strided_slice %2 {offsets = [1, 0], sizes = [432, 32], strides = [1, 1]} : vector<456x32xbf16> to vector<432x32xbf16>
    %c1 = arith.constant 1 : index
    %c0_6 = arith.constant 0 : index
    %c0_7 = arith.constant 0 : index
    %14 = vector.load %arg2[%c1, %c0_6, %c0_7] : memref<3x32x24xbf16, #tpu.memory_space<vmem>>, vector<1x32x24xbf16>
    %15 = vector.shape_cast %14 : vector<1x32x24xbf16> to vector<32x24xbf16>
    %cst_8 = arith.constant dense<0.000000e+00> : vector<432x24xf32>
    %16 = tpu.matmul %13, %15, %cst_8 {dimension_numbers = #tpu.dot_dimension_numbers<[1], [0], [0], [1], [0, 0, 1, 1], [], []>} : vector<432x32xbf16>, vector<32x24xbf16>, vector<432x24xf32> -> vector<432x24xf32>
    %17 = vector.shape_cast %16 : vector<432x24xf32> to vector<18x24x24xf32>
    %18 = vector.extract_strided_slice %17 {offsets = [0, 0, 0], sizes = [16, 24, 8], strides = [1, 1, 1]} : vector<18x24x24xf32> to vector<16x24x8xf32>
    %19 = arith.addf %12, %18 : vector<16x24x8xf32>
    %20 = vector.extract_strided_slice %17 {offsets = [1, 0, 8], sizes = [16, 24, 8], strides = [1, 1, 1]} : vector<18x24x24xf32> to vector<16x24x8xf32>
    %21 = arith.addf %19, %20 : vector<16x24x8xf32>
    %22 = vector.extract_strided_slice %17 {offsets = [2, 0, 16], sizes = [16, 24, 8], strides = [1, 1, 1]} : vector<18x24x24xf32> to vector<16x24x8xf32>
    %23 = arith.addf %21, %22 : vector<16x24x8xf32>
    %24 = vector.extract_strided_slice %2 {offsets = [2, 0], sizes = [432, 32], strides = [1, 1]} : vector<456x32xbf16> to vector<432x32xbf16>
    %c2 = arith.constant 2 : index
    %c0_9 = arith.constant 0 : index
    %c0_10 = arith.constant 0 : index
    %25 = vector.load %arg2[%c2, %c0_9, %c0_10] : memref<3x32x24xbf16, #tpu.memory_space<vmem>>, vector<1x32x24xbf16>
    %26 = vector.shape_cast %25 : vector<1x32x24xbf16> to vector<32x24xbf16>
    %cst_11 = arith.constant dense<0.000000e+00> : vector<432x24xf32>
    %27 = tpu.matmul %24, %26, %cst_11 {dimension_numbers = #tpu.dot_dimension_numbers<[1], [0], [0], [1], [0, 0, 1, 1], [], []>} : vector<432x32xbf16>, vector<32x24xbf16>, vector<432x24xf32> -> vector<432x24xf32>
    %28 = vector.shape_cast %27 : vector<432x24xf32> to vector<18x24x24xf32>
    %29 = vector.extract_strided_slice %28 {offsets = [0, 0, 0], sizes = [16, 24, 8], strides = [1, 1, 1]} : vector<18x24x24xf32> to vector<16x24x8xf32>
    %30 = arith.addf %23, %29 : vector<16x24x8xf32>
    %31 = vector.extract_strided_slice %28 {offsets = [1, 0, 8], sizes = [16, 24, 8], strides = [1, 1, 1]} : vector<18x24x24xf32> to vector<16x24x8xf32>
    %32 = arith.addf %30, %31 : vector<16x24x8xf32>
    %33 = vector.extract_strided_slice %28 {offsets = [2, 0, 16], sizes = [16, 24, 8], strides = [1, 1, 1]} : vector<18x24x24xf32> to vector<16x24x8xf32>
    %34 = arith.addf %32, %33 : vector<16x24x8xf32>
    %35 = vector.extract_strided_slice %34 {offsets = [0, 0, 0], sizes = [16, 16, 8], strides = [1, 1, 1]} : vector<16x24x8xf32> to vector<16x16x8xf32>
    %36 = arith.truncf %35 : vector<16x16x8xf32> to vector<16x16x8xbf16>
    %c0_12 = arith.constant 0 : index
    %c0_13 = arith.constant 0 : index
    %c0_14 = arith.constant 0 : index
    %c0_15 = arith.constant 0 : index
    %37 = vector.load %arg3[%c0_12, %c0_13, %c0_14, %c0_15] : memref<1x16x16x8xbf16, #tpu.memory_space<vmem>>, vector<1x16x16x8xbf16>
    %38 = vector.shape_cast %37 : vector<1x16x16x8xbf16> to vector<16x16x8xbf16>
    %39 = vector.shape_cast %36 : vector<16x16x8xbf16> to vector<1x16x16x8xbf16>
    tpu.vector_store %arg3[%c0_12, %c0_13, %c0_14, %c0_15], %39 {strides = array<i32>} : memref<1x16x16x8xbf16, #tpu.memory_space<vmem>>, vector<1x16x16x8xbf16>,
    return
  }
  func.func @transform_0(%arg0: i32) -> (i32, i32, i32, i32) {
    %c0_i32 = arith.constant 0 : i32
    %c0_i32_0 = arith.constant 0 : i32
    %c0_i32_1 = arith.constant 0 : i32
    %c0_i32_2 = arith.constant 0 : i32
    return %arg0, %c0_i32, %c0_i32_0, %c0_i32_1 : i32, i32, i32, i32
  }
  func.func @transform_1(%arg0: i32) -> (i32, i32, i32) {
    %c0_i32 = arith.constant 0 : i32
    %c0_i32_0 = arith.constant 0 : i32
    %c0_i32_1 = arith.constant 0 : i32
    %c0_i32_2 = arith.constant 0 : i32
    return %c0_i32, %c0_i32_0, %c0_i32_1 : i32, i32, i32
  }
  func.func @transform_2(%arg0: i32) -> (i32, i32, i32, i32) {
    %c0_i32 = arith.constant 0 : i32
    %c0_i32_0 = arith.constant 0 : i32
    %c0_i32_1 = arith.constant 0 : i32
    %c0_i32_2 = arith.constant 0 : i32
    return %arg0, %c0_i32, %c0_i32_0, %c0_i32_1 : i32, i32, i32, i32
  }
}

module attributes {stable_mosaic.version = 11 : i64} {
  func.func @_bn_relu_avgpool_kernel(%arg0: i32, %arg1: memref<1x8x2x8x64xbf16, #tpu.memory_space<vmem>>, %arg2: memref<1x1x1x64xf32, #tpu.memory_space<vmem>>, %arg3: memref<1x1x1x64xf32, #tpu.memory_space<vmem>>, %arg4: memref<1x8x8x32xbf16, #tpu.memory_space<vmem>>) attributes {dimension_semantics = [#tpu.dimension_semantics<parallel>], iteration_bounds = array<i64: 2>, scalar_prefetch = 0 : i64, scratch_operands = 0 : i64, tpu.core_type = #tpu.core_type<tc>, window_params = [{transform_indices = @transform_0, window_bounds = array<i64: 1, 8, 2, 8, 64>}, {pipeline_mode = #tpu.pipeline_mode<synchronous>, transform_indices = @transform_1, window_bounds = array<i64: 1, 1, 1, 64>}, {pipeline_mode = #tpu.pipeline_mode<synchronous>, transform_indices = @transform_2, window_bounds = array<i64: 1, 1, 1, 64>}, {transform_indices = @transform_3, window_bounds = array<i64: 1, 8, 8, 32>}]} {
    %c0 = arith.constant 0 : index
    %c0_0 = arith.constant 0 : index
    %c0_1 = arith.constant 0 : index
    %c0_2 = arith.constant 0 : index
    %c0_3 = arith.constant 0 : index
    %0 = vector.load %arg1[%c0, %c0_0, %c0_1, %c0_2, %c0_3] : memref<1x8x2x8x64xbf16, #tpu.memory_space<vmem>>, vector<1x8x2x8x64xbf16>
    %1 = vector.shape_cast %0 : vector<1x8x2x8x64xbf16> to vector<8x2x8x64xbf16>
    %2 = arith.extf %1 : vector<8x2x8x64xbf16> to vector<8x2x8x64xf32>
    %c0_4 = arith.constant 0 : index
    %c0_5 = arith.constant 0 : index
    %c0_6 = arith.constant 0 : index
    %c0_7 = arith.constant 0 : index
    %3 = vector.load %arg2[%c0_4, %c0_5, %c0_6, %c0_7] : memref<1x1x1x64xf32, #tpu.memory_space<vmem>>, vector<1x1x1x64xf32>
    %4 = vector.shape_cast %3 : vector<1x1x1x64xf32> to vector<1x1x64xf32>
    %5 = vector.shape_cast %4 : vector<1x1x64xf32> to vector<1x1x1x64xf32>
    %6 = vector.broadcast %5 : vector<1x1x1x64xf32> to vector<8x2x8x64xf32>
    %7 = arith.mulf %2, %6 : vector<8x2x8x64xf32>
    %c0_8 = arith.constant 0 : index
    %c0_9 = arith.constant 0 : index
    %c0_10 = arith.constant 0 : index
    %c0_11 = arith.constant 0 : index
    %8 = vector.load %arg3[%c0_8, %c0_9, %c0_10, %c0_11] : memref<1x1x1x64xf32, #tpu.memory_space<vmem>>, vector<1x1x1x64xf32>
    %9 = vector.shape_cast %8 : vector<1x1x1x64xf32> to vector<1x1x64xf32>
    %10 = vector.shape_cast %9 : vector<1x1x64xf32> to vector<1x1x1x64xf32>
    %11 = vector.broadcast %10 : vector<1x1x1x64xf32> to vector<8x2x8x64xf32>
    %12 = arith.addf %7, %11 : vector<8x2x8x64xf32>
    %cst = arith.constant 0.000000e+00 : f32
    %13 = vector.broadcast %cst : f32 to vector<8x2x8x64xf32>
    %14 = arith.maximumf %12, %13 : vector<8x2x8x64xf32>
    %15 = vector.extract_strided_slice %14 {offsets = [0, 0, 0, 0], sizes = [8, 1, 8, 64], strides = [1, 1, 1, 1]} : vector<8x2x8x64xf32> to vector<8x1x8x64xf32>
    %16 = vector.shape_cast %15 : vector<8x1x8x64xf32> to vector<8x8x64xf32>
    %17 = vector.extract_strided_slice %14 {offsets = [0, 1, 0, 0], sizes = [8, 1, 8, 64], strides = [1, 1, 1, 1]} : vector<8x2x8x64xf32> to vector<8x1x8x64xf32>
    %18 = vector.shape_cast %17 : vector<8x1x8x64xf32> to vector<8x8x64xf32>
    %19 = arith.addf %16, %18 : vector<8x8x64xf32>
    %20 = vector.extract_strided_slice %19 {offsets = [0, 0, 0], sizes = [8, 8, 32], strides = [1, 1, 1]} : vector<8x8x64xf32> to vector<8x8x32xf32>
    %21 = vector.extract_strided_slice %19 {offsets = [0, 0, 32], sizes = [8, 8, 32], strides = [1, 1, 1]} : vector<8x8x64xf32> to vector<8x8x32xf32>
    %22 = arith.addf %20, %21 : vector<8x8x32xf32>
    %cst_12 = arith.constant 2.500000e-01 : f32
    %23 = vector.broadcast %cst_12 : f32 to vector<8x8x32xf32>
    %24 = arith.mulf %22, %23 : vector<8x8x32xf32>
    %25 = arith.truncf %24 : vector<8x8x32xf32> to vector<8x8x32xbf16>
    %c0_13 = arith.constant 0 : index
    %c0_14 = arith.constant 0 : index
    %c0_15 = arith.constant 0 : index
    %c0_16 = arith.constant 0 : index
    %26 = vector.load %arg4[%c0_13, %c0_14, %c0_15, %c0_16] : memref<1x8x8x32xbf16, #tpu.memory_space<vmem>>, vector<1x8x8x32xbf16>
    %27 = vector.shape_cast %26 : vector<1x8x8x32xbf16> to vector<8x8x32xbf16>
    %28 = vector.shape_cast %25 : vector<8x8x32xbf16> to vector<1x8x8x32xbf16>
    tpu.vector_store %arg4[%c0_13, %c0_14, %c0_15, %c0_16], %28 {strides = array<i32>} : memref<1x8x8x32xbf16, #tpu.memory_space<vmem>>, vector<1x8x8x32xbf16>,
    return
  }
  func.func @transform_0(%arg0: i32) -> (i32, i32, i32, i32, i32) {
    %c0_i32 = arith.constant 0 : i32
    %c0_i32_0 = arith.constant 0 : i32
    %c0_i32_1 = arith.constant 0 : i32
    %c0_i32_2 = arith.constant 0 : i32
    %c0_i32_3 = arith.constant 0 : i32
    return %arg0, %c0_i32, %c0_i32_0, %c0_i32_1, %c0_i32_2 : i32, i32, i32, i32, i32
  }
  func.func @transform_1(%arg0: i32) -> (i32, i32, i32, i32) {
    %c0_i32 = arith.constant 0 : i32
    %c0_i32_0 = arith.constant 0 : i32
    %c0_i32_1 = arith.constant 0 : i32
    %c0_i32_2 = arith.constant 0 : i32
    %c0_i32_3 = arith.constant 0 : i32
    return %c0_i32, %c0_i32_0, %c0_i32_1, %c0_i32_2 : i32, i32, i32, i32
  }
  func.func @transform_2(%arg0: i32) -> (i32, i32, i32, i32) {
    %c0_i32 = arith.constant 0 : i32
    %c0_i32_0 = arith.constant 0 : i32
    %c0_i32_1 = arith.constant 0 : i32
    %c0_i32_2 = arith.constant 0 : i32
    %c0_i32_3 = arith.constant 0 : i32
    return %c0_i32, %c0_i32_0, %c0_i32_1, %c0_i32_2 : i32, i32, i32, i32
  }
  func.func @transform_3(%arg0: i32) -> (i32, i32, i32, i32) {
    %c0_i32 = arith.constant 0 : i32
    %c0_i32_0 = arith.constant 0 : i32
    %c0_i32_1 = arith.constant 0 : i32
    %c0_i32_2 = arith.constant 0 : i32
    return %arg0, %c0_i32, %c0_i32_0, %c0_i32_1 : i32, i32, i32, i32
  }
}

module attributes {stable_mosaic.version = 11 : i64} {
  func.func @_mm_kernel(%arg0: i32, %arg1: memref<128x32xbf16, #tpu.memory_space<vmem>>, %arg2: memref<32x16xbf16, #tpu.memory_space<vmem>>, %arg3: memref<128x16xbf16, #tpu.memory_space<vmem>>) attributes {dimension_semantics = [#tpu.dimension_semantics<parallel>], iteration_bounds = array<i64: 1>, scalar_prefetch = 0 : i64, scratch_operands = 0 : i64, tpu.core_type = #tpu.core_type<tc>, window_params = [{transform_indices = @transform_0, window_bounds = array<i64: 128, 32>}, {pipeline_mode = #tpu.pipeline_mode<synchronous>, transform_indices = @transform_1, window_bounds = array<i64: 32, 16>}, {transform_indices = @transform_2, window_bounds = array<i64: 128, 16>}]} {
    %c0 = arith.constant 0 : index
    %c0_0 = arith.constant 0 : index
    %0 = vector.load %arg1[%c0, %c0_0] : memref<128x32xbf16, #tpu.memory_space<vmem>>, vector<128x32xbf16>
    %c0_1 = arith.constant 0 : index
    %c0_2 = arith.constant 0 : index
    %1 = vector.load %arg2[%c0_1, %c0_2] : memref<32x16xbf16, #tpu.memory_space<vmem>>, vector<32x16xbf16>
    %cst = arith.constant dense<0.000000e+00> : vector<128x16xf32>
    %2 = tpu.matmul %0, %1, %cst {dimension_numbers = #tpu.dot_dimension_numbers<[1], [0], [0], [1], [0, 0, 1, 1], [], []>} : vector<128x32xbf16>, vector<32x16xbf16>, vector<128x16xf32> -> vector<128x16xf32>
    %3 = arith.truncf %2 : vector<128x16xf32> to vector<128x16xbf16>
    %c0_3 = arith.constant 0 : index
    %c0_4 = arith.constant 0 : index
    %4 = vector.load %arg3[%c0_3, %c0_4] : memref<128x16xbf16, #tpu.memory_space<vmem>>, vector<128x16xbf16>
    tpu.vector_store %arg3[%c0_3, %c0_4], %3 {strides = array<i32>} : memref<128x16xbf16, #tpu.memory_space<vmem>>, vector<128x16xbf16>,
    return
  }
  func.func @transform_0(%arg0: i32) -> (i32, i32) {
    %c0_i32 = arith.constant 0 : i32
    %c0_i32_0 = arith.constant 0 : i32
    return %arg0, %c0_i32 : i32, i32
  }
  func.func @transform_1(%arg0: i32) -> (i32, i32) {
    %c0_i32 = arith.constant 0 : i32
    %c0_i32_0 = arith.constant 0 : i32
    %c0_i32_1 = arith.constant 0 : i32
    return %c0_i32, %c0_i32_0 : i32, i32
  }
  func.func @transform_2(%arg0: i32) -> (i32, i32) {
    %c0_i32 = arith.constant 0 : i32
    %c0_i32_0 = arith.constant 0 : i32
    return %arg0, %c0_i32 : i32, i32
  }
}

module attributes {stable_mosaic.version = 11 : i64} {
  func.func @_mm_kernel(%arg0: i32, %arg1: memref<128x32xbf16, #tpu.memory_space<vmem>>, %arg2: memref<1x32xf32, #tpu.memory_space<vmem>>, %arg3: memref<1x32xf32, #tpu.memory_space<vmem>>, %arg4: memref<32x32xbf16, #tpu.memory_space<vmem>>, %arg5: memref<1x32xf32, #tpu.memory_space<vmem>>, %arg6: memref<1x32xf32, #tpu.memory_space<vmem>>, %arg7: memref<128x32xbf16, #tpu.memory_space<vmem>>) attributes {dimension_semantics = [#tpu.dimension_semantics<parallel>], iteration_bounds = array<i64: 1>, scalar_prefetch = 0 : i64, scratch_operands = 0 : i64, tpu.core_type = #tpu.core_type<tc>, window_params = [{transform_indices = @transform_0, window_bounds = array<i64: 128, 32>}, {pipeline_mode = #tpu.pipeline_mode<synchronous>, transform_indices = @transform_1, window_bounds = array<i64: 1, 32>}, {pipeline_mode = #tpu.pipeline_mode<synchronous>, transform_indices = @transform_2, window_bounds = array<i64: 1, 32>}, {pipeline_mode = #tpu.pipeline_mode<synchronous>, transform_indices = @transform_3, window_bounds = array<i64: 32, 32>}, {pipeline_mode = #tpu.pipeline_mode<synchronous>, transform_indices = @transform_4, window_bounds = array<i64: 1, 32>}, {pipeline_mode = #tpu.pipeline_mode<synchronous>, transform_indices = @transform_5, window_bounds = array<i64: 1, 32>}, {transform_indices = @transform_6, window_bounds = array<i64: 128, 32>}]} {
    %c0 = arith.constant 0 : index
    %c0_0 = arith.constant 0 : index
    %0 = vector.load %arg1[%c0, %c0_0] : memref<128x32xbf16, #tpu.memory_space<vmem>>, vector<128x32xbf16>
    %c0_1 = arith.constant 0 : index
    %c0_2 = arith.constant 0 : index
    %1 = vector.load %arg2[%c0_1, %c0_2] : memref<1x32xf32, #tpu.memory_space<vmem>>, vector<1x32xf32>
    %2 = arith.extf %0 : vector<128x32xbf16> to vector<128x32xf32>
    %3 = vector.broadcast %1 : vector<1x32xf32> to vector<128x32xf32>
    %4 = arith.mulf %2, %3 : vector<128x32xf32>
    %c0_3 = arith.constant 0 : index
    %c0_4 = arith.constant 0 : index
    %5 = vector.load %arg3[%c0_3, %c0_4] : memref<1x32xf32, #tpu.memory_space<vmem>>, vector<1x32xf32>
    %6 = vector.broadcast %5 : vector<1x32xf32> to vector<128x32xf32>
    %7 = arith.addf %4, %6 : vector<128x32xf32>
    %cst = arith.constant 0.000000e+00 : f32
    %8 = vector.broadcast %cst : f32 to vector<128x32xf32>
    %9 = arith.maximumf %7, %8 : vector<128x32xf32>
    %10 = arith.truncf %9 : vector<128x32xf32> to vector<128x32xbf16>
    %c0_5 = arith.constant 0 : index
    %c0_6 = arith.constant 0 : index
    %11 = vector.load %arg4[%c0_5, %c0_6] : memref<32x32xbf16, #tpu.memory_space<vmem>>, vector<32x32xbf16>
    %cst_7 = arith.constant dense<0.000000e+00> : vector<128x32xf32>
    %12 = tpu.matmul %10, %11, %cst_7 {dimension_numbers = #tpu.dot_dimension_numbers<[1], [0], [0], [1], [0, 0, 1, 1], [], []>} : vector<128x32xbf16>, vector<32x32xbf16>, vector<128x32xf32> -> vector<128x32xf32>
    %c0_8 = arith.constant 0 : index
    %c0_9 = arith.constant 0 : index
    %13 = vector.load %arg5[%c0_8, %c0_9] : memref<1x32xf32, #tpu.memory_space<vmem>>, vector<1x32xf32>
    %14 = vector.broadcast %13 : vector<1x32xf32> to vector<128x32xf32>
    %15 = arith.mulf %12, %14 : vector<128x32xf32>
    %c0_10 = arith.constant 0 : index
    %c0_11 = arith.constant 0 : index
    %16 = vector.load %arg6[%c0_10, %c0_11] : memref<1x32xf32, #tpu.memory_space<vmem>>, vector<1x32xf32>
    %17 = vector.broadcast %16 : vector<1x32xf32> to vector<128x32xf32>
    %18 = arith.addf %15, %17 : vector<128x32xf32>
    %cst_12 = arith.constant 0.000000e+00 : f32
    %19 = vector.broadcast %cst_12 : f32 to vector<128x32xf32>
    %20 = arith.maximumf %18, %19 : vector<128x32xf32>
    %21 = arith.truncf %20 : vector<128x32xf32> to vector<128x32xbf16>
    %c0_13 = arith.constant 0 : index
    %c0_14 = arith.constant 0 : index
    %22 = vector.load %arg7[%c0_13, %c0_14] : memref<128x32xbf16, #tpu.memory_space<vmem>>, vector<128x32xbf16>
    tpu.vector_store %arg7[%c0_13, %c0_14], %21 {strides = array<i32>} : memref<128x32xbf16, #tpu.memory_space<vmem>>, vector<128x32xbf16>,
    return
  }
  func.func @transform_0(%arg0: i32) -> (i32, i32) {
    %c0_i32 = arith.constant 0 : i32
    %c0_i32_0 = arith.constant 0 : i32
    return %arg0, %c0_i32 : i32, i32
  }
  func.func @transform_1(%arg0: i32) -> (i32, i32) {
    %c0_i32 = arith.constant 0 : i32
    %c0_i32_0 = arith.constant 0 : i32
    %c0_i32_1 = arith.constant 0 : i32
    return %c0_i32, %c0_i32_0 : i32, i32
  }
  func.func @transform_2(%arg0: i32) -> (i32, i32) {
    %c0_i32 = arith.constant 0 : i32
    %c0_i32_0 = arith.constant 0 : i32
    %c0_i32_1 = arith.constant 0 : i32
    return %c0_i32, %c0_i32_0 : i32, i32
  }
  func.func @transform_3(%arg0: i32) -> (i32, i32) {
    %c0_i32 = arith.constant 0 : i32
    %c0_i32_0 = arith.constant 0 : i32
    %c0_i32_1 = arith.constant 0 : i32
    return %c0_i32, %c0_i32_0 : i32, i32
  }
  func.func @transform_4(%arg0: i32) -> (i32, i32) {
    %c0_i32 = arith.constant 0 : i32
    %c0_i32_0 = arith.constant 0 : i32
    %c0_i32_1 = arith.constant 0 : i32
    return %c0_i32, %c0_i32_0 : i32, i32
  }
  func.func @transform_5(%arg0: i32) -> (i32, i32) {
    %c0_i32 = arith.constant 0 : i32
    %c0_i32_0 = arith.constant 0 : i32
    %c0_i32_1 = arith.constant 0 : i32
    return %c0_i32, %c0_i32_0 : i32, i32
  }
  func.func @transform_6(%arg0: i32) -> (i32, i32) {
    %c0_i32 = arith.constant 0 : i32
    %c0_i32_0 = arith.constant 0 : i32
    return %arg0, %c0_i32 : i32, i32
  }
}

module attributes {stable_mosaic.version = 11 : i64} {
  func.func @_conv3x3_kernel(%arg0: i32, %arg1: memref<1x11x16x32xbf16, #tpu.memory_space<vmem>>, %arg2: memref<3x32x24xbf16, #tpu.memory_space<vmem>>, %arg3: memref<1x8x8x8xbf16, #tpu.memory_space<vmem>>) attributes {dimension_semantics = [#tpu.dimension_semantics<parallel>], iteration_bounds = array<i64: 2>, scalar_prefetch = 0 : i64, scratch_operands = 0 : i64, tpu.core_type = #tpu.core_type<tc>, window_params = [{transform_indices = @transform_0, window_bounds = array<i64: 1, 11, 16, 32>}, {pipeline_mode = #tpu.pipeline_mode<synchronous>, transform_indices = @transform_1, window_bounds = array<i64: 3, 32, 24>}, {transform_indices = @transform_2, window_bounds = array<i64: 1, 8, 8, 8>}]} {
    %c0 = arith.constant 0 : index
    %c0_0 = arith.constant 0 : index
    %c0_1 = arith.constant 0 : index
    %c0_2 = arith.constant 0 : index
    %0 = vector.load %arg1[%c0, %c0_0, %c0_1, %c0_2] : memref<1x11x16x32xbf16, #tpu.memory_space<vmem>>, vector<1x11x16x32xbf16>
    %1 = vector.shape_cast %0 : vector<1x11x16x32xbf16> to vector<11x16x32xbf16>
    %2 = vector.shape_cast %1 : vector<11x16x32xbf16> to vector<176x32xbf16>
    %3 = vector.extract_strided_slice %2 {offsets = [0, 0], sizes = [160, 32], strides = [1, 1]} : vector<176x32xbf16> to vector<160x32xbf16>
    %c0_3 = arith.constant 0 : index
    %c0_4 = arith.constant 0 : index
    %c0_5 = arith.constant 0 : index
    %4 = vector.load %arg2[%c0_3, %c0_4, %c0_5] : memref<3x32x24xbf16, #tpu.memory_space<vmem>>, vector<1x32x24xbf16>
    %5 = vector.shape_cast %4 : vector<1x32x24xbf16> to vector<32x24xbf16>
    %cst = arith.constant dense<0.000000e+00> : vector<160x24xf32>
    %6 = tpu.matmul %3, %5, %cst {dimension_numbers = #tpu.dot_dimension_numbers<[1], [0], [0], [1], [0, 0, 1, 1], [], []>} : vector<160x32xbf16>, vector<32x24xbf16>, vector<160x24xf32> -> vector<160x24xf32>
    %7 = vector.shape_cast %6 : vector<160x24xf32> to vector<10x16x24xf32>
    %8 = vector.extract_strided_slice %7 {offsets = [0, 0, 0], sizes = [8, 16, 8], strides = [1, 1, 1]} : vector<10x16x24xf32> to vector<8x16x8xf32>
    %9 = vector.extract_strided_slice %7 {offsets = [1, 0, 8], sizes = [8, 16, 8], strides = [1, 1, 1]} : vector<10x16x24xf32> to vector<8x16x8xf32>
    %10 = arith.addf %8, %9 : vector<8x16x8xf32>
    %11 = vector.extract_strided_slice %7 {offsets = [2, 0, 16], sizes = [8, 16, 8], strides = [1, 1, 1]} : vector<10x16x24xf32> to vector<8x16x8xf32>
    %12 = arith.addf %10, %11 : vector<8x16x8xf32>
    %13 = vector.extract_strided_slice %2 {offsets = [1, 0], sizes = [160, 32], strides = [1, 1]} : vector<176x32xbf16> to vector<160x32xbf16>
    %c1 = arith.constant 1 : index
    %c0_6 = arith.constant 0 : index
    %c0_7 = arith.constant 0 : index
    %14 = vector.load %arg2[%c1, %c0_6, %c0_7] : memref<3x32x24xbf16, #tpu.memory_space<vmem>>, vector<1x32x24xbf16>
    %15 = vector.shape_cast %14 : vector<1x32x24xbf16> to vector<32x24xbf16>
    %cst_8 = arith.constant dense<0.000000e+00> : vector<160x24xf32>
    %16 = tpu.matmul %13, %15, %cst_8 {dimension_numbers = #tpu.dot_dimension_numbers<[1], [0], [0], [1], [0, 0, 1, 1], [], []>} : vector<160x32xbf16>, vector<32x24xbf16>, vector<160x24xf32> -> vector<160x24xf32>
    %17 = vector.shape_cast %16 : vector<160x24xf32> to vector<10x16x24xf32>
    %18 = vector.extract_strided_slice %17 {offsets = [0, 0, 0], sizes = [8, 16, 8], strides = [1, 1, 1]} : vector<10x16x24xf32> to vector<8x16x8xf32>
    %19 = arith.addf %12, %18 : vector<8x16x8xf32>
    %20 = vector.extract_strided_slice %17 {offsets = [1, 0, 8], sizes = [8, 16, 8], strides = [1, 1, 1]} : vector<10x16x24xf32> to vector<8x16x8xf32>
    %21 = arith.addf %19, %20 : vector<8x16x8xf32>
    %22 = vector.extract_strided_slice %17 {offsets = [2, 0, 16], sizes = [8, 16, 8], strides = [1, 1, 1]} : vector<10x16x24xf32> to vector<8x16x8xf32>
    %23 = arith.addf %21, %22 : vector<8x16x8xf32>
    %24 = vector.extract_strided_slice %2 {offsets = [2, 0], sizes = [160, 32], strides = [1, 1]} : vector<176x32xbf16> to vector<160x32xbf16>
    %c2 = arith.constant 2 : index
    %c0_9 = arith.constant 0 : index
    %c0_10 = arith.constant 0 : index
    %25 = vector.load %arg2[%c2, %c0_9, %c0_10] : memref<3x32x24xbf16, #tpu.memory_space<vmem>>, vector<1x32x24xbf16>
    %26 = vector.shape_cast %25 : vector<1x32x24xbf16> to vector<32x24xbf16>
    %cst_11 = arith.constant dense<0.000000e+00> : vector<160x24xf32>
    %27 = tpu.matmul %24, %26, %cst_11 {dimension_numbers = #tpu.dot_dimension_numbers<[1], [0], [0], [1], [0, 0, 1, 1], [], []>} : vector<160x32xbf16>, vector<32x24xbf16>, vector<160x24xf32> -> vector<160x24xf32>
    %28 = vector.shape_cast %27 : vector<160x24xf32> to vector<10x16x24xf32>
    %29 = vector.extract_strided_slice %28 {offsets = [0, 0, 0], sizes = [8, 16, 8], strides = [1, 1, 1]} : vector<10x16x24xf32> to vector<8x16x8xf32>
    %30 = arith.addf %23, %29 : vector<8x16x8xf32>
    %31 = vector.extract_strided_slice %28 {offsets = [1, 0, 8], sizes = [8, 16, 8], strides = [1, 1, 1]} : vector<10x16x24xf32> to vector<8x16x8xf32>
    %32 = arith.addf %30, %31 : vector<8x16x8xf32>
    %33 = vector.extract_strided_slice %28 {offsets = [2, 0, 16], sizes = [8, 16, 8], strides = [1, 1, 1]} : vector<10x16x24xf32> to vector<8x16x8xf32>
    %34 = arith.addf %32, %33 : vector<8x16x8xf32>
    %35 = vector.extract_strided_slice %34 {offsets = [0, 0, 0], sizes = [8, 8, 8], strides = [1, 1, 1]} : vector<8x16x8xf32> to vector<8x8x8xf32>
    %36 = arith.truncf %35 : vector<8x8x8xf32> to vector<8x8x8xbf16>
    %c0_12 = arith.constant 0 : index
    %c0_13 = arith.constant 0 : index
    %c0_14 = arith.constant 0 : index
    %c0_15 = arith.constant 0 : index
    %37 = vector.load %arg3[%c0_12, %c0_13, %c0_14, %c0_15] : memref<1x8x8x8xbf16, #tpu.memory_space<vmem>>, vector<1x8x8x8xbf16>
    %38 = vector.shape_cast %37 : vector<1x8x8x8xbf16> to vector<8x8x8xbf16>
    %39 = vector.shape_cast %36 : vector<8x8x8xbf16> to vector<1x8x8x8xbf16>
    tpu.vector_store %arg3[%c0_12, %c0_13, %c0_14, %c0_15], %39 {strides = array<i32>} : memref<1x8x8x8xbf16, #tpu.memory_space<vmem>>, vector<1x8x8x8xbf16>,
    return
  }
  func.func @transform_0(%arg0: i32) -> (i32, i32, i32, i32) {
    %c0_i32 = arith.constant 0 : i32
    %c0_i32_0 = arith.constant 0 : i32
    %c0_i32_1 = arith.constant 0 : i32
    %c0_i32_2 = arith.constant 0 : i32
    return %arg0, %c0_i32, %c0_i32_0, %c0_i32_1 : i32, i32, i32, i32
  }
  func.func @transform_1(%arg0: i32) -> (i32, i32, i32) {
    %c0_i32 = arith.constant 0 : i32
    %c0_i32_0 = arith.constant 0 : i32
    %c0_i32_1 = arith.constant 0 : i32
    %c0_i32_2 = arith.constant 0 : i32
    return %c0_i32, %c0_i32_0, %c0_i32_1 : i32, i32, i32
  }
  func.func @transform_2(%arg0: i32) -> (i32, i32, i32, i32) {
    %c0_i32 = arith.constant 0 : i32
    %c0_i32_0 = arith.constant 0 : i32
    %c0_i32_1 = arith.constant 0 : i32
    %c0_i32_2 = arith.constant 0 : i32
    return %arg0, %c0_i32, %c0_i32_0, %c0_i32_1 : i32, i32, i32, i32
  }
}

module attributes {stable_mosaic.version = 11 : i64} {
  func.func @_bn_relu_avgpool_kernel(%arg0: i32, %arg1: memref<1x4x2x4x64xbf16, #tpu.memory_space<vmem>>, %arg2: memref<1x1x1x64xf32, #tpu.memory_space<vmem>>, %arg3: memref<1x1x1x64xf32, #tpu.memory_space<vmem>>, %arg4: memref<1x4x4x32xbf16, #tpu.memory_space<vmem>>) attributes {dimension_semantics = [#tpu.dimension_semantics<parallel>], iteration_bounds = array<i64: 2>, scalar_prefetch = 0 : i64, scratch_operands = 0 : i64, tpu.core_type = #tpu.core_type<tc>, window_params = [{transform_indices = @transform_0, window_bounds = array<i64: 1, 4, 2, 4, 64>}, {pipeline_mode = #tpu.pipeline_mode<synchronous>, transform_indices = @transform_1, window_bounds = array<i64: 1, 1, 1, 64>}, {pipeline_mode = #tpu.pipeline_mode<synchronous>, transform_indices = @transform_2, window_bounds = array<i64: 1, 1, 1, 64>}, {transform_indices = @transform_3, window_bounds = array<i64: 1, 4, 4, 32>}]} {
    %c0 = arith.constant 0 : index
    %c0_0 = arith.constant 0 : index
    %c0_1 = arith.constant 0 : index
    %c0_2 = arith.constant 0 : index
    %c0_3 = arith.constant 0 : index
    %0 = vector.load %arg1[%c0, %c0_0, %c0_1, %c0_2, %c0_3] : memref<1x4x2x4x64xbf16, #tpu.memory_space<vmem>>, vector<1x4x2x4x64xbf16>
    %1 = vector.shape_cast %0 : vector<1x4x2x4x64xbf16> to vector<4x2x4x64xbf16>
    %2 = arith.extf %1 : vector<4x2x4x64xbf16> to vector<4x2x4x64xf32>
    %c0_4 = arith.constant 0 : index
    %c0_5 = arith.constant 0 : index
    %c0_6 = arith.constant 0 : index
    %c0_7 = arith.constant 0 : index
    %3 = vector.load %arg2[%c0_4, %c0_5, %c0_6, %c0_7] : memref<1x1x1x64xf32, #tpu.memory_space<vmem>>, vector<1x1x1x64xf32>
    %4 = vector.shape_cast %3 : vector<1x1x1x64xf32> to vector<1x1x64xf32>
    %5 = vector.shape_cast %4 : vector<1x1x64xf32> to vector<1x1x1x64xf32>
    %6 = vector.broadcast %5 : vector<1x1x1x64xf32> to vector<4x2x4x64xf32>
    %7 = arith.mulf %2, %6 : vector<4x2x4x64xf32>
    %c0_8 = arith.constant 0 : index
    %c0_9 = arith.constant 0 : index
    %c0_10 = arith.constant 0 : index
    %c0_11 = arith.constant 0 : index
    %8 = vector.load %arg3[%c0_8, %c0_9, %c0_10, %c0_11] : memref<1x1x1x64xf32, #tpu.memory_space<vmem>>, vector<1x1x1x64xf32>
    %9 = vector.shape_cast %8 : vector<1x1x1x64xf32> to vector<1x1x64xf32>
    %10 = vector.shape_cast %9 : vector<1x1x64xf32> to vector<1x1x1x64xf32>
    %11 = vector.broadcast %10 : vector<1x1x1x64xf32> to vector<4x2x4x64xf32>
    %12 = arith.addf %7, %11 : vector<4x2x4x64xf32>
    %cst = arith.constant 0.000000e+00 : f32
    %13 = vector.broadcast %cst : f32 to vector<4x2x4x64xf32>
    %14 = arith.maximumf %12, %13 : vector<4x2x4x64xf32>
    %15 = vector.extract_strided_slice %14 {offsets = [0, 0, 0, 0], sizes = [4, 1, 4, 64], strides = [1, 1, 1, 1]} : vector<4x2x4x64xf32> to vector<4x1x4x64xf32>
    %16 = vector.shape_cast %15 : vector<4x1x4x64xf32> to vector<4x4x64xf32>
    %17 = vector.extract_strided_slice %14 {offsets = [0, 1, 0, 0], sizes = [4, 1, 4, 64], strides = [1, 1, 1, 1]} : vector<4x2x4x64xf32> to vector<4x1x4x64xf32>
    %18 = vector.shape_cast %17 : vector<4x1x4x64xf32> to vector<4x4x64xf32>
    %19 = arith.addf %16, %18 : vector<4x4x64xf32>
    %20 = vector.extract_strided_slice %19 {offsets = [0, 0, 0], sizes = [4, 4, 32], strides = [1, 1, 1]} : vector<4x4x64xf32> to vector<4x4x32xf32>
    %21 = vector.extract_strided_slice %19 {offsets = [0, 0, 32], sizes = [4, 4, 32], strides = [1, 1, 1]} : vector<4x4x64xf32> to vector<4x4x32xf32>
    %22 = arith.addf %20, %21 : vector<4x4x32xf32>
    %cst_12 = arith.constant 2.500000e-01 : f32
    %23 = vector.broadcast %cst_12 : f32 to vector<4x4x32xf32>
    %24 = arith.mulf %22, %23 : vector<4x4x32xf32>
    %25 = arith.truncf %24 : vector<4x4x32xf32> to vector<4x4x32xbf16>
    %c0_13 = arith.constant 0 : index
    %c0_14 = arith.constant 0 : index
    %c0_15 = arith.constant 0 : index
    %c0_16 = arith.constant 0 : index
    %26 = vector.load %arg4[%c0_13, %c0_14, %c0_15, %c0_16] : memref<1x4x4x32xbf16, #tpu.memory_space<vmem>>, vector<1x4x4x32xbf16>
    %27 = vector.shape_cast %26 : vector<1x4x4x32xbf16> to vector<4x4x32xbf16>
    %28 = vector.shape_cast %25 : vector<4x4x32xbf16> to vector<1x4x4x32xbf16>
    tpu.vector_store %arg4[%c0_13, %c0_14, %c0_15, %c0_16], %28 {strides = array<i32>} : memref<1x4x4x32xbf16, #tpu.memory_space<vmem>>, vector<1x4x4x32xbf16>,
    return
  }
  func.func @transform_0(%arg0: i32) -> (i32, i32, i32, i32, i32) {
    %c0_i32 = arith.constant 0 : i32
    %c0_i32_0 = arith.constant 0 : i32
    %c0_i32_1 = arith.constant 0 : i32
    %c0_i32_2 = arith.constant 0 : i32
    %c0_i32_3 = arith.constant 0 : i32
    return %arg0, %c0_i32, %c0_i32_0, %c0_i32_1, %c0_i32_2 : i32, i32, i32, i32, i32
  }
  func.func @transform_1(%arg0: i32) -> (i32, i32, i32, i32) {
    %c0_i32 = arith.constant 0 : i32
    %c0_i32_0 = arith.constant 0 : i32
    %c0_i32_1 = arith.constant 0 : i32
    %c0_i32_2 = arith.constant 0 : i32
    %c0_i32_3 = arith.constant 0 : i32
    return %c0_i32, %c0_i32_0, %c0_i32_1, %c0_i32_2 : i32, i32, i32, i32
  }
  func.func @transform_2(%arg0: i32) -> (i32, i32, i32, i32) {
    %c0_i32 = arith.constant 0 : i32
    %c0_i32_0 = arith.constant 0 : i32
    %c0_i32_1 = arith.constant 0 : i32
    %c0_i32_2 = arith.constant 0 : i32
    %c0_i32_3 = arith.constant 0 : i32
    return %c0_i32, %c0_i32_0, %c0_i32_1, %c0_i32_2 : i32, i32, i32, i32
  }
  func.func @transform_3(%arg0: i32) -> (i32, i32, i32, i32) {
    %c0_i32 = arith.constant 0 : i32
    %c0_i32_0 = arith.constant 0 : i32
    %c0_i32_1 = arith.constant 0 : i32
    %c0_i32_2 = arith.constant 0 : i32
    return %arg0, %c0_i32, %c0_i32_0, %c0_i32_1 : i32, i32, i32, i32
  }
}

module attributes {stable_mosaic.version = 11 : i64} {
  func.func @_mm_kernel(%arg0: i32, %arg1: memref<32x32xbf16, #tpu.memory_space<vmem>>, %arg2: memref<32x16xbf16, #tpu.memory_space<vmem>>, %arg3: memref<32x16xbf16, #tpu.memory_space<vmem>>) attributes {dimension_semantics = [#tpu.dimension_semantics<parallel>], iteration_bounds = array<i64: 1>, scalar_prefetch = 0 : i64, scratch_operands = 0 : i64, tpu.core_type = #tpu.core_type<tc>, window_params = [{transform_indices = @transform_0, window_bounds = array<i64: 32, 32>}, {pipeline_mode = #tpu.pipeline_mode<synchronous>, transform_indices = @transform_1, window_bounds = array<i64: 32, 16>}, {transform_indices = @transform_2, window_bounds = array<i64: 32, 16>}]} {
    %c0 = arith.constant 0 : index
    %c0_0 = arith.constant 0 : index
    %0 = vector.load %arg1[%c0, %c0_0] : memref<32x32xbf16, #tpu.memory_space<vmem>>, vector<32x32xbf16>
    %c0_1 = arith.constant 0 : index
    %c0_2 = arith.constant 0 : index
    %1 = vector.load %arg2[%c0_1, %c0_2] : memref<32x16xbf16, #tpu.memory_space<vmem>>, vector<32x16xbf16>
    %cst = arith.constant dense<0.000000e+00> : vector<32x16xf32>
    %2 = tpu.matmul %0, %1, %cst {dimension_numbers = #tpu.dot_dimension_numbers<[1], [0], [0], [1], [0, 0, 1, 1], [], []>} : vector<32x32xbf16>, vector<32x16xbf16>, vector<32x16xf32> -> vector<32x16xf32>
    %3 = arith.truncf %2 : vector<32x16xf32> to vector<32x16xbf16>
    %c0_3 = arith.constant 0 : index
    %c0_4 = arith.constant 0 : index
    %4 = vector.load %arg3[%c0_3, %c0_4] : memref<32x16xbf16, #tpu.memory_space<vmem>>, vector<32x16xbf16>
    tpu.vector_store %arg3[%c0_3, %c0_4], %3 {strides = array<i32>} : memref<32x16xbf16, #tpu.memory_space<vmem>>, vector<32x16xbf16>,
    return
  }
  func.func @transform_0(%arg0: i32) -> (i32, i32) {
    %c0_i32 = arith.constant 0 : i32
    %c0_i32_0 = arith.constant 0 : i32
    return %arg0, %c0_i32 : i32, i32
  }
  func.func @transform_1(%arg0: i32) -> (i32, i32) {
    %c0_i32 = arith.constant 0 : i32
    %c0_i32_0 = arith.constant 0 : i32
    %c0_i32_1 = arith.constant 0 : i32
    return %c0_i32, %c0_i32_0 : i32, i32
  }
  func.func @transform_2(%arg0: i32) -> (i32, i32) {
    %c0_i32 = arith.constant 0 : i32
    %c0_i32_0 = arith.constant 0 : i32
    return %arg0, %c0_i32 : i32, i32
  }
}

module attributes {stable_mosaic.version = 11 : i64} {
  func.func @_conv3x3_kernel(%arg0: i32, %arg1: memref<1x7x8x32xbf16, #tpu.memory_space<vmem>>, %arg2: memref<3x32x24xbf16, #tpu.memory_space<vmem>>, %arg3: memref<1x4x4x8xbf16, #tpu.memory_space<vmem>>) attributes {dimension_semantics = [#tpu.dimension_semantics<parallel>], iteration_bounds = array<i64: 2>, scalar_prefetch = 0 : i64, scratch_operands = 0 : i64, tpu.core_type = #tpu.core_type<tc>, window_params = [{transform_indices = @transform_0, window_bounds = array<i64: 1, 7, 8, 32>}, {pipeline_mode = #tpu.pipeline_mode<synchronous>, transform_indices = @transform_1, window_bounds = array<i64: 3, 32, 24>}, {transform_indices = @transform_2, window_bounds = array<i64: 1, 4, 4, 8>}]} {
    %c0 = arith.constant 0 : index
    %c0_0 = arith.constant 0 : index
    %c0_1 = arith.constant 0 : index
    %c0_2 = arith.constant 0 : index
    %0 = vector.load %arg1[%c0, %c0_0, %c0_1, %c0_2] : memref<1x7x8x32xbf16, #tpu.memory_space<vmem>>, vector<1x7x8x32xbf16>
    %1 = vector.shape_cast %0 : vector<1x7x8x32xbf16> to vector<7x8x32xbf16>
    %2 = vector.shape_cast %1 : vector<7x8x32xbf16> to vector<56x32xbf16>
    %3 = vector.extract_strided_slice %2 {offsets = [0, 0], sizes = [48, 32], strides = [1, 1]} : vector<56x32xbf16> to vector<48x32xbf16>
    %c0_3 = arith.constant 0 : index
    %c0_4 = arith.constant 0 : index
    %c0_5 = arith.constant 0 : index
    %4 = vector.load %arg2[%c0_3, %c0_4, %c0_5] : memref<3x32x24xbf16, #tpu.memory_space<vmem>>, vector<1x32x24xbf16>
    %5 = vector.shape_cast %4 : vector<1x32x24xbf16> to vector<32x24xbf16>
    %cst = arith.constant dense<0.000000e+00> : vector<48x24xf32>
    %6 = tpu.matmul %3, %5, %cst {dimension_numbers = #tpu.dot_dimension_numbers<[1], [0], [0], [1], [0, 0, 1, 1], [], []>} : vector<48x32xbf16>, vector<32x24xbf16>, vector<48x24xf32> -> vector<48x24xf32>
    %7 = vector.shape_cast %6 : vector<48x24xf32> to vector<6x8x24xf32>
    %8 = vector.extract_strided_slice %7 {offsets = [0, 0, 0], sizes = [4, 8, 8], strides = [1, 1, 1]} : vector<6x8x24xf32> to vector<4x8x8xf32>
    %9 = vector.extract_strided_slice %7 {offsets = [1, 0, 8], sizes = [4, 8, 8], strides = [1, 1, 1]} : vector<6x8x24xf32> to vector<4x8x8xf32>
    %10 = arith.addf %8, %9 : vector<4x8x8xf32>
    %11 = vector.extract_strided_slice %7 {offsets = [2, 0, 16], sizes = [4, 8, 8], strides = [1, 1, 1]} : vector<6x8x24xf32> to vector<4x8x8xf32>
    %12 = arith.addf %10, %11 : vector<4x8x8xf32>
    %13 = vector.extract_strided_slice %2 {offsets = [1, 0], sizes = [48, 32], strides = [1, 1]} : vector<56x32xbf16> to vector<48x32xbf16>
    %c1 = arith.constant 1 : index
    %c0_6 = arith.constant 0 : index
    %c0_7 = arith.constant 0 : index
    %14 = vector.load %arg2[%c1, %c0_6, %c0_7] : memref<3x32x24xbf16, #tpu.memory_space<vmem>>, vector<1x32x24xbf16>
    %15 = vector.shape_cast %14 : vector<1x32x24xbf16> to vector<32x24xbf16>
    %cst_8 = arith.constant dense<0.000000e+00> : vector<48x24xf32>
    %16 = tpu.matmul %13, %15, %cst_8 {dimension_numbers = #tpu.dot_dimension_numbers<[1], [0], [0], [1], [0, 0, 1, 1], [], []>} : vector<48x32xbf16>, vector<32x24xbf16>, vector<48x24xf32> -> vector<48x24xf32>
    %17 = vector.shape_cast %16 : vector<48x24xf32> to vector<6x8x24xf32>
    %18 = vector.extract_strided_slice %17 {offsets = [0, 0, 0], sizes = [4, 8, 8], strides = [1, 1, 1]} : vector<6x8x24xf32> to vector<4x8x8xf32>
    %19 = arith.addf %12, %18 : vector<4x8x8xf32>
    %20 = vector.extract_strided_slice %17 {offsets = [1, 0, 8], sizes = [4, 8, 8], strides = [1, 1, 1]} : vector<6x8x24xf32> to vector<4x8x8xf32>
    %21 = arith.addf %19, %20 : vector<4x8x8xf32>
    %22 = vector.extract_strided_slice %17 {offsets = [2, 0, 16], sizes = [4, 8, 8], strides = [1, 1, 1]} : vector<6x8x24xf32> to vector<4x8x8xf32>
    %23 = arith.addf %21, %22 : vector<4x8x8xf32>
    %24 = vector.extract_strided_slice %2 {offsets = [2, 0], sizes = [48, 32], strides = [1, 1]} : vector<56x32xbf16> to vector<48x32xbf16>
    %c2 = arith.constant 2 : index
    %c0_9 = arith.constant 0 : index
    %c0_10 = arith.constant 0 : index
    %25 = vector.load %arg2[%c2, %c0_9, %c0_10] : memref<3x32x24xbf16, #tpu.memory_space<vmem>>, vector<1x32x24xbf16>
    %26 = vector.shape_cast %25 : vector<1x32x24xbf16> to vector<32x24xbf16>
    %cst_11 = arith.constant dense<0.000000e+00> : vector<48x24xf32>
    %27 = tpu.matmul %24, %26, %cst_11 {dimension_numbers = #tpu.dot_dimension_numbers<[1], [0], [0], [1], [0, 0, 1, 1], [], []>} : vector<48x32xbf16>, vector<32x24xbf16>, vector<48x24xf32> -> vector<48x24xf32>
    %28 = vector.shape_cast %27 : vector<48x24xf32> to vector<6x8x24xf32>
    %29 = vector.extract_strided_slice %28 {offsets = [0, 0, 0], sizes = [4, 8, 8], strides = [1, 1, 1]} : vector<6x8x24xf32> to vector<4x8x8xf32>
    %30 = arith.addf %23, %29 : vector<4x8x8xf32>
    %31 = vector.extract_strided_slice %28 {offsets = [1, 0, 8], sizes = [4, 8, 8], strides = [1, 1, 1]} : vector<6x8x24xf32> to vector<4x8x8xf32>
    %32 = arith.addf %30, %31 : vector<4x8x8xf32>
    %33 = vector.extract_strided_slice %28 {offsets = [2, 0, 16], sizes = [4, 8, 8], strides = [1, 1, 1]} : vector<6x8x24xf32> to vector<4x8x8xf32>
    %34 = arith.addf %32, %33 : vector<4x8x8xf32>
    %35 = vector.extract_strided_slice %34 {offsets = [0, 0, 0], sizes = [4, 4, 8], strides = [1, 1, 1]} : vector<4x8x8xf32> to vector<4x4x8xf32>
    %36 = arith.truncf %35 : vector<4x4x8xf32> to vector<4x4x8xbf16>
    %c0_12 = arith.constant 0 : index
    %c0_13 = arith.constant 0 : index
    %c0_14 = arith.constant 0 : index
    %c0_15 = arith.constant 0 : index
    %37 = vector.load %arg3[%c0_12, %c0_13, %c0_14, %c0_15] : memref<1x4x4x8xbf16, #tpu.memory_space<vmem>>, vector<1x4x4x8xbf16>
    %38 = vector.shape_cast %37 : vector<1x4x4x8xbf16> to vector<4x4x8xbf16>
    %39 = vector.shape_cast %36 : vector<4x4x8xbf16> to vector<1x4x4x8xbf16>
    tpu.vector_store %arg3[%c0_12, %c0_13, %c0_14, %c0_15], %39 {strides = array<i32>} : memref<1x4x4x8xbf16, #tpu.memory_space<vmem>>, vector<1x4x4x8xbf16>,
    return
  }
  func.func @transform_0(%arg0: i32) -> (i32, i32, i32, i32) {
    %c0_i32 = arith.constant 0 : i32
    %c0_i32_0 = arith.constant 0 : i32
    %c0_i32_1 = arith.constant 0 : i32
    %c0_i32_2 = arith.constant 0 : i32
    return %arg0, %c0_i32, %c0_i32_0, %c0_i32_1 : i32, i32, i32, i32
  }
  func.func @transform_1(%arg0: i32) -> (i32, i32, i32) {
    %c0_i32 = arith.constant 0 : i32
    %c0_i32_0 = arith.constant 0 : i32
    %c0_i32_1 = arith.constant 0 : i32
    %c0_i32_2 = arith.constant 0 : i32
    return %c0_i32, %c0_i32_0, %c0_i32_1 : i32, i32, i32
  }
  func.func @transform_2(%arg0: i32) -> (i32, i32, i32, i32) {
    %c0_i32 = arith.constant 0 : i32
    %c0_i32_0 = arith.constant 0 : i32
    %c0_i32_1 = arith.constant 0 : i32
    %c0_i32_2 = arith.constant 0 : i32
    return %arg0, %c0_i32, %c0_i32_0, %c0_i32_1 : i32, i32, i32, i32
  }
}

module attributes {stable_mosaic.version = 11 : i64} {
  func.func @_mm_kernel(%arg0: i32, %arg1: memref<32x48xbf16, #tpu.memory_space<vmem>>, %arg2: memref<1x48xf32, #tpu.memory_space<vmem>>, %arg3: memref<1x48xf32, #tpu.memory_space<vmem>>, %arg4: memref<48x32xbf16, #tpu.memory_space<vmem>>, %arg5: memref<1x32xf32, #tpu.memory_space<vmem>>, %arg6: memref<1x32xf32, #tpu.memory_space<vmem>>, %arg7: memref<32x32xbf16, #tpu.memory_space<vmem>>) attributes {dimension_semantics = [#tpu.dimension_semantics<parallel>], iteration_bounds = array<i64: 1>, scalar_prefetch = 0 : i64, scratch_operands = 0 : i64, tpu.core_type = #tpu.core_type<tc>, window_params = [{transform_indices = @transform_0, window_bounds = array<i64: 32, 48>}, {pipeline_mode = #tpu.pipeline_mode<synchronous>, transform_indices = @transform_1, window_bounds = array<i64: 1, 48>}, {pipeline_mode = #tpu.pipeline_mode<synchronous>, transform_indices = @transform_2, window_bounds = array<i64: 1, 48>}, {pipeline_mode = #tpu.pipeline_mode<synchronous>, transform_indices = @transform_3, window_bounds = array<i64: 48, 32>}, {pipeline_mode = #tpu.pipeline_mode<synchronous>, transform_indices = @transform_4, window_bounds = array<i64: 1, 32>}, {pipeline_mode = #tpu.pipeline_mode<synchronous>, transform_indices = @transform_5, window_bounds = array<i64: 1, 32>}, {transform_indices = @transform_6, window_bounds = array<i64: 32, 32>}]} {
    %c0 = arith.constant 0 : index
    %c0_0 = arith.constant 0 : index
    %0 = vector.load %arg1[%c0, %c0_0] : memref<32x48xbf16, #tpu.memory_space<vmem>>, vector<32x48xbf16>
    %c0_1 = arith.constant 0 : index
    %c0_2 = arith.constant 0 : index
    %1 = vector.load %arg2[%c0_1, %c0_2] : memref<1x48xf32, #tpu.memory_space<vmem>>, vector<1x48xf32>
    %2 = arith.extf %0 : vector<32x48xbf16> to vector<32x48xf32>
    %3 = vector.broadcast %1 : vector<1x48xf32> to vector<32x48xf32>
    %4 = arith.mulf %2, %3 : vector<32x48xf32>
    %c0_3 = arith.constant 0 : index
    %c0_4 = arith.constant 0 : index
    %5 = vector.load %arg3[%c0_3, %c0_4] : memref<1x48xf32, #tpu.memory_space<vmem>>, vector<1x48xf32>
    %6 = vector.broadcast %5 : vector<1x48xf32> to vector<32x48xf32>
    %7 = arith.addf %4, %6 : vector<32x48xf32>
    %cst = arith.constant 0.000000e+00 : f32
    %8 = vector.broadcast %cst : f32 to vector<32x48xf32>
    %9 = arith.maximumf %7, %8 : vector<32x48xf32>
    %10 = arith.truncf %9 : vector<32x48xf32> to vector<32x48xbf16>
    %c0_5 = arith.constant 0 : index
    %c0_6 = arith.constant 0 : index
    %11 = vector.load %arg4[%c0_5, %c0_6] : memref<48x32xbf16, #tpu.memory_space<vmem>>, vector<48x32xbf16>
    %cst_7 = arith.constant dense<0.000000e+00> : vector<32x32xf32>
    %12 = tpu.matmul %10, %11, %cst_7 {dimension_numbers = #tpu.dot_dimension_numbers<[1], [0], [0], [1], [0, 0, 1, 1], [], []>} : vector<32x48xbf16>, vector<48x32xbf16>, vector<32x32xf32> -> vector<32x32xf32>
    %c0_8 = arith.constant 0 : index
    %c0_9 = arith.constant 0 : index
    %13 = vector.load %arg5[%c0_8, %c0_9] : memref<1x32xf32, #tpu.memory_space<vmem>>, vector<1x32xf32>
    %14 = vector.broadcast %13 : vector<1x32xf32> to vector<32x32xf32>
    %15 = arith.mulf %12, %14 : vector<32x32xf32>
    %c0_10 = arith.constant 0 : index
    %c0_11 = arith.constant 0 : index
    %16 = vector.load %arg6[%c0_10, %c0_11] : memref<1x32xf32, #tpu.memory_space<vmem>>, vector<1x32xf32>
    %17 = vector.broadcast %16 : vector<1x32xf32> to vector<32x32xf32>
    %18 = arith.addf %15, %17 : vector<32x32xf32>
    %cst_12 = arith.constant 0.000000e+00 : f32
    %19 = vector.broadcast %cst_12 : f32 to vector<32x32xf32>
    %20 = arith.maximumf %18, %19 : vector<32x32xf32>
    %21 = arith.truncf %20 : vector<32x32xf32> to vector<32x32xbf16>
    %c0_13 = arith.constant 0 : index
    %c0_14 = arith.constant 0 : index
    %22 = vector.load %arg7[%c0_13, %c0_14] : memref<32x32xbf16, #tpu.memory_space<vmem>>, vector<32x32xbf16>
    tpu.vector_store %arg7[%c0_13, %c0_14], %21 {strides = array<i32>} : memref<32x32xbf16, #tpu.memory_space<vmem>>, vector<32x32xbf16>,
    return
  }
  func.func @transform_0(%arg0: i32) -> (i32, i32) {
    %c0_i32 = arith.constant 0 : i32
    %c0_i32_0 = arith.constant 0 : i32
    return %arg0, %c0_i32 : i32, i32
  }
  func.func @transform_1(%arg0: i32) -> (i32, i32) {
    %c0_i32 = arith.constant 0 : i32
    %c0_i32_0 = arith.constant 0 : i32
    %c0_i32_1 = arith.constant 0 : i32
    return %c0_i32, %c0_i32_0 : i32, i32
  }
  func.func @transform_2(%arg0: i32) -> (i32, i32) {
    %c0_i32 = arith.constant 0 : i32
    %c0_i32_0 = arith.constant 0 : i32
    %c0_i32_1 = arith.constant 0 : i32
    return %c0_i32, %c0_i32_0 : i32, i32
  }
  func.func @transform_3(%arg0: i32) -> (i32, i32) {
    %c0_i32 = arith.constant 0 : i32
    %c0_i32_0 = arith.constant 0 : i32
    %c0_i32_1 = arith.constant 0 : i32
    return %c0_i32, %c0_i32_0 : i32, i32
  }
  func.func @transform_4(%arg0: i32) -> (i32, i32) {
    %c0_i32 = arith.constant 0 : i32
    %c0_i32_0 = arith.constant 0 : i32
    %c0_i32_1 = arith.constant 0 : i32
    return %c0_i32, %c0_i32_0 : i32, i32
  }
  func.func @transform_5(%arg0: i32) -> (i32, i32) {
    %c0_i32 = arith.constant 0 : i32
    %c0_i32_0 = arith.constant 0 : i32
    %c0_i32_1 = arith.constant 0 : i32
    return %c0_i32, %c0_i32_0 : i32, i32
  }
  func.func @transform_6(%arg0: i32) -> (i32, i32) {
    %c0_i32 = arith.constant 0 : i32
    %c0_i32_0 = arith.constant 0 : i32
    return %arg0, %c0_i32 : i32, i32
  }
}

module attributes {stable_mosaic.version = 11 : i64} {
  func.func @_mm_kernel(%arg0: i32, %arg1: memref<32x48xbf16, #tpu.memory_space<vmem>>, %arg2: memref<1x48xf32, #tpu.memory_space<vmem>>, %arg3: memref<1x48xf32, #tpu.memory_space<vmem>>, %arg4: memref<48x32xbf16, #tpu.memory_space<vmem>>, %arg5: memref<1x32xf32, #tpu.memory_space<vmem>>, %arg6: memref<1x32xf32, #tpu.memory_space<vmem>>, %arg7: memref<32x32xbf16, #tpu.memory_space<vmem>>) attributes {dimension_semantics = [#tpu.dimension_semantics<parallel>], iteration_bounds = array<i64: 1>, scalar_prefetch = 0 : i64, scratch_operands = 0 : i64, tpu.core_type = #tpu.core_type<tc>, window_params = [{transform_indices = @transform_0, window_bounds = array<i64: 32, 48>}, {pipeline_mode = #tpu.pipeline_mode<synchronous>, transform_indices = @transform_1, window_bounds = array<i64: 1, 48>}, {pipeline_mode = #tpu.pipeline_mode<synchronous>, transform_indices = @transform_2, window_bounds = array<i64: 1, 48>}, {pipeline_mode = #tpu.pipeline_mode<synchronous>, transform_indices = @transform_3, window_bounds = array<i64: 48, 32>}, {pipeline_mode = #tpu.pipeline_mode<synchronous>, transform_indices = @transform_4, window_bounds = array<i64: 1, 32>}, {pipeline_mode = #tpu.pipeline_mode<synchronous>, transform_indices = @transform_5, window_bounds = array<i64: 1, 32>}, {transform_indices = @transform_6, window_bounds = array<i64: 32, 32>}]} {
    %c0 = arith.constant 0 : index
    %c0_0 = arith.constant 0 : index
    %0 = vector.load %arg1[%c0, %c0_0] : memref<32x48xbf16, #tpu.memory_space<vmem>>, vector<32x48xbf16>
    %c0_1 = arith.constant 0 : index
    %c0_2 = arith.constant 0 : index
    %1 = vector.load %arg2[%c0_1, %c0_2] : memref<1x48xf32, #tpu.memory_space<vmem>>, vector<1x48xf32>
    %2 = arith.extf %0 : vector<32x48xbf16> to vector<32x48xf32>
    %3 = vector.broadcast %1 : vector<1x48xf32> to vector<32x48xf32>
    %4 = arith.mulf %2, %3 : vector<32x48xf32>
    %c0_3 = arith.constant 0 : index
    %c0_4 = arith.constant 0 : index
    %5 = vector.load %arg3[%c0_3, %c0_4] : memref<1x48xf32, #tpu.memory_space<vmem>>, vector<1x48xf32>
    %6 = vector.broadcast %5 : vector<1x48xf32> to vector<32x48xf32>
    %7 = arith.addf %4, %6 : vector<32x48xf32>
    %cst = arith.constant 0.000000e+00 : f32
    %8 = vector.broadcast %cst : f32 to vector<32x48xf32>
    %9 = arith.maximumf %7, %8 : vector<32x48xf32>
    %10 = arith.truncf %9 : vector<32x48xf32> to vector<32x48xbf16>
    %c0_5 = arith.constant 0 : index
    %c0_6 = arith.constant 0 : index
    %11 = vector.load %arg4[%c0_5, %c0_6] : memref<48x32xbf16, #tpu.memory_space<vmem>>, vector<48x32xbf16>
    %cst_7 = arith.constant dense<0.000000e+00> : vector<32x32xf32>
    %12 = tpu.matmul %10, %11, %cst_7 {dimension_numbers = #tpu.dot_dimension_numbers<[1], [0], [0], [1], [0, 0, 1, 1], [], []>} : vector<32x48xbf16>, vector<48x32xbf16>, vector<32x32xf32> -> vector<32x32xf32>
    %c0_8 = arith.constant 0 : index
    %c0_9 = arith.constant 0 : index
    %13 = vector.load %arg5[%c0_8, %c0_9] : memref<1x32xf32, #tpu.memory_space<vmem>>, vector<1x32xf32>
    %14 = vector.broadcast %13 : vector<1x32xf32> to vector<32x32xf32>
    %15 = arith.mulf %12, %14 : vector<32x32xf32>
    %c0_10 = arith.constant 0 : index
    %c0_11 = arith.constant 0 : index
    %16 = vector.load %arg6[%c0_10, %c0_11] : memref<1x32xf32, #tpu.memory_space<vmem>>, vector<1x32xf32>
    %17 = vector.broadcast %16 : vector<1x32xf32> to vector<32x32xf32>
    %18 = arith.addf %15, %17 : vector<32x32xf32>
    %cst_12 = arith.constant 0.000000e+00 : f32
    %19 = vector.broadcast %cst_12 : f32 to vector<32x32xf32>
    %20 = arith.maximumf %18, %19 : vector<32x32xf32>
    %21 = arith.truncf %20 : vector<32x32xf32> to vector<32x32xbf16>
    %c0_13 = arith.constant 0 : index
    %c0_14 = arith.constant 0 : index
    %22 = vector.load %arg7[%c0_13, %c0_14] : memref<32x32xbf16, #tpu.memory_space<vmem>>, vector<32x32xbf16>
    tpu.vector_store %arg7[%c0_13, %c0_14], %21 {strides = array<i32>} : memref<32x32xbf16, #tpu.memory_space<vmem>>, vector<32x32xbf16>,
    return
  }
  func.func @transform_0(%arg0: i32) -> (i32, i32) {
    %c0_i32 = arith.constant 0 : i32
    %c0_i32_0 = arith.constant 0 : i32
    return %arg0, %c0_i32 : i32, i32
  }
  func.func @transform_1(%arg0: i32) -> (i32, i32) {
    %c0_i32 = arith.constant 0 : i32
    %c0_i32_0 = arith.constant 0 : i32
    %c0_i32_1 = arith.constant 0 : i32
    return %c0_i32, %c0_i32_0 : i32, i32
  }
  func.func @transform_2(%arg0: i32) -> (i32, i32) {
    %c0_i32 = arith.constant 0 : i32
    %c0_i32_0 = arith.constant 0 : i32
    %c0_i32_1 = arith.constant 0 : i32
    return %c0_i32, %c0_i32_0 : i32, i32
  }
  func.func @transform_3(%arg0: i32) -> (i32, i32) {
    %c0_i32 = arith.constant 0 : i32
    %c0_i32_0 = arith.constant 0 : i32
    %c0_i32_1 = arith.constant 0 : i32
    return %c0_i32, %c0_i32_0 : i32, i32
  }
  func.func @transform_4(%arg0: i32) -> (i32, i32) {
    %c0_i32 = arith.constant 0 : i32
    %c0_i32_0 = arith.constant 0 : i32
    %c0_i32_1 = arith.constant 0 : i32
    return %c0_i32, %c0_i32_0 : i32, i32
  }
  func.func @transform_5(%arg0: i32) -> (i32, i32) {
    %c0_i32 = arith.constant 0 : i32
    %c0_i32_0 = arith.constant 0 : i32
    %c0_i32_1 = arith.constant 0 : i32
    return %c0_i32, %c0_i32_0 : i32, i32
  }
  func.func @transform_6(%arg0: i32) -> (i32, i32) {
    %c0_i32 = arith.constant 0 : i32
    %c0_i32_0 = arith.constant 0 : i32
    return %arg0, %c0_i32 : i32, i32
  }
}

module attributes {stable_mosaic.version = 11 : i64} {
  func.func @_mm_kernel(%arg0: i32, %arg1: memref<32x48xbf16, #tpu.memory_space<vmem>>, %arg2: memref<1x48xf32, #tpu.memory_space<vmem>>, %arg3: memref<1x48xf32, #tpu.memory_space<vmem>>, %arg4: memref<48x32xbf16, #tpu.memory_space<vmem>>, %arg5: memref<1x32xf32, #tpu.memory_space<vmem>>, %arg6: memref<1x32xf32, #tpu.memory_space<vmem>>, %arg7: memref<32x32xbf16, #tpu.memory_space<vmem>>) attributes {dimension_semantics = [#tpu.dimension_semantics<parallel>], iteration_bounds = array<i64: 1>, scalar_prefetch = 0 : i64, scratch_operands = 0 : i64, tpu.core_type = #tpu.core_type<tc>, window_params = [{transform_indices = @transform_0, window_bounds = array<i64: 32, 48>}, {pipeline_mode = #tpu.pipeline_mode<synchronous>, transform_indices = @transform_1, window_bounds = array<i64: 1, 48>}, {pipeline_mode = #tpu.pipeline_mode<synchronous>, transform_indices = @transform_2, window_bounds = array<i64: 1, 48>}, {pipeline_mode = #tpu.pipeline_mode<synchronous>, transform_indices = @transform_3, window_bounds = array<i64: 48, 32>}, {pipeline_mode = #tpu.pipeline_mode<synchronous>, transform_indices = @transform_4, window_bounds = array<i64: 1, 32>}, {pipeline_mode = #tpu.pipeline_mode<synchronous>, transform_indices = @transform_5, window_bounds = array<i64: 1, 32>}, {transform_indices = @transform_6, window_bounds = array<i64: 32, 32>}]} {
    %c0 = arith.constant 0 : index
    %c0_0 = arith.constant 0 : index
    %0 = vector.load %arg1[%c0, %c0_0] : memref<32x48xbf16, #tpu.memory_space<vmem>>, vector<32x48xbf16>
    %c0_1 = arith.constant 0 : index
    %c0_2 = arith.constant 0 : index
    %1 = vector.load %arg2[%c0_1, %c0_2] : memref<1x48xf32, #tpu.memory_space<vmem>>, vector<1x48xf32>
    %2 = arith.extf %0 : vector<32x48xbf16> to vector<32x48xf32>
    %3 = vector.broadcast %1 : vector<1x48xf32> to vector<32x48xf32>
    %4 = arith.mulf %2, %3 : vector<32x48xf32>
    %c0_3 = arith.constant 0 : index
    %c0_4 = arith.constant 0 : index
    %5 = vector.load %arg3[%c0_3, %c0_4] : memref<1x48xf32, #tpu.memory_space<vmem>>, vector<1x48xf32>
    %6 = vector.broadcast %5 : vector<1x48xf32> to vector<32x48xf32>
    %7 = arith.addf %4, %6 : vector<32x48xf32>
    %cst = arith.constant 0.000000e+00 : f32
    %8 = vector.broadcast %cst : f32 to vector<32x48xf32>
    %9 = arith.maximumf %7, %8 : vector<32x48xf32>
    %10 = arith.truncf %9 : vector<32x48xf32> to vector<32x48xbf16>
    %c0_5 = arith.constant 0 : index
    %c0_6 = arith.constant 0 : index
    %11 = vector.load %arg4[%c0_5, %c0_6] : memref<48x32xbf16, #tpu.memory_space<vmem>>, vector<48x32xbf16>
    %cst_7 = arith.constant dense<0.000000e+00> : vector<32x32xf32>
    %12 = tpu.matmul %10, %11, %cst_7 {dimension_numbers = #tpu.dot_dimension_numbers<[1], [0], [0], [1], [0, 0, 1, 1], [], []>} : vector<32x48xbf16>, vector<48x32xbf16>, vector<32x32xf32> -> vector<32x32xf32>
    %c0_8 = arith.constant 0 : index
    %c0_9 = arith.constant 0 : index
    %13 = vector.load %arg5[%c0_8, %c0_9] : memref<1x32xf32, #tpu.memory_space<vmem>>, vector<1x32xf32>
    %14 = vector.broadcast %13 : vector<1x32xf32> to vector<32x32xf32>
    %15 = arith.mulf %12, %14 : vector<32x32xf32>
    %c0_10 = arith.constant 0 : index
    %c0_11 = arith.constant 0 : index
    %16 = vector.load %arg6[%c0_10, %c0_11] : memref<1x32xf32, #tpu.memory_space<vmem>>, vector<1x32xf32>
    %17 = vector.broadcast %16 : vector<1x32xf32> to vector<32x32xf32>
    %18 = arith.addf %15, %17 : vector<32x32xf32>
    %cst_12 = arith.constant 0.000000e+00 : f32
    %19 = vector.broadcast %cst_12 : f32 to vector<32x32xf32>
    %20 = arith.maximumf %18, %19 : vector<32x32xf32>
    %21 = arith.truncf %20 : vector<32x32xf32> to vector<32x32xbf16>
    %c0_13 = arith.constant 0 : index
    %c0_14 = arith.constant 0 : index
    %22 = vector.load %arg7[%c0_13, %c0_14] : memref<32x32xbf16, #tpu.memory_space<vmem>>, vector<32x32xbf16>
    tpu.vector_store %arg7[%c0_13, %c0_14], %21 {strides = array<i32>} : memref<32x32xbf16, #tpu.memory_space<vmem>>, vector<32x32xbf16>,
    return
  }
  func.func @transform_0(%arg0: i32) -> (i32, i32) {
    %c0_i32 = arith.constant 0 : i32
    %c0_i32_0 = arith.constant 0 : i32
    return %arg0, %c0_i32 : i32, i32
  }
  func.func @transform_1(%arg0: i32) -> (i32, i32) {
    %c0_i32 = arith.constant 0 : i32
    %c0_i32_0 = arith.constant 0 : i32
    %c0_i32_1 = arith.constant 0 : i32
    return %c0_i32, %c0_i32_0 : i32, i32
  }
  func.func @transform_2(%arg0: i32) -> (i32, i32) {
    %c0_i32 = arith.constant 0 : i32
    %c0_i32_0 = arith.constant 0 : i32
    %c0_i32_1 = arith.constant 0 : i32
    return %c0_i32, %c0_i32_0 : i32, i32
  }
  func.func @transform_3(%arg0: i32) -> (i32, i32) {
    %c0_i32 = arith.constant 0 : i32
    %c0_i32_0 = arith.constant 0 : i32
    %c0_i32_1 = arith.constant 0 : i32
    return %c0_i32, %c0_i32_0 : i32, i32
  }
  func.func @transform_4(%arg0: i32) -> (i32, i32) {
    %c0_i32 = arith.constant 0 : i32
    %c0_i32_0 = arith.constant 0 : i32
    %c0_i32_1 = arith.constant 0 : i32
    return %c0_i32, %c0_i32_0 : i32, i32
  }
  func.func @transform_5(%arg0: i32) -> (i32, i32) {
    %c0_i32 = arith.constant 0 : i32
    %c0_i32_0 = arith.constant 0 : i32
    %c0_i32_1 = arith.constant 0 : i32
    return %c0_i32, %c0_i32_0 : i32, i32
  }
  func.func @transform_6(%arg0: i32) -> (i32, i32) {
    %c0_i32 = arith.constant 0 : i32
    %c0_i32_0 = arith.constant 0 : i32
    return %arg0, %c0_i32 : i32, i32
  }
}

module attributes {stable_mosaic.version = 11 : i64} {
  func.func @_bn_relu_avgpool_kernel(%arg0: i32, %arg1: memref<1x2x2x2x96xbf16, #tpu.memory_space<vmem>>, %arg2: memref<1x1x1x96xf32, #tpu.memory_space<vmem>>, %arg3: memref<1x1x1x96xf32, #tpu.memory_space<vmem>>, %arg4: memref<1x2x2x48xbf16, #tpu.memory_space<vmem>>) attributes {dimension_semantics = [#tpu.dimension_semantics<parallel>], iteration_bounds = array<i64: 2>, scalar_prefetch = 0 : i64, scratch_operands = 0 : i64, tpu.core_type = #tpu.core_type<tc>, window_params = [{transform_indices = @transform_0, window_bounds = array<i64: 1, 2, 2, 2, 96>}, {pipeline_mode = #tpu.pipeline_mode<synchronous>, transform_indices = @transform_1, window_bounds = array<i64: 1, 1, 1, 96>}, {pipeline_mode = #tpu.pipeline_mode<synchronous>, transform_indices = @transform_2, window_bounds = array<i64: 1, 1, 1, 96>}, {transform_indices = @transform_3, window_bounds = array<i64: 1, 2, 2, 48>}]} {
    %c0 = arith.constant 0 : index
    %c0_0 = arith.constant 0 : index
    %c0_1 = arith.constant 0 : index
    %c0_2 = arith.constant 0 : index
    %c0_3 = arith.constant 0 : index
    %0 = vector.load %arg1[%c0, %c0_0, %c0_1, %c0_2, %c0_3] : memref<1x2x2x2x96xbf16, #tpu.memory_space<vmem>>, vector<1x2x2x2x96xbf16>
    %1 = vector.shape_cast %0 : vector<1x2x2x2x96xbf16> to vector<2x2x2x96xbf16>
    %2 = arith.extf %1 : vector<2x2x2x96xbf16> to vector<2x2x2x96xf32>
    %c0_4 = arith.constant 0 : index
    %c0_5 = arith.constant 0 : index
    %c0_6 = arith.constant 0 : index
    %c0_7 = arith.constant 0 : index
    %3 = vector.load %arg2[%c0_4, %c0_5, %c0_6, %c0_7] : memref<1x1x1x96xf32, #tpu.memory_space<vmem>>, vector<1x1x1x96xf32>
    %4 = vector.shape_cast %3 : vector<1x1x1x96xf32> to vector<1x1x96xf32>
    %5 = vector.shape_cast %4 : vector<1x1x96xf32> to vector<1x1x1x96xf32>
    %6 = vector.broadcast %5 : vector<1x1x1x96xf32> to vector<2x2x2x96xf32>
    %7 = arith.mulf %2, %6 : vector<2x2x2x96xf32>
    %c0_8 = arith.constant 0 : index
    %c0_9 = arith.constant 0 : index
    %c0_10 = arith.constant 0 : index
    %c0_11 = arith.constant 0 : index
    %8 = vector.load %arg3[%c0_8, %c0_9, %c0_10, %c0_11] : memref<1x1x1x96xf32, #tpu.memory_space<vmem>>, vector<1x1x1x96xf32>
    %9 = vector.shape_cast %8 : vector<1x1x1x96xf32> to vector<1x1x96xf32>
    %10 = vector.shape_cast %9 : vector<1x1x96xf32> to vector<1x1x1x96xf32>
    %11 = vector.broadcast %10 : vector<1x1x1x96xf32> to vector<2x2x2x96xf32>
    %12 = arith.addf %7, %11 : vector<2x2x2x96xf32>
    %cst = arith.constant 0.000000e+00 : f32
    %13 = vector.broadcast %cst : f32 to vector<2x2x2x96xf32>
    %14 = arith.maximumf %12, %13 : vector<2x2x2x96xf32>
    %15 = vector.extract_strided_slice %14 {offsets = [0, 0, 0, 0], sizes = [2, 1, 2, 96], strides = [1, 1, 1, 1]} : vector<2x2x2x96xf32> to vector<2x1x2x96xf32>
    %16 = vector.shape_cast %15 : vector<2x1x2x96xf32> to vector<2x2x96xf32>
    %17 = vector.extract_strided_slice %14 {offsets = [0, 1, 0, 0], sizes = [2, 1, 2, 96], strides = [1, 1, 1, 1]} : vector<2x2x2x96xf32> to vector<2x1x2x96xf32>
    %18 = vector.shape_cast %17 : vector<2x1x2x96xf32> to vector<2x2x96xf32>
    %19 = arith.addf %16, %18 : vector<2x2x96xf32>
    %20 = vector.extract_strided_slice %19 {offsets = [0, 0, 0], sizes = [2, 2, 48], strides = [1, 1, 1]} : vector<2x2x96xf32> to vector<2x2x48xf32>
    %21 = vector.extract_strided_slice %19 {offsets = [0, 0, 48], sizes = [2, 2, 48], strides = [1, 1, 1]} : vector<2x2x96xf32> to vector<2x2x48xf32>
    %22 = arith.addf %20, %21 : vector<2x2x48xf32>
    %cst_12 = arith.constant 2.500000e-01 : f32
    %23 = vector.broadcast %cst_12 : f32 to vector<2x2x48xf32>
    %24 = arith.mulf %22, %23 : vector<2x2x48xf32>
    %25 = arith.truncf %24 : vector<2x2x48xf32> to vector<2x2x48xbf16>
    %c0_13 = arith.constant 0 : index
    %c0_14 = arith.constant 0 : index
    %c0_15 = arith.constant 0 : index
    %c0_16 = arith.constant 0 : index
    %26 = vector.load %arg4[%c0_13, %c0_14, %c0_15, %c0_16] : memref<1x2x2x48xbf16, #tpu.memory_space<vmem>>, vector<1x2x2x48xbf16>
    %27 = vector.shape_cast %26 : vector<1x2x2x48xbf16> to vector<2x2x48xbf16>
    %28 = vector.shape_cast %25 : vector<2x2x48xbf16> to vector<1x2x2x48xbf16>
    tpu.vector_store %arg4[%c0_13, %c0_14, %c0_15, %c0_16], %28 {strides = array<i32>} : memref<1x2x2x48xbf16, #tpu.memory_space<vmem>>, vector<1x2x2x48xbf16>,
    return
  }
  func.func @transform_0(%arg0: i32) -> (i32, i32, i32, i32, i32) {
    %c0_i32 = arith.constant 0 : i32
    %c0_i32_0 = arith.constant 0 : i32
    %c0_i32_1 = arith.constant 0 : i32
    %c0_i32_2 = arith.constant 0 : i32
    %c0_i32_3 = arith.constant 0 : i32
    return %arg0, %c0_i32, %c0_i32_0, %c0_i32_1, %c0_i32_2 : i32, i32, i32, i32, i32
  }
  func.func @transform_1(%arg0: i32) -> (i32, i32, i32, i32) {
    %c0_i32 = arith.constant 0 : i32
    %c0_i32_0 = arith.constant 0 : i32
    %c0_i32_1 = arith.constant 0 : i32
    %c0_i32_2 = arith.constant 0 : i32
    %c0_i32_3 = arith.constant 0 : i32
    return %c0_i32, %c0_i32_0, %c0_i32_1, %c0_i32_2 : i32, i32, i32, i32
  }
  func.func @transform_2(%arg0: i32) -> (i32, i32, i32, i32) {
    %c0_i32 = arith.constant 0 : i32
    %c0_i32_0 = arith.constant 0 : i32
    %c0_i32_1 = arith.constant 0 : i32
    %c0_i32_2 = arith.constant 0 : i32
    %c0_i32_3 = arith.constant 0 : i32
    return %c0_i32, %c0_i32_0, %c0_i32_1, %c0_i32_2 : i32, i32, i32, i32
  }
  func.func @transform_3(%arg0: i32) -> (i32, i32, i32, i32) {
    %c0_i32 = arith.constant 0 : i32
    %c0_i32_0 = arith.constant 0 : i32
    %c0_i32_1 = arith.constant 0 : i32
    %c0_i32_2 = arith.constant 0 : i32
    return %arg0, %c0_i32, %c0_i32_0, %c0_i32_1 : i32, i32, i32, i32
  }
}

module attributes {stable_mosaic.version = 11 : i64} {
  func.func @_mm_kernel(%arg0: i32, %arg1: memref<8x48xbf16, #tpu.memory_space<vmem>>, %arg2: memref<48x24xbf16, #tpu.memory_space<vmem>>, %arg3: memref<8x24xbf16, #tpu.memory_space<vmem>>) attributes {dimension_semantics = [#tpu.dimension_semantics<parallel>], iteration_bounds = array<i64: 1>, scalar_prefetch = 0 : i64, scratch_operands = 0 : i64, tpu.core_type = #tpu.core_type<tc>, window_params = [{transform_indices = @transform_0, window_bounds = array<i64: 8, 48>}, {pipeline_mode = #tpu.pipeline_mode<synchronous>, transform_indices = @transform_1, window_bounds = array<i64: 48, 24>}, {transform_indices = @transform_2, window_bounds = array<i64: 8, 24>}]} {
    %c0 = arith.constant 0 : index
    %c0_0 = arith.constant 0 : index
    %0 = vector.load %arg1[%c0, %c0_0] : memref<8x48xbf16, #tpu.memory_space<vmem>>, vector<8x48xbf16>
    %c0_1 = arith.constant 0 : index
    %c0_2 = arith.constant 0 : index
    %1 = vector.load %arg2[%c0_1, %c0_2] : memref<48x24xbf16, #tpu.memory_space<vmem>>, vector<48x24xbf16>
    %cst = arith.constant dense<0.000000e+00> : vector<8x24xf32>
    %2 = tpu.matmul %0, %1, %cst {dimension_numbers = #tpu.dot_dimension_numbers<[1], [0], [0], [1], [0, 0, 1, 1], [], []>} : vector<8x48xbf16>, vector<48x24xbf16>, vector<8x24xf32> -> vector<8x24xf32>
    %3 = arith.truncf %2 : vector<8x24xf32> to vector<8x24xbf16>
    %c0_3 = arith.constant 0 : index
    %c0_4 = arith.constant 0 : index
    %4 = vector.load %arg3[%c0_3, %c0_4] : memref<8x24xbf16, #tpu.memory_space<vmem>>, vector<8x24xbf16>
    tpu.vector_store %arg3[%c0_3, %c0_4], %3 {strides = array<i32>} : memref<8x24xbf16, #tpu.memory_space<vmem>>, vector<8x24xbf16>,
    return
  }
  func.func @transform_0(%arg0: i32) -> (i32, i32) {
    %c0_i32 = arith.constant 0 : i32
    %c0_i32_0 = arith.constant 0 : i32
    return %arg0, %c0_i32 : i32, i32
  }
  func.func @transform_1(%arg0: i32) -> (i32, i32) {
    %c0_i32 = arith.constant 0 : i32
    %c0_i32_0 = arith.constant 0 : i32
    %c0_i32_1 = arith.constant 0 : i32
    return %c0_i32, %c0_i32_0 : i32, i32
  }
  func.func @transform_2(%arg0: i32) -> (i32, i32) {
    %c0_i32 = arith.constant 0 : i32
    %c0_i32_0 = arith.constant 0 : i32
    return %arg0, %c0_i32 : i32, i32
  }
}

module attributes {stable_mosaic.version = 11 : i64} {
  func.func @_mm_kernel(%arg0: i32, %arg1: memref<8x40xbf16, #tpu.memory_space<vmem>>, %arg2: memref<1x40xf32, #tpu.memory_space<vmem>>, %arg3: memref<1x40xf32, #tpu.memory_space<vmem>>, %arg4: memref<40x32xbf16, #tpu.memory_space<vmem>>, %arg5: memref<1x32xf32, #tpu.memory_space<vmem>>, %arg6: memref<1x32xf32, #tpu.memory_space<vmem>>, %arg7: memref<8x32xbf16, #tpu.memory_space<vmem>>) attributes {dimension_semantics = [#tpu.dimension_semantics<parallel>], iteration_bounds = array<i64: 1>, scalar_prefetch = 0 : i64, scratch_operands = 0 : i64, tpu.core_type = #tpu.core_type<tc>, window_params = [{transform_indices = @transform_0, window_bounds = array<i64: 8, 40>}, {pipeline_mode = #tpu.pipeline_mode<synchronous>, transform_indices = @transform_1, window_bounds = array<i64: 1, 40>}, {pipeline_mode = #tpu.pipeline_mode<synchronous>, transform_indices = @transform_2, window_bounds = array<i64: 1, 40>}, {pipeline_mode = #tpu.pipeline_mode<synchronous>, transform_indices = @transform_3, window_bounds = array<i64: 40, 32>}, {pipeline_mode = #tpu.pipeline_mode<synchronous>, transform_indices = @transform_4, window_bounds = array<i64: 1, 32>}, {pipeline_mode = #tpu.pipeline_mode<synchronous>, transform_indices = @transform_5, window_bounds = array<i64: 1, 32>}, {transform_indices = @transform_6, window_bounds = array<i64: 8, 32>}]} {
    %c0 = arith.constant 0 : index
    %c0_0 = arith.constant 0 : index
    %0 = vector.load %arg1[%c0, %c0_0] : memref<8x40xbf16, #tpu.memory_space<vmem>>, vector<8x40xbf16>
    %c0_1 = arith.constant 0 : index
    %c0_2 = arith.constant 0 : index
    %1 = vector.load %arg2[%c0_1, %c0_2] : memref<1x40xf32, #tpu.memory_space<vmem>>, vector<1x40xf32>
    %2 = arith.extf %0 : vector<8x40xbf16> to vector<8x40xf32>
    %3 = vector.broadcast %1 : vector<1x40xf32> to vector<8x40xf32>
    %4 = arith.mulf %2, %3 : vector<8x40xf32>
    %c0_3 = arith.constant 0 : index
    %c0_4 = arith.constant 0 : index
    %5 = vector.load %arg3[%c0_3, %c0_4] : memref<1x40xf32, #tpu.memory_space<vmem>>, vector<1x40xf32>
    %6 = vector.broadcast %5 : vector<1x40xf32> to vector<8x40xf32>
    %7 = arith.addf %4, %6 : vector<8x40xf32>
    %cst = arith.constant 0.000000e+00 : f32
    %8 = vector.broadcast %cst : f32 to vector<8x40xf32>
    %9 = arith.maximumf %7, %8 : vector<8x40xf32>
    %10 = arith.truncf %9 : vector<8x40xf32> to vector<8x40xbf16>
    %c0_5 = arith.constant 0 : index
    %c0_6 = arith.constant 0 : index
    %11 = vector.load %arg4[%c0_5, %c0_6] : memref<40x32xbf16, #tpu.memory_space<vmem>>, vector<40x32xbf16>
    %cst_7 = arith.constant dense<0.000000e+00> : vector<8x32xf32>
    %12 = tpu.matmul %10, %11, %cst_7 {dimension_numbers = #tpu.dot_dimension_numbers<[1], [0], [0], [1], [0, 0, 1, 1], [], []>} : vector<8x40xbf16>, vector<40x32xbf16>, vector<8x32xf32> -> vector<8x32xf32>
    %c0_8 = arith.constant 0 : index
    %c0_9 = arith.constant 0 : index
    %13 = vector.load %arg5[%c0_8, %c0_9] : memref<1x32xf32, #tpu.memory_space<vmem>>, vector<1x32xf32>
    %14 = vector.broadcast %13 : vector<1x32xf32> to vector<8x32xf32>
    %15 = arith.mulf %12, %14 : vector<8x32xf32>
    %c0_10 = arith.constant 0 : index
    %c0_11 = arith.constant 0 : index
    %16 = vector.load %arg6[%c0_10, %c0_11] : memref<1x32xf32, #tpu.memory_space<vmem>>, vector<1x32xf32>
    %17 = vector.broadcast %16 : vector<1x32xf32> to vector<8x32xf32>
    %18 = arith.addf %15, %17 : vector<8x32xf32>
    %cst_12 = arith.constant 0.000000e+00 : f32
    %19 = vector.broadcast %cst_12 : f32 to vector<8x32xf32>
    %20 = arith.maximumf %18, %19 : vector<8x32xf32>
    %21 = arith.truncf %20 : vector<8x32xf32> to vector<8x32xbf16>
    %c0_13 = arith.constant 0 : index
    %c0_14 = arith.constant 0 : index
    %22 = vector.load %arg7[%c0_13, %c0_14] : memref<8x32xbf16, #tpu.memory_space<vmem>>, vector<8x32xbf16>
    tpu.vector_store %arg7[%c0_13, %c0_14], %21 {strides = array<i32>} : memref<8x32xbf16, #tpu.memory_space<vmem>>, vector<8x32xbf16>,
    return
  }
  func.func @transform_0(%arg0: i32) -> (i32, i32) {
    %c0_i32 = arith.constant 0 : i32
    %c0_i32_0 = arith.constant 0 : i32
    return %arg0, %c0_i32 : i32, i32
  }
  func.func @transform_1(%arg0: i32) -> (i32, i32) {
    %c0_i32 = arith.constant 0 : i32
    %c0_i32_0 = arith.constant 0 : i32
    %c0_i32_1 = arith.constant 0 : i32
    return %c0_i32, %c0_i32_0 : i32, i32
  }
  func.func @transform_2(%arg0: i32) -> (i32, i32) {
    %c0_i32 = arith.constant 0 : i32
    %c0_i32_0 = arith.constant 0 : i32
    %c0_i32_1 = arith.constant 0 : i32
    return %c0_i32, %c0_i32_0 : i32, i32
  }
  func.func @transform_3(%arg0: i32) -> (i32, i32) {
    %c0_i32 = arith.constant 0 : i32
    %c0_i32_0 = arith.constant 0 : i32
    %c0_i32_1 = arith.constant 0 : i32
    return %c0_i32, %c0_i32_0 : i32, i32
  }
  func.func @transform_4(%arg0: i32) -> (i32, i32) {
    %c0_i32 = arith.constant 0 : i32
    %c0_i32_0 = arith.constant 0 : i32
    %c0_i32_1 = arith.constant 0 : i32
    return %c0_i32, %c0_i32_0 : i32, i32
  }
  func.func @transform_5(%arg0: i32) -> (i32, i32) {
    %c0_i32 = arith.constant 0 : i32
    %c0_i32_0 = arith.constant 0 : i32
    %c0_i32_1 = arith.constant 0 : i32
    return %c0_i32, %c0_i32_0 : i32, i32
  }
  func.func @transform_6(%arg0: i32) -> (i32, i32) {
    %c0_i32 = arith.constant 0 : i32
    %c0_i32_0 = arith.constant 0 : i32
    return %arg0, %c0_i32 : i32, i32
  }
}

module attributes {stable_mosaic.version = 11 : i64} {
  func.func @_conv3x3_kernel(%arg0: i32, %arg1: memref<1x5x8x32xbf16, #tpu.memory_space<vmem>>, %arg2: memref<3x32x24xbf16, #tpu.memory_space<vmem>>, %arg3: memref<1x2x2x8xbf16, #tpu.memory_space<vmem>>) attributes {dimension_semantics = [#tpu.dimension_semantics<parallel>], iteration_bounds = array<i64: 2>, scalar_prefetch = 0 : i64, scratch_operands = 0 : i64, tpu.core_type = #tpu.core_type<tc>, window_params = [{transform_indices = @transform_0, window_bounds = array<i64: 1, 5, 8, 32>}, {pipeline_mode = #tpu.pipeline_mode<synchronous>, transform_indices = @transform_1, window_bounds = array<i64: 3, 32, 24>}, {transform_indices = @transform_2, window_bounds = array<i64: 1, 2, 2, 8>}]} {
    %c0 = arith.constant 0 : index
    %c0_0 = arith.constant 0 : index
    %c0_1 = arith.constant 0 : index
    %c0_2 = arith.constant 0 : index
    %0 = vector.load %arg1[%c0, %c0_0, %c0_1, %c0_2] : memref<1x5x8x32xbf16, #tpu.memory_space<vmem>>, vector<1x5x8x32xbf16>
    %1 = vector.shape_cast %0 : vector<1x5x8x32xbf16> to vector<5x8x32xbf16>
    %2 = vector.shape_cast %1 : vector<5x8x32xbf16> to vector<40x32xbf16>
    %3 = vector.extract_strided_slice %2 {offsets = [0, 0], sizes = [32, 32], strides = [1, 1]} : vector<40x32xbf16> to vector<32x32xbf16>
    %c0_3 = arith.constant 0 : index
    %c0_4 = arith.constant 0 : index
    %c0_5 = arith.constant 0 : index
    %4 = vector.load %arg2[%c0_3, %c0_4, %c0_5] : memref<3x32x24xbf16, #tpu.memory_space<vmem>>, vector<1x32x24xbf16>
    %5 = vector.shape_cast %4 : vector<1x32x24xbf16> to vector<32x24xbf16>
    %cst = arith.constant dense<0.000000e+00> : vector<32x24xf32>
    %6 = tpu.matmul %3, %5, %cst {dimension_numbers = #tpu.dot_dimension_numbers<[1], [0], [0], [1], [0, 0, 1, 1], [], []>} : vector<32x32xbf16>, vector<32x24xbf16>, vector<32x24xf32> -> vector<32x24xf32>
    %7 = vector.shape_cast %6 : vector<32x24xf32> to vector<4x8x24xf32>
    %8 = vector.extract_strided_slice %7 {offsets = [0, 0, 0], sizes = [2, 8, 8], strides = [1, 1, 1]} : vector<4x8x24xf32> to vector<2x8x8xf32>
    %9 = vector.extract_strided_slice %7 {offsets = [1, 0, 8], sizes = [2, 8, 8], strides = [1, 1, 1]} : vector<4x8x24xf32> to vector<2x8x8xf32>
    %10 = arith.addf %8, %9 : vector<2x8x8xf32>
    %11 = vector.extract_strided_slice %7 {offsets = [2, 0, 16], sizes = [2, 8, 8], strides = [1, 1, 1]} : vector<4x8x24xf32> to vector<2x8x8xf32>
    %12 = arith.addf %10, %11 : vector<2x8x8xf32>
    %13 = vector.extract_strided_slice %2 {offsets = [1, 0], sizes = [32, 32], strides = [1, 1]} : vector<40x32xbf16> to vector<32x32xbf16>
    %c1 = arith.constant 1 : index
    %c0_6 = arith.constant 0 : index
    %c0_7 = arith.constant 0 : index
    %14 = vector.load %arg2[%c1, %c0_6, %c0_7] : memref<3x32x24xbf16, #tpu.memory_space<vmem>>, vector<1x32x24xbf16>
    %15 = vector.shape_cast %14 : vector<1x32x24xbf16> to vector<32x24xbf16>
    %cst_8 = arith.constant dense<0.000000e+00> : vector<32x24xf32>
    %16 = tpu.matmul %13, %15, %cst_8 {dimension_numbers = #tpu.dot_dimension_numbers<[1], [0], [0], [1], [0, 0, 1, 1], [], []>} : vector<32x32xbf16>, vector<32x24xbf16>, vector<32x24xf32> -> vector<32x24xf32>
    %17 = vector.shape_cast %16 : vector<32x24xf32> to vector<4x8x24xf32>
    %18 = vector.extract_strided_slice %17 {offsets = [0, 0, 0], sizes = [2, 8, 8], strides = [1, 1, 1]} : vector<4x8x24xf32> to vector<2x8x8xf32>
    %19 = arith.addf %12, %18 : vector<2x8x8xf32>
    %20 = vector.extract_strided_slice %17 {offsets = [1, 0, 8], sizes = [2, 8, 8], strides = [1, 1, 1]} : vector<4x8x24xf32> to vector<2x8x8xf32>
    %21 = arith.addf %19, %20 : vector<2x8x8xf32>
    %22 = vector.extract_strided_slice %17 {offsets = [2, 0, 16], sizes = [2, 8, 8], strides = [1, 1, 1]} : vector<4x8x24xf32> to vector<2x8x8xf32>
    %23 = arith.addf %21, %22 : vector<2x8x8xf32>
    %24 = vector.extract_strided_slice %2 {offsets = [2, 0], sizes = [32, 32], strides = [1, 1]} : vector<40x32xbf16> to vector<32x32xbf16>
    %c2 = arith.constant 2 : index
    %c0_9 = arith.constant 0 : index
    %c0_10 = arith.constant 0 : index
    %25 = vector.load %arg2[%c2, %c0_9, %c0_10] : memref<3x32x24xbf16, #tpu.memory_space<vmem>>, vector<1x32x24xbf16>
    %26 = vector.shape_cast %25 : vector<1x32x24xbf16> to vector<32x24xbf16>
    %cst_11 = arith.constant dense<0.000000e+00> : vector<32x24xf32>
    %27 = tpu.matmul %24, %26, %cst_11 {dimension_numbers = #tpu.dot_dimension_numbers<[1], [0], [0], [1], [0, 0, 1, 1], [], []>} : vector<32x32xbf16>, vector<32x24xbf16>, vector<32x24xf32> -> vector<32x24xf32>
    %28 = vector.shape_cast %27 : vector<32x24xf32> to vector<4x8x24xf32>
    %29 = vector.extract_strided_slice %28 {offsets = [0, 0, 0], sizes = [2, 8, 8], strides = [1, 1, 1]} : vector<4x8x24xf32> to vector<2x8x8xf32>
    %30 = arith.addf %23, %29 : vector<2x8x8xf32>
    %31 = vector.extract_strided_slice %28 {offsets = [1, 0, 8], sizes = [2, 8, 8], strides = [1, 1, 1]} : vector<4x8x24xf32> to vector<2x8x8xf32>
    %32 = arith.addf %30, %31 : vector<2x8x8xf32>
    %33 = vector.extract_strided_slice %28 {offsets = [2, 0, 16], sizes = [2, 8, 8], strides = [1, 1, 1]} : vector<4x8x24xf32> to vector<2x8x8xf32>
    %34 = arith.addf %32, %33 : vector<2x8x8xf32>
    %35 = vector.extract_strided_slice %34 {offsets = [0, 0, 0], sizes = [2, 2, 8], strides = [1, 1, 1]} : vector<2x8x8xf32> to vector<2x2x8xf32>
    %36 = arith.truncf %35 : vector<2x2x8xf32> to vector<2x2x8xbf16>
    %c0_12 = arith.constant 0 : index
    %c0_13 = arith.constant 0 : index
    %c0_14 = arith.constant 0 : index
    %c0_15 = arith.constant 0 : index
    %37 = vector.load %arg3[%c0_12, %c0_13, %c0_14, %c0_15] : memref<1x2x2x8xbf16, #tpu.memory_space<vmem>>, vector<1x2x2x8xbf16>
    %38 = vector.shape_cast %37 : vector<1x2x2x8xbf16> to vector<2x2x8xbf16>
    %39 = vector.shape_cast %36 : vector<2x2x8xbf16> to vector<1x2x2x8xbf16>
    tpu.vector_store %arg3[%c0_12, %c0_13, %c0_14, %c0_15], %39 {strides = array<i32>} : memref<1x2x2x8xbf16, #tpu.memory_space<vmem>>, vector<1x2x2x8xbf16>,
    return
  }
  func.func @transform_0(%arg0: i32) -> (i32, i32, i32, i32) {
    %c0_i32 = arith.constant 0 : i32
    %c0_i32_0 = arith.constant 0 : i32
    %c0_i32_1 = arith.constant 0 : i32
    %c0_i32_2 = arith.constant 0 : i32
    return %arg0, %c0_i32, %c0_i32_0, %c0_i32_1 : i32, i32, i32, i32
  }
  func.func @transform_1(%arg0: i32) -> (i32, i32, i32) {
    %c0_i32 = arith.constant 0 : i32
    %c0_i32_0 = arith.constant 0 : i32
    %c0_i32_1 = arith.constant 0 : i32
    %c0_i32_2 = arith.constant 0 : i32
    return %c0_i32, %c0_i32_0, %c0_i32_1 : i32, i32, i32
  }
  func.func @transform_2(%arg0: i32) -> (i32, i32, i32, i32) {
    %c0_i32 = arith.constant 0 : i32
    %c0_i32_0 = arith.constant 0 : i32
    %c0_i32_1 = arith.constant 0 : i32
    %c0_i32_2 = arith.constant 0 : i32
    return %arg0, %c0_i32, %c0_i32_0, %c0_i32_1 : i32, i32, i32, i32
  }
}

module attributes {stable_mosaic.version = 11 : i64} {
  func.func @_head_kernel(%arg0: memref<2x4x40xbf16, #tpu.memory_space<vmem>>, %arg1: memref<1x1x40xf32, #tpu.memory_space<vmem>>, %arg2: memref<1x1x40xf32, #tpu.memory_space<vmem>>, %arg3: memref<40x1000xbf16, #tpu.memory_space<vmem>>, %arg4: memref<1x1000xf32, #tpu.memory_space<vmem>>, %arg5: memref<1000x4xbf16, #tpu.memory_space<vmem>>, %arg6: memref<1x4xf32, #tpu.memory_space<vmem>>, %arg7: memref<2x4xf32, #tpu.memory_space<vmem>>) attributes {dimension_semantics = [], scalar_prefetch = 0 : i64, scratch_operands = 0 : i64, tpu.core_type = #tpu.core_type<tc>} {
    %c0 = arith.constant 0 : index
    %c0_0 = arith.constant 0 : index
    %c0_1 = arith.constant 0 : index
    %0 = vector.load %arg0[%c0, %c0_0, %c0_1] : memref<2x4x40xbf16, #tpu.memory_space<vmem>>, vector<2x4x40xbf16>
    %1 = arith.extf %0 : vector<2x4x40xbf16> to vector<2x4x40xf32>
    %c0_2 = arith.constant 0 : index
    %c0_3 = arith.constant 0 : index
    %c0_4 = arith.constant 0 : index
    %2 = vector.load %arg1[%c0_2, %c0_3, %c0_4] : memref<1x1x40xf32, #tpu.memory_space<vmem>>, vector<1x1x40xf32>
    %3 = vector.broadcast %2 : vector<1x1x40xf32> to vector<2x4x40xf32>
    %4 = arith.mulf %1, %3 : vector<2x4x40xf32>
    %c0_5 = arith.constant 0 : index
    %c0_6 = arith.constant 0 : index
    %c0_7 = arith.constant 0 : index
    %5 = vector.load %arg2[%c0_5, %c0_6, %c0_7] : memref<1x1x40xf32, #tpu.memory_space<vmem>>, vector<1x1x40xf32>
    %6 = vector.broadcast %5 : vector<1x1x40xf32> to vector<2x4x40xf32>
    %7 = arith.addf %4, %6 : vector<2x4x40xf32>
    %cst = arith.constant 0.000000e+00 : f32
    %8 = vector.broadcast %cst : f32 to vector<2x4x40xf32>
    %9 = arith.maximumf %7, %8 : vector<2x4x40xf32>
    %cst_8 = arith.constant dense<0.000000e+00> : vector<2x40xf32>
    %10 = vector.multi_reduction <add>, %9, %cst_8 [1] : vector<2x4x40xf32> to vector<2x40xf32>
    %cst_9 = arith.constant 4.000000e+00 : f32
    %11 = vector.broadcast %cst_9 : f32 to vector<2x40xf32>
    %12 = arith.divf %10, %11 : vector<2x40xf32>
    %13 = arith.truncf %12 : vector<2x40xf32> to vector<2x40xbf16>
    %c0_10 = arith.constant 0 : index
    %c0_11 = arith.constant 0 : index
    %14 = vector.load %arg3[%c0_10, %c0_11] : memref<40x1000xbf16, #tpu.memory_space<vmem>>, vector<40x1000xbf16>
    %cst_12 = arith.constant dense<0.000000e+00> : vector<2x1000xf32>
    %15 = tpu.matmul %13, %14, %cst_12 {dimension_numbers = #tpu.dot_dimension_numbers<[1], [0], [0], [1], [0, 0, 1, 1], [], []>} : vector<2x40xbf16>, vector<40x1000xbf16>, vector<2x1000xf32> -> vector<2x1000xf32>
    %c0_13 = arith.constant 0 : index
    %c0_14 = arith.constant 0 : index
    %16 = vector.load %arg4[%c0_13, %c0_14] : memref<1x1000xf32, #tpu.memory_space<vmem>>, vector<1x1000xf32>
    %17 = vector.broadcast %16 : vector<1x1000xf32> to vector<2x1000xf32>
    %18 = arith.addf %15, %17 : vector<2x1000xf32>
    %19 = arith.truncf %18 : vector<2x1000xf32> to vector<2x1000xbf16>
    %c0_15 = arith.constant 0 : index
    %c0_16 = arith.constant 0 : index
    %20 = vector.load %arg5[%c0_15, %c0_16] : memref<1000x4xbf16, #tpu.memory_space<vmem>>, vector<1000x4xbf16>
    %cst_17 = arith.constant dense<0.000000e+00> : vector<2x4xf32>
    %21 = tpu.matmul %19, %20, %cst_17 {dimension_numbers = #tpu.dot_dimension_numbers<[1], [0], [0], [1], [0, 0, 1, 1], [], []>} : vector<2x1000xbf16>, vector<1000x4xbf16>, vector<2x4xf32> -> vector<2x4xf32>
    %c0_18 = arith.constant 0 : index
    %c0_19 = arith.constant 0 : index
    %22 = vector.load %arg6[%c0_18, %c0_19] : memref<1x4xf32, #tpu.memory_space<vmem>>, vector<1x4xf32>
    %23 = vector.broadcast %22 : vector<1x4xf32> to vector<2x4xf32>
    %24 = arith.addf %21, %23 : vector<2x4xf32>
    %c0_20 = arith.constant 0 : index
    %c0_21 = arith.constant 0 : index
    %25 = vector.load %arg7[%c0_20, %c0_21] : memref<2x4xf32, #tpu.memory_space<vmem>>, vector<2x4xf32>
    tpu.vector_store %arg7[%c0_20, %c0_21], %24 {strides = array<i32>} : memref<2x4xf32, #tpu.memory_space<vmem>>, vector<2x4xf32>,
    return
  }
}

</mosaic_0001>

<bundles_post_ra>
// kernel: forward.30
= control target key start
LH: loop header
LB: loop body
LE: loop exit
PB: predicated region body
PF: predicated region fallthrough
CT: control target
= control target key end

     0   :  { %s1051_s6 = smov 0   ;;  %s1805_s0 = inlined_call_operand.vmem [shape: bf16[2,17,2,17,32], index: 0, kind: input, shape index: {}]   ;;  %s1806_s1 = inlined_call_operand.vmem [shape: bf16[2,16,16,16], index: 1, kind: output, shape index: {}]  }
   0x1 LB: > { %s1011_s7 = sadd.s32 4294967295, %s1038_s6   ;;  %p1015_p0 = scmp.ge.s32.totalorder %s1038_s6, 1  ;;  %s1038_s6 = sphi %s1051_s6, %s11_s6  }
   0x2   : > { %p87_p1 = scmp.lt.s32.totalorder %s1038_s6, 3 }
   0x4   : > { %p88_p2 = pnand %p1015_p0, %p87_p1 }
   0x6   : > { %91 = sbr.rel (%p88_p2) target bundleno = 205 (0xcd), region = 24 }
   0xd   : > { %p107_p3 = scmp.lt.s32.totalorder %s1011_s7, 1  ;;  %s1040_s12 = smov 112   ;;  %vm472_vm0 = vsmask.f32 3328  ;;  %vm473_vm1 = vsmask.f32 7440 }
   0xe   : > { %vm1285_vm2 = vmor %vm472_vm0, %vm473_vm1  ;;  %vm923_vm3 = vcmask 125952  }
   0xf   : > { %s1884_s7 = smov (!%p107_p3, %s1011_s7), 1 }
  0x10   : > { %s1022_s8 = smul.u32 408, %s1884_s7  ;;  %s1021_s13 = sshll.u32 %s1884_s7, 7 }
  0x11   : > { %s1424_s16 = scalar_lea.vmem %s1806_s1, %s1021_s13 }
  0x12   : > { %s1065_s11 = scalar_lea.vmem %s1805_s0, %s1022_s8 }
  0x13   : > { %v123_v0 = vld [vmem:[%s1065_s11 + $0x18] sm:$0xf]  ;;  %v126_v1 = vld [vmem:[%s1065_s11 + $0x24] sm:$0xf]  ;;  %v129_v2 = vld [vmem:[%s1065_s11 + $0x30] sm:$0xf] }
  0x14   : > { %v219_v3 = vmax.bf16 %v126_v1, %v123_v0  ;;  %v117_v4 = vld [vmem:[%s1065_s11] sm:$0xf]  ;;  %v120_v5 = vld [vmem:[%s1065_s11 + $0xc] sm:$0xf]  ;;  %v124_v6 = vld [vmem:[%s1065_s11 + $0x1c] sm:$0xf] }
  0x15   : > { %v216_v7 = vmax.bf16 %v120_v5, %v117_v4  ;;  %v127_v8 = vld [vmem:[%s1065_s11 + $0x28] sm:$0xf]  ;;  %v130_v9 = vld [vmem:[%s1065_s11 + $0x34] sm:$0xf]  ;;  %v118_v10 = vld [vmem:[%s1065_s11 + $0x4] sm:$0xf] }
  0x16   : > { %v1076_v11 = vmax.bf16 %v219_v3, %v129_v2  ;;  %v220_v12 = vmax.bf16 %v127_v8, %v124_v6  ;;  %v121_v13 = vld [vmem:[%s1065_s11 + $0x10] sm:$0xf]  ;;  %v133_v14 = vld [vmem:[%s1065_s11 + $0x40] sm:$0xf]  ;;  %v132_v17 = vld [vmem:[%s1065_s11 + $0x3c] sm:$0xf] }
  0x17   : > { %v1080_v15 = vmax.bf16 %v216_v7, %v123_v0  ;;  %v217_v16 = vmax.bf16 %v121_v13, %v118_v10  ;;  %v223_v19 = vmax.bf16 %v133_v14, %v130_v9  ;;  %v136_v21 = vld [vmem:[%s1065_s11 + $0x4c] sm:$0xf]  ;;  %v222_v22 = vmax.bf16 %v132_v17, %v129_v2  ;;  %v139_v23 = vld [vmem:[%s1065_s11 + $0x58] sm:$0xf]  ;;  %v135_v24 = vld [vmem:[%s1065_s11 + $0x48] sm:$0xf] }
  0x18   : > { %348 = vrot.lane.b32.xlu1 %v1076_v11, %s1040_s12  ;;  %v1085_v18 = vmax.bf16 %v220_v12, %v130_v9  ;;  %v138_v25 = vld [vmem:[%s1065_s11 + $0x54] sm:$0xf]  ;;  %v226_v27 = vmax.bf16 %v139_v23, %v136_v21  ;;  %v142_v29 = vld [vmem:[%s1065_s11 + $0x64] sm:$0xf]  ;;  %v145_v31 = vld [vmem:[%s1065_s11 + $0x70] sm:$0xf] }
  0x19   : > { %344 = vrot.lane.b32.xlu0 %v1080_v15, %s1040_s12  ;;  %v1089_v20 = vmax.bf16 %v217_v16, %v124_v6  ;;  %v1097_v26 = vmax.bf16 %v223_v19, %v136_v21  ;;  %v1101_v28 = vmax.bf16 %v222_v22, %v135_v24  ;;  %v225_v30 = vmax.bf16 %v138_v25, %v135_v24  ;;  %v141_v32 = vld [vmem:[%s1065_s11 + $0x60] sm:$0xf]  ;;  %v144_v33 = vld [vmem:[%s1065_s11 + $0x6c] sm:$0xf]  ;;  %v148_v37 = vld [vmem:[%s1065_s11 + $0x7c] sm:$0xf] }
  0x1a   : > { %v1109_v34 = vmax.bf16 %v226_v27, %v142_v29  ;;  %v229_v35 = vmax.bf16 %v145_v31, %v142_v29  ;;  %v228_v38 = vmax.bf16 %v144_v33, %v141_v32  ;;  %v151_v39 = vld [vmem:[%s1065_s11 + $0x88] sm:$0xf]  ;;  %v147_v40 = vld [vmem:[%s1065_s11 + $0x78] sm:$0xf]  ;;  %v150_v41 = vld [vmem:[%s1065_s11 + $0x84] sm:$0xf] }
  0x1b   : > { %v1113_v36 = vmax.bf16 %v225_v30, %v141_v32  ;;  %v232_v43 = vmax.bf16 %v151_v39, %v148_v37  ;;  %v154_v45 = vld [vmem:[%s1065_s11 + $0x94] sm:$0xf]  ;;  %v231_v46 = vmax.bf16 %v150_v41, %v147_v40  ;;  %v157_v47 = vld [vmem:[%s1065_s11 + $0xa0] sm:$0xf]  ;;  %v153_v48 = vld [vmem:[%s1065_s11 + $0x90] sm:$0xf] }
  0x1c   : > { %350 = vrot.lane.b32.xlu1 %v1085_v18, %s1040_s12  ;;  %v1121_v42 = vmax.bf16 %v229_v35, %v148_v37  ;;  %v1125_v44 = vmax.bf16 %v228_v38, %v147_v40  ;;  %v156_v49 = vld [vmem:[%s1065_s11 + $0x9c] sm:$0xf]  ;;  %v235_v51 = vmax.bf16 %v157_v47, %v154_v45  ;;  %v160_v53 = vld [vmem:[%s1065_s11 + $0xac] sm:$0xf]  ;;  %v163_v55 = vld [vmem:[%s1065_s11 + $0xb8] sm:$0xf] }
  0x1d   : > { %346 = vrot.lane.b32.xlu0 %v1089_v20, %s1040_s12  ;;  %v1133_v50 = vmax.bf16 %v232_v43, %v154_v45  ;;  %v1137_v52 = vmax.bf16 %v231_v46, %v153_v48  ;;  %v234_v54 = vmax.bf16 %v156_v49, %v153_v48  ;;  %v159_v56 = vld [vmem:[%s1065_s11 + $0xa8] sm:$0xf]  ;;  %v162_v57 = vld [vmem:[%s1065_s11 + $0xb4] sm:$0xf]  ;;  %v238_v59 = vmax.bf16 %v163_v55, %v160_v53  ;;  %v166_v61 = vld [vmem:[%s1065_s11 + $0xc4] sm:$0xf] }
  0x1e   : > { %v1145_v58 = vmax.bf16 %v235_v51, %v160_v53  ;;  %v237_v62 = vmax.bf16 %v162_v57, %v159_v56  ;;  %v169_v63 = vld [vmem:[%s1065_s11 + $0xd0] sm:$0xf]  ;;  %v165_v0 = vld [vmem:[%s1065_s11 + $0xc0] sm:$0xf]  ;;  %v168_v1 = vld [vmem:[%s1065_s11 + $0xcc] sm:$0xf] }
  0x1f   : > { %1835 = vst [vmem:[#allocation2_spill] sm:$0xff] %v1133_v50  ;;  %1836 = vst [vmem:[#allocation3_spill] sm:$0xff] %v1137_v52  ;;  %v1149_v60 = vmax.bf16 %v234_v54, %v159_v56  ;;  %v1157_v2 = vmax.bf16 %v238_v59, %v166_v61  ;;  %v241_v3 = vmax.bf16 %v169_v63, %v166_v61  ;;  %v172_v5 = vld [vmem:[%s1065_s11 + $0xdc] sm:$0xf]  ;;  %v175_v7 = vld [vmem:[%s1065_s11 + $0xe8] sm:$0xf] }
  0x20   : > { %354 = vrot.lane.b32.xlu1 %v1097_v26, %s1040_s12  ;;  %1837 = vst [vmem:[#allocation4_spill] sm:$0xff] %v1145_v58  ;;  %v1161_v4 = vmax.bf16 %v237_v62, %v165_v0  ;;  %v240_v6 = vmax.bf16 %v168_v1, %v165_v0  ;;  %v171_v8 = vld [vmem:[%s1065_s11 + $0xd8] sm:$0xf]  ;;  %v174_v9 = vld [vmem:[%s1065_s11 + $0xe4] sm:$0xf]  ;;  %v244_v12 = vmax.bf16 %v175_v7, %v172_v5 }
  0x21   : > { %352 = vrot.lane.b32.xlu0 %v1101_v28, %s1040_s12  ;;  %1838 = vst [vmem:[#allocation5_spill] sm:$0xff] %v1149_v60  ;;  %1839 = vst [vmem:[#allocation6_spill] sm:$0xff] %v1157_v2  ;;  %v1169_v10 = vmax.bf16 %v241_v3, %v172_v5  ;;  %v178_v14 = vld [vmem:[%s1065_s11 + $0xf4] sm:$0xf]  ;;  %v243_v16 = vmax.bf16 %v174_v9, %v171_v8  ;;  %v181_v17 = vld [vmem:[%s1065_s11 + $0x100] sm:$0xf] }
  0x22   : > { %1840 = vst [vmem:[#allocation7_spill] sm:$0xff] %v1161_v4  ;;  %v1173_v13 = vmax.bf16 %v240_v6, %v171_v8  ;;  %v177_v19 = vld [vmem:[%s1065_s11 + $0xf0] sm:$0xf]  ;;  %v180_v21 = vld [vmem:[%s1065_s11 + $0xfc] sm:$0xf]  ;;  %v1181_v22 = vmax.bf16 %v244_v12, %v178_v14  ;;  %v247_v23 = vmax.bf16 %v181_v17, %v178_v14 }
  0x23   : > { %v1185_v24 = vmax.bf16 %v243_v16, %v177_v19  ;;  %v184_v25 = vld [vmem:[%s1065_s11 + $0x10c] sm:$0xf]  ;;  %v246_v27 = vmax.bf16 %v180_v21, %v177_v19  ;;  %v187_v29 = vld [vmem:[%s1065_s11 + $0x118] sm:$0xf]  ;;  %v183_v30 = vld [vmem:[%s1065_s11 + $0x108] sm:$0xf] }
  0x24   : > { %358 = vrot.lane.b32.xlu1 %v1109_v34, %s1040_s12  ;;  %v186_v31 = vld [vmem:[%s1065_s11 + $0x114] sm:$0xf]  ;;  %v1193_v32 = vmax.bf16 %v247_v23, %v184_v25  ;;  %v250_v33 = vmax.bf16 %v187_v29, %v184_v25  ;;  %v190_v37 = vld [vmem:[%s1065_s11 + $0x124] sm:$0xf]  ;;  %v193_v39 = vld [vmem:[%s1065_s11 + $0x130] sm:$0xf] }
  0x25   : > { %356 = vrot.lane.b32.xlu0 %v1113_v36, %s1040_s12  ;;  %v1197_v35 = vmax.bf16 %v246_v27, %v183_v30  ;;  %v249_v38 = vmax.bf16 %v186_v31, %v183_v30  ;;  %v189_v40 = vld [vmem:[%s1065_s11 + $0x120] sm:$0xf]  ;;  %v192_v41 = vld [vmem:[%s1065_s11 + $0x12c] sm:$0xf]  ;;  %v253_v45 = vmax.bf16 %v193_v39, %v190_v37  ;;  %v196_v47 = vld [vmem:[%s1065_s11 + $0x13c] sm:$0xf] }
  0x26   : > { %v1205_v43 = vmax.bf16 %v250_v33, %v190_v37  ;;  %v252_v48 = vmax.bf16 %v192_v41, %v189_v40  ;;  %v199_v49 = vld [vmem:[%s1065_s11 + $0x148] sm:$0xf]  ;;  %v195_v51 = vld [vmem:[%s1065_s11 + $0x138] sm:$0xf]  ;;  %v198_v53 = vld [vmem:[%s1065_s11 + $0x144] sm:$0xf] }
  0x27   : > { %v1209_v46 = vmax.bf16 %v249_v38, %v189_v40  ;;  %v1217_v54 = vmax.bf16 %v253_v45, %v196_v47  ;;  %v256_v55 = vmax.bf16 %v199_v49, %v196_v47  ;;  %v202_v57 = vld [vmem:[%s1065_s11 + $0x154] sm:$0xf]  ;;  %v255_v59 = vmax.bf16 %v198_v53, %v195_v51  ;;  %v205_v61 = vld [vmem:[%s1065_s11 + $0x160] sm:$0xf]  ;;  %v201_v62 = vld [vmem:[%s1065_s11 + $0x150] sm:$0xf] }
  0x28   : > { %362 = vrot.lane.b32.xlu1 %v1121_v42, %s1040_s12  ;;  %1841 = vst [vmem:[#allocation8_spill] sm:$0xff] %v1205_v43  ;;  %v1221_v56 = vmax.bf16 %v252_v48, %v195_v51  ;;  %v204_v63 = vld [vmem:[%s1065_s11 + $0x15c] sm:$0xf]  ;;  %v259_v1 = vmax.bf16 %v205_v61, %v202_v57  ;;  %v208_v5 = vld [vmem:[%s1065_s11 + $0x16c] sm:$0xf]  ;;  %v500_v27 = vshrl.u32 %v1076_v11, 16 }
  0x29   : > { %360 = vrot.lane.b32.xlu0 %v1125_v44, %s1040_s12  ;;  %1842 = vst [vmem:[#allocation9_spill] sm:$0xff] %v1209_v46  ;;  %1843 = vst [vmem:[#allocation10_spill] sm:$0xff] %v1217_v54  ;;  %v1229_v0 = vmax.bf16 %v256_v55, %v202_v57  ;;  %v1233_v3 = vmax.bf16 %v255_v59, %v201_v62  ;;  %v258_v6 = vmax.bf16 %v204_v63, %v201_v62  ;;  %v211_v7 = vld [vmem:[%s1065_s11 + $0x178] sm:$0xf]  ;;  %v207_v8 = vld [vmem:[%s1065_s11 + $0x168] sm:$0xf] }
  0x2a   : > { %1844 = vst [vmem:[#allocation11_spill] sm:$0xff] %v1221_v56  ;;  %v210_v9 = vld [vmem:[%s1065_s11 + $0x174] sm:$0xf]  ;;  %v1241_v12 = vmax.bf16 %v259_v1, %v208_v5  ;;  %v262_v14 = vmax.bf16 %v211_v7, %v208_v5  ;;  %v214_v17 = vld [vmem:[%s1065_s11 + $0x184] sm:$0xf]  ;;  %v503_v29 = vshll.u32 %v1076_v11, 16 }
  0x2b   : > { %1845 = vst [vmem:[#allocation12_spill] sm:$0xff] %v1229_v0  ;;  %1846 = vst [vmem:[#allocation13_spill] sm:$0xff] %v1233_v3  ;;  %v1245_v16 = vmax.bf16 %v258_v6, %v207_v8  ;;  %v261_v19 = vmax.bf16 %v210_v9, %v207_v8  ;;  %v213_v21 = vld [vmem:[%s1065_s11 + $0x180] sm:$0xf]  ;;  %v128_v31 = vld [vmem:[%s1065_s11 + $0x2c] sm:$0x1] }
  0x2c   : > { %366 = vrot.lane.b32.xlu1 %v1133_v50, %s1040_s12  ;;  %1847 = vst [vmem:[#allocation14_spill] sm:$0xff] %v1241_v12  ;;  %v1251_v23 = vmax.bf16 %v262_v14, %v214_v17  ;;  %v125_v30 = vld [vmem:[%s1065_s11 + $0x20] sm:$0x1]  ;;  %v119_v33 = vld [vmem:[%s1065_s11 + $0x8] sm:$0x1]  ;;  %v502_v37 = vrot.slane %v500_v27, 4 }
  0x2d   : > { %364 = vrot.lane.b32.xlu0 %v1137_v52, %s1040_s12  ;;  %1848 = vst [vmem:[#allocation15_spill] sm:$0xff] %v1245_v16  ;;  %v1255_v25 = vmax.bf16 %v261_v19, %v213_v21  ;;  %v505_v38 = vrot.slane %v503_v29, 5  ;;  %v476_v39 = vshrl.u32 %v1080_v15, 16  ;;  %v479_v40 = vshll.u32 %v1080_v15, 16  ;;  %v122_v41 = vld [vmem:[%s1065_s11 + $0x14] sm:$0x1] }
  0x2e   : > { %1849 = vst [vmem:[#allocation16_spill] sm:$0xff] %v1251_v23  ;;  %v509_v45 = vshll.u32 %v1085_v18, 16  ;;  %v221_v47 = vmax.bf16 %v128_v31, %v125_v30  ;;  %v513_v48 = vshrl.u32 %v1085_v18, 16  ;;  %v131_v49 = vld [vmem:[%s1065_s11 + $0x38] sm:$0x1]  ;;  %v485_v53 = vshll.u32 %v1089_v20, 16 }
  0x2f   : > { %1850 = vst [vmem:[#allocation17_spill] sm:$0xff] %v1255_v25  ;;  %v134_v51 = vld [vmem:[%s1065_s11 + $0x44] sm:$0x1]  ;;  %v218_v55 = vmax.bf16 %v122_v41, %v119_v33  ;;  %v489_v57 = vshrl.u32 %v1089_v20, 16  ;;  %v506_v59 = vor.u32 %v505_v38, %v502_v37  ;;  %v478_v61 = vrot.slane %v476_v39, 4 }
  0x30   : > { %370 = vrot.lane.b32.xlu1 %v1145_v58, %s1040_s12  ;;  %v481_v62 = vrot.slane %v479_v40, 5  ;;  %v1275_v63 = vrot.slane %v509_v45, 5  ;;  %v269_v1 = vmax.bf16 %v221_v47, %v131_v49  ;;  %v515_v5 = vrot.slane %v513_v48, 4  ;;  %v137_v7 = vld [vmem:[%s1065_s11 + $0x50] sm:$0x1] }
  0x31   : > { %368 = vrot.lane.b32.xlu0 %v1149_v60, %s1040_s12  ;;  %v224_v6 = vmax.bf16 %v134_v51, %v131_v49  ;;  %v1278_v8 = vrot.slane %v485_v53, 5  ;;  %v266_v9 = vmax.bf16 %v218_v55, %v125_v30  ;;  %v491_v14 = vrot.slane %v489_v57, 4  ;;  %v140_v17 = vld [vmem:[%s1065_s11 + $0x5c] sm:$0x1]  ;;  %v146_v47 = vld [vmem:[%s1065_s11 + $0x74] sm:$0x1] }
  0x32   : > { %v1281_v19 = vrot.slane %v506_v59, 4  ;;  %v482_v21 = vor.u32 %v481_v62, %v478_v61  ;;  %v533_v27 = vshll.u32 %v1097_v26, 16  ;;  %v537_v29 = vshrl.u32 %v1097_v26, 16  ;;  %v143_v51 = vld [vmem:[%s1065_s11 + $0x68] sm:$0x1] }
  0x33   : > { %v516_v33 = vor.u32 %v515_v5, %v1275_v63  ;;  %v519_v37 = vshll.u32 %v269_v1, 16  ;;  %v272_v38 = vmax.bf16 %v224_v6, %v137_v7  ;;  %v524_v30 = vshrl.u32 %v1101_v28, 16 }
  0x34   : > { %374 = vrot.lane.b32.xlu1 %v1157_v2, %s1040_s12  ;;  %v527_v39 = vshll.u32 %v1101_v28, 16  ;;  %v227_v40 = vmax.bf16 %v140_v17, %v137_v7  ;;  %v557_v41 = vshll.u32 %v1109_v34, 16  ;;  %v561_v45 = vshrl.u32 %v1109_v34, 16 }
  0x35   : > { %372 = vrot.lane.b32.xlu0 %v1161_v4, %s1040_s12  ;;  %v492_v48 = vor.u32 %v491_v14, %v1278_v8  ;;  %v495_v49 = vshll.u32 %v266_v9, 16  ;;  %v548_v53 = vshrl.u32 %v1113_v36, 16  ;;  %v551_v55 = vshll.u32 %v1113_v36, 16 }
  0x36   : > { %v1303_v59 = vrot.slane %v482_v21, 4  ;;  %v1305_v61 = vrot.slane %v533_v27, 5  ;;  %v539_v62 = vrot.slane %v537_v29, 4  ;;  %v526_v1 = vrot.slane %v524_v30, 4 }
  0x37   : > { %v230_v5 = vmax.bf16 %v146_v47, %v143_v51  ;;  %v581_v6 = vshll.u32 %v1121_v42, 16  ;;  %v585_v7 = vshrl.u32 %v1121_v42, 16  ;;  %v529_v9 = vrot.slane %v527_v39, 5 }
  0x38   : > { %378 = vrot.lane.b32.xlu1 %v1169_v10, %s1040_s12  ;;  %v275_v14 = vmax.bf16 %v227_v40, %v143_v51  ;;  %v1309_v17 = vrot.slane %v557_v41, 5  ;;  %v553_v57 = vrot.slane %v551_v55, 5  ;;  %v572_v21 = vshrl.u32 %v1125_v44, 16 }
  0x39   : > { %376 = vrot.lane.b32.xlu0 %v1173_v13, %s1040_s12  ;;  %v575_v27 = vshll.u32 %v1125_v44, 16  ;;  %v1315_v29 = vrot.slane %v516_v33, 4  ;;  %v1317_v30 = vrot.slane %v519_v37, 5  ;;  %v1319_v47 = vrot.slane %v492_v48, 4  ;;  %v155_v37 = vld [vmem:[%s1065_s11 + $0x98] sm:$0x1] }
  0x3a   : > { %v543_v39 = vshll.u32 %v272_v38, 16  ;;  %v540_v40 = vor.u32 %v539_v62, %v1305_v61  ;;  %v587_v51 = vrot.slane %v585_v7, 4  ;;  %v574_v33 = vrot.slane %v572_v21, 4 }
  0x3b   : > { %v605_v48 = vshll.u32 %v1133_v50, 16  ;;  %v609_v38 = vshrl.u32 %v1133_v50, 16  ;;  %v596_v62 = vshrl.u32 %v1137_v52, 16 }
  0x3c   : > { %382 = vrot.lane.b32.xlu1 %v1181_v22, %s1040_s12 }
  0x3d   : > { %380 = vrot.lane.b32.xlu0 %v1185_v24, %s1040_s12 }
  0x40   : > { %386 = vrot.lane.b32.xlu1 %v1193_v32, %s1040_s12 }
  0x41   : > { %384 = vrot.lane.b32.xlu0 %v1197_v35, %s1040_s12 }
  0x44   : > { %390 = vrot.lane.b32.xlu1 %v1205_v43, %s1040_s12 }
  0x45   : > { %388 = vrot.lane.b32.xlu0 %v1209_v46, %s1040_s12  ;;  %v1327_v46 = vrot.slane %v495_v49, 5  ;;  %v1340_v49 = vrot.slane %v540_v40, 4 }
  0x48   : > { %394 = vrot.lane.b32.xlu1 %v1217_v54, %s1040_s12  ;;  %v577_v54 = vrot.slane %v575_v27, 5  ;;  %v1350_v27 = vrot.slane %v605_v48, 5 }
  0x49   : > { %392 = vrot.lane.b32.xlu0 %v1221_v56, %s1040_s12 }
  0x4a   : > { %v578_v21 = vor.u32 %v577_v54, %v574_v33  ;;  %v167_v54 = vld [vmem:[%s1065_s11 + $0xc8] sm:$0x1] }
  0x4c   : > { %398 = vrot.lane.b32.xlu1 %v1229_v0, %s1040_s12 }
  0x4d   : > { %396 = vrot.lane.b32.xlu0 %v1233_v3, %s1040_s12  ;;  %v567_v3 = vshll.u32 %v275_v14, 16 }
  0x50   : > { %402 = vrot.lane.b32.xlu1 %v1241_v12, %s1040_s12  ;;  %v152_v12 = vld [vmem:[%s1065_s11 + $0x8c] sm:$0x1] }
  0x51   : > { %400 = vrot.lane.b32.xlu0 %v1245_v16, %s1040_s12  ;;  %v550_v16 = vrot.slane %v548_v53, 4  ;;  %v530_v53 = vor.u32 %v529_v9, %v526_v1 }
  0x53   : > { %v554_v56 = vor.u32 %v553_v57, %v550_v16  ;;  %v158_v57 = vld [vmem:[%s1065_s11 + $0xa4] sm:$0x1]  ;;  %v1342_v1 = vrot.slane %v530_v53, 4  ;;  %v161_v53 = vld [vmem:[%s1065_s11 + $0xb0] sm:$0x1] }
  0x54   : > { %406 = vrot.lane.b32.xlu1 %v1251_v23, %s1040_s12  ;;  %v149_v23 = vld [vmem:[%s1065_s11 + $0x80] sm:$0x1] }
  0x55   : > { %404 = vrot.lane.b32.xlu0 %v1255_v25, %s1040_s12  ;;  %v563_v25 = vrot.slane %v561_v45, 4  ;;  %v278_v41 = vmax.bf16 %v230_v5, %v149_v23  ;;  %v1322_v45 = vrot.slane %v581_v6, 5  ;;  %v233_v0 = vmax.bf16 %v152_v12, %v149_v23 }
  0x56   : > { %v599_v5 = vshll.u32 %v1137_v52, 16  ;;  %v1336_v12 = vrot.slane %v543_v39, 5  ;;  %v1344_v6 = vrot.slane %v567_v3, 5  ;;  %v1348_v14 = vrot.slane %v554_v56, 4 }
  0x57   : > { %1853 = vst [vmem:[#allocation18_spill] sm:$0xff] %v1322_v45  ;;  %v564_v55 = vor.u32 %v563_v25, %v1309_v17  ;;  %v588_v16 = vor.u32 %v587_v51, %v1322_v45  ;;  %v591_v23 = vshll.u32 %v278_v41, 16  ;;  %v281_v7 = vmax.bf16 %v233_v0, %v155_v37 }
  0x58   : > { %v611_v39 = vrot.slane %v609_v38, 4  ;;  %v598_v25 = vrot.slane %v596_v62, 4  ;;  %v601_v51 = vrot.slane %v599_v5, 5  ;;  %v236_v41 = vmax.bf16 %v158_v57, %v155_v37  ;;  %v164_v5 = vld [vmem:[%s1065_s11 + $0xbc] sm:$0x1] }
  0x59   : > { %v1346_v9 = vrot.slane %v564_v55, 4  ;;  %v1352_v52 = vrot.slane %v588_v16, 4  ;;  %v1354_v40 = vrot.slane %v591_v23, 5  ;;  %v629_v3 = vshll.u32 %v1145_v58, 16  ;;  %v170_v37 = vld [vmem:[%s1065_s11 + $0xd4] sm:$0x1] }
  0x5a   : > { %v633_v0 = vshrl.u32 %v1145_v58, 16  ;;  %v615_v33 = vshll.u32 %v281_v7, 16  ;;  %v1383_v62 = vrot.slane %v578_v21, 4  ;;  %v612_v16 = vor.u32 %v611_v39, %v1350_v27  ;;  %v1413_v58 = vld [vmem:[%s1065_s11 + $0xe0] sm:$0x1] }
  0x5b   : > { %1854 = vst [vmem:[#allocation19_spill] sm:$0xff] %v1354_v40  ;;  %v602_v23 = vor.u32 %v601_v51, %v598_v25  ;;  %v284_v57 = vmax.bf16 %v236_v41, %v161_v53  ;;  %v620_v7 = vshrl.u32 %v1149_v60, 16  ;;  %v1393_v55 = vrot.slane %v629_v3, 5 }
  0x5c   : > { %v635_v56 = vrot.slane %v633_v0, 4  ;;  %v623_v21 = vshll.u32 %v1149_v60, 16  ;;  %v1396_v38 = vrot.slane %v615_v33, 5  ;;  %v239_v39 = vmax.bf16 %v164_v5, %v161_v53 }
  0x5d   : > { %v653_v25 = vshll.u32 %v1157_v2, 16  ;;  %v657_v51 = vshrl.u32 %v1157_v2, 16  ;;  %v644_v3 = vshrl.u32 %v1161_v4, 16  ;;  %v647_v0 = vshll.u32 %v1161_v4, 16 }
  0x5e   : > { %v242_v48 = vmax.bf16 %v170_v37, %v167_v54  ;;  %v1408_v60 = vrot.slane %v612_v16, 4  ;;  %v1410_v33 = vrot.slane %v602_v23, 4  ;;  %v639_v53 = vshll.u32 %v284_v57, 16 }
  0x5f   : > { %v622_v5 = vrot.slane %v620_v7, 4  ;;  %v636_v50 = vor.u32 %v635_v56, %v1393_v55  ;;  %v625_v43 = vrot.slane %v623_v21, 5  ;;  %v677_v40 = vshll.u32 %v1169_v10, 16 }
  0x60   : > { %v681_v41 = vshrl.u32 %v1169_v10, 16  ;;  %v287_v37 = vmax.bf16 %v239_v39, %v167_v54  ;;  %v1419_v16 = vrot.slane %v653_v25, 5  ;;  %v659_v23 = vrot.slane %v657_v51, 4 }
  0x61   : > { %v646_v57 = vrot.slane %v644_v3, 4  ;;  %v649_v7 = vrot.slane %v647_v0, 5  ;;  %v290_v21 = vmax.bf16 %v242_v48, %v1413_v58  ;;  %v1433_v54 = vrot.slane %v639_v53, 5 }
  0x62   : > { %v668_v39 = vshrl.u32 %v1173_v13, 16  ;;  %v671_v25 = vshll.u32 %v1173_v13, 16  ;;  %v1442_v51 = vrot.slane %v636_v50, 4  ;;  %v1444_v3 = vrot.slane %v677_v40, 5 }
  0x63   : > { %v618_v53 = vsel %vm1285_vm2, %v1408_v60, %v1396_v38  ;;  %v650_v40 = vor.u32 %v649_v7, %v646_v57  ;;  %v608_v57 = vsel %vm1285_vm2, %v1410_v33, %v1350_v27  ;;  %v197_v38 = vld [vmem:[%s1065_s11 + $0x140] sm:$0x1] }
  0x8a   : > { %v349_v2 = vpop.permute.xlu1 %348 }
  0x8b   : > { %v442_v45 = vmax.bf16 %v349_v2, %v1076_v11  ;;  %v345_v4 = vpop.permute.xlu0 %344  ;;  %v1855_v11 = vsel %vm1285_vm2, %v1281_v19, %v1275_v63  ;;  %v683_v63 = vrot.slane %v681_v41, 4  ;;  %v176_v19 = vld [vmem:[%s1065_s11 + $0xec] sm:$0x1]  ;;  %v687_v41 = vshll.u32 %v290_v21, 16 }
  0x8c   : > { %v440_v56 = vmax.bf16 %v345_v4, %v1080_v15  ;;  %v1856_v15 = vsel %vm1285_vm2, %v1303_v59, %v1278_v8  ;;  %v663_v8 = vshll.u32 %v287_v37, 16  ;;  %v660_v59 = vor.u32 %v659_v23, %v1419_v16 }
  0x8d   : > { %v893_v2 = vmax.bf16 %v1855_v11, %v442_v45  ;;  %v626_v11 = vor.u32 %v625_v43, %v622_v5  ;;  %v673_v43 = vrot.slane %v671_v25, 5  ;;  %v245_v5 = vmax.bf16 %v176_v19, %v1413_v58 }
  0x8e   : > { %v891_v4 = vmax.bf16 %v1856_v15, %v440_v56  ;;  %v351_v48 = vpop.permute.xlu1 %350  ;;  %v684_v58 = vor.u32 %v683_v63, %v1444_v3  ;;  %v701_v21 = vshll.u32 %v1181_v22, 16  ;;  %v1489_v15 = vrot.slane %v660_v59, 4  ;;  %v182_v63 = vld [vmem:[%s1065_s11 + $0x104] sm:$0x1] }
  0x8f   : > { %926 = vst.msk [vmem:[%s1424_s16 + $0x8] sm:$0xf] %vm923_vm3, %v893_v2  ;;  %v443_v45 = vmax.bf16 %v351_v48, %v1085_v18  ;;  %v347_v0 = vpop.permute.xlu0 %346  ;;  %v1857_v18 = vsel %vm1285_vm2, %v1315_v29, %v1317_v30  ;;  %v670_v2 = vrot.slane %v668_v39, 4  ;;  %v642_v29 = vsel %vm1285_vm2, %v1442_v51, %v1433_v54  ;;  %v179_v30 = vld [vmem:[%s1065_s11 + $0xf8] sm:$0x1] }
  0x90   : > { %924 = vst.msk [vmem:[%s1424_s16] sm:$0xf] %vm923_vm3, %v891_v4  ;;  %v441_v50 = vmax.bf16 %v347_v0, %v1089_v20  ;;  %v1858_v20 = vsel %vm1285_vm2, %v1319_v47, %v1327_v46  ;;  %v1482_v7 = vrot.slane %v626_v11, 4  ;;  %v705_v39 = vshrl.u32 %v1181_v22, 16 }
  0x91   : > { %v894_v56 = vmax.bf16 %v1857_v18, %v443_v45  ;;  %v1491_v4 = vrot.slane %v663_v8, 5  ;;  %v1493_v48 = vrot.slane %v650_v40, 4  ;;  %v1501_v45 = vrot.slane %v687_v41, 5 }
  0x92   : > { %v892_v37 = vmax.bf16 %v1858_v20, %v441_v50  ;;  %v355_v23 = vpop.permute.xlu1 %354  ;;  %v674_v0 = vor.u32 %v673_v43, %v670_v2  ;;  %v293_v11 = vmax.bf16 %v245_v5, %v179_v30  ;;  %v1508_v59 = vrot.slane %v684_v58, 4  ;;  %v185_v5 = vld [vmem:[%s1065_s11 + $0x110] sm:$0x1] }
  0x93   : > { %927 = vst.msk [vmem:[%s1424_s16 + $0xc] sm:$0xf] %vm923_vm3, %v894_v56  ;;  %v445_v46 = vmax.bf16 %v355_v23, %v1097_v26  ;;  %v353_v47 = vpop.permute.xlu0 %352  ;;  %v1859_v26 = vsel %vm1285_vm2, %v1340_v49, %v1336_v12  ;;  %v692_v40 = vshrl.u32 %v1185_v24, 16  ;;  %v695_v12 = vshll.u32 %v1185_v24, 16 }
  0x94   : > { %925 = vst.msk [vmem:[%s1424_s16 + $0x4] sm:$0xf] %vm923_vm3, %v892_v37  ;;  %v444_v25 = vmax.bf16 %v353_v47, %v1101_v28  ;;  %v1860_v28 = vsel %vm1285_vm2, %v1342_v1, %v1305_v61  ;;  %v1515_v18 = vrot.slane %v701_v21, 5  ;;  %v707_v56 = vrot.slane %v705_v39, 4 }
  0x95   : > { %v896_v19 = vmax.bf16 %v1859_v26, %v445_v46  ;;  %v248_v2 = vmax.bf16 %v182_v63, %v179_v30  ;;  %v632_v1 = vsel %vm1285_vm2, %v1482_v7, %v1393_v55  ;;  %v656_v43 = vsel %vm1285_vm2, %v1493_v48, %v1419_v16  ;;  %v188_v30 = vld [vmem:[%s1065_s11 + $0x11c] sm:$0x1] }
  0x96   : > { %v895_v8 = vmax.bf16 %v1860_v28, %v444_v25  ;;  %v359_v50 = vpop.permute.xlu1 %358  ;;  %v1538_v37 = vrot.slane %v674_v0, 4  ;;  %v711_v23 = vshll.u32 %v293_v11, 16  ;;  %v725_v58 = vshll.u32 %v1193_v32, 16 }
  0x97   : > { %929 = vst.msk [vmem:[%s1424_s16 + $0x14] sm:$0xf] %vm923_vm3, %v896_v19  ;;  %v447_v49 = vmax.bf16 %v359_v50, %v1109_v34  ;;  %v357_v41 = vpop.permute.xlu0 %356  ;;  %v666_v34 = vsel %vm1285_vm2, %v1489_v15, %v1491_v4  ;;  %v1862_v46 = vsel %vm1285_vm2, %v1348_v14, %v1309_v17  ;;  %v697_v39 = vrot.slane %v695_v12, 5 }
  0x98   : > { %928 = vst.msk [vmem:[%s1424_s16 + $0x10] sm:$0xf] %vm923_vm3, %v895_v8  ;;  %v446_v61 = vmax.bf16 %v357_v41, %v1113_v36  ;;  %v1861_v36 = vsel %vm1285_vm2, %v1346_v9, %v1344_v6  ;;  %v690_v6 = vsel %vm1285_vm2, %v1508_v59, %v1501_v45  ;;  %v694_v9 = vrot.slane %v692_v40, 4  ;;  %v1865_v41 = vld [vmem:[#allocation18_spill] sm:$0xff] }
  0x99   : > { %v898_v20 = vmax.bf16 %v1861_v36, %v447_v49  ;;  %v708_v26 = vor.u32 %v707_v56, %v1515_v18  ;;  %v296_v19 = vmax.bf16 %v248_v2, %v185_v5  ;;  %v729_v17 = vshrl.u32 %v1193_v32, 16  ;;  %v191_v49 = vld [vmem:[%s1065_s11 + $0x128] sm:$0x1] }
  0x9a   : > { %v897_v47 = vmax.bf16 %v1862_v46, %v446_v61  ;;  %v363_v21 = vpop.permute.xlu1 %362  ;;  %v716_v0 = vshrl.u32 %v1197_v35, 16  ;;  %v719_v11 = vshll.u32 %v1197_v35, 16  ;;  %v251_v28 = vmax.bf16 %v188_v30, %v185_v5  ;;  %v1867_v5 = vld [vmem:[#allocation8_spill] sm:$0xff] }
  0x9b   : > { %931 = vst.msk [vmem:[%s1424_s16 + $0x1c] sm:$0xf] %vm923_vm3, %v898_v20  ;;  %v449_v25 = vmax.bf16 %v363_v21, %v1121_v42  ;;  %v361_v63 = vpop.permute.xlu0 %360  ;;  %v1863_v42 = vld [vmem:[#allocation19_spill] sm:$0xff]  ;;  %v680_v40 = vsel %vm1285_vm2, %v1538_v37, %v1444_v3  ;;  %v1570_v12 = vrot.slane %v711_v23, 5  ;;  %v1866_v56 = vsel %vm1285_vm2, %v1383_v62, %v1865_v41  ;;  %v194_v30 = vld [vmem:[%s1065_s11 + $0x134] sm:$0x1] }
  0x9c   : > { %930 = vst.msk [vmem:[%s1424_s16 + $0x18] sm:$0xf] %vm923_vm3, %v897_v47  ;;  %v448_v14 = vmax.bf16 %v361_v63, %v1125_v44  ;;  %v1864_v8 = vsel %vm1285_vm2, %v1352_v52, %v1863_v42  ;;  %v1572_v44 = vrot.slane %v725_v58, 5  ;;  %v698_v52 = vor.u32 %v697_v39, %v694_v9  ;;  %v1868_v23 = vld [vmem:[#allocation2_spill] sm:$0xff]  ;;  %v1869_v62 = vld [vmem:[#allocation3_spill] sm:$0xff] }
  0x9d   : > { %v900_v50 = vmax.bf16 %v1864_v8, %v449_v25  ;;  %v749_v36 = vshll.u32 %v1867_v5, 16  ;;  %v753_v20 = vshrl.u32 %v1867_v5, 16  ;;  %v1586_v47 = vrot.slane %v708_v26, 4  ;;  %v1870_v8 = vld [vmem:[#allocation9_spill] sm:$0xff] }
  0x9e   : > { %v899_v2 = vmax.bf16 %v1866_v56, %v448_v14  ;;  %v367_v61 = vpop.permute.xlu1 %366  ;;  %v731_v21 = vrot.slane %v729_v17, 4  ;;  %v735_v25 = vshll.u32 %v296_v19, 16  ;;  %v718_v39 = vrot.slane %v716_v0, 4 }
  0x9f   : > { %933 = vst.msk [vmem:[%s1424_s16 + $0x24] sm:$0xf] %vm923_vm3, %v900_v50  ;;  %v451_v46 = vmax.bf16 %v367_v61, %v1868_v23  ;;  %v365_v58 = vpop.permute.xlu0 %364  ;;  %v721_v63 = vrot.slane %v719_v11, 5  ;;  %v299_v14 = vmax.bf16 %v251_v28, %v191_v49  ;;  %v740_v26 = vshrl.u32 %v1870_v8, 16 }
  0xa0   : > { %932 = vst.msk [vmem:[%s1424_s16 + $0x20] sm:$0xf] %vm923_vm3, %v899_v2  ;;  %v450_v9 = vmax.bf16 %v365_v58, %v1869_v62  ;;  %v743_v17 = vshll.u32 %v1870_v8, 16  ;;  %v254_v19 = vmax.bf16 %v194_v30, %v191_v49  ;;  %v1603_v28 = vrot.slane %v698_v52, 4  ;;  %v200_v30 = vld [vmem:[%s1065_s11 + $0x14c] sm:$0x1] }
  0xa1   : > { %v902_v42 = vmax.bf16 %v618_v53, %v451_v46  ;;  %v1605_v50 = vrot.slane %v749_v36, 5  ;;  %v755_v60 = vrot.slane %v753_v20, 4  ;;  %v1871_v53 = vld [vmem:[#allocation4_spill] sm:$0xff]  ;;  %v714_v49 = vsel %vm1285_vm2, %v1586_v47, %v1570_v12  ;;  %v1873_v36 = vld [vmem:[#allocation10_spill] sm:$0xff] }
  0xa2   : > { %v901_v0 = vmax.bf16 %v608_v57, %v450_v9  ;;  %v371_v11 = vpop.permute.xlu1 %370  ;;  %v732_v27 = vor.u32 %v731_v21, %v1572_v44  ;;  %v1616_v33 = vrot.slane %v735_v25, 5  ;;  %v1872_v57 = vld [vmem:[#allocation5_spill] sm:$0xff]  ;;  %v722_v61 = vor.u32 %v721_v63, %v718_v39 }
  0xa3   : > { %935 = vst.msk [vmem:[%s1424_s16 + $0x2c] sm:$0xf] %vm923_vm3, %v902_v42  ;;  %v453_v41 = vmax.bf16 %v371_v11, %v1871_v53  ;;  %v369_v56 = vpop.permute.xlu0 %368  ;;  %v759_v52 = vshll.u32 %v299_v14, 16  ;;  %v773_v20 = vshll.u32 %v1873_v36, 16  ;;  %v742_v46 = vrot.slane %v740_v26, 4  ;;  %v1875_v14 = vld [vmem:[#allocation11_spill] sm:$0xff] }
  0xa4   : > { %934 = vst.msk [vmem:[%s1424_s16 + $0x28] sm:$0xf] %vm923_vm3, %v901_v0  ;;  %v452_v2 = vmax.bf16 %v369_v56, %v1872_v57  ;;  %v745_v58 = vrot.slane %v743_v17, 5  ;;  %v302_v21 = vmax.bf16 %v254_v19, %v197_v38  ;;  %v704_v9 = vsel %vm1285_vm2, %v1603_v28, %v1515_v18  ;;  %v1654_v0 = vld [vmem:[%s1065_s11 + $0x158] sm:$0x1]  ;;  %v1877_v57 = vld [vmem:[#allocation12_spill] sm:$0xff] }
  0xa5   : > { %v904_v23 = vmax.bf16 %v642_v29, %v453_v41  ;;  %v756_v54 = vor.u32 %v755_v60, %v1605_v50  ;;  %v777_v51 = vshrl.u32 %v1873_v36, 16  ;;  %v1874_v29 = vld [vmem:[#allocation6_spill] sm:$0xff]  ;;  %v764_v42 = vshrl.u32 %v1875_v14, 16 }
  0xa6   : > { %v903_v25 = vmax.bf16 %v632_v1, %v452_v2  ;;  %v375_v62 = vpop.permute.xlu1 %374  ;;  %v767_v55 = vshll.u32 %v1875_v14, 16  ;;  %v257_v7 = vmax.bf16 %v200_v30, %v197_v38  ;;  %v1876_v1 = vld [vmem:[#allocation7_spill] sm:$0xff]  ;;  %v1647_v18 = vrot.slane %v732_v27, 4  ;;  %v1878_v30 = vld [vmem:[#allocation13_spill] sm:$0xff] }
  0xa7   : > { %937 = vst.msk [vmem:[%s1424_s16 + $0x34] sm:$0xf] %vm923_vm3, %v904_v23  ;;  %v455_v39 = vmax.bf16 %v375_v62, %v1874_v29  ;;  %v373_v63 = vpop.permute.xlu0 %372  ;;  %v1649_v17 = vrot.slane %v722_v61, 4  ;;  %v1651_v19 = vrot.slane %v759_v52, 5  ;;  %v746_v28 = vor.u32 %v745_v58, %v742_v46  ;;  %v206_v46 = vld [vmem:[%s1065_s11 + $0x164] sm:$0x1] }
  0xa8   : > { %936 = vst.msk [vmem:[%s1424_s16 + $0x30] sm:$0xf] %vm923_vm3, %v903_v25  ;;  %v454_v26 = vmax.bf16 %v373_v63, %v1876_v1  ;;  %v1661_v60 = vrot.slane %v773_v20, 5  ;;  %v783_v38 = vshll.u32 %v302_v21, 16  ;;  %v1668_v56 = vrot.slane %v756_v54, 4  ;;  %v1879_v29 = vld [vmem:[#allocation14_spill] sm:$0xff] }
  0xa9   : > { %v906_v11 = vmax.bf16 %v666_v34, %v455_v39  ;;  %v779_v27 = vrot.slane %v777_v51, 4  ;;  %v797_v2 = vshll.u32 %v1877_v57, 16  ;;  %v766_v34 = vrot.slane %v764_v42, 4 }
  0xaa   : > { %v905_v53 = vmax.bf16 %v656_v43, %v454_v26  ;;  %v379_v41 = vpop.permute.xlu1 %378  ;;  %v769_v61 = vrot.slane %v767_v55, 5  ;;  %v305_v52 = vmax.bf16 %v257_v7, %v1654_v0  ;;  %v738_v48 = vsel %vm1285_vm2, %v1647_v18, %v1616_v33  ;;  %v209_v55 = vld [vmem:[%s1065_s11 + $0x170] sm:$0x1] }
  0xab   : > { %939 = vst.msk [vmem:[%s1424_s16 + $0x3c] sm:$0xf] %vm923_vm3, %v906_v11  ;;  %v457_v15 = vmax.bf16 %v379_v41, %v1169_v10  ;;  %v377_v4 = vpop.permute.xlu0 %376  ;;  %v728_v10 = vsel %vm1285_vm2, %v1649_v17, %v1572_v44  ;;  %v801_v43 = vshrl.u32 %v1877_v57, 16  ;;  %v788_v23 = vshrl.u32 %v1878_v30, 16  ;;  %v1880_v17 = vld [vmem:[#allocation15_spill] sm:$0xff] }
  0xac   : > { %938 = vst.msk [vmem:[%s1424_s16 + $0x38] sm:$0xf] %vm923_vm3, %v905_v53  ;;  %v456_v16 = vmax.bf16 %v377_v4, %v1173_v13  ;;  %v1692_v13 = vrot.slane %v746_v28, 4  ;;  %v791_v33 = vshll.u32 %v1878_v30, 16  ;;  %v762_v45 = vsel %vm1285_vm2, %v1668_v56, %v1651_v19 }
  0xad   : > { %v908_v20 = vmax.bf16 %v690_v6, %v457_v15  ;;  %v780_v59 = vor.u32 %v779_v27, %v1661_v60  ;;  %v1707_v6 = vrot.slane %v783_v38, 5  ;;  %v770_v62 = vor.u32 %v769_v61, %v766_v34  ;;  %v1881_v34 = vld [vmem:[#allocation16_spill] sm:$0xff] }
  0xae   : > { %v907_v44 = vmax.bf16 %v680_v40, %v456_v16  ;;  %v383_v58 = vpop.permute.xlu1 %382  ;;  %v1712_v54 = vrot.slane %v797_v2, 5  ;;  %v807_v3 = vshll.u32 %v305_v52, 16  ;;  %v803_v40 = vrot.slane %v801_v43, 4 }
  0xaf   : > { %941 = vst.msk [vmem:[%s1424_s16 + $0x44] sm:$0xf] %vm923_vm3, %v908_v20  ;;  %v459_v21 = vmax.bf16 %v383_v58, %v1181_v22  ;;  %v381_v25 = vpop.permute.xlu0 %380  ;;  %v260_v51 = vmax.bf16 %v206_v46, %v1654_v0  ;;  %v821_v39 = vshll.u32 %v1879_v29, 16  ;;  %v790_v63 = vrot.slane %v788_v23, 4  ;;  %v212_v0 = vld [vmem:[%s1065_s11 + $0x17c] sm:$0x1] }
  0xb0   : > { %940 = vst.msk [vmem:[%s1424_s16 + $0x40] sm:$0xf] %vm923_vm3, %v907_v44  ;;  %v458_v37 = vmax.bf16 %v381_v25, %v1185_v24  ;;  %v793_v42 = vrot.slane %v791_v33, 5  ;;  %v825_v7 = vshrl.u32 %v1879_v29, 16  ;;  %v752_v24 = vsel %vm1285_vm2, %v1692_v13, %v1605_v50  ;;  %v215_v20 = vld [vmem:[%s1065_s11 + $0x188] sm:$0x1] }
  0xb1   : > { %v910_v22 = vmax.bf16 %v714_v49, %v459_v21  ;;  %v781_v18 = vrot.slane %v780_v59, 4  ;;  %v812_v19 = vshrl.u32 %v1880_v17, 16  ;;  %v771_v49 = vrot.slane %v770_v62, 4  ;;  %v1882_v13 = vld [vmem:[#allocation17_spill] sm:$0xff] }
  0xb2   : > { %v909_v1 = vmax.bf16 %v704_v9, %v458_v37  ;;  %v387_v26 = vpop.permute.xlu1 %386  ;;  %v809_v11 = vrot.slane %v807_v3, 5  ;;  %v815_v9 = vshll.u32 %v1880_v17, 16  ;;  %v804_v50 = vor.u32 %v803_v40, %v1712_v54 }
  0xb3   : > { %943 = vst.msk [vmem:[%s1424_s16 + $0x4c] sm:$0xf] %vm923_vm3, %v910_v22  ;;  %v461_v12 = vmax.bf16 %v387_v26, %v1193_v32  ;;  %v385_v47 = vpop.permute.xlu0 %384  ;;  %v308_v38 = vmax.bf16 %v260_v51, %v209_v55  ;;  %v1740_v53 = vrot.slane %v821_v39, 5  ;;  %v794_v56 = vor.u32 %v793_v42, %v790_v63 }
  0xb4   : > { %942 = vst.msk [vmem:[%s1424_s16 + $0x48] sm:$0xf] %vm923_vm3, %v909_v1  ;;  %v460_v28 = vmax.bf16 %v385_v47, %v1197_v35  ;;  %v827_v32 = vrot.slane %v825_v7, 4  ;;  %v263_v27 = vmax.bf16 %v212_v0, %v209_v55  ;;  %v814_v4 = vrot.slane %v812_v19, 4 }
  0xb5   : > { %v912_v41 = vmax.bf16 %v738_v48, %v461_v12  ;;  %v845_v61 = vshll.u32 %v1881_v34, 16  ;;  %v849_v52 = vshrl.u32 %v1881_v34, 16  ;;  %v817_v43 = vrot.slane %v815_v9, 5 }
  0xb6   : > { %v911_v2 = vmax.bf16 %v728_v10, %v460_v28  ;;  %v391_v15 = vpop.permute.xlu1 %390  ;;  %v836_v48 = vshrl.u32 %v1882_v13, 16  ;;  %v839_v23 = vshll.u32 %v1882_v13, 16  ;;  %v786_v33 = vsel %vm1285_vm2, %v781_v18, %v1707_v6 }
  0xb7   : > { %945 = vst.msk [vmem:[%s1424_s16 + $0x54] sm:$0xf] %vm923_vm3, %v912_v41  ;;  %v463_v35 = vmax.bf16 %v391_v15, %v1867_v5  ;;  %v389_v16 = vpop.permute.xlu0 %388  ;;  %v776_v5 = vsel %vm1285_vm2, %v771_v49, %v1661_v60  ;;  %v831_v46 = vshll.u32 %v308_v38, 16  ;;  %v805_v58 = vrot.slane %v804_v50, 4 }
  0xb8   : > { %944 = vst.msk [vmem:[%s1424_s16 + $0x50] sm:$0xf] %vm923_vm3, %v911_v2  ;;  %v462_v10 = vmax.bf16 %v389_v16, %v1870_v8  ;;  %v795_v59 = vrot.slane %v794_v56, 4  ;;  %v828_v21 = vor.u32 %v827_v32, %v1740_v53  ;;  %v311_v3 = vmax.bf16 %v263_v27, %v215_v20 }
  0xb9   : > { %v914_v44 = vmax.bf16 %v762_v45, %v463_v35  ;;  %v847_v37 = vrot.slane %v845_v61, 5  ;;  %v851_v8 = vrot.slane %v849_v52, 4  ;;  %v818_v51 = vor.u32 %v817_v43, %v814_v4 }
  0xba   : > { %v913_v25 = vmax.bf16 %v752_v24, %v462_v10  ;;  %v395_v62 = vpop.permute.xlu1 %394  ;;  %v838_v60 = vrot.slane %v836_v48, 4  ;;  %v841_v39 = vrot.slane %v839_v23, 5  ;;  %v810_v63 = vsel %vm1285_vm2, %v805_v58, %v809_v11 }
  0xbb   : > { %947 = vst.msk [vmem:[%s1424_s16 + $0x5c] sm:$0xf] %vm923_vm3, %v914_v44  ;;  %v465_v6 = vmax.bf16 %v395_v62, %v1873_v36  ;;  %v393_v40 = vpop.permute.xlu0 %392  ;;  %v833_v42 = vrot.slane %v831_v46, 5  ;;  %v829_v1 = vrot.slane %v828_v21, 4  ;;  %v852_v26 = vor.u32 %v851_v8, %v847_v37 }
  0xbc   : > { %946 = vst.msk [vmem:[%s1424_s16 + $0x58] sm:$0xf] %vm923_vm3, %v913_v25  ;;  %v464_v45 = vmax.bf16 %v393_v40, %v1875_v14  ;;  %v855_v36 = vshll.u32 %v311_v3, 16  ;;  %v800_v18 = vsel %vm1285_vm2, %v795_v59, %v1712_v54  ;;  %v819_v19 = vrot.slane %v818_v51, 4 }
  0xbd   : > { %v916_v22 = vmax.bf16 %v786_v33, %v465_v6  ;;  %v842_v0 = vor.u32 %v841_v39, %v838_v60  ;;  %v834_v11 = vsel %vm1285_vm2, %v829_v1, %v833_v42 }
  0xbe   : > { %v915_v55 = vmax.bf16 %v776_v5, %v464_v45  ;;  %v399_v7 = vpop.permute.xlu1 %398  ;;  %v857_v28 = vrot.slane %v855_v36, 5  ;;  %v824_v50 = vsel %vm1285_vm2, %v819_v19, %v1740_v53 }
  0xbf   : > { %949 = vst.msk [vmem:[%s1424_s16 + $0x64] sm:$0xf] %vm923_vm3, %v916_v22  ;;  %v467_v24 = vmax.bf16 %v399_v7, %v1877_v57  ;;  %v397_v14 = vpop.permute.xlu0 %396  ;;  %v853_v57 = vrot.slane %v852_v26, 4 }
  0xc0   : > { %948 = vst.msk [vmem:[%s1424_s16 + $0x60] sm:$0xf] %vm923_vm3, %v915_v55  ;;  %v466_v12 = vmax.bf16 %v397_v14, %v1878_v30  ;;  %v843_v30 = vrot.slane %v842_v0, 4 }
  0xc1   : > { %v918_v47 = vmax.bf16 %v810_v63, %v467_v24  ;;  %v858_v27 = vsel %vm1285_vm2, %v853_v57, %v857_v28 }
  0xc2   : > { %v917_v49 = vmax.bf16 %v800_v18, %v466_v12  ;;  %v403_v9 = vpop.permute.xlu1 %402  ;;  %v848_v53 = vsel %vm1285_vm2, %v843_v30, %v847_v37 }
  0xc3   : > { %951 = vst.msk [vmem:[%s1424_s16 + $0x6c] sm:$0xf] %vm923_vm3, %v918_v47  ;;  %v469_v54 = vmax.bf16 %v403_v9, %v1879_v29  ;;  %v401_v38 = vpop.permute.xlu0 %400 }
  0xc4   : > { %950 = vst.msk [vmem:[%s1424_s16 + $0x68] sm:$0xf] %vm923_vm3, %v917_v49  ;;  %v468_v41 = vmax.bf16 %v401_v38, %v1880_v17 }
  0xc5   : > { %v920_v56 = vmax.bf16 %v834_v11, %v469_v54 }
  0xc6   : > { %v919_v32 = vmax.bf16 %v824_v50, %v468_v41  ;;  %v407_v2 = vpop.permute.xlu1 %406 }
  0xc7   : > { %953 = vst.msk [vmem:[%s1424_s16 + $0x74] sm:$0xf] %vm923_vm3, %v920_v56  ;;  %v471_v29 = vmax.bf16 %v407_v2, %v1881_v34  ;;  %v405_v15 = vpop.permute.xlu0 %404 }
  0xc8   : > { %952 = vst.msk [vmem:[%s1424_s16 + $0x70] sm:$0xf] %vm923_vm3, %v919_v32  ;;  %v470_v4 = vmax.bf16 %v405_v15, %v1882_v13 }
  0xc9   : > { %v922_v61 = vmax.bf16 %v858_v27, %v471_v29 }
  0xca   : > { %v921_v17 = vmax.bf16 %v848_v53, %v470_v4 }
  0xcb   : > { %955 = vst.msk [vmem:[%s1424_s16 + $0x7c] sm:$0xf] %vm923_vm3, %v922_v61 }
  0xcc   : > { %954 = vst.msk [vmem:[%s1424_s16 + $0x78] sm:$0xf] %vm923_vm3, %v921_v17 }
  0xcd PF: > { %s11_s6 = sadd.s32 1, %s1038_s6  }
  0xce   : > { %p8_p4 = scmp.ge.s32.totalorder %s11_s6, 4  }
  0xd0   :  { %10 = sbr.rel (!%p8_p4) target bundleno = 1 (0x1), region = 54 }

// kernel: forward.29
= control target key start
LH: loop header
LB: loop body
LE: loop exit
PB: predicated region body
PF: predicated region fallthrough
CT: control target
= control target key end

     0   :  { %s2029_s15 = smov 0   ;;  %s2446_s0 = inlined_call_operand.vmem [shape: bf16[2048,147], index: 0, kind: input, shape index: {}]   ;;  %s2447_s1 = inlined_call_operand.vmem [shape: bf16[147,16], index: 1, kind: input, shape index: {}]   ;;  %s2448_s2 = inlined_call_operand.vmem [shape: f32[1,16], index: 2, kind: input, shape index: {}]   ;;  %s2449_s3 = inlined_call_operand.vmem [shape: f32[1,16], index: 3, kind: input, shape index: {}]   ;;  %s2450_s4 = inlined_call_operand.vmem [shape: bf16[2048,16], index: 4, kind: output, shape index: {}]  }
   0x1 LB: > { %s1609_s16 = sadd.s32 4294967295, %s2000_s15   ;;  %p1613_p0 = scmp.ge.s32.totalorder %s2000_s15, 1  ;;  %s2000_s15 = sphi %s2029_s15, %s14_s15  }
   0x2   : > { %p164_p1 = scmp.lt.s32.totalorder %s2000_s15, 5 }
   0x4   : > { %p165_p2 = pnand %p1613_p0, %p164_p1 }
   0x5   : > { %v1888_v0 = vld [vmem:[%s2447_s1] sm:$0xff] (!%p165_p2)   ;;  %v2002_v1 = vmov (!%p165_p2), 0   ;;  %v1889_v2 = vld [vmem:[%s2447_s1 + $0x8] sm:$0xff] (!%p165_p2)   ;;  %v1890_v3 = vld [vmem:[%s2447_s1 + $0x10] sm:$0xff] (!%p165_p2)   ;;  %s1614_s23 = sshll.u32 (!%p165_p2), %s1609_s16, 6  ;;  %vm633_vm0 = vcmask (!%p165_p2), 154624  }
   0x6   : > { %168 = sbr.rel (%p165_p2) target bundleno = 389 (0x185), region = 36  ;;  %737 = vmatprep.subr.bf16.mxu0 (!%p165_p2), %v2002_v1  ;;  %1858 = vmatprep.subr.bf16.mxu1 (!%p165_p2), %v2002_v1  ;;  %p192_p3 = scmp.lt.s32.totalorder (!%p165_p2), %s1614_s23, 255  ;;  %v1891_v4 = vld [vmem:[%s2447_s1 + $0x18] sm:$0xff] (!%p165_p2)   ;;  %v1892_v5 = vld [vmem:[%s2447_s1 + $0x20] sm:$0xff] (!%p165_p2)   ;;  %v1893_v8 = vld [vmem:[%s2447_s1 + $0x28] sm:$0xff] (!%p165_p2)   ;;  %vm730_vm1 = vcmask (!%p165_p2), 1040384  }
   0x7   : > { %738 = vmatpush1.bf16.msra.mxu0 (!%p165_p2), %v1888_v0  ;;  %1868 = vmatpush1.bf16.msra.mxu1 (!%p165_p2), %v1888_v0  ;;  %v1894_v9 = vld [vmem:[%s2447_s1 + $0x30] sm:$0xff] (!%p165_p2)   ;;  %v1895_v10 = vld [vmem:[%s2447_s1 + $0x38] sm:$0xff] (!%p165_p2)   ;;  %vm731_vm2 = vcmask (!%p165_p2), 1041408   ;;  %v2003_v11 = vmov (!%p165_p2), 65535   ;;  %v1896_v13 = vld [vmem:[%s2447_s1 + $0x40] sm:$0xff] (!%p165_p2)   ;;  %vm1488_vm3 = vcmask (!%p165_p2), 125952  }
   0x8   : > { %739 = vmatprep.subr.bf16.mxu0 (!%p165_p2), %v2002_v1  ;;  %1859 = vmatprep.subr.bf16.mxu1 (!%p165_p2), %v2002_v1  ;;  %v732_v12 = vsel (!%p165_p2), %vm730_vm1, 4294967295, %v2003_v11  ;;  %v1897_v14 = vld [vmem:[%s2447_s1 + $0x48] ss:$0 sps:$4 sm:$0x33] (!%p165_p2)  }
   0x9   : > { %v733_v15 = vsel (!%p165_p2), %vm731_vm2, %v732_v12, 0 }
   0xa   : > { %v735_v16 = vand.u32 (!%p165_p2), %v1897_v14, %v733_v15  ;;  %v2174_v15 = vld [vmem:[%s2448_s2] ss:$0 sm:$0xff] (!%p165_p2) }
   0xb   : > { %740 = vmatpush1.bf16.msra.mxu0 (!%p165_p2), %v1889_v2  ;;  %1869 = vmatpush1.bf16.msra.mxu1 (!%p165_p2), %v1889_v2 }
   0xc   : > { %741 = vmatprep.subr.bf16.mxu0 (!%p165_p2), %v2002_v1  ;;  %1860 = vmatprep.subr.bf16.mxu1 (!%p165_p2), %v2002_v1 }
   0xd   : > { %s2452_s23 = smov (!%p192_p3, %s1614_s23), 255 }
   0xe   : > { %s1793_s26 = sshll.u32 %s2452_s23, 3  ;;  %s1618_s21 = sshll.u32 %s2452_s23, 2 }
   0xf   : > { %742 = vmatpush1.bf16.msra.mxu0 %v1890_v3  ;;  %1870 = vmatpush1.bf16.msra.mxu1 %v1890_v3  ;;  %s2055_s29 = scalar_lea.vmem %s2446_s0, %s1793_s26  ;;  %s2193_s23 = scalar_lea.vmem %s2450_s4, %s1618_s21 }
  0x10   : > { %743 = vmatprep.subr.bf16.mxu0 %v2002_v1  ;;  %1861 = vmatprep.subr.bf16.mxu1 %v2002_v1  ;;  %v1900_v6 = vld [vmem:[%s2055_s29 + $0x4] ss:$8 sps:$4 sm:$0xff]   ;;  %v1898_v17 = vld [vmem:[%s2055_s29] ss:$8 sps:$4 sm:$0xff]   ;;  %v1904_v19 = vld [vmem:[%s2055_s29 + $0x14] ss:$8 sps:$4 sm:$0xff]  }
  0x11   : > { %v1903_v7 = vld [vmem:[%s2055_s29 + $0x104] ss:$8 sps:$4 sm:$0xff]   ;;  %1693 = vmatprep.mubr.msk.bf16.mxu0 %vm633_vm0, %v1900_v6  ;;  %v1901_v18 = vld [vmem:[%s2055_s29 + $0x100] ss:$8 sps:$4 sm:$0xff]   ;;  %v1906_v20 = vld [vmem:[%s2055_s29 + $0x114] ss:$8 sps:$4 sm:$0xff]  }
  0x12   : > { %1709 = vmatprep.mubr.msk.bf16.mxu1 %vm633_vm0, %v1903_v7  ;;  %v1908_v21 = vld [vmem:[%s2055_s29 + $0x10] ss:$8 sps:$4 sm:$0xff]   ;;  %v1910_v23 = vld [vmem:[%s2055_s29 + $0x24] ss:$8 sps:$4 sm:$0xff]   ;;  %v1914_v25 = vld [vmem:[%s2055_s29 + $0x20] ss:$8 sps:$4 sm:$0xff]  }
  0x13   : > { %744 = vmatpush1.bf16.msra.mxu0 %v1891_v4  ;;  %1871 = vmatpush1.bf16.msra.mxu1 %v1891_v4  ;;  %v1909_v22 = vld [vmem:[%s2055_s29 + $0x110] ss:$8 sps:$4 sm:$0xff]   ;;  %v1912_v24 = vld [vmem:[%s2055_s29 + $0x124] ss:$8 sps:$4 sm:$0xff]   ;;  %v1915_v26 = vld [vmem:[%s2055_s29 + $0x120] ss:$8 sps:$4 sm:$0xff]  }
  0x14   : > { %745 = vmatprep.subr.bf16.mxu0 %v2002_v1  ;;  %1862 = vmatprep.subr.bf16.mxu1 %v2002_v1  ;;  %v1916_v27 = vld [vmem:[%s2055_s29 + $0x34] ss:$8 sps:$4 sm:$0xff]   ;;  %v1920_v29 = vld [vmem:[%s2055_s29 + $0x30] ss:$8 sps:$4 sm:$0xff]   ;;  %v1922_v31 = vld [vmem:[%s2055_s29 + $0x44] ss:$8 sps:$4 sm:$0xff]  }
  0x15   : > { %v1918_v28 = vld [vmem:[%s2055_s29 + $0x134] ss:$8 sps:$4 sm:$0xff]   ;;  %v1921_v30 = vld [vmem:[%s2055_s29 + $0x130] ss:$8 sps:$4 sm:$0xff]   ;;  %v1924_v32 = vld [vmem:[%s2055_s29 + $0x144] ss:$8 sps:$4 sm:$0xff]  }
  0x16   : > { %v1926_v33 = vld [vmem:[%s2055_s29 + $0x40] ss:$8 sps:$4 sm:$0xff]   ;;  %v1928_v35 = vld [vmem:[%s2055_s29 + $0x54] ss:$8 sps:$4 sm:$0xff]   ;;  %v1932_v37 = vld [vmem:[%s2055_s29 + $0x50] ss:$8 sps:$4 sm:$0xff]  }
  0x17   : > { %746 = vmatpush1.bf16.msra.mxu0 %v1892_v5  ;;  %1872 = vmatpush1.bf16.msra.mxu1 %v1892_v5  ;;  %v1927_v34 = vld [vmem:[%s2055_s29 + $0x140] ss:$8 sps:$4 sm:$0xff]   ;;  %v1930_v36 = vld [vmem:[%s2055_s29 + $0x154] ss:$8 sps:$4 sm:$0xff]   ;;  %v1933_v38 = vld [vmem:[%s2055_s29 + $0x150] ss:$8 sps:$4 sm:$0xff]  }
  0x18   : > { %747 = vmatprep.subr.bf16.mxu0 %v2002_v1  ;;  %1863 = vmatprep.subr.bf16.mxu1 %v2002_v1  ;;  %v1934_v39 = vld [vmem:[%s2055_s29 + $0x64] ss:$8 sps:$4 sm:$0xff]   ;;  %v1938_v41 = vld [vmem:[%s2055_s29 + $0x60] ss:$8 sps:$4 sm:$0xff]   ;;  %v1940_v43 = vld [vmem:[%s2055_s29 + $0x74] ss:$8 sps:$4 sm:$0xff]  }
  0x19   : > { %v1936_v40 = vld [vmem:[%s2055_s29 + $0x164] ss:$8 sps:$4 sm:$0xff]   ;;  %v1939_v42 = vld [vmem:[%s2055_s29 + $0x160] ss:$8 sps:$4 sm:$0xff]   ;;  %v1942_v44 = vld [vmem:[%s2055_s29 + $0x174] ss:$8 sps:$4 sm:$0xff]  }
  0x1a   : > { %v1944_v45 = vld [vmem:[%s2055_s29 + $0x70] ss:$8 sps:$4 sm:$0xff]   ;;  %v1946_v47 = vld [vmem:[%s2055_s29 + $0x84] ss:$8 sps:$4 sm:$0xff]   ;;  %v1950_v49 = vld [vmem:[%s2055_s29 + $0x80] ss:$8 sps:$4 sm:$0xff]  }
  0x1b   : > { %748 = vmatpush1.bf16.msra.mxu0 %v1893_v8  ;;  %1873 = vmatpush1.bf16.msra.mxu1 %v1893_v8  ;;  %v1945_v46 = vld [vmem:[%s2055_s29 + $0x170] ss:$8 sps:$4 sm:$0xff]   ;;  %v1948_v48 = vld [vmem:[%s2055_s29 + $0x184] ss:$8 sps:$4 sm:$0xff]   ;;  %v1951_v50 = vld [vmem:[%s2055_s29 + $0x180] ss:$8 sps:$4 sm:$0xff]  }
  0x1c   : > { %749 = vmatprep.subr.bf16.mxu0 %v2002_v1  ;;  %1864 = vmatprep.subr.bf16.mxu1 %v2002_v1  ;;  %v1952_v51 = vld [vmem:[%s2055_s29 + $0x94] ss:$8 sps:$4 sm:$0xff]   ;;  %v1956_v53 = vld [vmem:[%s2055_s29 + $0x90] ss:$8 sps:$4 sm:$0xff]   ;;  %v1958_v55 = vld [vmem:[%s2055_s29 + $0xa4] ss:$8 sps:$4 sm:$0xff]  }
  0x1d   : > { %v1954_v52 = vld [vmem:[%s2055_s29 + $0x194] ss:$8 sps:$4 sm:$0xff]   ;;  %v1957_v54 = vld [vmem:[%s2055_s29 + $0x190] ss:$8 sps:$4 sm:$0xff]   ;;  %v1960_v56 = vld [vmem:[%s2055_s29 + $0x1a4] ss:$8 sps:$4 sm:$0xff]  }
  0x1e   : > { %v1962_v57 = vld [vmem:[%s2055_s29 + $0xa0] ss:$8 sps:$4 sm:$0xff]   ;;  %v1964_v59 = vld [vmem:[%s2055_s29 + $0xb4] ss:$8 sps:$4 sm:$0xff]   ;;  %v1968_v61 = vld [vmem:[%s2055_s29 + $0xb0] ss:$8 sps:$4 sm:$0xff]  }
  0x1f   : > { %750 = vmatpush1.bf16.msra.mxu0 %v1894_v9  ;;  %1874 = vmatpush1.bf16.msra.mxu1 %v1894_v9  ;;  %v1963_v58 = vld [vmem:[%s2055_s29 + $0x1a0] ss:$8 sps:$4 sm:$0xff]   ;;  %v1966_v60 = vld [vmem:[%s2055_s29 + $0x1b4] ss:$8 sps:$4 sm:$0xff]   ;;  %v1969_v62 = vld [vmem:[%s2055_s29 + $0x1b0] ss:$8 sps:$4 sm:$0xff]  }
  0x20   : > { %751 = vmatprep.subr.bf16.mxu0 %v2002_v1  ;;  %1865 = vmatprep.subr.bf16.mxu1 %v2002_v1  ;;  %v1970_v63 = vld [vmem:[%s2055_s29 + $0xc4] ss:$8 sps:$4 sm:$0xff]   ;;  %v1975_v2 = vld [vmem:[%s2055_s29 + $0x1c0] ss:$8 sps:$4 sm:$0xff]   ;;  %v1976_v3 = vld [vmem:[%s2055_s29 + $0xd4] ss:$8 sps:$4 sm:$0xff]  }
  0x21   : > { %v1972_v0 = vld [vmem:[%s2055_s29 + $0x1c4] ss:$8 sps:$4 sm:$0xff]   ;;  %v1978_v4 = vld [vmem:[%s2055_s29 + $0x1d4] ss:$8 sps:$4 sm:$0xff]   ;;  %v1980_v5 = vld [vmem:[%s2055_s29 + $0xd0] ss:$8 sps:$4 sm:$0xff]  }
  0x22   : > { %v1981_v6 = vld [vmem:[%s2055_s29 + $0x1d0] ss:$8 sps:$4 sm:$0xff]   ;;  %v1982_v7 = vld [vmem:[%s2055_s29 + $0xe4] ss:$8 sps:$4 sm:$0xff]   ;;  %v1986_v9 = vld [vmem:[%s2055_s29 + $0xe0] ss:$8 sps:$4 sm:$0xff]  }
  0x23   : > { %752 = vmatpush1.bf16.msra.mxu0 %v1895_v10  ;;  %1875 = vmatpush1.bf16.msra.mxu1 %v1895_v10  ;;  %v1984_v8 = vld [vmem:[%s2055_s29 + $0x1e4] ss:$8 sps:$4 sm:$0xff]   ;;  %v1987_v10 = vld [vmem:[%s2055_s29 + $0x1e0] ss:$8 sps:$4 sm:$0xff]   ;;  %v1988_v11 = vld [vmem:[%s2055_s29 + $0xf4] ss:$8 sps:$4 sm:$0xff]  }
  0x24   : > { %753 = vmatprep.subr.bf16.mxu0 %v2002_v1  ;;  %1866 = vmatprep.subr.bf16.mxu1 %v2002_v1  ;;  %v1990_v12 = vld [vmem:[%s2055_s29 + $0x1f4] ss:$8 sps:$4 sm:$0xff]   ;;  %v1993_v14 = vld [vmem:[%s2055_s29 + $0x1f0] ss:$8 sps:$4 sm:$0xff]  }
  0x27   : > { %754 = vmatpush1.bf16.msra.mxu0 %v1896_v13  ;;  %1876 = vmatpush1.bf16.msra.mxu1 %v1896_v13  ;;  %v1992_v13 = vld [vmem:[%s2055_s29 + $0xf0] ss:$8 sps:$4 sm:$0xff]  }
  0x28   : > { %755 = vmatprep.subr.bf16.mxu0 %v2002_v1  ;;  %1867 = vmatprep.subr.bf16.mxu1 %v2002_v1  ;;  %v1974_v1 = vld [vmem:[%s2055_s29 + $0xc0] ss:$8 sps:$4 sm:$0xff]  }
  0x2b   : > { %756 = vmatpush1.bf16.msra.mxu0 %v735_v16  ;;  %1877 = vmatpush1.bf16.msra.mxu1 %v735_v16 }
  0x2e   : > { %770 = vmatmul.mubr.bf16.vlgmr.msra.gmra.mrb[0].mxu0 %v1898_v17  ;;  %898 = vmatmul.mubr.bf16.vlgmr.msra.gmra.mrb[0].mxu1 %v1901_v18  ;;  %v2179_v17 = vld [vmem:[%s2449_s3] ss:$0 sm:$0xff] }
  0x2f   : > { %1694 = vmatprep.mubr.msk.bf16.mxu0 %vm633_vm0, %v1904_v19  ;;  %1710 = vmatprep.mubr.msk.bf16.mxu1 %vm633_vm0, %v1906_v20 }
  0x36   : > { %778 = vmatmul.mubr.bf16.gmra.mrb[4].mxu0 %v1908_v21  ;;  %906 = vmatmul.mubr.bf16.gmra.mrb[4].mxu1 %v1909_v22 }
  0x37   : > { %1695 = vmatprep.mubr.msk.bf16.mxu0 %vm633_vm0, %v1910_v23  ;;  %1711 = vmatprep.mubr.msk.bf16.mxu1 %vm633_vm0, %v1912_v24 }
  0x3e   : > { %786 = vmatmul.mubr.bf16.gmra.mrb[8].mxu0 %v1914_v25  ;;  %914 = vmatmul.mubr.bf16.gmra.mrb[8].mxu1 %v1915_v26 }
  0x3f   : > { %1696 = vmatprep.mubr.msk.bf16.mxu0 %vm633_vm0, %v1916_v27  ;;  %1712 = vmatprep.mubr.msk.bf16.mxu1 %vm633_vm0, %v1918_v28 }
  0x46   : > { %794 = vmatmul.mubr.bf16.gmra.mrb[12].mxu0 %v1920_v29  ;;  %922 = vmatmul.mubr.bf16.gmra.mrb[12].mxu1 %v1921_v30 }
  0x47   : > { %1697 = vmatprep.mubr.msk.bf16.mxu0 %vm633_vm0, %v1922_v31  ;;  %1713 = vmatprep.mubr.msk.bf16.mxu1 %vm633_vm0, %v1924_v32 }
  0x4e   : > { %802 = vmatmul.mubr.bf16.gmra.mrb[16].mxu0 %v1926_v33  ;;  %930 = vmatmul.mubr.bf16.gmra.mrb[16].mxu1 %v1927_v34 }
  0x4f   : > { %1698 = vmatprep.mubr.msk.bf16.mxu0 %vm633_vm0, %v1928_v35  ;;  %1714 = vmatprep.mubr.msk.bf16.mxu1 %vm633_vm0, %v1930_v36 }
  0x56   : > { %810 = vmatmul.mubr.bf16.gmra.mrb[20].mxu0 %v1932_v37  ;;  %938 = vmatmul.mubr.bf16.gmra.mrb[20].mxu1 %v1933_v38 }
  0x57   : > { %1699 = vmatprep.mubr.msk.bf16.mxu0 %vm633_vm0, %v1934_v39  ;;  %1715 = vmatprep.mubr.msk.bf16.mxu1 %vm633_vm0, %v1936_v40 }
  0x5e   : > { %818 = vmatmul.mubr.bf16.gmra.mrb[24].mxu0 %v1938_v41  ;;  %946 = vmatmul.mubr.bf16.gmra.mrb[24].mxu1 %v1939_v42 }
  0x5f   : > { %1700 = vmatprep.mubr.msk.bf16.mxu0 %vm633_vm0, %v1940_v43  ;;  %1716 = vmatprep.mubr.msk.bf16.mxu1 %vm633_vm0, %v1942_v44 }
  0x66   : > { %826 = vmatmul.mubr.bf16.gmra.mrb[28].mxu0 %v1944_v45  ;;  %954 = vmatmul.mubr.bf16.gmra.mrb[28].mxu1 %v1945_v46 }
  0x67   : > { %1701 = vmatprep.mubr.msk.bf16.mxu0 %vm633_vm0, %v1946_v47  ;;  %1717 = vmatprep.mubr.msk.bf16.mxu1 %vm633_vm0, %v1948_v48 }
  0x6e   : > { %834 = vmatmul.mubr.bf16.gmra.mrb[32].mxu0 %v1950_v49  ;;  %962 = vmatmul.mubr.bf16.gmra.mrb[32].mxu1 %v1951_v50 }
  0x6f   : > { %1702 = vmatprep.mubr.msk.bf16.mxu0 %vm633_vm0, %v1952_v51  ;;  %1718 = vmatprep.mubr.msk.bf16.mxu1 %vm633_vm0, %v1954_v52 }
  0x76   : > { %842 = vmatmul.mubr.bf16.gmra.mrb[36].mxu0 %v1956_v53  ;;  %970 = vmatmul.mubr.bf16.gmra.mrb[36].mxu1 %v1957_v54 }
  0x77   : > { %1703 = vmatprep.mubr.msk.bf16.mxu0 %vm633_vm0, %v1958_v55  ;;  %1719 = vmatprep.mubr.msk.bf16.mxu1 %vm633_vm0, %v1960_v56 }
  0x7e   : > { %850 = vmatmul.mubr.bf16.gmra.mrb[40].mxu0 %v1962_v57  ;;  %978 = vmatmul.mubr.bf16.gmra.mrb[40].mxu1 %v1963_v58 }
  0x7f   : > { %1704 = vmatprep.mubr.msk.bf16.mxu0 %vm633_vm0, %v1964_v59  ;;  %1720 = vmatprep.mubr.msk.bf16.mxu1 %vm633_vm0, %v1966_v60 }
  0x86   : > { %858 = vmatmul.mubr.bf16.gmra.mrb[44].mxu0 %v1968_v61  ;;  %986 = vmatmul.mubr.bf16.gmra.mrb[44].mxu1 %v1969_v62 }
  0x87   : > { %1705 = vmatprep.mubr.msk.bf16.mxu0 %vm633_vm0, %v1970_v63  ;;  %1721 = vmatprep.mubr.msk.bf16.mxu1 %vm633_vm0, %v1972_v0 }
  0x8e   : > { %866 = vmatmul.mubr.bf16.gmra.mrb[48].mxu0 %v1974_v1  ;;  %994 = vmatmul.mubr.bf16.gmra.mrb[48].mxu1 %v1975_v2 }
  0x8f   : > { %1706 = vmatprep.mubr.msk.bf16.mxu0 %vm633_vm0, %v1976_v3  ;;  %1722 = vmatprep.mubr.msk.bf16.mxu1 %vm633_vm0, %v1978_v4 }
  0x96   : > { %874 = vmatmul.mubr.bf16.gmra.mrb[52].mxu0 %v1980_v5  ;;  %1002 = vmatmul.mubr.bf16.gmra.mrb[52].mxu1 %v1981_v6 }
  0x97   : > { %1707 = vmatprep.mubr.msk.bf16.mxu0 %vm633_vm0, %v1982_v7  ;;  %1723 = vmatprep.mubr.msk.bf16.mxu1 %vm633_vm0, %v1984_v8 }
  0x9e   : > { %882 = vmatmul.mubr.bf16.gmra.mrb[56].mxu0 %v1986_v9  ;;  %1010 = vmatmul.mubr.bf16.gmra.mrb[56].mxu1 %v1987_v10 }
  0x9f   : > { %1708 = vmatprep.mubr.msk.bf16.mxu0 %vm633_vm0, %v1988_v11  ;;  %1724 = vmatprep.mubr.msk.bf16.mxu1 %vm633_vm0, %v1990_v12 }
  0xa6   : > { %890 = vmatmul.mubr.bf16.gmra.mrb[60].mxu0 %v1992_v13  ;;  %1018 = vmatmul.mubr.bf16.gmra.mrb[60].mxu1 %v1993_v14 }
 0x101   : > { %v771_v16 = vpop.f32.mrb[0].mxu0  ;;  %v899_v18 = vpop.f32.mrb[0].mxu1 }
 0x102   : > { %v1033_v19 = vmul.f32 %v2174_v15, %v771_v16  ;;  %v1065_v20 = vmul.f32 %v2174_v15, %v899_v18  ;;  %v773_v21 = vpop.f32.mrb[1].mxu0  ;;  %v901_v22 = vpop.f32.mrb[1].mxu1 }
 0x103   : > { %v774_v23 = vpop.f32.mrb[2].mxu0  ;;  %v902_v24 = vpop.f32.mrb[2].mxu1 }
 0x104   : > { %v1104_v25 = vadd.f32 %v2179_v17, %v1033_v19  ;;  %v1136_v26 = vadd.f32 %v2179_v17, %v1065_v20  ;;  %v1034_v27 = vmul.f32 %v2174_v15, %v774_v23  ;;  %v1066_v28 = vmul.f32 %v2174_v15, %v902_v24  ;;  %v776_v29 = vpop.f32.mrb[3].mxu0  ;;  %v904_v30 = vpop.f32.mrb[3].mxu1 }
 0x106   : > { %v1168_v31 = vmax.f32 %v1104_v25, 0.0  ;;  %v1200_v32 = vmax.f32 %v1136_v26, 0.0  ;;  %v1105_v33 = vadd.f32 %v2179_v17, %v1034_v27  ;;  %v1137_v34 = vadd.f32 %v2179_v17, %v1066_v28 }
 0x108   : > { %v1794_v35 = vpack.c.bf16 %v1168_v31, %v1168_v31  ;;  %v1826_v36 = vpack.c.bf16 %v1200_v32, %v1200_v32  ;;  %v1169_v37 = vmax.f32 %v1105_v33, 0.0  ;;  %v1201_v38 = vmax.f32 %v1137_v34, 0.0 }
 0x109   : > { %v779_v39 = vpop.f32.mrb[4].mxu0  ;;  %v907_v40 = vpop.f32.mrb[4].mxu1 }
 0x10a   : > { %1489 = vst.msk [vmem:[%s2193_s23] sm:$0xf] %vm1488_vm3, %v1794_v35  ;;  %1521 = vst.msk [vmem:[%s2193_s23 + $0x80] sm:$0xf] %vm1488_vm3, %v1826_v36  ;;  %v1795_v41 = vpack.c.bf16 %v1169_v37, %v1169_v37  ;;  %v1827_v42 = vpack.c.bf16 %v1201_v38, %v1201_v38  ;;  %v1035_v43 = vmul.f32 %v2174_v15, %v779_v39  ;;  %v781_v45 = vpop.f32.mrb[5].mxu0  ;;  %v909_v46 = vpop.f32.mrb[5].mxu1 }
 0x10b   : > { %v1067_v44 = vmul.f32 %v2174_v15, %v907_v40  ;;  %v782_v47 = vpop.f32.mrb[6].mxu0  ;;  %v910_v48 = vpop.f32.mrb[6].mxu1 }
 0x10c   : > { %1490 = vst.msk [vmem:[%s2193_s23 + $0x4] sm:$0xf] %vm1488_vm3, %v1795_v41  ;;  %1522 = vst.msk [vmem:[%s2193_s23 + $0x84] sm:$0xf] %vm1488_vm3, %v1827_v42  ;;  %v1106_v49 = vadd.f32 %v2179_v17, %v1035_v43  ;;  %v1036_v51 = vmul.f32 %v2174_v15, %v782_v47  ;;  %v1068_v52 = vmul.f32 %v2174_v15, %v910_v48  ;;  %v784_v53 = vpop.f32.mrb[7].mxu0  ;;  %v912_v54 = vpop.f32.mrb[7].mxu1 }
 0x10d   : > { %v1138_v50 = vadd.f32 %v2179_v17, %v1067_v44 }
 0x10e   : > { %v1170_v55 = vmax.f32 %v1106_v49, 0.0  ;;  %v1107_v57 = vadd.f32 %v2179_v17, %v1036_v51  ;;  %v1139_v58 = vadd.f32 %v2179_v17, %v1068_v52 }
 0x10f   : > { %v1202_v56 = vmax.f32 %v1138_v50, 0.0 }
 0x110   : > { %v1796_v59 = vpack.c.bf16 %v1170_v55, %v1170_v55  ;;  %v1171_v61 = vmax.f32 %v1107_v57, 0.0  ;;  %v1203_v62 = vmax.f32 %v1139_v58, 0.0 }
 0x111   : > { %v1828_v60 = vpack.c.bf16 %v1202_v56, %v1202_v56  ;;  %v787_v63 = vpop.f32.mrb[8].mxu0  ;;  %v915_v0 = vpop.f32.mrb[8].mxu1 }
 0x112   : > { %1491 = vst.msk [vmem:[%s2193_s23 + $0x8] sm:$0xf] %vm1488_vm3, %v1796_v59  ;;  %v1797_v1 = vpack.c.bf16 %v1171_v61, %v1171_v61  ;;  %v1829_v2 = vpack.c.bf16 %v1203_v62, %v1203_v62  ;;  %v1037_v3 = vmul.f32 %v2174_v15, %v787_v63  ;;  %v1069_v4 = vmul.f32 %v2174_v15, %v915_v0  ;;  %v789_v5 = vpop.f32.mrb[9].mxu0  ;;  %v917_v6 = vpop.f32.mrb[9].mxu1 }
 0x113   : > { %1523 = vst.msk [vmem:[%s2193_s23 + $0x88] sm:$0xf] %vm1488_vm3, %v1828_v60  ;;  %v790_v7 = vpop.f32.mrb[10].mxu0  ;;  %v918_v8 = vpop.f32.mrb[10].mxu1 }
 0x114   : > { %1492 = vst.msk [vmem:[%s2193_s23 + $0xc] sm:$0xf] %vm1488_vm3, %v1797_v1  ;;  %1524 = vst.msk [vmem:[%s2193_s23 + $0x8c] sm:$0xf] %vm1488_vm3, %v1829_v2  ;;  %v1108_v9 = vadd.f32 %v2179_v17, %v1037_v3  ;;  %v1140_v10 = vadd.f32 %v2179_v17, %v1069_v4  ;;  %v1038_v11 = vmul.f32 %v2174_v15, %v790_v7  ;;  %v792_v13 = vpop.f32.mrb[11].mxu0  ;;  %v920_v14 = vpop.f32.mrb[11].mxu1 }
 0x115   : > { %v1070_v12 = vmul.f32 %v2174_v15, %v918_v8 }
 0x116   : > { %v1172_v16 = vmax.f32 %v1108_v9, 0.0  ;;  %v1204_v18 = vmax.f32 %v1140_v10, 0.0  ;;  %v1109_v19 = vadd.f32 %v2179_v17, %v1038_v11 }
 0x117   : > { %v1141_v20 = vadd.f32 %v2179_v17, %v1070_v12 }
 0x118   : > { %v1798_v21 = vpack.c.bf16 %v1172_v16, %v1172_v16  ;;  %v1830_v22 = vpack.c.bf16 %v1204_v18, %v1204_v18  ;;  %v1173_v23 = vmax.f32 %v1109_v19, 0.0 }
 0x119   : > { %v1205_v24 = vmax.f32 %v1141_v20, 0.0  ;;  %v795_v25 = vpop.f32.mrb[12].mxu0  ;;  %v923_v26 = vpop.f32.mrb[12].mxu1 }
 0x11a   : > { %1493 = vst.msk [vmem:[%s2193_s23 + $0x10] sm:$0xf] %vm1488_vm3, %v1798_v21  ;;  %1525 = vst.msk [vmem:[%s2193_s23 + $0x90] sm:$0xf] %vm1488_vm3, %v1830_v22  ;;  %v1799_v27 = vpack.c.bf16 %v1173_v23, %v1173_v23  ;;  %v1039_v29 = vmul.f32 %v2174_v15, %v795_v25  ;;  %v1071_v30 = vmul.f32 %v2174_v15, %v923_v26  ;;  %v797_v31 = vpop.f32.mrb[13].mxu0  ;;  %v925_v32 = vpop.f32.mrb[13].mxu1 }
 0x11b   : > { %v1831_v28 = vpack.c.bf16 %v1205_v24, %v1205_v24  ;;  %v798_v33 = vpop.f32.mrb[14].mxu0  ;;  %v926_v34 = vpop.f32.mrb[14].mxu1 }
 0x11c   : > { %1494 = vst.msk [vmem:[%s2193_s23 + $0x14] sm:$0xf] %vm1488_vm3, %v1799_v27  ;;  %v1110_v35 = vadd.f32 %v2179_v17, %v1039_v29  ;;  %v1142_v36 = vadd.f32 %v2179_v17, %v1071_v30  ;;  %v1040_v37 = vmul.f32 %v2174_v15, %v798_v33  ;;  %v1072_v38 = vmul.f32 %v2174_v15, %v926_v34  ;;  %v800_v39 = vpop.f32.mrb[15].mxu0  ;;  %v928_v40 = vpop.f32.mrb[15].mxu1 }
 0x11d   : > { %1526 = vst.msk [vmem:[%s2193_s23 + $0x94] sm:$0xf] %vm1488_vm3, %v1831_v28 }
 0x11e   : > { %v1174_v41 = vmax.f32 %v1110_v35, 0.0  ;;  %v1206_v42 = vmax.f32 %v1142_v36, 0.0  ;;  %v1111_v43 = vadd.f32 %v2179_v17, %v1040_v37  ;;  %v1143_v44 = vadd.f32 %v2179_v17, %v1072_v38 }
 0x120   : > { %v1800_v45 = vpack.c.bf16 %v1174_v41, %v1174_v41  ;;  %v1832_v46 = vpack.c.bf16 %v1206_v42, %v1206_v42  ;;  %v1175_v47 = vmax.f32 %v1111_v43, 0.0  ;;  %v1207_v48 = vmax.f32 %v1143_v44, 0.0 }
 0x121   : > { %v803_v49 = vpop.f32.mrb[16].mxu0  ;;  %v931_v50 = vpop.f32.mrb[16].mxu1 }
 0x122   : > { %1495 = vst.msk [vmem:[%s2193_s23 + $0x18] sm:$0xf] %vm1488_vm3, %v1800_v45  ;;  %1527 = vst.msk [vmem:[%s2193_s23 + $0x98] sm:$0xf] %vm1488_vm3, %v1832_v46  ;;  %v1801_v51 = vpack.c.bf16 %v1175_v47, %v1175_v47  ;;  %v1833_v52 = vpack.c.bf16 %v1207_v48, %v1207_v48  ;;  %v1041_v53 = vmul.f32 %v2174_v15, %v803_v49  ;;  %v805_v55 = vpop.f32.mrb[17].mxu0  ;;  %v933_v56 = vpop.f32.mrb[17].mxu1 }
 0x123   : > { %v1073_v54 = vmul.f32 %v2174_v15, %v931_v50  ;;  %v806_v57 = vpop.f32.mrb[18].mxu0  ;;  %v934_v58 = vpop.f32.mrb[18].mxu1 }
 0x124   : > { %1496 = vst.msk [vmem:[%s2193_s23 + $0x1c] sm:$0xf] %vm1488_vm3, %v1801_v51  ;;  %1528 = vst.msk [vmem:[%s2193_s23 + $0x9c] sm:$0xf] %vm1488_vm3, %v1833_v52  ;;  %v1112_v59 = vadd.f32 %v2179_v17, %v1041_v53  ;;  %v1042_v61 = vmul.f32 %v2174_v15, %v806_v57  ;;  %v1074_v62 = vmul.f32 %v2174_v15, %v934_v58  ;;  %v808_v63 = vpop.f32.mrb[19].mxu0  ;;  %v936_v0 = vpop.f32.mrb[19].mxu1 }
 0x125   : > { %v1144_v60 = vadd.f32 %v2179_v17, %v1073_v54 }
 0x126   : > { %v1176_v1 = vmax.f32 %v1112_v59, 0.0  ;;  %v1113_v3 = vadd.f32 %v2179_v17, %v1042_v61  ;;  %v1145_v4 = vadd.f32 %v2179_v17, %v1074_v62 }
 0x127   : > { %v1208_v2 = vmax.f32 %v1144_v60, 0.0 }
 0x128   : > { %v1802_v5 = vpack.c.bf16 %v1176_v1, %v1176_v1  ;;  %v1177_v7 = vmax.f32 %v1113_v3, 0.0  ;;  %v1209_v8 = vmax.f32 %v1145_v4, 0.0 }
 0x129   : > { %v1834_v6 = vpack.c.bf16 %v1208_v2, %v1208_v2  ;;  %v811_v9 = vpop.f32.mrb[20].mxu0  ;;  %v939_v10 = vpop.f32.mrb[20].mxu1 }
 0x12a   : > { %1497 = vst.msk [vmem:[%s2193_s23 + $0x20] sm:$0xf] %vm1488_vm3, %v1802_v5  ;;  %v1803_v11 = vpack.c.bf16 %v1177_v7, %v1177_v7  ;;  %v1835_v12 = vpack.c.bf16 %v1209_v8, %v1209_v8  ;;  %v1043_v13 = vmul.f32 %v2174_v15, %v811_v9  ;;  %v1075_v14 = vmul.f32 %v2174_v15, %v939_v10  ;;  %v813_v16 = vpop.f32.mrb[21].mxu0  ;;  %v941_v18 = vpop.f32.mrb[21].mxu1 }
 0x12b   : > { %1529 = vst.msk [vmem:[%s2193_s23 + $0xa0] sm:$0xf] %vm1488_vm3, %v1834_v6  ;;  %v814_v19 = vpop.f32.mrb[22].mxu0  ;;  %v942_v20 = vpop.f32.mrb[22].mxu1 }
 0x12c   : > { %1498 = vst.msk [vmem:[%s2193_s23 + $0x24] sm:$0xf] %vm1488_vm3, %v1803_v11  ;;  %1530 = vst.msk [vmem:[%s2193_s23 + $0xa4] sm:$0xf] %vm1488_vm3, %v1835_v12  ;;  %v1114_v21 = vadd.f32 %v2179_v17, %v1043_v13  ;;  %v1146_v22 = vadd.f32 %v2179_v17, %v1075_v14  ;;  %v1044_v23 = vmul.f32 %v2174_v15, %v814_v19  ;;  %v816_v25 = vpop.f32.mrb[23].mxu0  ;;  %v944_v26 = vpop.f32.mrb[23].mxu1 }
 0x12d   : > { %v1076_v24 = vmul.f32 %v2174_v15, %v942_v20 }
 0x12e   : > { %v1178_v27 = vmax.f32 %v1114_v21, 0.0  ;;  %v1210_v28 = vmax.f32 %v1146_v22, 0.0  ;;  %v1115_v29 = vadd.f32 %v2179_v17, %v1044_v23 }
 0x12f   : > { %v1147_v30 = vadd.f32 %v2179_v17, %v1076_v24 }
 0x130   : > { %v1804_v31 = vpack.c.bf16 %v1178_v27, %v1178_v27  ;;  %v1836_v32 = vpack.c.bf16 %v1210_v28, %v1210_v28  ;;  %v1179_v33 = vmax.f32 %v1115_v29, 0.0 }
 0x131   : > { %v1211_v34 = vmax.f32 %v1147_v30, 0.0  ;;  %v819_v35 = vpop.f32.mrb[24].mxu0  ;;  %v947_v36 = vpop.f32.mrb[24].mxu1 }
 0x132   : > { %1499 = vst.msk [vmem:[%s2193_s23 + $0x28] sm:$0xf] %vm1488_vm3, %v1804_v31  ;;  %1531 = vst.msk [vmem:[%s2193_s23 + $0xa8] sm:$0xf] %vm1488_vm3, %v1836_v32  ;;  %v1805_v37 = vpack.c.bf16 %v1179_v33, %v1179_v33  ;;  %v1045_v39 = vmul.f32 %v2174_v15, %v819_v35  ;;  %v1077_v40 = vmul.f32 %v2174_v15, %v947_v36  ;;  %v821_v41 = vpop.f32.mrb[25].mxu0  ;;  %v949_v42 = vpop.f32.mrb[25].mxu1 }
 0x133   : > { %v1837_v38 = vpack.c.bf16 %v1211_v34, %v1211_v34  ;;  %v822_v43 = vpop.f32.mrb[26].mxu0  ;;  %v950_v44 = vpop.f32.mrb[26].mxu1 }
 0x134   : > { %1500 = vst.msk [vmem:[%s2193_s23 + $0x2c] sm:$0xf] %vm1488_vm3, %v1805_v37  ;;  %v1116_v45 = vadd.f32 %v2179_v17, %v1045_v39  ;;  %v1148_v46 = vadd.f32 %v2179_v17, %v1077_v40  ;;  %v1046_v47 = vmul.f32 %v2174_v15, %v822_v43  ;;  %v1078_v48 = vmul.f32 %v2174_v15, %v950_v44  ;;  %v824_v49 = vpop.f32.mrb[27].mxu0  ;;  %v952_v50 = vpop.f32.mrb[27].mxu1 }
 0x135   : > { %1532 = vst.msk [vmem:[%s2193_s23 + $0xac] sm:$0xf] %vm1488_vm3, %v1837_v38 }
 0x136   : > { %v1180_v51 = vmax.f32 %v1116_v45, 0.0  ;;  %v1212_v52 = vmax.f32 %v1148_v46, 0.0  ;;  %v1117_v53 = vadd.f32 %v2179_v17, %v1046_v47  ;;  %v1149_v54 = vadd.f32 %v2179_v17, %v1078_v48 }
 0x138   : > { %v1806_v55 = vpack.c.bf16 %v1180_v51, %v1180_v51  ;;  %v1838_v56 = vpack.c.bf16 %v1212_v52, %v1212_v52  ;;  %v1181_v57 = vmax.f32 %v1117_v53, 0.0  ;;  %v1213_v58 = vmax.f32 %v1149_v54, 0.0 }
 0x139   : > { %v827_v59 = vpop.f32.mrb[28].mxu0  ;;  %v955_v60 = vpop.f32.mrb[28].mxu1 }
 0x13a   : > { %1501 = vst.msk [vmem:[%s2193_s23 + $0x30] sm:$0xf] %vm1488_vm3, %v1806_v55  ;;  %1533 = vst.msk [vmem:[%s2193_s23 + $0xb0] sm:$0xf] %vm1488_vm3, %v1838_v56  ;;  %v1807_v61 = vpack.c.bf16 %v1181_v57, %v1181_v57  ;;  %v1839_v62 = vpack.c.bf16 %v1213_v58, %v1213_v58  ;;  %v1047_v63 = vmul.f32 %v2174_v15, %v827_v59  ;;  %v829_v1 = vpop.f32.mrb[29].mxu0  ;;  %v957_v2 = vpop.f32.mrb[29].mxu1 }
 0x13b   : > { %v1079_v0 = vmul.f32 %v2174_v15, %v955_v60  ;;  %v830_v3 = vpop.f32.mrb[30].mxu0  ;;  %v958_v4 = vpop.f32.mrb[30].mxu1 }
 0x13c   : > { %1502 = vst.msk [vmem:[%s2193_s23 + $0x34] sm:$0xf] %vm1488_vm3, %v1807_v61  ;;  %1534 = vst.msk [vmem:[%s2193_s23 + $0xb4] sm:$0xf] %vm1488_vm3, %v1839_v62  ;;  %v1118_v5 = vadd.f32 %v2179_v17, %v1047_v63  ;;  %v1048_v7 = vmul.f32 %v2174_v15, %v830_v3  ;;  %v1080_v8 = vmul.f32 %v2174_v15, %v958_v4  ;;  %v832_v9 = vpop.f32.mrb[31].mxu0  ;;  %v960_v10 = vpop.f32.mrb[31].mxu1 }
 0x13d   : > { %v1150_v6 = vadd.f32 %v2179_v17, %v1079_v0 }
 0x13e   : > { %v1182_v11 = vmax.f32 %v1118_v5, 0.0  ;;  %v1119_v13 = vadd.f32 %v2179_v17, %v1048_v7  ;;  %v1151_v14 = vadd.f32 %v2179_v17, %v1080_v8 }
 0x13f   : > { %v1214_v12 = vmax.f32 %v1150_v6, 0.0 }
 0x140   : > { %v1808_v16 = vpack.c.bf16 %v1182_v11, %v1182_v11  ;;  %v1183_v19 = vmax.f32 %v1119_v13, 0.0  ;;  %v1215_v20 = vmax.f32 %v1151_v14, 0.0 }
 0x141   : > { %v1840_v18 = vpack.c.bf16 %v1214_v12, %v1214_v12  ;;  %v835_v21 = vpop.f32.mrb[32].mxu0  ;;  %v963_v22 = vpop.f32.mrb[32].mxu1 }
 0x142   : > { %1503 = vst.msk [vmem:[%s2193_s23 + $0x38] sm:$0xf] %vm1488_vm3, %v1808_v16  ;;  %v1809_v23 = vpack.c.bf16 %v1183_v19, %v1183_v19  ;;  %v1841_v24 = vpack.c.bf16 %v1215_v20, %v1215_v20  ;;  %v1049_v25 = vmul.f32 %v2174_v15, %v835_v21  ;;  %v1081_v26 = vmul.f32 %v2174_v15, %v963_v22  ;;  %v837_v27 = vpop.f32.mrb[33].mxu0  ;;  %v965_v28 = vpop.f32.mrb[33].mxu1 }
 0x143   : > { %1535 = vst.msk [vmem:[%s2193_s23 + $0xb8] sm:$0xf] %vm1488_vm3, %v1840_v18  ;;  %v838_v29 = vpop.f32.mrb[34].mxu0  ;;  %v966_v30 = vpop.f32.mrb[34].mxu1 }
 0x144   : > { %1504 = vst.msk [vmem:[%s2193_s23 + $0x3c] sm:$0xf] %vm1488_vm3, %v1809_v23  ;;  %1536 = vst.msk [vmem:[%s2193_s23 + $0xbc] sm:$0xf] %vm1488_vm3, %v1841_v24  ;;  %v1120_v31 = vadd.f32 %v2179_v17, %v1049_v25  ;;  %v1152_v32 = vadd.f32 %v2179_v17, %v1081_v26  ;;  %v1050_v33 = vmul.f32 %v2174_v15, %v838_v29  ;;  %v840_v35 = vpop.f32.mrb[35].mxu0  ;;  %v968_v36 = vpop.f32.mrb[35].mxu1 }
 0x145   : > { %v1082_v34 = vmul.f32 %v2174_v15, %v966_v30 }
 0x146   : > { %v1184_v37 = vmax.f32 %v1120_v31, 0.0  ;;  %v1216_v38 = vmax.f32 %v1152_v32, 0.0  ;;  %v1121_v39 = vadd.f32 %v2179_v17, %v1050_v33 }
 0x147   : > { %v1153_v40 = vadd.f32 %v2179_v17, %v1082_v34 }
 0x148   : > { %v1810_v41 = vpack.c.bf16 %v1184_v37, %v1184_v37  ;;  %v1842_v42 = vpack.c.bf16 %v1216_v38, %v1216_v38  ;;  %v1185_v43 = vmax.f32 %v1121_v39, 0.0 }
 0x149   : > { %v1217_v44 = vmax.f32 %v1153_v40, 0.0  ;;  %v843_v45 = vpop.f32.mrb[36].mxu0  ;;  %v971_v46 = vpop.f32.mrb[36].mxu1 }
 0x14a   : > { %1505 = vst.msk [vmem:[%s2193_s23 + $0x40] sm:$0xf] %vm1488_vm3, %v1810_v41  ;;  %1537 = vst.msk [vmem:[%s2193_s23 + $0xc0] sm:$0xf] %vm1488_vm3, %v1842_v42  ;;  %v1811_v47 = vpack.c.bf16 %v1185_v43, %v1185_v43  ;;  %v1051_v49 = vmul.f32 %v2174_v15, %v843_v45  ;;  %v1083_v50 = vmul.f32 %v2174_v15, %v971_v46  ;;  %v845_v51 = vpop.f32.mrb[37].mxu0  ;;  %v973_v52 = vpop.f32.mrb[37].mxu1 }
 0x14b   : > { %v1843_v48 = vpack.c.bf16 %v1217_v44, %v1217_v44  ;;  %v846_v53 = vpop.f32.mrb[38].mxu0  ;;  %v974_v54 = vpop.f32.mrb[38].mxu1 }
 0x14c   : > { %1506 = vst.msk [vmem:[%s2193_s23 + $0x44] sm:$0xf] %vm1488_vm3, %v1811_v47  ;;  %v1122_v55 = vadd.f32 %v2179_v17, %v1051_v49  ;;  %v1154_v56 = vadd.f32 %v2179_v17, %v1083_v50  ;;  %v1052_v57 = vmul.f32 %v2174_v15, %v846_v53  ;;  %v1084_v58 = vmul.f32 %v2174_v15, %v974_v54  ;;  %v848_v59 = vpop.f32.mrb[39].mxu0  ;;  %v976_v60 = vpop.f32.mrb[39].mxu1 }
 0x14d   : > { %1538 = vst.msk [vmem:[%s2193_s23 + $0xc4] sm:$0xf] %vm1488_vm3, %v1843_v48 }
 0x14e   : > { %v1186_v61 = vmax.f32 %v1122_v55, 0.0  ;;  %v1218_v62 = vmax.f32 %v1154_v56, 0.0  ;;  %v1123_v63 = vadd.f32 %v2179_v17, %v1052_v57  ;;  %v1155_v0 = vadd.f32 %v2179_v17, %v1084_v58 }
 0x150   : > { %v1812_v1 = vpack.c.bf16 %v1186_v61, %v1186_v61  ;;  %v1844_v2 = vpack.c.bf16 %v1218_v62, %v1218_v62  ;;  %v1187_v3 = vmax.f32 %v1123_v63, 0.0  ;;  %v1219_v4 = vmax.f32 %v1155_v0, 0.0 }
 0x151   : > { %v851_v5 = vpop.f32.mrb[40].mxu0  ;;  %v979_v6 = vpop.f32.mrb[40].mxu1 }
 0x152   : > { %1507 = vst.msk [vmem:[%s2193_s23 + $0x48] sm:$0xf] %vm1488_vm3, %v1812_v1  ;;  %1539 = vst.msk [vmem:[%s2193_s23 + $0xc8] sm:$0xf] %vm1488_vm3, %v1844_v2  ;;  %v1813_v7 = vpack.c.bf16 %v1187_v3, %v1187_v3  ;;  %v1845_v8 = vpack.c.bf16 %v1219_v4, %v1219_v4  ;;  %v1053_v9 = vmul.f32 %v2174_v15, %v851_v5  ;;  %v853_v11 = vpop.f32.mrb[41].mxu0  ;;  %v981_v12 = vpop.f32.mrb[41].mxu1 }
 0x153   : > { %v1085_v10 = vmul.f32 %v2174_v15, %v979_v6  ;;  %v854_v13 = vpop.f32.mrb[42].mxu0  ;;  %v982_v14 = vpop.f32.mrb[42].mxu1 }
 0x154   : > { %1508 = vst.msk [vmem:[%s2193_s23 + $0x4c] sm:$0xf] %vm1488_vm3, %v1813_v7  ;;  %1540 = vst.msk [vmem:[%s2193_s23 + $0xcc] sm:$0xf] %vm1488_vm3, %v1845_v8  ;;  %v1124_v16 = vadd.f32 %v2179_v17, %v1053_v9  ;;  %v1054_v19 = vmul.f32 %v2174_v15, %v854_v13  ;;  %v1086_v20 = vmul.f32 %v2174_v15, %v982_v14  ;;  %v856_v21 = vpop.f32.mrb[43].mxu0  ;;  %v984_v22 = vpop.f32.mrb[43].mxu1 }
 0x155   : > { %v1156_v18 = vadd.f32 %v2179_v17, %v1085_v10 }
 0x156   : > { %v1188_v23 = vmax.f32 %v1124_v16, 0.0  ;;  %v1125_v25 = vadd.f32 %v2179_v17, %v1054_v19  ;;  %v1157_v26 = vadd.f32 %v2179_v17, %v1086_v20 }
 0x157   : > { %v1220_v24 = vmax.f32 %v1156_v18, 0.0 }
 0x158   : > { %v1814_v27 = vpack.c.bf16 %v1188_v23, %v1188_v23  ;;  %v1189_v29 = vmax.f32 %v1125_v25, 0.0  ;;  %v1221_v30 = vmax.f32 %v1157_v26, 0.0 }
 0x159   : > { %v1846_v28 = vpack.c.bf16 %v1220_v24, %v1220_v24  ;;  %v859_v31 = vpop.f32.mrb[44].mxu0  ;;  %v987_v32 = vpop.f32.mrb[44].mxu1 }
 0x15a   : > { %1509 = vst.msk [vmem:[%s2193_s23 + $0x50] sm:$0xf] %vm1488_vm3, %v1814_v27  ;;  %v1815_v33 = vpack.c.bf16 %v1189_v29, %v1189_v29  ;;  %v1847_v34 = vpack.c.bf16 %v1221_v30, %v1221_v30  ;;  %v1055_v35 = vmul.f32 %v2174_v15, %v859_v31  ;;  %v1087_v36 = vmul.f32 %v2174_v15, %v987_v32  ;;  %v861_v37 = vpop.f32.mrb[45].mxu0  ;;  %v989_v38 = vpop.f32.mrb[45].mxu1 }
 0x15b   : > { %1541 = vst.msk [vmem:[%s2193_s23 + $0xd0] sm:$0xf] %vm1488_vm3, %v1846_v28  ;;  %v862_v39 = vpop.f32.mrb[46].mxu0  ;;  %v990_v40 = vpop.f32.mrb[46].mxu1 }
 0x15c   : > { %1510 = vst.msk [vmem:[%s2193_s23 + $0x54] sm:$0xf] %vm1488_vm3, %v1815_v33  ;;  %1542 = vst.msk [vmem:[%s2193_s23 + $0xd4] sm:$0xf] %vm1488_vm3, %v1847_v34  ;;  %v1126_v41 = vadd.f32 %v2179_v17, %v1055_v35  ;;  %v1158_v42 = vadd.f32 %v2179_v17, %v1087_v36  ;;  %v1056_v43 = vmul.f32 %v2174_v15, %v862_v39  ;;  %v864_v45 = vpop.f32.mrb[47].mxu0  ;;  %v992_v46 = vpop.f32.mrb[47].mxu1 }
 0x15d   : > { %v1088_v44 = vmul.f32 %v2174_v15, %v990_v40 }
 0x15e   : > { %v1190_v47 = vmax.f32 %v1126_v41, 0.0  ;;  %v1222_v48 = vmax.f32 %v1158_v42, 0.0  ;;  %v1127_v49 = vadd.f32 %v2179_v17, %v1056_v43 }
 0x15f   : > { %v1159_v50 = vadd.f32 %v2179_v17, %v1088_v44 }
 0x160   : > { %v1816_v51 = vpack.c.bf16 %v1190_v47, %v1190_v47  ;;  %v1848_v52 = vpack.c.bf16 %v1222_v48, %v1222_v48  ;;  %v1191_v53 = vmax.f32 %v1127_v49, 0.0 }
 0x161   : > { %v1223_v54 = vmax.f32 %v1159_v50, 0.0  ;;  %v867_v55 = vpop.f32.mrb[48].mxu0  ;;  %v995_v56 = vpop.f32.mrb[48].mxu1 }
 0x162   : > { %1511 = vst.msk [vmem:[%s2193_s23 + $0x58] sm:$0xf] %vm1488_vm3, %v1816_v51  ;;  %1543 = vst.msk [vmem:[%s2193_s23 + $0xd8] sm:$0xf] %vm1488_vm3, %v1848_v52  ;;  %v1817_v57 = vpack.c.bf16 %v1191_v53, %v1191_v53  ;;  %v1057_v59 = vmul.f32 %v2174_v15, %v867_v55  ;;  %v1089_v60 = vmul.f32 %v2174_v15, %v995_v56  ;;  %v869_v61 = vpop.f32.mrb[49].mxu0  ;;  %v997_v62 = vpop.f32.mrb[49].mxu1 }
 0x163   : > { %v1849_v58 = vpack.c.bf16 %v1223_v54, %v1223_v54  ;;  %v870_v63 = vpop.f32.mrb[50].mxu0  ;;  %v998_v0 = vpop.f32.mrb[50].mxu1 }
 0x164   : > { %1512 = vst.msk [vmem:[%s2193_s23 + $0x5c] sm:$0xf] %vm1488_vm3, %v1817_v57  ;;  %v1128_v1 = vadd.f32 %v2179_v17, %v1057_v59  ;;  %v1160_v2 = vadd.f32 %v2179_v17, %v1089_v60  ;;  %v1058_v3 = vmul.f32 %v2174_v15, %v870_v63  ;;  %v1090_v4 = vmul.f32 %v2174_v15, %v998_v0  ;;  %v872_v5 = vpop.f32.mrb[51].mxu0  ;;  %v1000_v6 = vpop.f32.mrb[51].mxu1 }
 0x165   : > { %1544 = vst.msk [vmem:[%s2193_s23 + $0xdc] sm:$0xf] %vm1488_vm3, %v1849_v58 }
 0x166   : > { %v1192_v7 = vmax.f32 %v1128_v1, 0.0  ;;  %v1224_v8 = vmax.f32 %v1160_v2, 0.0  ;;  %v1129_v9 = vadd.f32 %v2179_v17, %v1058_v3  ;;  %v1161_v10 = vadd.f32 %v2179_v17, %v1090_v4 }
 0x168   : > { %v1818_v11 = vpack.c.bf16 %v1192_v7, %v1192_v7  ;;  %v1850_v12 = vpack.c.bf16 %v1224_v8, %v1224_v8  ;;  %v1193_v13 = vmax.f32 %v1129_v9, 0.0  ;;  %v1225_v14 = vmax.f32 %v1161_v10, 0.0 }
 0x169   : > { %v875_v16 = vpop.f32.mrb[52].mxu0  ;;  %v1003_v18 = vpop.f32.mrb[52].mxu1 }
 0x16a   : > { %1513 = vst.msk [vmem:[%s2193_s23 + $0x60] sm:$0xf] %vm1488_vm3, %v1818_v11  ;;  %1545 = vst.msk [vmem:[%s2193_s23 + $0xe0] sm:$0xf] %vm1488_vm3, %v1850_v12  ;;  %v1819_v19 = vpack.c.bf16 %v1193_v13, %v1193_v13  ;;  %v1851_v20 = vpack.c.bf16 %v1225_v14, %v1225_v14  ;;  %v1059_v21 = vmul.f32 %v2174_v15, %v875_v16  ;;  %v877_v23 = vpop.f32.mrb[53].mxu0  ;;  %v1005_v24 = vpop.f32.mrb[53].mxu1 }
 0x16b   : > { %v1091_v22 = vmul.f32 %v2174_v15, %v1003_v18  ;;  %v878_v25 = vpop.f32.mrb[54].mxu0  ;;  %v1006_v26 = vpop.f32.mrb[54].mxu1 }
 0x16c   : > { %1514 = vst.msk [vmem:[%s2193_s23 + $0x64] sm:$0xf] %vm1488_vm3, %v1819_v19  ;;  %1546 = vst.msk [vmem:[%s2193_s23 + $0xe4] sm:$0xf] %vm1488_vm3, %v1851_v20  ;;  %v1130_v27 = vadd.f32 %v2179_v17, %v1059_v21  ;;  %v1060_v29 = vmul.f32 %v2174_v15, %v878_v25  ;;  %v1092_v30 = vmul.f32 %v2174_v15, %v1006_v26  ;;  %v880_v31 = vpop.f32.mrb[55].mxu0  ;;  %v1008_v32 = vpop.f32.mrb[55].mxu1 }
 0x16d   : > { %v1162_v28 = vadd.f32 %v2179_v17, %v1091_v22 }
 0x16e   : > { %v1194_v33 = vmax.f32 %v1130_v27, 0.0  ;;  %v1131_v35 = vadd.f32 %v2179_v17, %v1060_v29  ;;  %v1163_v36 = vadd.f32 %v2179_v17, %v1092_v30 }
 0x16f   : > { %v1226_v34 = vmax.f32 %v1162_v28, 0.0 }
 0x170   : > { %v1820_v37 = vpack.c.bf16 %v1194_v33, %v1194_v33  ;;  %v1195_v39 = vmax.f32 %v1131_v35, 0.0  ;;  %v1227_v40 = vmax.f32 %v1163_v36, 0.0 }
 0x171   : > { %v1852_v38 = vpack.c.bf16 %v1226_v34, %v1226_v34  ;;  %v883_v41 = vpop.f32.mrb[56].mxu0  ;;  %v1011_v42 = vpop.f32.mrb[56].mxu1 }
 0x172   : > { %1515 = vst.msk [vmem:[%s2193_s23 + $0x68] sm:$0xf] %vm1488_vm3, %v1820_v37  ;;  %v1821_v43 = vpack.c.bf16 %v1195_v39, %v1195_v39  ;;  %v1853_v44 = vpack.c.bf16 %v1227_v40, %v1227_v40  ;;  %v1061_v45 = vmul.f32 %v2174_v15, %v883_v41  ;;  %v1093_v46 = vmul.f32 %v2174_v15, %v1011_v42  ;;  %v885_v47 = vpop.f32.mrb[57].mxu0  ;;  %v1013_v48 = vpop.f32.mrb[57].mxu1 }
 0x173   : > { %1547 = vst.msk [vmem:[%s2193_s23 + $0xe8] sm:$0xf] %vm1488_vm3, %v1852_v38  ;;  %v886_v49 = vpop.f32.mrb[58].mxu0  ;;  %v1014_v50 = vpop.f32.mrb[58].mxu1 }
 0x174   : > { %1516 = vst.msk [vmem:[%s2193_s23 + $0x6c] sm:$0xf] %vm1488_vm3, %v1821_v43  ;;  %1548 = vst.msk [vmem:[%s2193_s23 + $0xec] sm:$0xf] %vm1488_vm3, %v1853_v44  ;;  %v1132_v51 = vadd.f32 %v2179_v17, %v1061_v45  ;;  %v1164_v52 = vadd.f32 %v2179_v17, %v1093_v46  ;;  %v1062_v53 = vmul.f32 %v2174_v15, %v886_v49  ;;  %v888_v55 = vpop.f32.mrb[59].mxu0  ;;  %v1016_v56 = vpop.f32.mrb[59].mxu1 }
 0x175   : > { %v1094_v54 = vmul.f32 %v2174_v15, %v1014_v50 }
 0x176   : > { %v1196_v57 = vmax.f32 %v1132_v51, 0.0  ;;  %v1228_v58 = vmax.f32 %v1164_v52, 0.0  ;;  %v1133_v59 = vadd.f32 %v2179_v17, %v1062_v53 }
 0x177   : > { %v1165_v60 = vadd.f32 %v2179_v17, %v1094_v54 }
 0x178   : > { %v1822_v61 = vpack.c.bf16 %v1196_v57, %v1196_v57  ;;  %v1854_v62 = vpack.c.bf16 %v1228_v58, %v1228_v58  ;;  %v1197_v63 = vmax.f32 %v1133_v59, 0.0 }
 0x179   : > { %v1229_v0 = vmax.f32 %v1165_v60, 0.0  ;;  %v891_v1 = vpop.f32.mrb[60].mxu0  ;;  %v1019_v2 = vpop.f32.mrb[60].mxu1 }
 0x17a   : > { %1517 = vst.msk [vmem:[%s2193_s23 + $0x70] sm:$0xf] %vm1488_vm3, %v1822_v61  ;;  %1549 = vst.msk [vmem:[%s2193_s23 + $0xf0] sm:$0xf] %vm1488_vm3, %v1854_v62  ;;  %v1823_v3 = vpack.c.bf16 %v1197_v63, %v1197_v63  ;;  %v1063_v5 = vmul.f32 %v2174_v15, %v891_v1  ;;  %v1095_v6 = vmul.f32 %v2174_v15, %v1019_v2  ;;  %v893_v7 = vpop.f32.mrb[61].mxu0  ;;  %v1021_v8 = vpop.f32.mrb[61].mxu1 }
 0x17b   : > { %v1855_v4 = vpack.c.bf16 %v1229_v0, %v1229_v0  ;;  %v894_v9 = vpop.f32.mrb[62].mxu0  ;;  %v1022_v10 = vpop.f32.mrb[62].mxu1 }
 0x17c   : > { %1518 = vst.msk [vmem:[%s2193_s23 + $0x74] sm:$0xf] %vm1488_vm3, %v1823_v3  ;;  %v1134_v11 = vadd.f32 %v2179_v17, %v1063_v5  ;;  %v1166_v12 = vadd.f32 %v2179_v17, %v1095_v6  ;;  %v1064_v13 = vmul.f32 %v2174_v15, %v894_v9  ;;  %v1096_v14 = vmul.f32 %v2174_v15, %v1022_v10  ;;  %v896_v16 = vpop.f32.mrb[63].mxu0  ;;  %v1024_v18 = vpop.f32.mrb[63].mxu1 }
 0x17d   : > { %1550 = vst.msk [vmem:[%s2193_s23 + $0xf4] sm:$0xf] %vm1488_vm3, %v1855_v4 }
 0x17e   : > { %v1198_v19 = vmax.f32 %v1134_v11, 0.0  ;;  %v1230_v20 = vmax.f32 %v1166_v12, 0.0  ;;  %v1135_v21 = vadd.f32 %v2179_v17, %v1064_v13  ;;  %v1167_v22 = vadd.f32 %v2179_v17, %v1096_v14 }
 0x180   : > { %v1824_v23 = vpack.c.bf16 %v1198_v19, %v1198_v19  ;;  %v1856_v24 = vpack.c.bf16 %v1230_v20, %v1230_v20  ;;  %v1199_v25 = vmax.f32 %v1135_v21, 0.0  ;;  %v1231_v26 = vmax.f32 %v1167_v22, 0.0 }
 0x182   : > { %1519 = vst.msk [vmem:[%s2193_s23 + $0x78] sm:$0xf] %vm1488_vm3, %v1824_v23  ;;  %1551 = vst.msk [vmem:[%s2193_s23 + $0xf8] sm:$0xf] %vm1488_vm3, %v1856_v24  ;;  %v1825_v27 = vpack.c.bf16 %v1199_v25, %v1199_v25  ;;  %v1857_v28 = vpack.c.bf16 %v1231_v26, %v1231_v26 }
 0x184   : > { %1520 = vst.msk [vmem:[%s2193_s23 + $0x7c] sm:$0xf] %vm1488_vm3, %v1825_v27  ;;  %1552 = vst.msk [vmem:[%s2193_s23 + $0xfc] sm:$0xf] %vm1488_vm3, %v1857_v28 }
 0x185 PF: > { %s14_s15 = sadd.s32 1, %s2000_s15  }
 0x186   : > { %p11_p4 = scmp.ge.s32.totalorder %s14_s15, 6  }
 0x188   :  { %13 = sbr.rel (!%p11_p4) target bundleno = 1 (0x1), region = 66 }

// kernel: forward.31
= control target key start
LH: loop header
LB: loop body
LE: loop exit
PB: predicated region body
PF: predicated region fallthrough
CT: control target
= control target key end

     0   :  { %vm406_vm0 = vcmask 261120   ;;  %vm1254_vm1 = vcmask 257024   ;;  %s2457_s3 = inlined_call_operand.vmem [shape: bf16[32,32], index: 3, kind: input, shape index: {}]   ;;  %s2458_s0 = inlined_call_operand.vmem [shape: bf16[512,32], index: 0, kind: input, shape index: {}]   ;;  %s2459_s1 = inlined_call_operand.vmem [shape: f32[1,32], index: 1, kind: input, shape index: {}]   ;;  %s2460_s2 = inlined_call_operand.vmem [shape: f32[1,32], index: 2, kind: input, shape index: {}]   ;;  %s2461_s4 = inlined_call_operand.vmem [shape: f32[1,32], index: 4, kind: input, shape index: {}]   ;;  %s2462_s5 = inlined_call_operand.vmem [shape: f32[1,32], index: 5, kind: input, shape index: {}]   ;;  %s2463_s6 = inlined_call_operand.vmem [shape: bf16[512,32], index: 6, kind: output, shape index: {}]  }
   0x1   :  { %v1754_v0 = vld [vmem:[%s2457_s3] sm:$0xff]   ;;  %v1755_v1 = vld [vmem:[%s2457_s3 + $0x8] sm:$0xff]   ;;  %v1618_v14 = vld [vmem:[%s2458_s0 + $0x10] sm:$0xff]  }
   0x2   :  { %1682 = vmatprep.subr.bf16.mxu0 %v1754_v0  ;;  %1750 = vmatprep.subr.bf16.mxu1 %v1754_v0  ;;  %v1490_v2 = vld [vmem:[%s2458_s0] sm:$0xff]   ;;  %v1617_v7 = vld [vmem:[%s2458_s0 + $0x8] sm:$0xff]   ;;  %v1499_v26 = vunpack.c.l.bf16 %v1618_v14  ;;  %v1634_v35 = vld [vmem:[%s2458_s0 + $0x90] sm:$0xff]   ;;  %v1500_v44 = vunpack.c.h.bf16 %v1618_v14 }
   0x3   :  { %v1803_v3 = vld [vmem:[%s2459_s1] ss:$0 sm:$0xff]  ;;  %1683 = vmatpush3.bf16.msra.mxu0 %v1754_v0  ;;  %1752 = vmatpush3.bf16.msra.mxu1 %v1754_v0  ;;  %v1491_v4 = vunpack.c.l.bf16 %v1490_v2  ;;  %v1492_v5 = vunpack.c.h.bf16 %v1490_v2  ;;  %v1633_v8 = vld [vmem:[%s2458_s0 + $0x88] sm:$0xff]   ;;  %v1495_v12 = vunpack.c.l.bf16 %v1617_v7  ;;  %v1496_v13 = vunpack.c.h.bf16 %v1617_v7  ;;  %v1619_v40 = vld [vmem:[%s2458_s0 + $0x18] sm:$0xff]  }
   0x4   :  { %v1632_v6 = vld [vmem:[%s2458_s0 + $0x80] sm:$0xff]   ;;  %1684 = vmatprep.subr.bf16.mxu0 %v1755_v1  ;;  %1751 = vmatprep.subr.bf16.mxu1 %v1755_v1  ;;  %v1559_v17 = vunpack.c.l.bf16 %v1633_v8  ;;  %v1560_v18 = vunpack.c.h.bf16 %v1633_v8  ;;  %v1635_v45 = vld [vmem:[%s2458_s0 + $0x98] sm:$0xff]   ;;  %v163_v48 = vmul.f32 %v1499_v26, %v1803_v3  ;;  %v1563_v49 = vunpack.c.l.bf16 %v1634_v35 }
   0x5   :  { %v1817_v9 = vld [vmem:[%s2460_s2] ss:$0 sm:$0xff]  ;;  %v1555_v10 = vunpack.c.l.bf16 %v1632_v6  ;;  %v1556_v11 = vunpack.c.h.bf16 %v1632_v6  ;;  %v159_v15 = vmul.f32 %v1491_v4, %v1803_v3  ;;  %v160_v16 = vmul.f32 %v1492_v5, %v1803_v3 }
   0x6   :  { %v161_v21 = vmul.f32 %v1495_v12, %v1803_v3  ;;  %v162_v22 = vmul.f32 %v1496_v13, %v1803_v3  ;;  %v193_v25 = vmul.f32 %v1559_v17, %v1803_v3  ;;  %v194_v33 = vmul.f32 %v1560_v18, %v1803_v3  ;;  %v1620_v62 = vld [vmem:[%s2458_s0 + $0x20] sm:$0xff]  }
   0x7   :  { %v191_v19 = vmul.f32 %v1555_v10, %v1803_v3  ;;  %v192_v20 = vmul.f32 %v1556_v11, %v1803_v3  ;;  %1685 = vmatpush3.bf16.msra.mxu0 %v1755_v1  ;;  %1753 = vmatpush3.bf16.msra.mxu1 %v1755_v1  ;;  %v230_v23 = vadd.f32 %v1817_v9, %v159_v15  ;;  %v1564_v52 = vunpack.c.h.bf16 %v1634_v35  ;;  %v1636_v13 = vld [vmem:[%s2458_s0 + $0xa0] sm:$0xff]  }
   0x8   :  { %v231_v24 = vadd.f32 %v1817_v9, %v160_v16  ;;  %v232_v29 = vadd.f32 %v1817_v9, %v161_v21  ;;  %v233_v30 = vadd.f32 %v1817_v9, %v162_v22  ;;  %v264_v34 = vadd.f32 %v1817_v9, %v193_v25  ;;  %v1621_v22 = vld [vmem:[%s2458_s0 + $0x28] sm:$0xff]  }
   0x9   :  { %v262_v27 = vadd.f32 %v1817_v9, %v191_v19  ;;  %v263_v28 = vadd.f32 %v1817_v9, %v192_v20  ;;  %v294_v31 = vmax.f32 %v230_v23, 0.0  ;;  %v265_v42 = vadd.f32 %v1817_v9, %v194_v33 }
   0xa   :  { %v295_v32 = vmax.f32 %v231_v24, 0.0  ;;  %v296_v38 = vmax.f32 %v232_v29, 0.0  ;;  %v297_v39 = vmax.f32 %v233_v30, 0.0  ;;  %v328_v43 = vmax.f32 %v264_v34, 0.0 }
   0xb   :  { %v326_v36 = vmax.f32 %v262_v27, 0.0  ;;  %v327_v37 = vmax.f32 %v263_v28, 0.0  ;;  %v329_v50 = vmax.f32 %v265_v42, 0.0  ;;  %v164_v51 = vmul.f32 %v1500_v44, %v1803_v3  ;;  %v1637_v27 = vld [vmem:[%s2458_s0 + $0xa8] sm:$0xff]  }
   0xc   :  { %v358_v41 = vpack.c.bf16 %v295_v32, %v294_v31  ;;  %v359_v47 = vpack.c.bf16 %v297_v39, %v296_v38  ;;  %v1503_v53 = vunpack.c.l.bf16 %v1619_v40  ;;  %v234_v54 = vadd.f32 %v1817_v9, %v163_v48 }
   0xd   :  { %v374_v46 = vpack.c.bf16 %v327_v37, %v326_v36  ;;  %v195_v55 = vmul.f32 %v1563_v49, %v1803_v3  ;;  %v1504_v56 = vunpack.c.h.bf16 %v1619_v40  ;;  %v1567_v57 = vunpack.c.l.bf16 %v1635_v45  ;;  %v1622_v36 = vld [vmem:[%s2458_s0 + $0x30] sm:$0xff]  }
   0xe   :  { %1686 = vmatprep.mubr.msk.bf16.mxu0 %vm406_vm0, %v358_v41  ;;  %v375_v58 = vpack.c.bf16 %v329_v50, %v328_v43  ;;  %v235_v59 = vadd.f32 %v1817_v9, %v164_v51  ;;  %v196_v60 = vmul.f32 %v1564_v52, %v1803_v3  ;;  %v165_v61 = vmul.f32 %v1503_v53, %v1803_v3  ;;  %v1638_v53 = vld [vmem:[%s2458_s0 + $0xb0] sm:$0xff]  }
   0xf   :  { %1718 = vmatprep.mubr.msk.bf16.mxu1 %vm406_vm0, %v374_v46  ;;  %1687 = vmatmul.mubr.msk.bf16.vlgmr.msra.gmra.mrb[0].mxu0 %vm406_vm0, %v359_v47  ;;  %v298_v63 = vmax.f32 %v234_v54, 0.0  ;;  %v266_v0 = vadd.f32 %v1817_v9, %v195_v55  ;;  %v166_v1 = vmul.f32 %v1504_v56, %v1803_v3  ;;  %v1568_v2 = vunpack.c.h.bf16 %v1635_v45 }
  0x10   :  { %1719 = vmatmul.mubr.msk.bf16.vlgmr.msra.gmra.mrb[0].mxu1 %vm406_vm0, %v375_v58  ;;  %v299_v4 = vmax.f32 %v235_v59, 0.0  ;;  %v267_v5 = vadd.f32 %v1817_v9, %v196_v60  ;;  %v236_v6 = vadd.f32 %v1817_v9, %v165_v61  ;;  %v197_v7 = vmul.f32 %v1567_v57, %v1803_v3  ;;  %v1623_v58 = vld [vmem:[%s2458_s0 + $0x38] sm:$0xff]  }
  0x11   :  { %v330_v8 = vmax.f32 %v266_v0, 0.0  ;;  %v237_v10 = vadd.f32 %v1817_v9, %v166_v1  ;;  %v198_v11 = vmul.f32 %v1568_v2, %v1803_v3  ;;  %v1507_v12 = vunpack.c.l.bf16 %v1620_v62 }
  0x12   :  { %v360_v14 = vpack.c.bf16 %v299_v4, %v298_v63  ;;  %v331_v15 = vmax.f32 %v267_v5, 0.0  ;;  %v300_v16 = vmax.f32 %v236_v6, 0.0  ;;  %v268_v17 = vadd.f32 %v1817_v9, %v197_v7  ;;  %v1639_v4 = vld [vmem:[%s2458_s0 + $0xb8] sm:$0xff]  }
  0x13   :  { %v301_v18 = vmax.f32 %v237_v10, 0.0  ;;  %v269_v19 = vadd.f32 %v1817_v9, %v198_v11  ;;  %v1508_v20 = vunpack.c.h.bf16 %v1620_v62  ;;  %v167_v21 = vmul.f32 %v1507_v12, %v1803_v3 }
  0x14   :  { %1690 = vmatprep.mubr.msk.bf16.mxu0 %vm406_vm0, %v360_v14  ;;  %v376_v23 = vpack.c.bf16 %v331_v15, %v330_v8  ;;  %v332_v24 = vmax.f32 %v268_v17, 0.0  ;;  %v1571_v25 = vunpack.c.l.bf16 %v1636_v13  ;;  %v1572_v26 = vunpack.c.h.bf16 %v1636_v13 }
  0x15   :  { %v361_v28 = vpack.c.bf16 %v301_v18, %v300_v16  ;;  %v333_v29 = vmax.f32 %v269_v19, 0.0  ;;  %v168_v30 = vmul.f32 %v1508_v20, %v1803_v3  ;;  %v238_v31 = vadd.f32 %v1817_v9, %v167_v21  ;;  %v1624_v18 = vld [vmem:[%s2458_s0 + $0x40] sm:$0xff]  }
  0x16   :  { %1722 = vmatprep.mubr.msk.bf16.mxu1 %vm406_vm0, %v376_v23  ;;  %v199_v32 = vmul.f32 %v1571_v25, %v1803_v3  ;;  %v200_v33 = vmul.f32 %v1572_v26, %v1803_v3  ;;  %v1511_v34 = vunpack.c.l.bf16 %v1621_v22  ;;  %v1512_v35 = vunpack.c.h.bf16 %v1621_v22 }
  0x17   :  { %1691 = vmatmul.mubr.msk.bf16.gmra.mrb[4].mxu0 %vm406_vm0, %v361_v28  ;;  %v377_v37 = vpack.c.bf16 %v333_v29, %v332_v24  ;;  %v239_v38 = vadd.f32 %v1817_v9, %v168_v30  ;;  %v302_v39 = vmax.f32 %v238_v31, 0.0  ;;  %v1575_v40 = vunpack.c.l.bf16 %v1637_v27 }
  0x18   :  { %v270_v41 = vadd.f32 %v1817_v9, %v199_v32  ;;  %v271_v42 = vadd.f32 %v1817_v9, %v200_v33  ;;  %v169_v43 = vmul.f32 %v1511_v34, %v1803_v3  ;;  %v170_v44 = vmul.f32 %v1512_v35, %v1803_v3 }
  0x19   :  { %1723 = vmatmul.mubr.msk.bf16.gmra.mrb[4].mxu1 %vm406_vm0, %v377_v37  ;;  %v303_v45 = vmax.f32 %v239_v38, 0.0  ;;  %v1576_v46 = vunpack.c.h.bf16 %v1637_v27  ;;  %v201_v47 = vmul.f32 %v1575_v40, %v1803_v3  ;;  %v1515_v48 = vunpack.c.l.bf16 %v1622_v36  ;;  %v1640_v27 = vld [vmem:[%s2458_s0 + $0xc0] sm:$0xff]   ;;  %v1625_v40 = vld [vmem:[%s2458_s0 + $0x48] sm:$0xff]  }
  0x1a   :  { %v334_v49 = vmax.f32 %v270_v41, 0.0  ;;  %v335_v50 = vmax.f32 %v271_v42, 0.0  ;;  %v240_v51 = vadd.f32 %v1817_v9, %v169_v43  ;;  %v241_v52 = vadd.f32 %v1817_v9, %v170_v44 }
  0x1b   :  { %v362_v54 = vpack.c.bf16 %v303_v45, %v302_v39  ;;  %v202_v55 = vmul.f32 %v1576_v46, %v1803_v3  ;;  %v272_v56 = vadd.f32 %v1817_v9, %v201_v47  ;;  %v1516_v57 = vunpack.c.h.bf16 %v1622_v36  ;;  %v1641_v45 = vld [vmem:[%s2458_s0 + $0xc8] sm:$0xff]  }
  0x1c   :  { %v378_v59 = vpack.c.bf16 %v335_v50, %v334_v49  ;;  %v304_v60 = vmax.f32 %v240_v51, 0.0  ;;  %v305_v61 = vmax.f32 %v241_v52, 0.0  ;;  %v171_v62 = vmul.f32 %v1515_v48, %v1803_v3 }
  0x1d   :  { %1694 = vmatprep.mubr.msk.bf16.mxu0 %vm406_vm0, %v362_v54  ;;  %v273_v63 = vadd.f32 %v1817_v9, %v202_v55  ;;  %v336_v0 = vmax.f32 %v272_v56, 0.0  ;;  %v172_v1 = vmul.f32 %v1516_v57, %v1803_v3  ;;  %v1579_v2 = vunpack.c.l.bf16 %v1638_v53 }
  0x1e   :  { %1726 = vmatprep.mubr.msk.bf16.mxu1 %vm406_vm0, %v378_v59  ;;  %v363_v5 = vpack.c.bf16 %v305_v61, %v304_v60  ;;  %v242_v6 = vadd.f32 %v1817_v9, %v171_v62  ;;  %v1580_v7 = vunpack.c.h.bf16 %v1638_v53  ;;  %v1519_v8 = vunpack.c.l.bf16 %v1623_v58 }
  0x1f   :  { %v337_v10 = vmax.f32 %v273_v63, 0.0  ;;  %v243_v11 = vadd.f32 %v1817_v9, %v172_v1  ;;  %v203_v12 = vmul.f32 %v1579_v2, %v1803_v3  ;;  %v1520_v13 = vunpack.c.h.bf16 %v1623_v58  ;;  %v1626_v58 = vld [vmem:[%s2458_s0 + $0x50] sm:$0xff]  }
  0x20   :  { %1695 = vmatmul.mubr.msk.bf16.gmra.mrb[8].mxu0 %vm406_vm0, %v363_v5  ;;  %v306_v14 = vmax.f32 %v242_v6, 0.0  ;;  %v204_v15 = vmul.f32 %v1580_v7, %v1803_v3  ;;  %v173_v16 = vmul.f32 %v1519_v8, %v1803_v3  ;;  %v1583_v17 = vunpack.c.l.bf16 %v1639_v4  ;;  %v1642_v8 = vld [vmem:[%s2458_s0 + $0xd0] sm:$0xff]  }
  0x21   :  { %v379_v19 = vpack.c.bf16 %v337_v10, %v336_v0  ;;  %v307_v20 = vmax.f32 %v243_v11, 0.0  ;;  %v274_v21 = vadd.f32 %v1817_v9, %v203_v12  ;;  %v174_v22 = vmul.f32 %v1520_v13, %v1803_v3 }
  0x22   :  { %v275_v23 = vadd.f32 %v1817_v9, %v204_v15  ;;  %v244_v24 = vadd.f32 %v1817_v9, %v173_v16  ;;  %v1584_v25 = vunpack.c.h.bf16 %v1639_v4  ;;  %v205_v26 = vmul.f32 %v1583_v17, %v1803_v3 }
  0x23   :  { %1727 = vmatmul.mubr.msk.bf16.gmra.mrb[8].mxu1 %vm406_vm0, %v379_v19  ;;  %v364_v28 = vpack.c.bf16 %v307_v20, %v306_v14  ;;  %v338_v29 = vmax.f32 %v274_v21, 0.0  ;;  %v245_v30 = vadd.f32 %v1817_v9, %v174_v22  ;;  %v1523_v31 = vunpack.c.l.bf16 %v1624_v18  ;;  %v1627_v14 = vld [vmem:[%s2458_s0 + $0x58] sm:$0xff]  }
  0x24   :  { %v339_v32 = vmax.f32 %v275_v23, 0.0  ;;  %v308_v33 = vmax.f32 %v244_v24, 0.0  ;;  %v206_v34 = vmul.f32 %v1584_v25, %v1803_v3  ;;  %v276_v35 = vadd.f32 %v1817_v9, %v205_v26  ;;  %v1643_v23 = vld [vmem:[%s2458_s0 + $0xd8] sm:$0xff]  }
  0x25   :  { %1698 = vmatprep.mubr.msk.bf16.mxu0 %vm406_vm0, %v364_v28  ;;  %v309_v36 = vmax.f32 %v245_v30, 0.0  ;;  %v1524_v37 = vunpack.c.h.bf16 %v1624_v18  ;;  %v175_v38 = vmul.f32 %v1523_v31, %v1803_v3  ;;  %v1587_v39 = vunpack.c.l.bf16 %v1640_v27 }
  0x26   :  { %v380_v41 = vpack.c.bf16 %v339_v32, %v338_v29  ;;  %v277_v42 = vadd.f32 %v1817_v9, %v206_v34  ;;  %v340_v43 = vmax.f32 %v276_v35, 0.0  ;;  %v1588_v44 = vunpack.c.h.bf16 %v1640_v27 }
  0x27   :  { %v365_v46 = vpack.c.bf16 %v309_v36, %v308_v33  ;;  %v176_v47 = vmul.f32 %v1524_v37, %v1803_v3  ;;  %v246_v48 = vadd.f32 %v1817_v9, %v175_v38  ;;  %v207_v49 = vmul.f32 %v1587_v39, %v1803_v3  ;;  %v1628_v36 = vld [vmem:[%s2458_s0 + $0x60] sm:$0xff]  }
  0x28   :  { %1730 = vmatprep.mubr.msk.bf16.mxu1 %vm406_vm0, %v380_v41  ;;  %v341_v50 = vmax.f32 %v277_v42, 0.0  ;;  %v208_v51 = vmul.f32 %v1588_v44, %v1803_v3  ;;  %v1527_v52 = vunpack.c.l.bf16 %v1625_v40  ;;  %v1528_v53 = vunpack.c.h.bf16 %v1625_v40 }
  0x29   :  { %1699 = vmatmul.mubr.msk.bf16.gmra.mrb[12].mxu0 %vm406_vm0, %v365_v46  ;;  %v247_v54 = vadd.f32 %v1817_v9, %v176_v47  ;;  %v310_v55 = vmax.f32 %v246_v48, 0.0  ;;  %v278_v56 = vadd.f32 %v1817_v9, %v207_v49  ;;  %v1591_v57 = vunpack.c.l.bf16 %v1641_v45 }
  0x2a   :  { %v381_v59 = vpack.c.bf16 %v341_v50, %v340_v43  ;;  %v279_v60 = vadd.f32 %v1817_v9, %v208_v51  ;;  %v177_v61 = vmul.f32 %v1527_v52, %v1803_v3  ;;  %v178_v62 = vmul.f32 %v1528_v53, %v1803_v3 }
  0x2b   :  { %v311_v63 = vmax.f32 %v247_v54, 0.0  ;;  %v342_v0 = vmax.f32 %v278_v56, 0.0  ;;  %v1592_v1 = vunpack.c.h.bf16 %v1641_v45  ;;  %v209_v2 = vmul.f32 %v1591_v57, %v1803_v3  ;;  %v1644_v45 = vld [vmem:[%s2458_s0 + $0xe0] sm:$0xff]  }
  0x2c   :  { %1731 = vmatmul.mubr.msk.bf16.gmra.mrb[12].mxu1 %vm406_vm0, %v381_v59  ;;  %v343_v4 = vmax.f32 %v279_v60, 0.0  ;;  %v248_v5 = vadd.f32 %v1817_v9, %v177_v61  ;;  %v249_v6 = vadd.f32 %v1817_v9, %v178_v62  ;;  %v1531_v7 = vunpack.c.l.bf16 %v1626_v58 }
  0x2d   :  { %v366_v10 = vpack.c.bf16 %v311_v63, %v310_v55  ;;  %v210_v11 = vmul.f32 %v1592_v1, %v1803_v3  ;;  %v280_v12 = vadd.f32 %v1817_v9, %v209_v2  ;;  %v1532_v13 = vunpack.c.h.bf16 %v1626_v58  ;;  %v1629_v58 = vld [vmem:[%s2458_s0 + $0x68] sm:$0xff]  }
  0x2e   :  { %v382_v15 = vpack.c.bf16 %v343_v4, %v342_v0  ;;  %v312_v16 = vmax.f32 %v248_v5, 0.0  ;;  %v313_v17 = vmax.f32 %v249_v6, 0.0  ;;  %v179_v18 = vmul.f32 %v1531_v7, %v1803_v3  ;;  %v1645_v63 = vld [vmem:[%s2458_s0 + $0xe8] sm:$0xff]  }
  0x2f   :  { %1702 = vmatprep.mubr.msk.bf16.mxu0 %vm406_vm0, %v366_v10  ;;  %v281_v19 = vadd.f32 %v1817_v9, %v210_v11  ;;  %v344_v20 = vmax.f32 %v280_v12, 0.0  ;;  %v180_v21 = vmul.f32 %v1532_v13, %v1803_v3  ;;  %v1595_v22 = vunpack.c.l.bf16 %v1642_v8 }
  0x30   :  { %1734 = vmatprep.mubr.msk.bf16.mxu1 %vm406_vm0, %v382_v15  ;;  %v367_v24 = vpack.c.bf16 %v313_v17, %v312_v16  ;;  %v250_v25 = vadd.f32 %v1817_v9, %v179_v18  ;;  %v1596_v26 = vunpack.c.h.bf16 %v1642_v8  ;;  %v1535_v27 = vunpack.c.l.bf16 %v1627_v14 }
  0x31   :  { %v345_v28 = vmax.f32 %v281_v19, 0.0  ;;  %v251_v29 = vadd.f32 %v1817_v9, %v180_v21  ;;  %v211_v30 = vmul.f32 %v1595_v22, %v1803_v3  ;;  %v1536_v31 = vunpack.c.h.bf16 %v1627_v14  ;;  %v1630_v14 = vld [vmem:[%s2458_s0 + $0x70] sm:$0xff]  }
  0x32   :  { %1703 = vmatmul.mubr.msk.bf16.gmra.mrb[16].mxu0 %vm406_vm0, %v367_v24  ;;  %v314_v32 = vmax.f32 %v250_v25, 0.0  ;;  %v212_v33 = vmul.f32 %v1596_v26, %v1803_v3  ;;  %v181_v34 = vmul.f32 %v1535_v27, %v1803_v3  ;;  %v1599_v35 = vunpack.c.l.bf16 %v1643_v23  ;;  %v1646_v27 = vld [vmem:[%s2458_s0 + $0xf0] sm:$0xff]  }
  0x33   :  { %v383_v37 = vpack.c.bf16 %v345_v28, %v344_v20  ;;  %v315_v38 = vmax.f32 %v251_v29, 0.0  ;;  %v282_v39 = vadd.f32 %v1817_v9, %v211_v30  ;;  %v182_v40 = vmul.f32 %v1536_v31, %v1803_v3 }
  0x34   :  { %v283_v41 = vadd.f32 %v1817_v9, %v212_v33  ;;  %v252_v42 = vadd.f32 %v1817_v9, %v181_v34  ;;  %v1600_v43 = vunpack.c.h.bf16 %v1643_v23  ;;  %v213_v44 = vmul.f32 %v1599_v35, %v1803_v3 }
  0x35   :  { %1735 = vmatmul.mubr.msk.bf16.gmra.mrb[16].mxu1 %vm406_vm0, %v383_v37  ;;  %v368_v46 = vpack.c.bf16 %v315_v38, %v314_v32  ;;  %v346_v47 = vmax.f32 %v282_v39, 0.0  ;;  %v253_v48 = vadd.f32 %v1817_v9, %v182_v40  ;;  %v1539_v49 = vunpack.c.l.bf16 %v1628_v36  ;;  %v1631_v32 = vld [vmem:[%s2458_s0 + $0x78] sm:$0xff]  }
  0x36   :  { %v347_v50 = vmax.f32 %v283_v41, 0.0  ;;  %v316_v51 = vmax.f32 %v252_v42, 0.0  ;;  %v214_v52 = vmul.f32 %v1600_v43, %v1803_v3  ;;  %v284_v53 = vadd.f32 %v1817_v9, %v213_v44  ;;  %v1647_v41 = vld [vmem:[%s2458_s0 + $0xf8] sm:$0xff]  }
  0x37   :  { %1706 = vmatprep.mubr.msk.bf16.mxu0 %vm406_vm0, %v368_v46  ;;  %v317_v54 = vmax.f32 %v253_v48, 0.0  ;;  %v1540_v55 = vunpack.c.h.bf16 %v1628_v36  ;;  %v183_v56 = vmul.f32 %v1539_v49, %v1803_v3  ;;  %v1603_v57 = vunpack.c.l.bf16 %v1644_v45 }
  0x38   :  { %v384_v59 = vpack.c.bf16 %v347_v50, %v346_v47  ;;  %v285_v60 = vadd.f32 %v1817_v9, %v214_v52  ;;  %v348_v61 = vmax.f32 %v284_v53, 0.0  ;;  %v1604_v62 = vunpack.c.h.bf16 %v1644_v45 }
  0x39   :  { %v369_v0 = vpack.c.bf16 %v317_v54, %v316_v51  ;;  %v184_v1 = vmul.f32 %v1540_v55, %v1803_v3  ;;  %v254_v2 = vadd.f32 %v1817_v9, %v183_v56  ;;  %v215_v4 = vmul.f32 %v1603_v57, %v1803_v3 }
  0x3a   :  { %1738 = vmatprep.mubr.msk.bf16.mxu1 %vm406_vm0, %v384_v59  ;;  %v349_v5 = vmax.f32 %v285_v60, 0.0  ;;  %v216_v6 = vmul.f32 %v1604_v62, %v1803_v3  ;;  %v1543_v7 = vunpack.c.l.bf16 %v1629_v58  ;;  %v1544_v8 = vunpack.c.h.bf16 %v1629_v58 }
  0x3b   :  { %1707 = vmatmul.mubr.msk.bf16.gmra.mrb[20].mxu0 %vm406_vm0, %v369_v0  ;;  %v255_v10 = vadd.f32 %v1817_v9, %v184_v1  ;;  %v318_v11 = vmax.f32 %v254_v2, 0.0  ;;  %v286_v12 = vadd.f32 %v1817_v9, %v215_v4  ;;  %v1607_v13 = vunpack.c.l.bf16 %v1645_v63 }
  0x3c   :  { %v385_v15 = vpack.c.bf16 %v349_v5, %v348_v61  ;;  %v287_v16 = vadd.f32 %v1817_v9, %v216_v6  ;;  %v185_v17 = vmul.f32 %v1543_v7, %v1803_v3  ;;  %v186_v18 = vmul.f32 %v1544_v8, %v1803_v3 }
  0x3d   :  { %v319_v19 = vmax.f32 %v255_v10, 0.0  ;;  %v350_v20 = vmax.f32 %v286_v12, 0.0  ;;  %v1608_v21 = vunpack.c.h.bf16 %v1645_v63  ;;  %v217_v22 = vmul.f32 %v1607_v13, %v1803_v3 }
  0x3e   :  { %1739 = vmatmul.mubr.msk.bf16.gmra.mrb[20].mxu1 %vm406_vm0, %v385_v15  ;;  %v351_v23 = vmax.f32 %v287_v16, 0.0  ;;  %v256_v24 = vadd.f32 %v1817_v9, %v185_v17  ;;  %v257_v25 = vadd.f32 %v1817_v9, %v186_v18  ;;  %v1547_v26 = vunpack.c.l.bf16 %v1630_v14 }
  0x3f   :  { %v370_v28 = vpack.c.bf16 %v319_v19, %v318_v11  ;;  %v218_v29 = vmul.f32 %v1608_v21, %v1803_v3  ;;  %v288_v30 = vadd.f32 %v1817_v9, %v217_v22  ;;  %v1548_v31 = vunpack.c.h.bf16 %v1630_v14 }
  0x40   :  { %v386_v33 = vpack.c.bf16 %v351_v23, %v350_v20  ;;  %v320_v34 = vmax.f32 %v256_v24, 0.0  ;;  %v321_v35 = vmax.f32 %v257_v25, 0.0  ;;  %v187_v36 = vmul.f32 %v1547_v26, %v1803_v3 }
  0x41   :  { %1710 = vmatprep.mubr.msk.bf16.mxu0 %vm406_vm0, %v370_v28  ;;  %v289_v37 = vadd.f32 %v1817_v9, %v218_v29  ;;  %v352_v38 = vmax.f32 %v288_v30, 0.0  ;;  %v188_v39 = vmul.f32 %v1548_v31, %v1803_v3  ;;  %v1611_v40 = vunpack.c.l.bf16 %v1646_v27 }
  0x42   :  { %1742 = vmatprep.mubr.msk.bf16.mxu1 %vm406_vm0, %v386_v33  ;;  %v371_v42 = vpack.c.bf16 %v321_v35, %v320_v34  ;;  %v258_v43 = vadd.f32 %v1817_v9, %v187_v36  ;;  %v1612_v44 = vunpack.c.h.bf16 %v1646_v27  ;;  %v1551_v45 = vunpack.c.l.bf16 %v1631_v32 }
  0x43   :  { %v353_v46 = vmax.f32 %v289_v37, 0.0  ;;  %v259_v47 = vadd.f32 %v1817_v9, %v188_v39  ;;  %v219_v48 = vmul.f32 %v1611_v40, %v1803_v3  ;;  %v1552_v49 = vunpack.c.h.bf16 %v1631_v32 }
  0x44   :  { %1711 = vmatmul.mubr.msk.bf16.gmra.mrb[24].mxu0 %vm406_vm0, %v371_v42  ;;  %v322_v50 = vmax.f32 %v258_v43, 0.0  ;;  %v220_v51 = vmul.f32 %v1612_v44, %v1803_v3  ;;  %v189_v52 = vmul.f32 %v1551_v45, %v1803_v3  ;;  %v1615_v53 = vunpack.c.l.bf16 %v1647_v41 }
  0x45   :  { %v387_v54 = vpack.c.bf16 %v353_v46, %v352_v38  ;;  %v323_v55 = vmax.f32 %v259_v47, 0.0  ;;  %v290_v56 = vadd.f32 %v1817_v9, %v219_v48  ;;  %v190_v57 = vmul.f32 %v1552_v49, %v1803_v3 }
  0x46   :  { %v291_v58 = vadd.f32 %v1817_v9, %v220_v51  ;;  %v260_v59 = vadd.f32 %v1817_v9, %v189_v52  ;;  %v1616_v60 = vunpack.c.h.bf16 %v1647_v41  ;;  %v221_v61 = vmul.f32 %v1615_v53, %v1803_v3 }
  0x47   :  { %1743 = vmatmul.mubr.msk.bf16.gmra.mrb[24].mxu1 %vm406_vm0, %v387_v54  ;;  %v372_v62 = vpack.c.bf16 %v323_v55, %v322_v50  ;;  %v354_v63 = vmax.f32 %v290_v56, 0.0  ;;  %v261_v0 = vadd.f32 %v1817_v9, %v190_v57 }
  0x48   :  { %v355_v1 = vmax.f32 %v291_v58, 0.0  ;;  %v324_v2 = vmax.f32 %v260_v59, 0.0  ;;  %v222_v4 = vmul.f32 %v1616_v60, %v1803_v3  ;;  %v292_v5 = vadd.f32 %v1817_v9, %v221_v61  ;;  %v2066_v3 = vld [vmem:[%s2461_s4] ss:$0 sm:$0xff] }
  0x49   :  { %1714 = vmatprep.mubr.msk.bf16.mxu0 %vm406_vm0, %v372_v62  ;;  %v325_v6 = vmax.f32 %v261_v0, 0.0 }
  0x4a   :  { %v388_v7 = vpack.c.bf16 %v355_v1, %v354_v63  ;;  %v293_v8 = vadd.f32 %v1817_v9, %v222_v4  ;;  %v356_v10 = vmax.f32 %v292_v5, 0.0  ;;  %v2071_v9 = vld [vmem:[%s2462_s5] ss:$0 sm:$0xff] }
  0x4b   :  { %v373_v11 = vpack.c.bf16 %v325_v6, %v324_v2 }
  0x4c   :  { %1746 = vmatprep.mubr.msk.bf16.mxu1 %vm406_vm0, %v388_v7  ;;  %v357_v12 = vmax.f32 %v293_v8, 0.0 }
  0x4d   :  { %1715 = vmatmul.mubr.msk.bf16.gmra.mrb[28].mxu0 %vm406_vm0, %v373_v11 }
  0x4e   :  { %v389_v13 = vpack.c.bf16 %v357_v12, %v356_v10 }
  0x50   :  { %1747 = vmatmul.mubr.msk.bf16.gmra.mrb[28].mxu1 %vm406_vm0, %v389_v13 }
  0xe2   :  { %v1688_v14 = vpop.f32.mrb[0].mxu0 }
  0xe3   :  { %v801_v15 = vmul.f32 %v1688_v14, %v2066_v3  ;;  %v537_v16 = vpop.f32.mrb[1].mxu0  ;;  %v1720_v20 = vpop.f32.mrb[0].mxu1 }
  0xe4   :  { %v799_v17 = vmul.f32 %v2066_v3, %v537_v16  ;;  %v1689_v18 = vpop.f32.mrb[2].mxu0  ;;  %v833_v23 = vmul.f32 %v1720_v20, %v2066_v3  ;;  %v665_v25 = vpop.f32.mrb[1].mxu1 }
  0xe5   :  { %v872_v19 = vadd.f32 %v2071_v9, %v801_v15  ;;  %v802_v21 = vmul.f32 %v1689_v18, %v2066_v3  ;;  %v540_v22 = vpop.f32.mrb[3].mxu0  ;;  %v831_v28 = vmul.f32 %v2066_v3, %v665_v25  ;;  %v1721_v30 = vpop.f32.mrb[2].mxu1 }
  0xe6   :  { %v870_v24 = vadd.f32 %v2071_v9, %v799_v17  ;;  %v800_v26 = vmul.f32 %v2066_v3, %v540_v22  ;;  %v904_v31 = vadd.f32 %v2071_v9, %v833_v23  ;;  %v834_v33 = vmul.f32 %v1721_v30, %v2066_v3  ;;  %v668_v35 = vpop.f32.mrb[3].mxu1 }
  0xe7   :  { %v936_v27 = vmax.f32 %v872_v19, 0.0  ;;  %v873_v29 = vadd.f32 %v2071_v9, %v802_v21  ;;  %v902_v37 = vadd.f32 %v2071_v9, %v831_v28  ;;  %v832_v39 = vmul.f32 %v2066_v3, %v668_v35 }
  0xe8   :  { %v934_v32 = vmax.f32 %v870_v24, 0.0  ;;  %v871_v34 = vadd.f32 %v2071_v9, %v800_v26  ;;  %v968_v40 = vmax.f32 %v904_v31, 0.0  ;;  %v905_v42 = vadd.f32 %v2071_v9, %v834_v33 }
  0xe9   :  { %v1427_v36 = vpack.c.bf16 %v936_v27, %v936_v27  ;;  %v937_v38 = vmax.f32 %v873_v29, 0.0  ;;  %v966_v44 = vmax.f32 %v902_v37, 0.0  ;;  %v903_v46 = vadd.f32 %v2071_v9, %v832_v39 }
  0xea   :  { %v1425_v41 = vpack.c.bf16 %v934_v32, %v934_v32  ;;  %v935_v43 = vmax.f32 %v871_v34, 0.0  ;;  %v1459_v47 = vpack.c.bf16 %v968_v40, %v968_v40  ;;  %v969_v48 = vmax.f32 %v905_v42, 0.0  ;;  %v1692_v50 = vpop.f32.mrb[4].mxu0 }
  0xeb   :  { %1257 = vst.msk [vmem:[%s2463_s6 + $0x8] sm:$0xf] %vm1254_vm1, %v1427_v36  ;;  %v1428_v45 = vpack.c.bf16 %v937_v38, %v937_v38  ;;  %v1457_v51 = vpack.c.bf16 %v966_v44, %v966_v44  ;;  %v967_v52 = vmax.f32 %v903_v46, 0.0  ;;  %v805_v53 = vmul.f32 %v1692_v50, %v2066_v3  ;;  %v553_v54 = vpop.f32.mrb[5].mxu0 }
  0xec   :  { %1255 = vst.msk [vmem:[%s2463_s6] sm:$0xf] %vm1254_vm1, %v1425_v41  ;;  %v1426_v49 = vpack.c.bf16 %v935_v43, %v935_v43  ;;  %1289 = vst.msk [vmem:[%s2463_s6 + $0x88] sm:$0xf] %vm1254_vm1, %v1459_v47  ;;  %v1460_v55 = vpack.c.bf16 %v969_v48, %v969_v48  ;;  %v1724_v56 = vpop.f32.mrb[4].mxu1  ;;  %v803_v57 = vmul.f32 %v2066_v3, %v553_v54  ;;  %v1693_v58 = vpop.f32.mrb[6].mxu0 }
  0xed   :  { %1258 = vst.msk [vmem:[%s2463_s6 + $0xc] sm:$0xf] %vm1254_vm1, %v1428_v45  ;;  %1287 = vst.msk [vmem:[%s2463_s6 + $0x80] sm:$0xf] %vm1254_vm1, %v1457_v51  ;;  %v1458_v59 = vpack.c.bf16 %v967_v52, %v967_v52  ;;  %v876_v60 = vadd.f32 %v2071_v9, %v805_v53  ;;  %v837_v61 = vmul.f32 %v1724_v56, %v2066_v3  ;;  %v681_v62 = vpop.f32.mrb[5].mxu1  ;;  %v556_v0 = vpop.f32.mrb[7].mxu0 }
  0xee   :  { %1256 = vst.msk [vmem:[%s2463_s6 + $0x4] sm:$0xf] %vm1254_vm1, %v1426_v49  ;;  %v806_v63 = vmul.f32 %v1693_v58, %v2066_v3  ;;  %1290 = vst.msk [vmem:[%s2463_s6 + $0x8c] sm:$0xf] %vm1254_vm1, %v1460_v55  ;;  %v874_v1 = vadd.f32 %v2071_v9, %v803_v57  ;;  %v835_v2 = vmul.f32 %v2066_v3, %v681_v62  ;;  %v1725_v4 = vpop.f32.mrb[6].mxu1 }
  0xef   :  { %v804_v5 = vmul.f32 %v2066_v3, %v556_v0  ;;  %1288 = vst.msk [vmem:[%s2463_s6 + $0x84] sm:$0xf] %vm1254_vm1, %v1458_v59  ;;  %v940_v6 = vmax.f32 %v876_v60, 0.0  ;;  %v908_v7 = vadd.f32 %v2071_v9, %v837_v61  ;;  %v838_v10 = vmul.f32 %v1725_v4, %v2066_v3  ;;  %v684_v11 = vpop.f32.mrb[7].mxu1 }
  0xf0   :  { %v877_v8 = vadd.f32 %v2071_v9, %v806_v63  ;;  %v938_v12 = vmax.f32 %v874_v1, 0.0  ;;  %v906_v13 = vadd.f32 %v2071_v9, %v835_v2  ;;  %v836_v15 = vmul.f32 %v2066_v3, %v684_v11 }
  0xf1   :  { %v875_v14 = vadd.f32 %v2071_v9, %v804_v5  ;;  %v1431_v16 = vpack.c.bf16 %v940_v6, %v940_v6  ;;  %v972_v17 = vmax.f32 %v908_v7, 0.0  ;;  %v909_v19 = vadd.f32 %v2071_v9, %v838_v10 }
  0xf2   :  { %v941_v18 = vmax.f32 %v877_v8, 0.0  ;;  %v1429_v20 = vpack.c.bf16 %v938_v12, %v938_v12  ;;  %v970_v21 = vmax.f32 %v906_v13, 0.0  ;;  %v907_v23 = vadd.f32 %v2071_v9, %v836_v15 }
  0xf3   :  { %v939_v22 = vmax.f32 %v875_v14, 0.0  ;;  %1261 = vst.msk [vmem:[%s2463_s6 + $0x18] sm:$0xf] %vm1254_vm1, %v1431_v16  ;;  %v1463_v24 = vpack.c.bf16 %v972_v17, %v972_v17  ;;  %v973_v26 = vmax.f32 %v909_v19, 0.0  ;;  %v1696_v27 = vpop.f32.mrb[8].mxu0 }
  0xf4   :  { %v1432_v25 = vpack.c.bf16 %v941_v18, %v941_v18  ;;  %1259 = vst.msk [vmem:[%s2463_s6 + $0x10] sm:$0xf] %vm1254_vm1, %v1429_v20  ;;  %v1461_v28 = vpack.c.bf16 %v970_v21, %v970_v21  ;;  %v971_v30 = vmax.f32 %v907_v23, 0.0  ;;  %v809_v31 = vmul.f32 %v1696_v27, %v2066_v3  ;;  %v569_v32 = vpop.f32.mrb[9].mxu0 }
  0xf5   :  { %v1430_v29 = vpack.c.bf16 %v939_v22, %v939_v22  ;;  %1293 = vst.msk [vmem:[%s2463_s6 + $0x98] sm:$0xf] %vm1254_vm1, %v1463_v24  ;;  %v1464_v33 = vpack.c.bf16 %v973_v26, %v973_v26  ;;  %v807_v34 = vmul.f32 %v2066_v3, %v569_v32  ;;  %v1697_v35 = vpop.f32.mrb[10].mxu0 }
  0xf6   :  { %1262 = vst.msk [vmem:[%s2463_s6 + $0x1c] sm:$0xf] %vm1254_vm1, %v1432_v25  ;;  %1291 = vst.msk [vmem:[%s2463_s6 + $0x90] sm:$0xf] %vm1254_vm1, %v1461_v28  ;;  %v1462_v36 = vpack.c.bf16 %v971_v30, %v971_v30  ;;  %v880_v37 = vadd.f32 %v2071_v9, %v809_v31  ;;  %v1728_v38 = vpop.f32.mrb[8].mxu1  ;;  %v810_v39 = vmul.f32 %v1697_v35, %v2066_v3  ;;  %v572_v40 = vpop.f32.mrb[11].mxu0 }
  0xf7   :  { %1260 = vst.msk [vmem:[%s2463_s6 + $0x14] sm:$0xf] %vm1254_vm1, %v1430_v29  ;;  %1294 = vst.msk [vmem:[%s2463_s6 + $0x9c] sm:$0xf] %vm1254_vm1, %v1464_v33  ;;  %v841_v41 = vmul.f32 %v1728_v38, %v2066_v3  ;;  %v878_v42 = vadd.f32 %v2071_v9, %v807_v34  ;;  %v697_v43 = vpop.f32.mrb[9].mxu1  ;;  %v808_v44 = vmul.f32 %v2066_v3, %v572_v40 }
  0xf8   :  { %1292 = vst.msk [vmem:[%s2463_s6 + $0x94] sm:$0xf] %vm1254_vm1, %v1462_v36  ;;  %v944_v45 = vmax.f32 %v880_v37, 0.0  ;;  %v839_v46 = vmul.f32 %v2066_v3, %v697_v43  ;;  %v881_v47 = vadd.f32 %v2071_v9, %v810_v39  ;;  %v1729_v48 = vpop.f32.mrb[10].mxu1 }
  0xf9   :  { %v912_v49 = vadd.f32 %v2071_v9, %v841_v41  ;;  %v942_v50 = vmax.f32 %v878_v42, 0.0  ;;  %v842_v51 = vmul.f32 %v1729_v48, %v2066_v3  ;;  %v879_v52 = vadd.f32 %v2071_v9, %v808_v44  ;;  %v700_v53 = vpop.f32.mrb[11].mxu1 }
  0xfa   :  { %v1435_v54 = vpack.c.bf16 %v944_v45, %v944_v45  ;;  %v910_v55 = vadd.f32 %v2071_v9, %v839_v46  ;;  %v945_v56 = vmax.f32 %v881_v47, 0.0  ;;  %v840_v57 = vmul.f32 %v2066_v3, %v700_v53 }
  0xfb   :  { %v976_v58 = vmax.f32 %v912_v49, 0.0  ;;  %v1433_v59 = vpack.c.bf16 %v942_v50, %v942_v50  ;;  %v913_v60 = vadd.f32 %v2071_v9, %v842_v51  ;;  %v943_v61 = vmax.f32 %v879_v52, 0.0 }
  0xfc   :  { %1265 = vst.msk [vmem:[%s2463_s6 + $0x28] sm:$0xf] %vm1254_vm1, %v1435_v54  ;;  %v974_v62 = vmax.f32 %v910_v55, 0.0  ;;  %v1436_v63 = vpack.c.bf16 %v945_v56, %v945_v56  ;;  %v911_v0 = vadd.f32 %v2071_v9, %v840_v57  ;;  %v1700_v1 = vpop.f32.mrb[12].mxu0 }
  0xfd   :  { %v1467_v2 = vpack.c.bf16 %v976_v58, %v976_v58  ;;  %1263 = vst.msk [vmem:[%s2463_s6 + $0x20] sm:$0xf] %vm1254_vm1, %v1433_v59  ;;  %v977_v4 = vmax.f32 %v913_v60, 0.0  ;;  %v1434_v5 = vpack.c.bf16 %v943_v61, %v943_v61  ;;  %v813_v6 = vmul.f32 %v1700_v1, %v2066_v3  ;;  %v585_v7 = vpop.f32.mrb[13].mxu0 }
  0xfe   :  { %v1465_v8 = vpack.c.bf16 %v974_v62, %v974_v62  ;;  %1266 = vst.msk [vmem:[%s2463_s6 + $0x2c] sm:$0xf] %vm1254_vm1, %v1436_v63  ;;  %v975_v10 = vmax.f32 %v911_v0, 0.0  ;;  %v811_v11 = vmul.f32 %v2066_v3, %v585_v7  ;;  %v1701_v12 = vpop.f32.mrb[14].mxu0 }
  0xff   :  { %1297 = vst.msk [vmem:[%s2463_s6 + $0xa8] sm:$0xf] %vm1254_vm1, %v1467_v2  ;;  %v1468_v13 = vpack.c.bf16 %v977_v4, %v977_v4  ;;  %1264 = vst.msk [vmem:[%s2463_s6 + $0x24] sm:$0xf] %vm1254_vm1, %v1434_v5  ;;  %v884_v14 = vadd.f32 %v2071_v9, %v813_v6  ;;  %v1732_v15 = vpop.f32.mrb[12].mxu1  ;;  %v814_v16 = vmul.f32 %v1701_v12, %v2066_v3  ;;  %v588_v17 = vpop.f32.mrb[15].mxu0 }
 0x100   :  { %1295 = vst.msk [vmem:[%s2463_s6 + $0xa0] sm:$0xf] %vm1254_vm1, %v1465_v8  ;;  %v1466_v18 = vpack.c.bf16 %v975_v10, %v975_v10  ;;  %v845_v19 = vmul.f32 %v1732_v15, %v2066_v3  ;;  %v882_v20 = vadd.f32 %v2071_v9, %v811_v11  ;;  %v713_v21 = vpop.f32.mrb[13].mxu1  ;;  %v812_v22 = vmul.f32 %v2066_v3, %v588_v17 }
 0x101   :  { %1298 = vst.msk [vmem:[%s2463_s6 + $0xac] sm:$0xf] %vm1254_vm1, %v1468_v13  ;;  %v948_v23 = vmax.f32 %v884_v14, 0.0  ;;  %v843_v24 = vmul.f32 %v2066_v3, %v713_v21  ;;  %v885_v25 = vadd.f32 %v2071_v9, %v814_v16  ;;  %v1733_v26 = vpop.f32.mrb[14].mxu1 }
 0x102   :  { %1296 = vst.msk [vmem:[%s2463_s6 + $0xa4] sm:$0xf] %vm1254_vm1, %v1466_v18  ;;  %v916_v27 = vadd.f32 %v2071_v9, %v845_v19  ;;  %v946_v28 = vmax.f32 %v882_v20, 0.0  ;;  %v846_v29 = vmul.f32 %v1733_v26, %v2066_v3  ;;  %v883_v30 = vadd.f32 %v2071_v9, %v812_v22  ;;  %v716_v31 = vpop.f32.mrb[15].mxu1 }
 0x103   :  { %v1439_v32 = vpack.c.bf16 %v948_v23, %v948_v23  ;;  %v914_v33 = vadd.f32 %v2071_v9, %v843_v24  ;;  %v949_v34 = vmax.f32 %v885_v25, 0.0  ;;  %v844_v35 = vmul.f32 %v2066_v3, %v716_v31 }
 0x104   :  { %v980_v36 = vmax.f32 %v916_v27, 0.0  ;;  %v1437_v37 = vpack.c.bf16 %v946_v28, %v946_v28  ;;  %v917_v38 = vadd.f32 %v2071_v9, %v846_v29  ;;  %v947_v39 = vmax.f32 %v883_v30, 0.0 }
 0x105   :  { %1269 = vst.msk [vmem:[%s2463_s6 + $0x38] sm:$0xf] %vm1254_vm1, %v1439_v32  ;;  %v978_v40 = vmax.f32 %v914_v33, 0.0  ;;  %v1440_v41 = vpack.c.bf16 %v949_v34, %v949_v34  ;;  %v915_v42 = vadd.f32 %v2071_v9, %v844_v35  ;;  %v1704_v43 = vpop.f32.mrb[16].mxu0 }
 0x106   :  { %v1471_v44 = vpack.c.bf16 %v980_v36, %v980_v36  ;;  %1267 = vst.msk [vmem:[%s2463_s6 + $0x30] sm:$0xf] %vm1254_vm1, %v1437_v37  ;;  %v981_v45 = vmax.f32 %v917_v38, 0.0  ;;  %v1438_v46 = vpack.c.bf16 %v947_v39, %v947_v39  ;;  %v817_v47 = vmul.f32 %v1704_v43, %v2066_v3  ;;  %v601_v48 = vpop.f32.mrb[17].mxu0 }
 0x107   :  { %v1469_v49 = vpack.c.bf16 %v978_v40, %v978_v40  ;;  %1270 = vst.msk [vmem:[%s2463_s6 + $0x3c] sm:$0xf] %vm1254_vm1, %v1440_v41  ;;  %v979_v50 = vmax.f32 %v915_v42, 0.0  ;;  %v815_v51 = vmul.f32 %v2066_v3, %v601_v48  ;;  %v1705_v52 = vpop.f32.mrb[18].mxu0 }
 0x108   :  { %1301 = vst.msk [vmem:[%s2463_s6 + $0xb8] sm:$0xf] %vm1254_vm1, %v1471_v44  ;;  %v1472_v53 = vpack.c.bf16 %v981_v45, %v981_v45  ;;  %1268 = vst.msk [vmem:[%s2463_s6 + $0x34] sm:$0xf] %vm1254_vm1, %v1438_v46  ;;  %v888_v54 = vadd.f32 %v2071_v9, %v817_v47  ;;  %v1736_v55 = vpop.f32.mrb[16].mxu1  ;;  %v818_v56 = vmul.f32 %v1705_v52, %v2066_v3  ;;  %v604_v57 = vpop.f32.mrb[19].mxu0 }
 0x109   :  { %1299 = vst.msk [vmem:[%s2463_s6 + $0xb0] sm:$0xf] %vm1254_vm1, %v1469_v49  ;;  %v1470_v58 = vpack.c.bf16 %v979_v50, %v979_v50  ;;  %v849_v59 = vmul.f32 %v1736_v55, %v2066_v3  ;;  %v886_v60 = vadd.f32 %v2071_v9, %v815_v51  ;;  %v729_v61 = vpop.f32.mrb[17].mxu1  ;;  %v816_v62 = vmul.f32 %v2066_v3, %v604_v57 }
 0x10a   :  { %1302 = vst.msk [vmem:[%s2463_s6 + $0xbc] sm:$0xf] %vm1254_vm1, %v1472_v53  ;;  %v952_v63 = vmax.f32 %v888_v54, 0.0  ;;  %v847_v0 = vmul.f32 %v2066_v3, %v729_v61  ;;  %v889_v1 = vadd.f32 %v2071_v9, %v818_v56  ;;  %v1737_v2 = vpop.f32.mrb[18].mxu1 }
 0x10b   :  { %1300 = vst.msk [vmem:[%s2463_s6 + $0xb4] sm:$0xf] %vm1254_vm1, %v1470_v58  ;;  %v920_v4 = vadd.f32 %v2071_v9, %v849_v59  ;;  %v950_v5 = vmax.f32 %v886_v60, 0.0  ;;  %v850_v6 = vmul.f32 %v1737_v2, %v2066_v3  ;;  %v887_v7 = vadd.f32 %v2071_v9, %v816_v62  ;;  %v732_v8 = vpop.f32.mrb[19].mxu1 }
 0x10c   :  { %v1443_v10 = vpack.c.bf16 %v952_v63, %v952_v63  ;;  %v918_v11 = vadd.f32 %v2071_v9, %v847_v0  ;;  %v953_v12 = vmax.f32 %v889_v1, 0.0  ;;  %v848_v13 = vmul.f32 %v2066_v3, %v732_v8 }
 0x10d   :  { %v984_v14 = vmax.f32 %v920_v4, 0.0  ;;  %v1441_v15 = vpack.c.bf16 %v950_v5, %v950_v5  ;;  %v921_v16 = vadd.f32 %v2071_v9, %v850_v6  ;;  %v951_v17 = vmax.f32 %v887_v7, 0.0 }
 0x10e   :  { %1273 = vst.msk [vmem:[%s2463_s6 + $0x48] sm:$0xf] %vm1254_vm1, %v1443_v10  ;;  %v982_v18 = vmax.f32 %v918_v11, 0.0  ;;  %v1444_v19 = vpack.c.bf16 %v953_v12, %v953_v12  ;;  %v919_v20 = vadd.f32 %v2071_v9, %v848_v13  ;;  %v1708_v21 = vpop.f32.mrb[20].mxu0 }
 0x10f   :  { %v1475_v22 = vpack.c.bf16 %v984_v14, %v984_v14  ;;  %1271 = vst.msk [vmem:[%s2463_s6 + $0x40] sm:$0xf] %vm1254_vm1, %v1441_v15  ;;  %v985_v23 = vmax.f32 %v921_v16, 0.0  ;;  %v1442_v24 = vpack.c.bf16 %v951_v17, %v951_v17  ;;  %v821_v25 = vmul.f32 %v1708_v21, %v2066_v3  ;;  %v617_v26 = vpop.f32.mrb[21].mxu0 }
 0x110   :  { %v1473_v27 = vpack.c.bf16 %v982_v18, %v982_v18  ;;  %1274 = vst.msk [vmem:[%s2463_s6 + $0x4c] sm:$0xf] %vm1254_vm1, %v1444_v19  ;;  %v983_v28 = vmax.f32 %v919_v20, 0.0  ;;  %v819_v29 = vmul.f32 %v2066_v3, %v617_v26  ;;  %v1709_v30 = vpop.f32.mrb[22].mxu0 }
 0x111   :  { %1305 = vst.msk [vmem:[%s2463_s6 + $0xc8] sm:$0xf] %vm1254_vm1, %v1475_v22  ;;  %v1476_v31 = vpack.c.bf16 %v985_v23, %v985_v23  ;;  %1272 = vst.msk [vmem:[%s2463_s6 + $0x44] sm:$0xf] %vm1254_vm1, %v1442_v24  ;;  %v892_v32 = vadd.f32 %v2071_v9, %v821_v25  ;;  %v1740_v33 = vpop.f32.mrb[20].mxu1  ;;  %v822_v34 = vmul.f32 %v1709_v30, %v2066_v3  ;;  %v620_v35 = vpop.f32.mrb[23].mxu0 }
 0x112   :  { %1303 = vst.msk [vmem:[%s2463_s6 + $0xc0] sm:$0xf] %vm1254_vm1, %v1473_v27  ;;  %v1474_v36 = vpack.c.bf16 %v983_v28, %v983_v28  ;;  %v853_v37 = vmul.f32 %v1740_v33, %v2066_v3  ;;  %v890_v38 = vadd.f32 %v2071_v9, %v819_v29  ;;  %v745_v39 = vpop.f32.mrb[21].mxu1  ;;  %v820_v40 = vmul.f32 %v2066_v3, %v620_v35 }
 0x113   :  { %1306 = vst.msk [vmem:[%s2463_s6 + $0xcc] sm:$0xf] %vm1254_vm1, %v1476_v31  ;;  %v956_v41 = vmax.f32 %v892_v32, 0.0  ;;  %v851_v42 = vmul.f32 %v2066_v3, %v745_v39  ;;  %v893_v43 = vadd.f32 %v2071_v9, %v822_v34  ;;  %v1741_v44 = vpop.f32.mrb[22].mxu1 }
 0x114   :  { %1304 = vst.msk [vmem:[%s2463_s6 + $0xc4] sm:$0xf] %vm1254_vm1, %v1474_v36  ;;  %v924_v45 = vadd.f32 %v2071_v9, %v853_v37  ;;  %v954_v46 = vmax.f32 %v890_v38, 0.0  ;;  %v854_v47 = vmul.f32 %v1741_v44, %v2066_v3  ;;  %v891_v48 = vadd.f32 %v2071_v9, %v820_v40  ;;  %v748_v49 = vpop.f32.mrb[23].mxu1 }
 0x115   :  { %v1447_v50 = vpack.c.bf16 %v956_v41, %v956_v41  ;;  %v922_v51 = vadd.f32 %v2071_v9, %v851_v42  ;;  %v957_v52 = vmax.f32 %v893_v43, 0.0  ;;  %v852_v53 = vmul.f32 %v2066_v3, %v748_v49 }
 0x116   :  { %v988_v54 = vmax.f32 %v924_v45, 0.0  ;;  %v1445_v55 = vpack.c.bf16 %v954_v46, %v954_v46  ;;  %v925_v56 = vadd.f32 %v2071_v9, %v854_v47  ;;  %v955_v57 = vmax.f32 %v891_v48, 0.0 }
 0x117   :  { %1277 = vst.msk [vmem:[%s2463_s6 + $0x58] sm:$0xf] %vm1254_vm1, %v1447_v50  ;;  %v986_v58 = vmax.f32 %v922_v51, 0.0  ;;  %v1448_v59 = vpack.c.bf16 %v957_v52, %v957_v52  ;;  %v923_v60 = vadd.f32 %v2071_v9, %v852_v53  ;;  %v1712_v61 = vpop.f32.mrb[24].mxu0 }
 0x118   :  { %v1479_v62 = vpack.c.bf16 %v988_v54, %v988_v54  ;;  %1275 = vst.msk [vmem:[%s2463_s6 + $0x50] sm:$0xf] %vm1254_vm1, %v1445_v55  ;;  %v989_v63 = vmax.f32 %v925_v56, 0.0  ;;  %v1446_v0 = vpack.c.bf16 %v955_v57, %v955_v57  ;;  %v825_v1 = vmul.f32 %v1712_v61, %v2066_v3  ;;  %v633_v2 = vpop.f32.mrb[25].mxu0 }
 0x119   :  { %v1477_v4 = vpack.c.bf16 %v986_v58, %v986_v58  ;;  %1278 = vst.msk [vmem:[%s2463_s6 + $0x5c] sm:$0xf] %vm1254_vm1, %v1448_v59  ;;  %v987_v5 = vmax.f32 %v923_v60, 0.0  ;;  %v823_v6 = vmul.f32 %v2066_v3, %v633_v2  ;;  %v1713_v7 = vpop.f32.mrb[26].mxu0 }
 0x11a   :  { %1309 = vst.msk [vmem:[%s2463_s6 + $0xd8] sm:$0xf] %vm1254_vm1, %v1479_v62  ;;  %v1480_v8 = vpack.c.bf16 %v989_v63, %v989_v63  ;;  %1276 = vst.msk [vmem:[%s2463_s6 + $0x54] sm:$0xf] %vm1254_vm1, %v1446_v0  ;;  %v896_v10 = vadd.f32 %v2071_v9, %v825_v1  ;;  %v1744_v11 = vpop.f32.mrb[24].mxu1  ;;  %v826_v12 = vmul.f32 %v1713_v7, %v2066_v3  ;;  %v636_v13 = vpop.f32.mrb[27].mxu0 }
 0x11b   :  { %1307 = vst.msk [vmem:[%s2463_s6 + $0xd0] sm:$0xf] %vm1254_vm1, %v1477_v4  ;;  %v1478_v14 = vpack.c.bf16 %v987_v5, %v987_v5  ;;  %v857_v15 = vmul.f32 %v1744_v11, %v2066_v3  ;;  %v894_v16 = vadd.f32 %v2071_v9, %v823_v6  ;;  %v761_v17 = vpop.f32.mrb[25].mxu1  ;;  %v824_v18 = vmul.f32 %v2066_v3, %v636_v13 }
 0x11c   :  { %1310 = vst.msk [vmem:[%s2463_s6 + $0xdc] sm:$0xf] %vm1254_vm1, %v1480_v8  ;;  %v960_v19 = vmax.f32 %v896_v10, 0.0  ;;  %v855_v20 = vmul.f32 %v2066_v3, %v761_v17  ;;  %v897_v21 = vadd.f32 %v2071_v9, %v826_v12  ;;  %v1745_v22 = vpop.f32.mrb[26].mxu1 }
 0x11d   :  { %1308 = vst.msk [vmem:[%s2463_s6 + $0xd4] sm:$0xf] %vm1254_vm1, %v1478_v14  ;;  %v928_v23 = vadd.f32 %v2071_v9, %v857_v15  ;;  %v958_v24 = vmax.f32 %v894_v16, 0.0  ;;  %v858_v25 = vmul.f32 %v1745_v22, %v2066_v3  ;;  %v895_v26 = vadd.f32 %v2071_v9, %v824_v18  ;;  %v764_v27 = vpop.f32.mrb[27].mxu1 }
 0x11e   :  { %v1451_v28 = vpack.c.bf16 %v960_v19, %v960_v19  ;;  %v926_v29 = vadd.f32 %v2071_v9, %v855_v20  ;;  %v961_v30 = vmax.f32 %v897_v21, 0.0  ;;  %v856_v31 = vmul.f32 %v2066_v3, %v764_v27 }
 0x11f   :  { %v992_v32 = vmax.f32 %v928_v23, 0.0  ;;  %v1449_v33 = vpack.c.bf16 %v958_v24, %v958_v24  ;;  %v929_v34 = vadd.f32 %v2071_v9, %v858_v25  ;;  %v959_v35 = vmax.f32 %v895_v26, 0.0 }
 0x120   :  { %1281 = vst.msk [vmem:[%s2463_s6 + $0x68] sm:$0xf] %vm1254_vm1, %v1451_v28  ;;  %v990_v36 = vmax.f32 %v926_v29, 0.0  ;;  %v1452_v37 = vpack.c.bf16 %v961_v30, %v961_v30  ;;  %v927_v38 = vadd.f32 %v2071_v9, %v856_v31  ;;  %v1716_v39 = vpop.f32.mrb[28].mxu0 }
 0x121   :  { %v1483_v40 = vpack.c.bf16 %v992_v32, %v992_v32  ;;  %1279 = vst.msk [vmem:[%s2463_s6 + $0x60] sm:$0xf] %vm1254_vm1, %v1449_v33  ;;  %v993_v41 = vmax.f32 %v929_v34, 0.0  ;;  %v1450_v42 = vpack.c.bf16 %v959_v35, %v959_v35  ;;  %v829_v43 = vmul.f32 %v1716_v39, %v2066_v3  ;;  %v649_v44 = vpop.f32.mrb[29].mxu0 }
 0x122   :  { %v1481_v45 = vpack.c.bf16 %v990_v36, %v990_v36  ;;  %1282 = vst.msk [vmem:[%s2463_s6 + $0x6c] sm:$0xf] %vm1254_vm1, %v1452_v37  ;;  %v991_v46 = vmax.f32 %v927_v38, 0.0  ;;  %v827_v47 = vmul.f32 %v2066_v3, %v649_v44  ;;  %v1717_v48 = vpop.f32.mrb[30].mxu0 }
 0x123   :  { %1313 = vst.msk [vmem:[%s2463_s6 + $0xe8] sm:$0xf] %vm1254_vm1, %v1483_v40  ;;  %v1484_v49 = vpack.c.bf16 %v993_v41, %v993_v41  ;;  %1280 = vst.msk [vmem:[%s2463_s6 + $0x64] sm:$0xf] %vm1254_vm1, %v1450_v42  ;;  %v900_v50 = vadd.f32 %v2071_v9, %v829_v43  ;;  %v1748_v51 = vpop.f32.mrb[28].mxu1  ;;  %v830_v52 = vmul.f32 %v1717_v48, %v2066_v3  ;;  %v652_v53 = vpop.f32.mrb[31].mxu0 }
 0x124   :  { %1311 = vst.msk [vmem:[%s2463_s6 + $0xe0] sm:$0xf] %vm1254_vm1, %v1481_v45  ;;  %v1482_v54 = vpack.c.bf16 %v991_v46, %v991_v46  ;;  %v861_v55 = vmul.f32 %v1748_v51, %v2066_v3  ;;  %v898_v56 = vadd.f32 %v2071_v9, %v827_v47  ;;  %v777_v57 = vpop.f32.mrb[29].mxu1  ;;  %v828_v58 = vmul.f32 %v2066_v3, %v652_v53 }
 0x125   :  { %1314 = vst.msk [vmem:[%s2463_s6 + $0xec] sm:$0xf] %vm1254_vm1, %v1484_v49  ;;  %v964_v59 = vmax.f32 %v900_v50, 0.0  ;;  %v859_v60 = vmul.f32 %v2066_v3, %v777_v57  ;;  %v901_v61 = vadd.f32 %v2071_v9, %v830_v52  ;;  %v1749_v62 = vpop.f32.mrb[30].mxu1 }
 0x126   :  { %1312 = vst.msk [vmem:[%s2463_s6 + $0xe4] sm:$0xf] %vm1254_vm1, %v1482_v54  ;;  %v932_v63 = vadd.f32 %v2071_v9, %v861_v55  ;;  %v962_v0 = vmax.f32 %v898_v56, 0.0  ;;  %v862_v1 = vmul.f32 %v1749_v62, %v2066_v3  ;;  %v899_v2 = vadd.f32 %v2071_v9, %v828_v58  ;;  %v780_v4 = vpop.f32.mrb[31].mxu1 }
 0x127   :  { %v1455_v5 = vpack.c.bf16 %v964_v59, %v964_v59  ;;  %v930_v6 = vadd.f32 %v2071_v9, %v859_v60  ;;  %v965_v7 = vmax.f32 %v901_v61, 0.0  ;;  %v860_v8 = vmul.f32 %v2066_v3, %v780_v4 }
 0x128   :  { %v996_v10 = vmax.f32 %v932_v63, 0.0  ;;  %v1453_v11 = vpack.c.bf16 %v962_v0, %v962_v0  ;;  %v933_v12 = vadd.f32 %v2071_v9, %v862_v1  ;;  %v963_v13 = vmax.f32 %v899_v2, 0.0 }
 0x129   :  { %1285 = vst.msk [vmem:[%s2463_s6 + $0x78] sm:$0xf] %vm1254_vm1, %v1455_v5  ;;  %v994_v14 = vmax.f32 %v930_v6, 0.0  ;;  %v1456_v15 = vpack.c.bf16 %v965_v7, %v965_v7  ;;  %v931_v16 = vadd.f32 %v2071_v9, %v860_v8 }
 0x12a   :  { %v1487_v17 = vpack.c.bf16 %v996_v10, %v996_v10  ;;  %1283 = vst.msk [vmem:[%s2463_s6 + $0x70] sm:$0xf] %vm1254_vm1, %v1453_v11  ;;  %v997_v3 = vmax.f32 %v933_v12, 0.0  ;;  %v1454_v18 = vpack.c.bf16 %v963_v13, %v963_v13 }
 0x12b   :  { %v1485_v19 = vpack.c.bf16 %v994_v14, %v994_v14  ;;  %1286 = vst.msk [vmem:[%s2463_s6 + $0x7c] sm:$0xf] %vm1254_vm1, %v1456_v15  ;;  %v995_v20 = vmax.f32 %v931_v16, 0.0 }
 0x12c   :  { %1317 = vst.msk [vmem:[%s2463_s6 + $0xf8] sm:$0xf] %vm1254_vm1, %v1487_v17  ;;  %v1488_v9 = vpack.c.bf16 %v997_v3, %v997_v3  ;;  %1284 = vst.msk [vmem:[%s2463_s6 + $0x74] sm:$0xf] %vm1254_vm1, %v1454_v18 }
 0x12d   :  { %1315 = vst.msk [vmem:[%s2463_s6 + $0xf0] sm:$0xf] %vm1254_vm1, %v1485_v19  ;;  %v1486_v21 = vpack.c.bf16 %v995_v20, %v995_v20 }
 0x12e   :  { %1318 = vst.msk [vmem:[%s2463_s6 + $0xfc] sm:$0xf] %vm1254_vm1, %v1488_v9 }
 0x12f   :  { %1316 = vst.msk [vmem:[%s2463_s6 + $0xf4] sm:$0xf] %vm1254_vm1, %v1486_v21 }

// kernel: forward.32
= control target key start
LH: loop header
LB: loop body
LE: loop exit
PB: predicated region body
PF: predicated region fallthrough
CT: control target
= control target key end

     0   :  { %s3424_s9 = smov 0   ;;  %s4952_s0 = inlined_call_operand.vmem [shape: bf16[2,19,24,32], index: 0, kind: input, shape index: {}]   ;;  %s4953_s1 = inlined_call_operand.vmem [shape: bf16[3,32,24], index: 1, kind: input, shape index: {}]   ;;  %s4954_s2 = inlined_call_operand.vmem [shape: bf16[2,16,16,8], index: 2, kind: output, shape index: {}]  }
   0x1 LB: > { %s2725_s10 = sadd.s32 4294967295, %s3403_s9   ;;  %p2729_p0 = scmp.ge.s32.totalorder %s3403_s9, 1  ;;  %s3403_s9 = sphi %s3424_s9, %s12_s9  }
   0x2   : > { %p112_p1 = scmp.lt.s32.totalorder %s3403_s9, 3 }
   0x4   : > { %p113_p2 = pnand %p2729_p0, %p112_p1 }
   0x6   : > { %116 = sbr.rel (%p113_p2) target bundleno = 743 (0x2e7), region = 28 }
   0xd   : > { %v3363_v0 = vld [vmem:[%s4953_s1] sm:$0xff]   ;;  %v3405_v1 = vmov 0.0   ;;  %v3364_v2 = vld [vmem:[%s4953_s1 + $0x8] sm:$0xff]   ;;  %p134_p3 = scmp.lt.s32.totalorder %s2725_s10, 1  ;;  %vm3406_vm0 = vmmov 0   ;;  %vm351_vm1 = vcmask 261120  }
   0xe   : > { %3010 = vmatprep.subr.bf16.mxu0 %v3405_v1  ;;  %3346 = vmatprep.subr.bf16.mxu1 %v3405_v1  ;;  %v3369_v3 = vld [vmem:[%s4953_s1 + $0x20] sm:$0xff]   ;;  %v3370_v4 = vld [vmem:[%s4953_s1 + $0x10] sm:$0xff]   ;;  %vm962_vm2 = vsmask.f32 7424  ;;  %v3385_v10 = vld [vmem:[%s4953_s1 + $0x28] sm:$0xff]   ;;  %vm1807_vm3 = vcmask 1046528  }
   0xf   : > { %3011 = vmatpush3.bf16.msra.mxu0 %v3363_v0  ;;  %3348 = vmatpush3.bf16.msra.mxu1 %v3363_v0  ;;  %s5062_s10 = smov (!%p134_p3, %s2725_s10), 1  ;;  %v3384_v12 = vld [vmem:[%s4953_s1 + $0x18] sm:$0xff]   ;;  %s3407_s27 = smov 120   ;;  %vm2637_vm4 = vcmask 60416  }
  0x10   : > { %3012 = vmatprep.subr.bf16.mxu0 %v3405_v1  ;;  %3347 = vmatprep.subr.bf16.mxu1 %v3405_v1  ;;  %s3350_s15 = smul.u32 228, %s5062_s10  ;;  %s3408_s28 = smov 112  }
  0x11   : > { %3014 = vmatprep.mubr.msk.bf16.mxu0 %vm3406_vm0, %v3405_v1  ;;  %3070 = vmatprep.mubr.msk.bf16.mxu1 %vm3406_vm0, %v3405_v1  ;;  %s2890_s29 = sshll.u32 %s5062_s10, 7 }
  0x12   : > { %s3454_s18 = scalar_lea.vmem %s4952_s0, %s3350_s15  ;;  %s4648_s4 = scalar_lea.vmem %s4954_s2, %s2890_s29 }
  0x13   : > { %3013 = vmatpush3.bf16.msra.mxu0 %v3364_v2  ;;  %3349 = vmatpush3.bf16.msra.mxu1 %v3364_v2  ;;  %v3365_v5 = vld [vmem:[%s3454_s18] sm:$0xff]   ;;  %v3464_v6 = vld [vmem:[%s3454_s18 + $0x70] sm:$0xff]   ;;  %v3367_v7 = vld [vmem:[%s3454_s18 + $0x8] sm:$0xff]  }
  0x14   : > { %3234 = vmatprep.subr.bf16.mxu0 %v3405_v1  ;;  %3122 = vmatprep.subr.bf16.mxu1 %v3405_v1  ;;  %v963_v8 = vshrl.u32 %v3365_v5, 16  ;;  %v965_v9 = vshll.u32 %v3365_v5, 16  ;;  %v969_v11 = vshll.u32 %v3367_v7, 16  ;;  %v3371_v14 = vld [vmem:[%s3454_s18 + $0x10] sm:$0xff]   ;;  %v3484_v16 = vld [vmem:[%s3454_s18 + $0x78] sm:$0xff]   ;;  %v973_v18 = vshrl.u32 %v3367_v7, 16 }
  0x15   : > { %v976_v19 = vshll.u32 %v3371_v14, 16  ;;  %v3373_v20 = vld [vmem:[%s3454_s18 + $0x18] sm:$0xff]   ;;  %v980_v23 = vshrl.u32 %v3371_v14, 16  ;;  %v1808_v28 = vrot.slane %v3365_v5, 1  ;;  %v3376_v30 = vld [vmem:[%s3454_s18 + $0x20] sm:$0xff]   ;;  %v1809_v31 = vrot.slane %v3367_v7, 1 }
  0x16   : > { %3015 = vmatmul.mubr.msk.bf16.vlgmr.msra.gmra.mrb[0].mxu0 %vm351_vm1, %v3365_v5  ;;  %3071 = vmatmul.mubr.msk.bf16.vlgmr.msra.gmra.mrb[0].mxu1 %vm351_vm1, %v3464_v6  ;;  %v967_v13 = vrot.slane %v965_v9, 1  ;;  %v971_v15 = vrot.slane %v969_v11, 1  ;;  %v983_v25 = vshll.u32 %v3373_v20, 16  ;;  %v3502_v32 = vld [vmem:[%s3454_s18 + $0x80] sm:$0xff]   ;;  %v987_v34 = vshrl.u32 %v3373_v20, 16  ;;  %v3379_v39 = vld [vmem:[%s3454_s18 + $0x28] sm:$0xff]  }
  0x17   : > { %3018 = vmatprep.mubr.msk.bf16.mxu0 %vm3406_vm0, %v3405_v1  ;;  %3074 = vmatprep.mubr.msk.bf16.mxu1 %vm3406_vm0, %v3405_v1  ;;  %v978_v24 = vrot.slane %v976_v19, 1  ;;  %v3508_v35 = vsel %vm1807_vm3, %v1808_v28, %v1809_v31  ;;  %v990_v36 = vshll.u32 %v3376_v30, 16  ;;  %v1811_v38 = vrot.slane %v3371_v14, 1  ;;  %v3525_v47 = vld [vmem:[%s3454_s18 + $0x30] sm:$0xff]   ;;  %v3528_v49 = vld [vmem:[%s3454_s18 + $0x88] sm:$0xff]   ;;  %v3538_v54 = vld [vmem:[%s3454_s18 + $0x38] sm:$0xff]  }
  0x18   : > { %3235 = vmatpush3.bf16.msra.mxu0 %v3369_v3  ;;  %3123 = vmatpush3.bf16.msra.mxu1 %v3370_v4  ;;  %v968_v17 = vor.u32 %v967_v13, %v963_v8  ;;  %v975_v22 = vor.u32 %v973_v18, %v971_v15  ;;  %v985_v29 = vrot.slane %v983_v25, 1  ;;  %v994_v42 = vshrl.u32 %v3376_v30, 16  ;;  %v3542_v57 = vld [vmem:[%s3454_s18 + $0x40] sm:$0xff]   ;;  %v3564_v8 = vld [vmem:[%s3454_s18 + $0x90] sm:$0xff]  }
  0x19   : > { %3236 = vmatprep.subr.bf16.mxu0 %v3405_v1  ;;  %3124 = vmatprep.subr.bf16.mxu1 %v3405_v1  ;;  %v982_v27 = vor.u32 %v980_v23, %v978_v24  ;;  %v992_v40 = vrot.slane %v990_v36, 1  ;;  %v3517_v41 = vsel %vm1807_vm3, %v1809_v31, %v1811_v38  ;;  %v997_v44 = vshll.u32 %v3379_v39, 16  ;;  %v3596_v23 = vld [vmem:[%s3454_s18 + $0x50] sm:$0xff]   ;;  %v3615_v31 = vld [vmem:[%s3454_s18 + $0x58] sm:$0xff]  }
  0x1a   : > { %v3488_v21 = vsel %vm962_vm2, %v968_v17, %v971_v15  ;;  %v3498_v26 = vsel %vm962_vm2, %v975_v22, %v978_v24  ;;  %v989_v37 = vor.u32 %v987_v34, %v985_v29  ;;  %v1813_v46 = vrot.slane %v3373_v20, 1 }
  0x1b   : > { %v3505_v33 = vsel %vm962_vm2, %v982_v27, %v985_v29  ;;  %v996_v45 = vor.u32 %v994_v42, %v992_v40  ;;  %v999_v48 = vrot.slane %v997_v44, 1  ;;  %v1001_v51 = vshrl.u32 %v3379_v39, 16  ;;  %v3607_v29 = vld [vmem:[%s3454_s18 + $0xa0] sm:$0xff]   ;;  %v3630_v42 = vld [vmem:[%s3454_s18 + $0xa8] sm:$0xff]  }
  0x1c   : > { %3237 = vmatpush3.bf16.msra.mxu0 %v3385_v10  ;;  %3125 = vmatpush3.bf16.msra.mxu1 %v3384_v12  ;;  %v3522_v43 = vsel %vm962_vm2, %v989_v37, %v992_v40  ;;  %v3531_v50 = vsel %vm1807_vm3, %v1811_v38, %v1813_v46  ;;  %v1004_v53 = vshll.u32 %v3525_v47, 16  ;;  %v1815_v56 = vrot.slane %v3376_v30, 1  ;;  %v3574_v12 = vld [vmem:[%s3454_s18 + $0x48] sm:$0xff]  }
  0x1d   : > { %v3534_v52 = vsel %vm962_vm2, %v996_v45, %v999_v48  ;;  %v1003_v55 = vor.u32 %v1001_v51, %v999_v48  ;;  %v1008_v60 = vshrl.u32 %v3525_v47, 16  ;;  %v1011_v61 = vshll.u32 %v3538_v54, 16  ;;  %v3394_v45 = vld [vmem:[%s3454_s18 + $0x60] sm:$0xff]  }
  0x1e   : > { %3019 = vmatmul.mubr.msk.bf16.gmra.mrb[4].mxu0 %vm351_vm1, %v3367_v7  ;;  %3075 = vmatmul.mubr.msk.bf16.gmra.mrb[4].mxu1 %vm351_vm1, %v3484_v16  ;;  %v1006_v58 = vrot.slane %v1004_v53, 1  ;;  %v3549_v59 = vsel %vm1807_vm3, %v1813_v46, %v1815_v56  ;;  %v1817_v62 = vrot.slane %v3379_v39, 1  ;;  %v1015_v0 = vshrl.u32 %v3538_v54, 16 }
  0x1f   : > { %3022 = vmatprep.mubr.msk.bf16.mxu0 %vm3406_vm0, %v3405_v1  ;;  %3078 = vmatprep.mubr.msk.bf16.mxu1 %vm3406_vm0, %v3405_v1  ;;  %v1018_v2 = vshll.u32 %v3542_v57, 16  ;;  %v1013_v4 = vrot.slane %v1011_v61, 1  ;;  %v1819_v13 = vrot.slane %v3525_v47, 1  ;;  %v1025_v15 = vshll.u32 %v3574_v12, 16 }
  0x20   : > { %v3556_v63 = vsel %vm962_vm2, %v1003_v55, %v1006_v58  ;;  %v1010_v3 = vor.u32 %v1008_v60, %v1006_v58  ;;  %v3561_v5 = vsel %vm1807_vm3, %v1815_v56, %v1817_v62  ;;  %v1029_v24 = vshrl.u32 %v3574_v12, 16  ;;  %v3650_v55 = vld [vmem:[%s3454_s18 + $0xb0] sm:$0xff]   ;;  %v3658_v58 = vld [vmem:[%s3454_s18 + $0x68] sm:$0xff]  }
  0x21   : > { %v1020_v7 = vrot.slane %v1018_v2, 1  ;;  %v1017_v10 = vor.u32 %v1015_v0, %v1013_v4  ;;  %v3586_v17 = vsel %vm1807_vm3, %v1817_v62, %v1819_v13  ;;  %v1027_v19 = vrot.slane %v1025_v15, 1  ;;  %v3714_v15 = vld [vmem:[%s3454_s18 + $0xd0] sm:$0xff]  }
  0x22   : > { %v3567_v9 = vsel %vm962_vm2, %v1010_v3, %v1013_v4  ;;  %v1032_v25 = vshll.u32 %v3596_v23, 16  ;;  %v1821_v34 = vrot.slane %v3538_v54, 1  ;;  %v1036_v36 = vshrl.u32 %v3596_v23, 16  ;;  %v3674_v3 = vld [vmem:[%s3454_s18 + $0xb8] sm:$0xff]  }
  0x23   : > { %v3570_v11 = vsel %vm962_vm2, %v1017_v10, %v1020_v7  ;;  %v1031_v27 = vor.u32 %v1029_v24, %v1027_v19  ;;  %v1039_v37 = vshll.u32 %v3615_v31, 16  ;;  %v1823_v46 = vrot.slane %v3542_v57, 1 }
  0x24   : > { %v1034_v28 = vrot.slane %v1032_v25, 1  ;;  %v3627_v38 = vsel %vm1807_vm3, %v1819_v13, %v1821_v34  ;;  %v1046_v48 = vshll.u32 %v3394_v45, 16  ;;  %v1825_v60 = vrot.slane %v3574_v12, 1  ;;  %v3702_v13 = vld [vmem:[%s3454_s18 + $0xc8] sm:$0xff]  }
  0x25   : > { %v1041_v40 = vrot.slane %v1039_v37, 1  ;;  %v3647_v51 = vsel %vm1807_vm3, %v1821_v34, %v1823_v46  ;;  %v1050_v61 = vshrl.u32 %v3394_v45, 16  ;;  %v1053_v62 = vshll.u32 %v3658_v58, 16 }
  0x26   : > { %3023 = vmatmul.mubr.msk.bf16.gmra.mrb[8].mxu0 %vm351_vm1, %v3371_v14  ;;  %3079 = vmatmul.mubr.msk.bf16.gmra.mrb[8].mxu1 %vm351_vm1, %v3502_v32  ;;  %v1022_v14 = vshrl.u32 %v3542_v57, 16  ;;  %v3669_v0 = vsel %vm1807_vm3, %v1823_v46, %v1825_v60  ;;  %v1827_v10 = vrot.slane %v3596_v23, 1  ;;  %v1833_v24 = vrot.slane %v3658_v58, 1 }
  0x27   : > { %3026 = vmatprep.mubr.msk.bf16.mxu0 %vm3406_vm0, %v3405_v1  ;;  %3082 = vmatprep.mubr.msk.bf16.mxu1 %vm3406_vm0, %v3405_v1  ;;  %v3671_v2 = vrot.slane %v1053_v62, 1  ;;  %v1074_v34 = vshll.u32 %v3502_v32, 16  ;;  %v1837_v37 = vrot.slane %v3484_v16, 1 }
  0x28   : > { %v1024_v18 = vor.u32 %v1022_v14, %v1020_v7  ;;  %v3689_v7 = vld [vmem:[%s3454_s18 + $0xc0] sm:$0xff]   ;;  %v1829_v14 = vrot.slane %v3615_v31, 1 }
  0x2a   : > { %v3592_v22 = vsel %vm962_vm2, %v1024_v18, %v1027_v19  ;;  %v1830_v18 = vsel %vm1807_vm3, %v1827_v10, %v1829_v14  ;;  %v1831_v19 = vrot.slane %v3394_v45, 1 }
  0x2e   : > { %3027 = vmatmul.mubr.msk.bf16.gmra.mrb[12].mxu0 %vm351_vm1, %v3373_v20  ;;  %3083 = vmatmul.mubr.msk.bf16.gmra.mrb[12].mxu1 %vm351_vm1, %v3528_v49  ;;  %v3589_v20 = vld [vmem:[%s3454_s18 + $0x98] sm:$0xff]  }
  0x2f   : > { %3030 = vmatprep.mubr.msk.bf16.mxu0 %vm3406_vm0, %v3405_v1  ;;  %3086 = vmatprep.mubr.msk.bf16.mxu1 %vm3406_vm0, %v3405_v1 }
  0x36   : > { %3031 = vmatmul.mubr.msk.bf16.gmra.mrb[16].mxu0 %vm351_vm1, %v3376_v30  ;;  %3087 = vmatmul.mubr.msk.bf16.gmra.mrb[16].mxu1 %vm351_vm1, %v3564_v8  ;;  %v3610_v30 = vsel %vm962_vm2, %v1031_v27, %v1034_v28 }
  0x37   : > { %3034 = vmatprep.mubr.msk.bf16.mxu0 %vm3406_vm0, %v3405_v1  ;;  %3090 = vmatprep.mubr.msk.bf16.mxu1 %vm3406_vm0, %v3405_v1 }
  0x3e   : > { %3035 = vmatmul.mubr.msk.bf16.gmra.mrb[20].mxu0 %vm351_vm1, %v3379_v39  ;;  %3091 = vmatmul.mubr.msk.bf16.gmra.mrb[20].mxu1 %vm351_vm1, %v3589_v20  ;;  %v1038_v39 = vor.u32 %v1036_v36, %v1034_v28 }
  0x3f   : > { %3038 = vmatprep.mubr.msk.bf16.mxu0 %vm3406_vm0, %v3405_v1  ;;  %3094 = vmatprep.mubr.msk.bf16.mxu1 %vm3406_vm0, %v3405_v1 }
  0x40   : > { %v3633_v44 = vsel %vm962_vm2, %v1038_v39, %v1041_v40  ;;  %v1076_v39 = vrot.slane %v1074_v34, 1 }
  0x46   : > { %3039 = vmatmul.mubr.msk.bf16.gmra.mrb[24].mxu0 %vm351_vm1, %v3525_v47  ;;  %3095 = vmatmul.mubr.msk.bf16.gmra.mrb[24].mxu1 %vm351_vm1, %v3607_v29  ;;  %v1043_v47 = vshrl.u32 %v3615_v31, 16 }
  0x47   : > { %3042 = vmatprep.mubr.msk.bf16.mxu0 %vm3406_vm0, %v3405_v1  ;;  %3098 = vmatprep.mubr.msk.bf16.mxu1 %vm3406_vm0, %v3405_v1 }
  0x48   : > { %v1045_v53 = vor.u32 %v1043_v47, %v1041_v40 }
  0x4e   : > { %3043 = vmatmul.mubr.msk.bf16.gmra.mrb[28].mxu0 %vm351_vm1, %v3538_v54  ;;  %3099 = vmatmul.mubr.msk.bf16.gmra.mrb[28].mxu1 %vm351_vm1, %v3630_v42  ;;  %v1048_v54 = vrot.slane %v1046_v48, 1 }
  0x4f   : > { %3046 = vmatprep.mubr.msk.bf16.mxu0 %vm3406_vm0, %v3405_v1  ;;  %3102 = vmatprep.mubr.msk.bf16.mxu1 %vm3406_vm0, %v3405_v1 }
  0x50   : > { %v3653_v56 = vsel %vm962_vm2, %v1045_v53, %v1048_v54 }
  0x56   : > { %3047 = vmatmul.mubr.msk.bf16.gmra.mrb[32].mxu0 %vm351_vm1, %v3542_v57  ;;  %3103 = vmatmul.mubr.msk.bf16.gmra.mrb[32].mxu1 %vm351_vm1, %v3650_v55  ;;  %v1052_v57 = vor.u32 %v1050_v61, %v1048_v54  ;;  %v1078_v54 = vshrl.u32 %v3502_v32, 16 }
  0x57   : > { %3050 = vmatprep.mubr.msk.bf16.mxu0 %vm3406_vm0, %v3405_v1  ;;  %3106 = vmatprep.mubr.msk.bf16.mxu1 %vm3406_vm0, %v3405_v1 }
  0x58   : > { %v3678_v4 = vsel %vm962_vm2, %v1052_v57, %v3671_v2  ;;  %v1080_v61 = vor.u32 %v1078_v54, %v1076_v39 }
  0x5e   : > { %3051 = vmatmul.mubr.msk.bf16.gmra.mrb[36].mxu0 %vm351_vm1, %v3574_v12  ;;  %3107 = vmatmul.mubr.msk.bf16.gmra.mrb[36].mxu1 %vm351_vm1, %v3674_v3  ;;  %v1828_v12 = vsel %vm1807_vm3, %v1825_v60, %v1827_v10  ;;  %v1839_v60 = vrot.slane %v3502_v32, 1 }
  0x5f   : > { %3054 = vmatprep.mubr.msk.bf16.mxu0 %vm3406_vm0, %v3405_v1  ;;  %3110 = vmatprep.mubr.msk.bf16.mxu1 %vm3406_vm0, %v3405_v1 }
  0x60   : > { %v1840_v10 = vsel %vm1807_vm3, %v1837_v37, %v1839_v60 }
  0x66   : > { %3055 = vmatmul.mubr.msk.bf16.gmra.mrb[40].mxu0 %vm351_vm1, %v3596_v23  ;;  %3111 = vmatmul.mubr.msk.bf16.gmra.mrb[40].mxu1 %vm351_vm1, %v3689_v7  ;;  %v1832_v23 = vsel %vm1807_vm3, %v1829_v14, %v1831_v19 }
  0x67   : > { %3058 = vmatprep.mubr.msk.bf16.mxu0 %vm3406_vm0, %v3405_v1  ;;  %3114 = vmatprep.mubr.msk.bf16.mxu1 %vm3406_vm0, %v3405_v1 }
  0x6e   : > { %3059 = vmatmul.mubr.msk.bf16.gmra.mrb[44].mxu0 %vm351_vm1, %v3615_v31  ;;  %3115 = vmatmul.mubr.msk.bf16.gmra.mrb[44].mxu1 %vm351_vm1, %v3702_v13  ;;  %v1071_v31 = vshrl.u32 %v3484_v16, 16 }
  0x6f   : > { %3062 = vmatprep.mubr.msk.bf16.mxu0 %vm3406_vm0, %v3405_v1  ;;  %3118 = vmatprep.mubr.msk.bf16.mxu1 %vm3406_vm0, %v3405_v1 }
  0x76   : > { %3063 = vmatmul.mubr.msk.bf16.gmra.mrb[48].mxu0 %vm351_vm1, %v3394_v45  ;;  %3119 = vmatmul.mubr.msk.bf16.gmra.mrb[48].mxu1 %vm351_vm1, %v3714_v15 }
  0x77   : > { %3066 = vmatprep.mubr.msk.bf16.mxu0 %vm3406_vm0, %v3405_v1  ;;  %3126 = vmatprep.mubr.msk.bf16.mxu1 %vm3406_vm0, %v3405_v1 }
  0x7e   : > { %3067 = vmatmul.mubr.msk.bf16.gmra.mrb[52].mxu0 %vm351_vm1, %v3658_v58  ;;  %3127 = vmatmul.mubr.msk.bf16.vlgmr.msra.gmra.mrb[52].mxu1 %vm351_vm1, %v3488_v21  ;;  %v1834_v21 = vsel %vm1807_vm3, %v1831_v19, %v1833_v24  ;;  %v1085_v19 = vshrl.u32 %v3528_v49, 16 }
  0x7f   : > { %3238 = vmatprep.mubr.msk.bf16.mxu0 %vm3406_vm0, %v3405_v1  ;;  %3130 = vmatprep.mubr.msk.bf16.mxu1 %vm3406_vm0, %v3405_v1 }
  0x86   : > { %3239 = vmatmul.mubr.msk.bf16.vlgmr.msra.gmra.mrb[56].mxu0 %vm351_vm1, %v3508_v35  ;;  %3131 = vmatmul.mubr.msk.bf16.gmra.mrb[56].mxu1 %vm351_vm1, %v3498_v26  ;;  %v1057_v26 = vshrl.u32 %v3658_v58, 16 }
  0x87   : > { %3242 = vmatprep.mubr.msk.bf16.mxu0 %vm3406_vm0, %v3405_v1  ;;  %3134 = vmatprep.mubr.msk.bf16.mxu1 %vm3406_vm0, %v3405_v1 }
  0x88   : > { %v1059_v35 = vor.u32 %v1057_v26, %v3671_v2 }
  0x8e   : > { %3243 = vmatmul.mubr.msk.bf16.gmra.mrb[60].mxu0 %vm351_vm1, %v3517_v41  ;;  %3135 = vmatmul.mubr.msk.bf16.gmra.mrb[60].mxu1 %vm351_vm1, %v3505_v33  ;;  %v1060_v33 = vshll.u32 %v3464_v6, 16 }
  0x8f   : > { %3246 = vmatprep.mubr.msk.bf16.mxu0 %vm3406_vm0, %v3405_v1  ;;  %3138 = vmatprep.mubr.msk.bf16.mxu1 %vm3406_vm0, %v3405_v1 }
  0x90   : > { %v1062_v41 = vrot.slane %v1060_v33, 1 }
  0x96   : > { %3247 = vmatmul.mubr.msk.bf16.gmra.mrb[64].mxu0 %vm351_vm1, %v3531_v50  ;;  %3139 = vmatmul.mubr.msk.bf16.gmra.mrb[64].mxu1 %vm351_vm1, %v3522_v43  ;;  %v1063_v43 = vsel %vm962_vm2, %v1059_v35, %v1062_v41  ;;  %v1064_v50 = vshrl.u32 %v3464_v6, 16 }
  0x97   : > { %3250 = vmatprep.mubr.msk.bf16.mxu0 %vm3406_vm0, %v3405_v1  ;;  %3142 = vmatprep.mubr.msk.bf16.mxu1 %vm3406_vm0, %v3405_v1 }
  0x9e   : > { %3251 = vmatmul.mubr.msk.bf16.gmra.mrb[68].mxu0 %vm351_vm1, %v3549_v59  ;;  %3143 = vmatmul.mubr.msk.bf16.gmra.mrb[68].mxu1 %vm351_vm1, %v3534_v52  ;;  %v1067_v52 = vshll.u32 %v3484_v16, 16  ;;  %v1835_v59 = vrot.slane %v3464_v6, 1 }
  0x9f   : > { %3254 = vmatprep.mubr.msk.bf16.mxu0 %vm3406_vm0, %v3405_v1  ;;  %3146 = vmatprep.mubr.msk.bf16.mxu1 %vm3406_vm0, %v3405_v1 }
  0xa0   : > { %v1836_v6 = vsel %vm1807_vm3, %v1833_v24, %v1835_v59  ;;  %v1838_v16 = vsel %vm1807_vm3, %v1835_v59, %v1837_v37 }
  0xa6   : > { %3255 = vmatmul.mubr.msk.bf16.gmra.mrb[72].mxu0 %vm351_vm1, %v3561_v5  ;;  %3147 = vmatmul.mubr.msk.bf16.gmra.mrb[72].mxu1 %vm351_vm1, %v3556_v63  ;;  %v1066_v63 = vor.u32 %v1064_v50, %v1062_v41  ;;  %v1069_v5 = vrot.slane %v1067_v52, 1 }
  0xa7   : > { %3258 = vmatprep.mubr.msk.bf16.mxu0 %vm3406_vm0, %v3405_v1  ;;  %3150 = vmatprep.mubr.msk.bf16.mxu1 %vm3406_vm0, %v3405_v1 }
  0xae   : > { %3259 = vmatmul.mubr.msk.bf16.gmra.mrb[76].mxu0 %vm351_vm1, %v3586_v17  ;;  %3151 = vmatmul.mubr.msk.bf16.gmra.mrb[76].mxu1 %vm351_vm1, %v3567_v9 }
  0xaf   : > { %3262 = vmatprep.mubr.msk.bf16.mxu0 %vm3406_vm0, %v3405_v1  ;;  %3154 = vmatprep.mubr.msk.bf16.mxu1 %vm3406_vm0, %v3405_v1 }
  0xb6   : > { %3263 = vmatmul.mubr.msk.bf16.gmra.mrb[80].mxu0 %vm351_vm1, %v3627_v38  ;;  %3155 = vmatmul.mubr.msk.bf16.gmra.mrb[80].mxu1 %vm351_vm1, %v3570_v11  ;;  %v1073_v38 = vor.u32 %v1071_v31, %v1069_v5 }
  0xb7   : > { %3266 = vmatprep.mubr.msk.bf16.mxu0 %vm3406_vm0, %v3405_v1  ;;  %3158 = vmatprep.mubr.msk.bf16.mxu1 %vm3406_vm0, %v3405_v1 }
  0xb8   : > { %v1077_v53 = vsel %vm962_vm2, %v1073_v38, %v1076_v39 }
  0xbe   : > { %3267 = vmatmul.mubr.msk.bf16.gmra.mrb[84].mxu0 %vm351_vm1, %v3647_v51  ;;  %3159 = vmatmul.mubr.msk.bf16.gmra.mrb[84].mxu1 %vm351_vm1, %v3592_v22 }
  0xbf   : > { %3270 = vmatprep.mubr.msk.bf16.mxu0 %vm3406_vm0, %v3405_v1  ;;  %3162 = vmatprep.mubr.msk.bf16.mxu1 %vm3406_vm0, %v3405_v1 }
  0xc6   : > { %3271 = vmatmul.mubr.msk.bf16.gmra.mrb[88].mxu0 %vm351_vm1, %v3669_v0  ;;  %3163 = vmatmul.mubr.msk.bf16.gmra.mrb[88].mxu1 %vm351_vm1, %v3610_v30  ;;  %v1070_v30 = vsel %vm962_vm2, %v1066_v63, %v1069_v5 }
  0xc7   : > { %3274 = vmatprep.mubr.msk.bf16.mxu0 %vm3406_vm0, %v3405_v1  ;;  %3166 = vmatprep.mubr.msk.bf16.mxu1 %vm3406_vm0, %v3405_v1 }
  0xce   : > { %3275 = vmatmul.mubr.msk.bf16.gmra.mrb[92].mxu0 %vm351_vm1, %v1828_v12  ;;  %3167 = vmatmul.mubr.msk.bf16.gmra.mrb[92].mxu1 %vm351_vm1, %v3633_v44 }
  0xcf   : > { %3278 = vmatprep.mubr.msk.bf16.mxu0 %vm3406_vm0, %v3405_v1  ;;  %3170 = vmatprep.mubr.msk.bf16.mxu1 %vm3406_vm0, %v3405_v1 }
  0xd6   : > { %3279 = vmatmul.mubr.msk.bf16.gmra.mrb[96].mxu0 %vm351_vm1, %v1830_v18  ;;  %3171 = vmatmul.mubr.msk.bf16.gmra.mrb[96].mxu1 %vm351_vm1, %v3653_v56  ;;  %v1081_v56 = vshll.u32 %v3528_v49, 16 }
  0xd7   : > { %3282 = vmatprep.mubr.msk.bf16.mxu0 %vm3406_vm0, %v3405_v1  ;;  %3174 = vmatprep.mubr.msk.bf16.mxu1 %vm3406_vm0, %v3405_v1 }
  0xd8   : > { %v1083_v62 = vrot.slane %v1081_v56, 1 }
  0xda   : > { %v1084_v18 = vsel %vm962_vm2, %v1080_v61, %v1083_v62  ;;  %v1087_v26 = vor.u32 %v1085_v19, %v1083_v62  ;;  %v1847_v19 = vrot.slane %v3607_v29, 1 }
  0xde   : > { %3283 = vmatmul.mubr.msk.bf16.gmra.mrb[100].mxu0 %vm351_vm1, %v1832_v23  ;;  %3175 = vmatmul.mubr.msk.bf16.gmra.mrb[100].mxu1 %vm351_vm1, %v3678_v4  ;;  %v1088_v23 = vshll.u32 %v3564_v8, 16 }
  0xdf   : > { %3286 = vmatprep.mubr.msk.bf16.mxu0 %vm3406_vm0, %v3405_v1  ;;  %3178 = vmatprep.mubr.msk.bf16.mxu1 %vm3406_vm0, %v3405_v1 }
  0xe0   : > { %v1090_v33 = vrot.slane %v1088_v23, 1 }
  0xe2   : > { %v1091_v5 = vsel %vm962_vm2, %v1087_v26, %v1090_v33 }
  0xe6   : > { %3287 = vmatmul.mubr.msk.bf16.gmra.mrb[104].mxu0 %vm351_vm1, %v1834_v21  ;;  %3179 = vmatmul.mubr.msk.bf16.gmra.mrb[104].mxu1 %vm351_vm1, %v1063_v43  ;;  %v1841_v21 = vrot.slane %v3528_v49, 1 }
  0xe7   : > { %3290 = vmatprep.mubr.msk.bf16.mxu0 %vm3406_vm0, %v3405_v1  ;;  %3182 = vmatprep.mubr.msk.bf16.mxu1 %vm3406_vm0, %v3405_v1 }
  0xe8   : > { %v1842_v52 = vsel %vm1807_vm3, %v1839_v60, %v1841_v21 }
  0xe9   : > { %v3843_v9 = vpop.f32.mrb[0].mxu0  ;;  %v3845_v11 = vpop.f32.mrb[0].mxu1 }
  0xea   : > { %v3016_v17 = vpop.f32.mrb[1].mxu0  ;;  %730 = vrot.lane.b32.xlu1 %v3845_v11, %s3407_s27  ;;  %v3072_v22 = vpop.f32.mrb[1].mxu1 }
  0xeb   : > { %v3849_v25 = vpop.f32.mrb[2].mxu0  ;;  %v573_v27 = vpop.f32.mrb[2].mxu1  ;;  %v1092_v17 = vshrl.u32 %v3564_v8, 16  ;;  %v1095_v22 = vshll.u32 %v3589_v20, 16 }
  0xec   : > { %v3017_v28 = vpop.f32.mrb[3].mxu0  ;;  %v3073_v36 = vpop.f32.mrb[3].mxu1  ;;  %v1843_v27 = vrot.slane %v3564_v8, 1 }
  0xed   : > { %v1094_v28 = vor.u32 %v1092_v17, %v1090_v33  ;;  %v1116_v17 = vshll.u32 %v3650_v55, 16 }
  0xee   : > { %3291 = vmatmul.mubr.msk.bf16.gmra.mrb[108].mxu0 %vm351_vm1, %v1836_v6  ;;  %856 = vrot.lane.b32.xlu1 %v3845_v11, %s3408_s28  ;;  %v1844_v38 = vsel %vm1807_vm3, %v1841_v21, %v1843_v27 }
  0xef   : > { %3183 = vmatmul.mubr.msk.bf16.gmra.mrb[108].mxu1 %vm351_vm1, %v1070_v30  ;;  %3294 = vmatprep.mubr.msk.bf16.mxu0 %vm3406_vm0, %v3405_v1  ;;  %v1097_v30 = vrot.slane %v1095_v22, 1 }
  0xf0   : > { %3186 = vmatprep.mubr.msk.bf16.mxu1 %vm3406_vm0, %v3405_v1 }
  0xf1   : > { %v475_v40 = vpop.f32.mrb[4].mxu0  ;;  %v3866_v44 = vpop.f32.mrb[4].mxu1 }
  0xf2   : > { %v3020_v45 = vpop.f32.mrb[5].mxu0  ;;  %732 = vrot.lane.b32.xlu0 %v3866_v44, %s3407_s27  ;;  %v3076_v46 = vpop.f32.mrb[5].mxu1  ;;  %v1098_v40 = vsel %vm962_vm2, %v1094_v28, %v1097_v30  ;;  %v1118_v28 = vrot.slane %v1116_v17, 1 }
  0xf3   : > { %v3870_v47 = vpop.f32.mrb[6].mxu0  ;;  %v3873_v48 = vpop.f32.mrb[6].mxu1  ;;  %v1099_v46 = vshrl.u32 %v3589_v20, 16 }
  0xf4   : > { %v3021_v51 = vpop.f32.mrb[7].mxu0  ;;  %734 = vrot.lane.b32.xlu1 %v3873_v48, %s3407_s27  ;;  %v3077_v58 = vpop.f32.mrb[7].mxu1 }
  0xf5   : > { %v1101_v54 = vor.u32 %v1099_v46, %v1097_v30 }
  0xf6   : > { %3295 = vmatmul.mubr.msk.bf16.gmra.mrb[112].mxu0 %vm351_vm1, %v1838_v16  ;;  %858 = vrot.lane.b32.xlu0 %v3866_v44, %s3408_s28  ;;  %v1102_v16 = vshll.u32 %v3607_v29, 16 }
  0xf7   : > { %3187 = vmatmul.mubr.msk.bf16.gmra.mrb[112].mxu1 %vm351_vm1, %v1077_v53  ;;  %3298 = vmatprep.mubr.msk.bf16.mxu0 %vm3406_vm0, %v3405_v1  ;;  %v1845_v53 = vrot.slane %v3589_v20, 1 }
  0xf8   : > { %3190 = vmatprep.mubr.msk.bf16.mxu1 %vm3406_vm0, %v3405_v1  ;;  %860 = vrot.lane.b32.xlu1 %v3873_v48, %s3408_s28  ;;  %v1104_v56 = vrot.slane %v1102_v16, 1  ;;  %v1120_v16 = vshrl.u32 %v3650_v55, 16 }
  0xf9   : > { %v3891_v0 = vpop.f32.mrb[8].mxu0  ;;  %v585_v57 = vpop.f32.mrb[8].mxu1 }
  0xfa   : > { %v3024_v2 = vpop.f32.mrb[9].mxu0  ;;  %696 = vrot.lane.b32.xlu0 %v3870_v47, %s3407_s27  ;;  %v3080_v32 = vpop.f32.mrb[9].mxu1  ;;  %v1846_v57 = vsel %vm1807_vm3, %v1843_v27, %v1845_v53 }
  0xfb   : > { %v485_v4 = vpop.f32.mrb[10].mxu0  ;;  %v3896_v14 = vpop.f32.mrb[10].mxu1  ;;  %v1105_v2 = vsel %vm962_vm2, %v1101_v54, %v1104_v56  ;;  %v1851_v54 = vrot.slane %v3650_v55, 1 }
  0xfc   : > { %v3025_v12 = vpop.f32.mrb[11].mxu0  ;;  %v3081_v24 = vpop.f32.mrb[11].mxu1 }
  0xfd   : > { %v1109_v12 = vshll.u32 %v3630_v42, 16 }
  0xfe   : > { %3299 = vmatmul.mubr.msk.bf16.gmra.mrb[116].mxu0 %vm351_vm1, %v1840_v10  ;;  %698 = vrot.lane.b32.xlu0 %v3891_v0, %s3407_s27  ;;  %v1106_v10 = vshrl.u32 %v3607_v29, 16 }
  0xff   : > { %3191 = vmatmul.mubr.msk.bf16.gmra.mrb[116].mxu1 %vm351_vm1, %v1084_v18  ;;  %3302 = vmatprep.mubr.msk.bf16.mxu0 %vm3406_vm0, %v3405_v1  ;;  %v1111_v24 = vrot.slane %v1109_v12, 1 }
 0x100   : > { %3194 = vmatprep.mubr.msk.bf16.mxu1 %vm3406_vm0, %v3405_v1  ;;  %v1108_v23 = vor.u32 %v1106_v10, %v1104_v56  ;;  %v1122_v56 = vor.u32 %v1120_v16, %v1118_v28 }
 0x101   : > { %v3910_v35 = vpop.f32.mrb[12].mxu0  ;;  %v3912_v41 = vpop.f32.mrb[12].mxu1 }
 0x102   : > { %700 = vrot.lane.b32.xlu1 %v3910_v35, %s3407_s27  ;;  %v3028_v43 = vpop.f32.mrb[13].mxu0  ;;  %736 = vrot.lane.b32.xlu0 %v3896_v14, %s3407_s27  ;;  %v3084_v50 = vpop.f32.mrb[13].mxu1 }
 0x103   : > { %v3918_v49 = vpop.f32.mrb[14].mxu0  ;;  %v595_v63 = vpop.f32.mrb[14].mxu1  ;;  %v1848_v50 = vsel %vm1807_vm3, %v1845_v53, %v1847_v19 }
 0x104   : > { %v3029_v59 = vpop.f32.mrb[15].mxu0  ;;  %v3085_v6 = vpop.f32.mrb[15].mxu1 }
 0x105   : > { %v1849_v6 = vrot.slane %v3630_v42, 1 }
 0x106   : > { %738 = vrot.lane.b32.xlu1 %v3912_v41, %s3407_s27  ;;  %3303 = vmatmul.mubr.msk.bf16.gmra.mrb[120].mxu0 %vm351_vm1, %v1842_v52  ;;  %v1112_v52 = vsel %vm962_vm2, %v1108_v23, %v1111_v24 }
 0x107   : > { %3195 = vmatmul.mubr.msk.bf16.gmra.mrb[120].mxu1 %vm351_vm1, %v1091_v5  ;;  %862 = vrot.lane.b32.xlu0 %v3896_v14, %s3408_s28  ;;  %v1113_v5 = vshrl.u32 %v3630_v42, 16 }
 0x108   : > { %3198 = vmatprep.mubr.msk.bf16.mxu1 %vm3406_vm0, %v3405_v1  ;;  %3306 = vmatprep.mubr.msk.bf16.mxu0 %vm3406_vm0, %v3405_v1 }
 0x109   : > { %v497_v31 = vpop.f32.mrb[16].mxu0  ;;  %v3935_v34 = vpop.f32.mrb[16].mxu1  ;;  %v1115_v27 = vor.u32 %v1113_v5, %v1111_v24  ;;  %v1853_v24 = vrot.slane %v3674_v3, 1 }
 0x10a   : > { %864 = vrot.lane.b32.xlu1 %v3912_v41, %s3408_s28  ;;  %v3032_v36 = vpop.f32.mrb[17].mxu0  ;;  %v3088_v37 = vpop.f32.mrb[17].mxu1 }
 0x10b   : > { %826 = vrot.lane.b32.xlu0 %v3910_v35, %s3408_s28  ;;  %v3941_v8 = vpop.f32.mrb[18].mxu0  ;;  %v3944_v39 = vpop.f32.mrb[18].mxu1  ;;  %v1854_v5 = vsel %vm1807_vm3, %v1851_v54, %v1853_v24 }
 0x10c   : > { %4971 = vst [vmem:[#allocation2_spill] sm:$0xff] %v3944_v39  ;;  %v3033_v45 = vpop.f32.mrb[19].mxu0  ;;  %v3089_v51 = vpop.f32.mrb[19].mxu1 }
 0x10d   : > { %v1123_v51 = vshll.u32 %v3674_v3, 16 }
 0x10e   : > { %702 = vrot.lane.b32.xlu1 %v3918_v49, %s3407_s27  ;;  %3307 = vmatmul.mubr.msk.bf16.gmra.mrb[124].mxu0 %vm351_vm1, %v1844_v38  ;;  %v1850_v38 = vsel %vm1807_vm3, %v1847_v19, %v1849_v6  ;;  %v1130_v19 = vshll.u32 %v3689_v7, 16 }
 0x10f   : > { %3199 = vmatmul.mubr.msk.bf16.gmra.mrb[124].mxu1 %vm351_vm1, %v1098_v40  ;;  %740 = vrot.lane.b32.xlu0 %v3935_v34, %s3407_s27  ;;  %v1119_v40 = vsel %vm962_vm2, %v1115_v27, %v1118_v28  ;;  %v1134_v27 = vshrl.u32 %v3689_v7, 16  ;;  %v1137_v28 = vshll.u32 %v3702_v13, 16 }
 0x110   : > { %3202 = vmatprep.mubr.msk.bf16.mxu1 %vm3406_vm0, %v3405_v1  ;;  %3310 = vmatprep.mubr.msk.bf16.mxu0 %vm3406_vm0, %v3405_v1 }
 0x111   : > { %v3960_v58 = vpop.f32.mrb[20].mxu0  ;;  %v607_v60 = vpop.f32.mrb[20].mxu1 }
 0x112   : > { %828 = vrot.lane.b32.xlu1 %v3918_v49, %s3408_s28  ;;  %v3036_v61 = vpop.f32.mrb[21].mxu0  ;;  %v3092_v62 = vpop.f32.mrb[21].mxu1  ;;  %v1125_v60 = vrot.slane %v1123_v51, 1 }
 0x113   : > { %866 = vrot.lane.b32.xlu0 %v3935_v34, %s3408_s28  ;;  %v507_v20 = vpop.f32.mrb[22].mxu0  ;;  %v3968_v4 = vpop.f32.mrb[22].mxu1 }
 0x114   : > { %4972 = vst [vmem:[#allocation3_spill] sm:$0xff] %v3968_v4  ;;  %v3037_v32 = vpop.f32.mrb[23].mxu0  ;;  %v3093_v18 = vpop.f32.mrb[23].mxu1 }
 0x115   : > { %v1126_v32 = vsel %vm962_vm2, %v1122_v56, %v1125_v60  ;;  %v1127_v18 = vshrl.u32 %v3674_v3, 16 }
 0x116   : > { %742 = vrot.lane.b32.xlu1 %v3944_v39, %s3407_s27  ;;  %3311 = vmatmul.mubr.msk.bf16.gmra.mrb[128].mxu0 %vm351_vm1, %v1846_v57 }
 0x117   : > { %3203 = vmatmul.mubr.msk.bf16.gmra.mrb[128].mxu1 %vm351_vm1, %v1105_v2  ;;  %704 = vrot.lane.b32.xlu0 %v3941_v8, %s3407_s27  ;;  %v1852_v2 = vsel %vm1807_vm3, %v1849_v6, %v1851_v54 }
 0x118   : > { %3206 = vmatprep.mubr.msk.bf16.mxu1 %vm3406_vm0, %v3405_v1  ;;  %3314 = vmatprep.mubr.msk.bf16.mxu0 %vm3406_vm0, %v3405_v1 }
 0x119   : > { %v3983_v21 = vpop.f32.mrb[24].mxu0  ;;  %v3987_v26 = vpop.f32.mrb[24].mxu1 }
 0x11a   : > { %868 = vrot.lane.b32.xlu1 %v3944_v39, %s3408_s28  ;;  %4973 = vst [vmem:[#allocation4_spill] sm:$0xff] %v3987_v26  ;;  %v3040_v33 = vpop.f32.mrb[25].mxu0  ;;  %v3096_v29 = vpop.f32.mrb[25].mxu1 }
 0x11b   : > { %830 = vrot.lane.b32.xlu0 %v3941_v8, %s3408_s28  ;;  %v3991_v43 = vpop.f32.mrb[26].mxu0  ;;  %v617_v59 = vpop.f32.mrb[26].mxu1  ;;  %v1129_v33 = vor.u32 %v1127_v18, %v1125_v60  ;;  %v1132_v29 = vrot.slane %v1130_v19, 1 }
 0x11c   : > { %v3041_v63 = vpop.f32.mrb[27].mxu0  ;;  %v3097_v22 = vpop.f32.mrb[27].mxu1 }
 0x11d   : > { %v1133_v17 = vsel %vm962_vm2, %v1129_v33, %v1132_v29 }
 0x11e   : > { %706 = vrot.lane.b32.xlu1 %v3960_v58, %s3407_s27  ;;  %3315 = vmatmul.mubr.msk.bf16.gmra.mrb[132].mxu0 %vm351_vm1, %v1848_v50 }
 0x11f   : > { %3207 = vmatmul.mubr.msk.bf16.gmra.mrb[132].mxu1 %vm351_vm1, %v1112_v52  ;;  %744 = vrot.lane.b32.xlu0 %v3968_v4, %s3407_s27 }
 0x120   : > { %3210 = vmatprep.mubr.msk.bf16.mxu1 %vm3406_vm0, %v3405_v1  ;;  %3318 = vmatprep.mubr.msk.bf16.mxu0 %vm3406_vm0, %v3405_v1 }
 0x121   : > { %v519_v30 = vpop.f32.mrb[28].mxu0  ;;  %v4010_v31 = vpop.f32.mrb[28].mxu1 }
 0x122   : > { %832 = vrot.lane.b32.xlu1 %v3960_v58, %s3408_s28  ;;  %4974 = vst [vmem:[#allocation5_spill] sm:$0xff] %v4010_v31  ;;  %v3044_v36 = vpop.f32.mrb[29].mxu0  ;;  %v3100_v37 = vpop.f32.mrb[29].mxu1 }
 0x123   : > { %870 = vrot.lane.b32.xlu0 %v3968_v4, %s3408_s28  ;;  %v4014_v42 = vpop.f32.mrb[30].mxu0  ;;  %v4018_v45 = vpop.f32.mrb[30].mxu1  ;;  %v1855_v36 = vrot.slane %v3689_v7, 1  ;;  %v1136_v37 = vor.u32 %v1134_v27, %v1132_v29 }
 0x124   : > { %4975 = vst [vmem:[#allocation6_spill] sm:$0xff] %v4018_v45  ;;  %v3045_v46 = vpop.f32.mrb[31].mxu0  ;;  %v3101_v53 = vpop.f32.mrb[31].mxu1 }
 0x125   : > { %v1856_v53 = vsel %vm1807_vm3, %v1853_v24, %v1855_v36 }
 0x126   : > { %746 = vrot.lane.b32.xlu1 %v3987_v26, %s3407_s27  ;;  %3319 = vmatmul.mubr.msk.bf16.gmra.mrb[136].mxu0 %vm351_vm1, %v1850_v38  ;;  %v1139_v38 = vrot.slane %v1137_v28, 1 }
 0x127   : > { %3211 = vmatmul.mubr.msk.bf16.gmra.mrb[136].mxu1 %vm351_vm1, %v1119_v40  ;;  %708 = vrot.lane.b32.xlu0 %v3983_v21, %s3407_s27 }
 0x128   : > { %3214 = vmatprep.mubr.msk.bf16.mxu1 %vm3406_vm0, %v3405_v1  ;;  %3322 = vmatprep.mubr.msk.bf16.mxu0 %vm3406_vm0, %v3405_v1  ;;  %v1140_v60 = vsel %vm962_vm2, %v1136_v37, %v1139_v38 }
 0x129   : > { %v4033_v61 = vpop.f32.mrb[32].mxu0  ;;  %v629_v20 = vpop.f32.mrb[32].mxu1 }
 0x12a   : > { %872 = vrot.lane.b32.xlu1 %v3987_v26, %s3408_s28  ;;  %v3048_v62 = vpop.f32.mrb[33].mxu0  ;;  %v3104_v55 = vpop.f32.mrb[33].mxu1  ;;  %v1144_v20 = vshll.u32 %v3714_v15, 16 }
 0x12b   : > { %834 = vrot.lane.b32.xlu0 %v3983_v21, %s3408_s28  ;;  %v529_v57 = vpop.f32.mrb[34].mxu0  ;;  %v4041_v12 = vpop.f32.mrb[34].mxu1  ;;  %v1141_v62 = vshrl.u32 %v3702_v13, 16  ;;  %v1857_v55 = vrot.slane %v3702_v13, 1 }
 0x12c   : > { %v3049_v10 = vpop.f32.mrb[35].mxu0  ;;  %4976 = vst [vmem:[#allocation7_spill] sm:$0xff] %v4041_v12  ;;  %v3105_v23 = vpop.f32.mrb[35].mxu1 }
 0x12d   : > { %v3396_v10 = vld [vmem:[%s3454_s18 + $0xd8] ss:$0 sps:$4 sm:$0xff]   ;;  %v1858_v33 = vsel %vm1807_vm3, %v1855_v36, %v1857_v55 }
 0x12e   : > { %710 = vrot.lane.b32.xlu1 %v3991_v43, %s3407_s27  ;;  %3323 = vmatmul.mubr.msk.bf16.gmra.mrb[140].mxu0 %vm351_vm1, %v1852_v2  ;;  %v1143_v2 = vor.u32 %v1141_v62, %v1139_v38 }
 0x12f   : > { %3215 = vmatmul.mubr.msk.bf16.gmra.mrb[140].mxu1 %vm351_vm1, %v1126_v32  ;;  %748 = vrot.lane.b32.xlu0 %v4010_v31, %s3407_s27  ;;  %v1146_v32 = vrot.slane %v1144_v20, 1 }
 0x130   : > { %3218 = vmatprep.mubr.msk.bf16.mxu1 %vm3406_vm0, %v3405_v1  ;;  %3326 = vmatprep.mubr.msk.bf16.mxu0 %vm3406_vm0, %v3405_v1 }
 0x131   : > { %v4056_v50 = vpop.f32.mrb[36].mxu0  ;;  %v4060_v59 = vpop.f32.mrb[36].mxu1 }
 0x132   : > { %836 = vrot.lane.b32.xlu1 %v3991_v43, %s3408_s28  ;;  %v3052_v52 = vpop.f32.mrb[37].mxu0  ;;  %4977 = vst [vmem:[#allocation8_spill] sm:$0xff] %v4060_v59  ;;  %v3108_v63 = vpop.f32.mrb[37].mxu1 }
 0x133   : > { %874 = vrot.lane.b32.xlu0 %v4010_v31, %s3408_s28  ;;  %v4064_v3 = vpop.f32.mrb[38].mxu0  ;;  %v639_v6 = vpop.f32.mrb[38].mxu1  ;;  %v1147_v63 = vsel %vm962_vm2, %v1143_v2, %v1146_v32 }
 0x134   : > { %v3053_v22 = vpop.f32.mrb[39].mxu0  ;;  %v3109_v30 = vpop.f32.mrb[39].mxu1  ;;  %v1859_v6 = vrot.slane %v3714_v15, 1 }
 0x136   : > { %750 = vrot.lane.b32.xlu1 %v4018_v45, %s3407_s27  ;;  %3327 = vmatmul.mubr.msk.bf16.gmra.mrb[144].mxu0 %vm351_vm1, %v1854_v5  ;;  %v1148_v5 = vshrl.u32 %v3714_v15, 16 }
 0x137   : > { %3219 = vmatmul.mubr.msk.bf16.gmra.mrb[144].mxu1 %vm351_vm1, %v1133_v17  ;;  %712 = vrot.lane.b32.xlu0 %v4014_v42, %s3407_s27  ;;  %v1152_v17 = vshll.u32 %v3396_v10, 16 }
 0x138   : > { %3330 = vmatprep.mubr.msk.bf16.mxu0 %vm3406_vm0, %v3405_v1  ;;  %3222 = vmatprep.mubr.msk.bf16.mxu1 %vm3406_vm0, %v3405_v1  ;;  %v1150_v27 = vor.u32 %v1148_v5, %v1146_v32 }
 0x139   : > { %v541_v40 = vpop.f32.mrb[40].mxu0  ;;  %v4083_v16 = vpop.f32.mrb[40].mxu1  ;;  %v1154_v28 = vrot.slane %v1152_v17, 1 }
 0x13a   : > { %876 = vrot.lane.b32.xlu1 %v4018_v45, %s3408_s28  ;;  %v3056_v46 = vpop.f32.mrb[41].mxu0  ;;  %v3112_v7 = vpop.f32.mrb[41].mxu1  ;;  %v1860_v40 = vsel %vm1807_vm3, %v1857_v55, %v1859_v6 }
 0x13b   : > { %838 = vrot.lane.b32.xlu0 %v4014_v42, %s3408_s28  ;;  %v4087_v51 = vpop.f32.mrb[42].mxu0  ;;  %v4090_v56 = vpop.f32.mrb[42].mxu1 }
 0x13c   : > { %v3057_v54 = vpop.f32.mrb[43].mxu0  ;;  %v3113_v57 = vpop.f32.mrb[43].mxu1 }
 0x13e   : > { %714 = vrot.lane.b32.xlu1 %v4033_v61, %s3407_s27  ;;  %3331 = vmatmul.mubr.msk.bf16.gmra.mrb[148].mxu0 %vm351_vm1, %v1856_v53  ;;  %v1155_v53 = vsel %vm962_vm2, %v1150_v27, %v1154_v28 }
 0x13f   : > { %752 = vrot.lane.b32.xlu0 %v4041_v12, %s3407_s27  ;;  %3223 = vmatmul.mubr.msk.bf16.gmra.mrb[148].mxu1 %vm351_vm1, %v1140_v60  ;;  %v1861_v60 = vrot.slane %v3396_v10, 1 }
 0x140   : > { %3226 = vmatprep.mubr.msk.bf16.mxu1 %vm3406_vm0, %v3405_v1  ;;  %3334 = vmatprep.mubr.msk.bf16.mxu0 %vm3406_vm0, %v3405_v1 }
 0x141   : > { %v4107_v18 = vpop.f32.mrb[44].mxu0  ;;  %v651_v23 = vpop.f32.mrb[44].mxu1  ;;  %v1862_v32 = vsel %vm1807_vm3, %v1859_v6, %v1861_v60 }
 0x142   : > { %840 = vrot.lane.b32.xlu1 %v4033_v61, %s3408_s28  ;;  %v3060_v19 = vpop.f32.mrb[45].mxu0  ;;  %v3116_v24 = vpop.f32.mrb[45].mxu1 }
 0x143   : > { %878 = vrot.lane.b32.xlu0 %v4041_v12, %s3408_s28  ;;  %v551_v13 = vpop.f32.mrb[46].mxu0  ;;  %v653_v52 = vpop.f32.mrb[46].mxu1 }
 0x144   : > { %v3061_v29 = vpop.f32.mrb[47].mxu0  ;;  %v3117_v22 = vpop.f32.mrb[47].mxu1 }
 0x146   : > { %754 = vrot.lane.b32.xlu1 %v4060_v59, %s3407_s27  ;;  %3335 = vmatmul.mubr.msk.bf16.gmra.mrb[152].mxu0 %vm351_vm1, %v1858_v33 }
 0x147   : > { %716 = vrot.lane.b32.xlu0 %v4056_v50, %s3407_s27  ;;  %3227 = vmatmul.mubr.msk.bf16.gmra.mrb[152].mxu1 %vm351_vm1, %v1147_v63 }
 0x148   : > { %3230 = vmatprep.mubr.msk.bf16.mxu1 %vm3406_vm0, %v3405_v1  ;;  %3338 = vmatprep.mubr.msk.bf16.mxu0 %vm3406_vm0, %v3405_v1 }
 0x149   : > { %v4127_v30 = vpop.f32.mrb[48].mxu0  ;;  %v658_v37 = vpop.f32.mrb[48].mxu1 }
 0x14a   : > { %880 = vrot.lane.b32.xlu1 %v4060_v59, %s3408_s28  ;;  %v3064_v36 = vpop.f32.mrb[49].mxu0  ;;  %v3120_v15 = vpop.f32.mrb[49].mxu1 }
 0x14b   : > { %842 = vrot.lane.b32.xlu0 %v4056_v50, %s3408_s28  ;;  %v4133_v38 = vpop.f32.mrb[50].mxu0  ;;  %v661_v7 = vpop.f32.mrb[50].mxu1 }
 0x14c   : > { %v3065_v46 = vpop.f32.mrb[51].mxu0  ;;  %v3121_v54 = vpop.f32.mrb[51].mxu1 }
 0x14e   : > { %718 = vrot.lane.b32.xlu1 %v4064_v3, %s3407_s27  ;;  %3339 = vmatmul.mubr.msk.bf16.gmra.mrb[156].mxu0 %vm351_vm1, %v1860_v40 }
 0x14f   : > { %756 = vrot.lane.b32.xlu0 %v4083_v16, %s3407_s27  ;;  %3231 = vmatmul.mubr.msk.bf16.gmra.mrb[156].mxu1 %vm351_vm1, %v1155_v53 }
 0x150   : > { %3342 = vmatprep.mubr.msk.bf16.mxu0 %vm3406_vm0, %v3405_v1 }
 0x151   : > { %v563_v62 = vpop.f32.mrb[52].mxu0  ;;  %v4147_v57 = vpop.f32.mrb[52].mxu1 }
 0x152   : > { %844 = vrot.lane.b32.xlu1 %v4064_v3, %s3408_s28  ;;  %v3068_v20 = vpop.f32.mrb[53].mxu0  ;;  %v3128_v2 = vpop.f32.mrb[53].mxu1 }
 0x153   : > { %882 = vrot.lane.b32.xlu0 %v4083_v16, %s3408_s28  ;;  %v4151_v55 = vpop.f32.mrb[54].mxu0  ;;  %v4154_v10 = vpop.f32.mrb[54].mxu1 }
 0x154   : > { %v3069_v19 = vpop.f32.mrb[55].mxu0  ;;  %v3129_v23 = vpop.f32.mrb[55].mxu1 }
 0x156   : > { %758 = vrot.lane.b32.xlu1 %v4090_v56, %s3407_s27  ;;  %3343 = vmatmul.mubr.msk.bf16.gmra.mrb[160].mxu0 %vm351_vm1, %v1862_v32 }
 0x157   : > { %720 = vrot.lane.b32.xlu0 %v4087_v51, %s3407_s27 }
 0x159   : > { %v4161_v1 = vpop.f32.mrb[56].mxu0  ;;  %v1291_v13 = vpop.f32.mrb[56].mxu1 }
 0x15a   : > { %4978 = vst [vmem:[#allocation9_spill] sm:$0xff] %v4161_v1  ;;  %884 = vrot.lane.b32.xlu1 %v4090_v56, %s3408_s28  ;;  %v3240_v16 = vpop.f32.mrb[57].mxu0  ;;  %v3132_v33 = vpop.f32.mrb[57].mxu1 }
 0x15b   : > { %846 = vrot.lane.b32.xlu0 %v4087_v51, %s3408_s28  ;;  %v4167_v24 = vpop.f32.mrb[58].mxu0  ;;  %v4169_v63 = vpop.f32.mrb[58].mxu1 }
 0x15c   : > { %4979 = vst [vmem:[#allocation10_spill] sm:$0xff] %v4167_v24  ;;  %v3241_v29 = vpop.f32.mrb[59].mxu0  ;;  %v4171_v5 = vpop.permute.xlu1 %730 }
 0x15d   : > { %v3133_v17 = vpop.f32.mrb[59].mxu1 }
 0x15e   : > { %722 = vrot.lane.b32.xlu1 %v4107_v18, %s3407_s27 }
 0x15f   : > { %886 = vrot.lane.b32.xlu0 %v653_v52, %s3408_s28 }
 0x160   : > { %v4176_v56 = vpop.permute.xlu1 %856 }
 0x161   : > { %v1998_v22 = vpop.f32.mrb[60].mxu0  ;;  %v4180_v27 = vpop.f32.mrb[60].mxu1 }
 0x162   : > { %848 = vrot.lane.b32.xlu1 %v4107_v18, %s3408_s28  ;;  %v3244_v6 = vpop.f32.mrb[61].mxu0  ;;  %v3136_v36 = vpop.f32.mrb[61].mxu1 }
 0x163   : > { %724 = vrot.lane.b32.xlu0 %v4127_v30, %s3407_s27  ;;  %v4184_v28 = vpop.f32.mrb[62].mxu0  ;;  %v1301_v40 = vpop.f32.mrb[62].mxu1 }
 0x164   : > { %4980 = vst [vmem:[#allocation11_spill] sm:$0xff] %v4184_v28  ;;  %v3245_v15 = vpop.f32.mrb[63].mxu0  ;;  %v4186_v46 = vpop.permute.xlu0 %732 }
 0x165   : > { %v3137_v52 = vpop.f32.mrb[63].mxu1 }
 0x166   : > { %888 = vrot.lane.b32.xlu1 %v658_v37, %s3408_s28  ;;  %v4191_v7 = vpop.permute.xlu1 %734 }
 0x167   : > { %850 = vrot.lane.b32.xlu0 %v4127_v30, %s3408_s28 }
 0x168   : > { %v4193_v53 = vpop.permute.xlu0 %858 }
 0x169   : > { %v4195_v54 = vpop.f32.mrb[64].mxu0  ;;  %v4199_v62 = vpop.f32.mrb[64].mxu1 }
 0x16a   : > { %4981 = vst [vmem:[#allocation12_spill] sm:$0xff] %v4195_v54  ;;  %726 = vrot.lane.b32.xlu1 %v4133_v38, %s3407_s27  ;;  %v3248_v60 = vpop.f32.mrb[65].mxu0  ;;  %v3140_v37 = vpop.f32.mrb[65].mxu1 }
 0x16b   : > { %728 = vrot.lane.b32.xlu0 %v4151_v55, %s3407_s27  ;;  %v2008_v20 = vpop.f32.mrb[66].mxu0  ;;  %v4203_v19 = vpop.f32.mrb[66].mxu1 }
 0x16c   : > { %v3249_v2 = vpop.f32.mrb[67].mxu0  ;;  %v697_v32 = vpop.permute.xlu0 %696 }
 0x16d   : > { %v3141_v23 = vpop.f32.mrb[67].mxu1  ;;  %v4209_v16 = vpop.permute.xlu1 %860 }
 0x16e   : > { %852 = vrot.lane.b32.xlu1 %v4133_v38, %s3408_s28 }
 0x16f   : > { %854 = vrot.lane.b32.xlu0 %v4151_v55, %s3408_s28 }
 0x170   : > { %v699_v13 = vpop.permute.xlu0 %698 }
 0x171   : > { %v4211_v33 = vpop.f32.mrb[68].mxu0  ;;  %v1313_v17 = vpop.f32.mrb[68].mxu1 }
 0x172   : > { %4982 = vst [vmem:[#allocation13_spill] sm:$0xff] %v4211_v33  ;;  %1546 = vrot.lane.b32.xlu1 %v4180_v27, %s3407_s27  ;;  %v3252_v29 = vpop.f32.mrb[69].mxu0  ;;  %v3144_v6 = vpop.f32.mrb[69].mxu1 }
 0x173   : > { %1544 = vrot.lane.b32.xlu0 %v4169_v63, %s3407_s27  ;;  %v4217_v22 = vpop.f32.mrb[70].mxu0  ;;  %v4221_v52 = vpop.f32.mrb[70].mxu1 }
 0x174   : > { %4983 = vst [vmem:[#allocation14_spill] sm:$0xff] %v4217_v22  ;;  %v701_v36 = vpop.permute.xlu1 %700  ;;  %v3253_v15 = vpop.f32.mrb[71].mxu0 }
 0x175   : > { %v4219_v40 = vpop.permute.xlu0 %736  ;;  %v3145_v60 = vpop.f32.mrb[71].mxu1  ;;  %v792_v15 = vadd.f32 %v697_v32, %v3843_v9 }
 0x176   : > { %2253 = vrot.lane.b32.xlu1 %v4195_v54, %s3407_s27 }
 0x177   : > { %2251 = vrot.lane.b32.xlu0 %v4184_v28, %s3407_s27 }
 0x178   : > { %v4227_v20 = vpop.permute.xlu1 %738 }
 0x179   : > { %v4229_v37 = vpop.permute.xlu0 %862  ;;  %v2020_v2 = vpop.f32.mrb[72].mxu0 }
 0x17a   : > { %1550 = vrot.lane.b32.xlu1 %v4203_v19, %s3407_s27  ;;  %v4233_v23 = vpop.f32.mrb[72].mxu1  ;;  %v3256_v29 = vpop.f32.mrb[73].mxu0 }
 0x17b   : > { %1548 = vrot.lane.b32.xlu0 %v4199_v62, %s3407_s27  ;;  %v3148_v17 = vpop.f32.mrb[73].mxu1  ;;  %v4237_v6 = vpop.f32.mrb[74].mxu0 }
 0x17c   : > { %4984 = vst [vmem:[#allocation15_spill] sm:$0xff] %v4237_v6  ;;  %v4240_v60 = vpop.permute.xlu1 %864  ;;  %v1323_v59 = vpop.f32.mrb[74].mxu1 }
 0x17d   : > { %v827_v28 = vpop.permute.xlu0 %826  ;;  %v3149_v54 = vpop.f32.mrb[75].mxu1 }
 0x17e   : > { %v922_v2 = vadd.f32 %v827_v28, %v792_v15  ;;  %1676 = vrot.lane.b32.xlu1 %v4203_v19, %s3408_s28  ;;  %v3257_v12 = vpop.f32.mrb[75].mxu0  ;;  %v793_v54 = vadd.f32 %v699_v13, %v3849_v25 }
 0x17f   : > { %1674 = vrot.lane.b32.xlu0 %v4199_v62, %s3408_s28 }
 0x180   : > { %v703_v29 = vpop.permute.xlu1 %702  ;;  %v4247_v17 = vadd.f32 %v4147_v57, %v922_v2 }
 0x181   : > { %v4249_v45 = vpop.permute.xlu0 %740  ;;  %v4251_v9 = vpop.f32.mrb[76].mxu0 }
 0x182   : > { %4985 = vst [vmem:[#allocation16_spill] sm:$0xff] %v4247_v17  ;;  %4986 = vst [vmem:[#allocation17_spill] sm:$0xff] %v4251_v9  ;;  %2257 = vrot.lane.b32.xlu1 %v4217_v22, %s3407_s27  ;;  %v3260_v59 = vpop.f32.mrb[77].mxu0  ;;  %v4255_v28 = vpop.f32.mrb[76].mxu1 }
 0x183   : > { %2255 = vrot.lane.b32.xlu0 %v4211_v33, %s3407_s27  ;;  %v2030_v12 = vpop.f32.mrb[78].mxu0  ;;  %v3152_v32 = vpop.f32.mrb[77].mxu1 }
 0x184   : > { %v829_v15 = vpop.permute.xlu1 %828  ;;  %v3261_v57 = vpop.f32.mrb[79].mxu0 }
 0x185   : > { %v4260_v2 = vpop.permute.xlu0 %866  ;;  %v923_v31 = vadd.f32 %v829_v15, %v793_v54  ;;  %v4262_v1 = vpop.f32.mrb[78].mxu1 }
 0x186   : > { %2383 = vrot.lane.b32.xlu1 %v4217_v22, %s3408_s28  ;;  %v3153_v59 = vpop.f32.mrb[79].mxu1 }
 0x187   : > { %2381 = vrot.lane.b32.xlu0 %v4211_v33, %s3408_s28  ;;  %v4269_v25 = vadd.f32 %v4154_v10, %v923_v31  ;;  %v794_v33 = vadd.f32 %v701_v36, %v3870_v47 }
 0x188   : > { %v4271_v13 = vpop.permute.xlu1 %742 }
 0x189   : > { %4987 = vst [vmem:[#allocation18_spill] sm:$0xff] %v4269_v25  ;;  %v705_v12 = vpop.permute.xlu0 %704  ;;  %v4273_v32 = vpop.f32.mrb[80].mxu0 }
 0x18a   : > { %4988 = vst [vmem:[#allocation19_spill] sm:$0xff] %v4273_v32  ;;  %1554 = vrot.lane.b32.xlu1 %v4233_v23, %s3407_s27  ;;  %v1335_v54 = vpop.f32.mrb[80].mxu1  ;;  %v3264_v15 = vpop.f32.mrb[81].mxu0 }
 0x18b   : > { %1552 = vrot.lane.b32.xlu0 %v4221_v52, %s3407_s27  ;;  %v3156_v57 = vpop.f32.mrb[81].mxu1  ;;  %v4279_v59 = vpop.f32.mrb[82].mxu0 }
 0x18c   : > { %4989 = vst [vmem:[#allocation20_spill] sm:$0xff] %v4279_v59  ;;  %v4282_v31 = vpop.permute.xlu1 %868  ;;  %v4284_v10 = vpop.f32.mrb[82].mxu1 }
 0x18d   : > { %v831_v22 = vpop.permute.xlu0 %830  ;;  %v3265_v24 = vpop.f32.mrb[83].mxu0 }
 0x18e   : > { %v924_v17 = vadd.f32 %v831_v22, %v794_v33  ;;  %1680 = vrot.lane.b32.xlu1 %v4233_v23, %s3408_s28  ;;  %v3157_v54 = vpop.f32.mrb[83].mxu1  ;;  %v795_v33 = vadd.f32 %v703_v29, %v3891_v0 }
 0x18f   : > { %1678 = vrot.lane.b32.xlu0 %v4221_v52, %s3408_s28 }
 0x190   : > { %v707_v15 = vpop.permute.xlu1 %706  ;;  %v4291_v57 = vadd.f32 %v4169_v63, %v924_v17 }
 0x191   : > { %v4293_v25 = vpop.permute.xlu0 %744  ;;  %v2042_v47 = vpop.f32.mrb[84].mxu0 }
 0x192   : > { %4990 = vst [vmem:[#allocation21_spill] sm:$0xff] %v4291_v57  ;;  %2261 = vrot.lane.b32.xlu1 %v4251_v9, %s3407_s27  ;;  %v4297_v36 = vpop.f32.mrb[84].mxu1  ;;  %v3268_v24 = vpop.f32.mrb[85].mxu0 }
 0x193   : > { %2259 = vrot.lane.b32.xlu0 %v4237_v6, %s3407_s27  ;;  %v3160_v22 = vpop.f32.mrb[85].mxu1  ;;  %v4302_v54 = vpop.f32.mrb[86].mxu0 }
 0x194   : > { %v833_v26 = vpop.permute.xlu1 %832  ;;  %v1345_v63 = vpop.f32.mrb[86].mxu1 }
 0x195   : > { %v4304_v17 = vpop.permute.xlu0 %870  ;;  %v925_v57 = vadd.f32 %v833_v26, %v795_v33  ;;  %v3161_v47 = vpop.f32.mrb[87].mxu1 }
 0x196   : > { %2387 = vrot.lane.b32.xlu1 %v4251_v9, %s3408_s28  ;;  %v3269_v4 = vpop.f32.mrb[87].mxu0  ;;  %v796_v47 = vadd.f32 %v705_v12, %v3910_v35  ;;  %v797_v12 = vadd.f32 %v707_v15, %v3918_v49 }
 0x197   : > { %2385 = vrot.lane.b32.xlu0 %v4237_v6, %s3408_s28  ;;  %v4311_v0 = vadd.f32 %v4180_v27, %v925_v57 }
 0x198   : > { %v4313_v29 = vpop.permute.xlu1 %746 }
 0x199   : > { %4991 = vst [vmem:[#allocation22_spill] sm:$0xff] %v4311_v0  ;;  %4992 = vst [vmem:[#allocation23_spill] sm:$0xff] %v4313_v29  ;;  %v709_v24 = vpop.permute.xlu0 %708  ;;  %v4315_v22 = vpop.f32.mrb[88].mxu0 }
 0x19a   : > { %1558 = vrot.lane.b32.xlu1 %v4262_v1, %s3407_s27  ;;  %v4319_v26 = vpop.f32.mrb[88].mxu1  ;;  %v3272_v33 = vpop.f32.mrb[89].mxu0 }
 0x19b   : > { %1556 = vrot.lane.b32.xlu0 %v4255_v28, %s3407_s27  ;;  %v3164_v4 = vpop.f32.mrb[89].mxu1  ;;  %v2052_v63 = vpop.f32.mrb[90].mxu0 }
 0x19c   : > { %v4324_v27 = vpop.permute.xlu1 %872  ;;  %v4326_v57 = vpop.f32.mrb[90].mxu1 }
 0x19d   : > { %v835_v6 = vpop.permute.xlu0 %834  ;;  %v3165_v9 = vpop.f32.mrb[91].mxu1 }
 0x19e   : > { %v926_v0 = vadd.f32 %v835_v6, %v796_v47  ;;  %1684 = vrot.lane.b32.xlu1 %v4262_v1, %s3408_s28  ;;  %v3273_v29 = vpop.f32.mrb[91].mxu0 }
 0x19f   : > { %1682 = vrot.lane.b32.xlu0 %v4255_v28, %s3408_s28 }
 0x1a0   : > { %v711_v33 = vpop.permute.xlu1 %710  ;;  %v4333_v4 = vadd.f32 %v4199_v62, %v926_v0 }
 0x1a1   : > { %v4335_v63 = vpop.permute.xlu0 %748  ;;  %v4337_v35 = vpop.f32.mrb[92].mxu0 }
 0x1a2   : > { %4993 = vst [vmem:[#allocation24_spill] sm:$0xff] %v4333_v4  ;;  %4994 = vst [vmem:[#allocation25_spill] sm:$0xff] %v4335_v63  ;;  %2265 = vrot.lane.b32.xlu1 %v4279_v59, %s3407_s27  ;;  %v1357_v9 = vpop.f32.mrb[92].mxu1  ;;  %v3276_v6 = vpop.f32.mrb[93].mxu0 }
 0x1a3   : > { %2263 = vrot.lane.b32.xlu0 %v4273_v32, %s3407_s27  ;;  %v3168_v29 = vpop.f32.mrb[93].mxu1  ;;  %v4344_v47 = vpop.f32.mrb[94].mxu0 }
 0x1a4   : > { %v837_v39 = vpop.permute.xlu1 %836  ;;  %v4346_v62 = vpop.f32.mrb[94].mxu1 }
 0x1a5   : > { %v4348_v0 = vpop.permute.xlu0 %874  ;;  %v927_v4 = vadd.f32 %v837_v39, %v797_v12  ;;  %v3169_v63 = vpop.f32.mrb[95].mxu1 }
 0x1a6   : > { %4995 = vst [vmem:[#allocation26_spill] sm:$0xff] %v4348_v0  ;;  %2391 = vrot.lane.b32.xlu1 %v4279_v59, %s3408_s28  ;;  %v3277_v9 = vpop.f32.mrb[95].mxu0 }
 0x1a7   : > { %2389 = vrot.lane.b32.xlu0 %v4273_v32, %s3408_s28  ;;  %v4355_v49 = vadd.f32 %v4203_v19, %v927_v4  ;;  %v798_v9 = vadd.f32 %v709_v24, %v3941_v8  ;;  %v809_v8 = vadd.f32 %v4171_v5, %v4133_v38 }
 0x1a8   : > { %v4357_v15 = vpop.permute.xlu1 %750 }
 0x1a9   : > { %4996 = vst [vmem:[#allocation27_spill] sm:$0xff] %v4355_v49  ;;  %4997 = vst [vmem:[#allocation28_spill] sm:$0xff] %v4357_v15  ;;  %v713_v6 = vpop.permute.xlu0 %712  ;;  %v2064_v29 = vpop.f32.mrb[96].mxu0 }
 0x1aa   : > { %1562 = vrot.lane.b32.xlu1 %v4297_v36, %s3407_s27  ;;  %v4361_v0 = vpop.f32.mrb[96].mxu1  ;;  %v3280_v39 = vpop.f32.mrb[97].mxu0 }
 0x1ab   : > { %1560 = vrot.lane.b32.xlu0 %v4284_v10, %s3407_s27  ;;  %v3172_v63 = vpop.f32.mrb[97].mxu1  ;;  %v4365_v12 = vpop.f32.mrb[98].mxu0 }
 0x1ac   : > { %v4368_v19 = vpop.permute.xlu1 %876  ;;  %v1367_v4 = vpop.f32.mrb[98].mxu1 }
 0x1ad   : > { %4998 = vst [vmem:[#allocation29_spill] sm:$0xff] %v4368_v19  ;;  %v839_v32 = vpop.permute.xlu0 %838  ;;  %v3173_v59 = vpop.f32.mrb[99].mxu1 }
 0x1ae   : > { %v928_v29 = vadd.f32 %v839_v32, %v798_v9  ;;  %1688 = vrot.lane.b32.xlu1 %v4297_v36, %s3408_s28  ;;  %v3281_v49 = vpop.f32.mrb[99].mxu0  ;;  %v799_v9 = vadd.f32 %v711_v33, %v3960_v58 }
 0x1af   : > { %1686 = vrot.lane.b32.xlu0 %v4284_v10, %s3408_s28  ;;  %v939_v49 = vadd.f32 %v4209_v16, %v809_v8 }
 0x1b0   : > { %v715_v39 = vpop.permute.xlu1 %714  ;;  %v4375_v63 = vadd.f32 %v4221_v52, %v928_v29 }
 0x1b1   : > { %v4379_v24 = vpop.permute.xlu0 %752  ;;  %v4381_v4 = vpop.f32.mrb[100].mxu0 }
 0x1b2   : > { %4999 = vst [vmem:[#allocation30_spill] sm:$0xff] %v4375_v63  ;;  %5000 = vst [vmem:[#allocation31_spill] sm:$0xff] %v4379_v24  ;;  %v4383_v59 = vpop.f32.mrb[100].mxu1  ;;  %2269 = vrot.lane.b32.xlu1 %v4315_v22, %s3407_s27  ;;  %v3284_v32 = vpop.f32.mrb[101].mxu0 }
 0x1b3   : > { %v3176_v15 = vpop.f32.mrb[101].mxu1  ;;  %2267 = vrot.lane.b32.xlu0 %v4302_v54, %s3407_s27  ;;  %v2074_v52 = vpop.f32.mrb[102].mxu0 }
 0x1b4   : > { %v4391_v38 = vpop.f32.mrb[102].mxu1  ;;  %v841_v5 = vpop.permute.xlu1 %840  ;;  %v810_v15 = vadd.f32 %v4186_v46, %v4151_v55 }
 0x1b5   : > { %v4393_v29 = vpop.permute.xlu0 %878  ;;  %v929_v63 = vadd.f32 %v841_v5, %v799_v9  ;;  %v3177_v24 = vpop.f32.mrb[103].mxu1  ;;  %v4396_v19 = vadd.f32 %v4391_v38, %v939_v49 }
 0x1b6   : > { %2395 = vrot.lane.b32.xlu1 %v4315_v22, %s3408_s28  ;;  %v3285_v16 = vpop.f32.mrb[103].mxu0  ;;  %v940_v9 = vadd.f32 %v4229_v37, %v810_v15  ;;  %v811_v15 = vadd.f32 %v4191_v7, %v3845_v11  ;;  %v801_v11 = vadd.f32 %v715_v39, %v3991_v43  ;;  %v812_v43 = vadd.f32 %v4219_v40, %v3866_v44 }
 0x1b7   : > { %2393 = vrot.lane.b32.xlu0 %v4302_v54, %s3408_s28  ;;  %v4403_v58 = vadd.f32 %v4233_v23, %v929_v63  ;;  %v800_v63 = vadd.f32 %v713_v6, %v3983_v21 }
 0x1b8   : > { %v4405_v33 = vpop.permute.xlu1 %754 }
 0x1b9   : > { %v717_v8 = vpop.permute.xlu0 %716  ;;  %v4409_v24 = vpop.f32.mrb[104].mxu0 }
 0x1ba   : > { %5001 = vst [vmem:[#allocation32_spill] sm:$0xff] %v4409_v24  ;;  %v1379_v32 = vpop.f32.mrb[104].mxu1  ;;  %1566 = vrot.lane.b32.xlu1 %v4326_v57, %s3407_s27  ;;  %v3288_v49 = vpop.f32.mrb[105].mxu0 }
 0x1bb   : > { %v3180_v52 = vpop.f32.mrb[105].mxu1  ;;  %1564 = vrot.lane.b32.xlu0 %v4319_v26, %s3407_s27  ;;  %v4416_v23 = vpop.f32.mrb[106].mxu0 }
 0x1bc   : > { %v4419_v5 = vpop.f32.mrb[106].mxu1  ;;  %v4421_v55 = vpop.permute.xlu1 %880  ;;  %v941_v52 = vadd.f32 %v4240_v60, %v811_v15 }
 0x1bd   : > { %v843_v46 = vpop.permute.xlu0 %842  ;;  %v3181_v16 = vpop.f32.mrb[107].mxu1  ;;  %v4424_v32 = vadd.f32 %v4419_v5, %v940_v9 }
 0x1be   : > { %v930_v49 = vadd.f32 %v843_v46, %v800_v63  ;;  %1692 = vrot.lane.b32.xlu1 %v4326_v57, %s3408_s28  ;;  %v3289_v37 = vpop.f32.mrb[107].mxu0 }
 0x1bf   : > { %5002 = vst [vmem:[#allocation33_spill] sm:$0xff] %v4424_v32  ;;  %1690 = vrot.lane.b32.xlu0 %v4319_v26, %s3408_s28 }
 0x1c0   : > { %v719_v21 = vpop.permute.xlu1 %718  ;;  %v4433_v6 = vadd.f32 %v4255_v28, %v930_v49 }
 0x1c1   : > { %v4436_v16 = vpop.permute.xlu0 %756  ;;  %v2086_v9 = vpop.f32.mrb[108].mxu0 }
 0x1c2   : > { %v4438_v63 = vpop.f32.mrb[108].mxu1  ;;  %2273 = vrot.lane.b32.xlu1 %v4344_v47, %s3407_s27  ;;  %v3292_v46 = vpop.f32.mrb[109].mxu0 }
 0x1c3   : > { %2271 = vrot.lane.b32.xlu0 %v4337_v35, %s3407_s27  ;;  %v3184_v7 = vpop.f32.mrb[109].mxu1  ;;  %v4445_v37 = vpop.f32.mrb[110].mxu0  ;;  %v4448_v28 = vadd.f32 %v4438_v63, %v941_v52 }
 0x1c4   : > { %v845_v60 = vpop.permute.xlu1 %844  ;;  %v1389_v49 = vpop.f32.mrb[110].mxu1  ;;  %v813_v7 = vadd.f32 %v4227_v20, %v3873_v48  ;;  %v802_v20 = vadd.f32 %v717_v8, %v4014_v42  ;;  %v814_v8 = vadd.f32 %v4249_v45, %v3896_v14 }
 0x1c5   : > { %5003 = vst [vmem:[#allocation34_spill] sm:$0xff] %v4448_v28  ;;  %v4450_v15 = vpop.permute.xlu0 %882  ;;  %v931_v9 = vadd.f32 %v845_v60, %v801_v11  ;;  %v3185_v32 = vpop.f32.mrb[111].mxu1 }
 0x1c6   : > { %2399 = vrot.lane.b32.xlu1 %v4344_v47, %s3408_s28  ;;  %v3293_v46 = vpop.f32.mrb[111].mxu0  ;;  %v942_v32 = vadd.f32 %v4260_v2, %v812_v43  ;;  %v943_v40 = vadd.f32 %v4282_v31, %v813_v7 }
 0x1c7   : > { %2397 = vrot.lane.b32.xlu0 %v4337_v35, %s3408_s28  ;;  %v4459_v39 = vadd.f32 %v4262_v1, %v931_v9 }
 0x1c8   : > { %v4461_v52 = vpop.permute.xlu1 %758 }
 0x1c9   : > { %v721_v11 = vpop.permute.xlu0 %720  ;;  %v4466_v60 = vpop.f32.mrb[112].mxu0 }
 0x1ca   : > { %v4468_v49 = vpop.f32.mrb[112].mxu1  ;;  %1570 = vrot.lane.b32.xlu1 %v4361_v0, %s3407_s27  ;;  %v3296_v44 = vpop.f32.mrb[113].mxu0 }
 0x1cb   : > { %v3188_v1 = vpop.f32.mrb[113].mxu1  ;;  %1568 = vrot.lane.b32.xlu0 %v4346_v62, %s3407_s27  ;;  %v2096_v9 = vpop.f32.mrb[114].mxu0  ;;  %v4476_v48 = vadd.f32 %v4468_v49, %v942_v32 }
 0x1cc   : > { %v4479_v2 = vpop.f32.mrb[114].mxu1  ;;  %v4481_v46 = vpop.permute.xlu1 %884 }
 0x1cd   : > { %5004 = vst [vmem:[#allocation35_spill] sm:$0xff] %v4476_v48  ;;  %v847_v43 = vpop.permute.xlu0 %846  ;;  %v3189_v28 = vpop.f32.mrb[115].mxu1  ;;  %v4484_v44 = vadd.f32 %v4479_v2, %v943_v40 }
 0x1ce   : > { %v932_v31 = vadd.f32 %v847_v43, %v802_v20  ;;  %1696 = vrot.lane.b32.xlu1 %v4361_v0, %s3408_s28  ;;  %v3297_v7 = vpop.f32.mrb[115].mxu0  ;;  %v944_v20 = vadd.f32 %v4304_v17, %v814_v8  ;;  %v803_v43 = vadd.f32 %v719_v21, %v4033_v61  ;;  %v815_v61 = vadd.f32 %v4271_v13, %v3912_v41 }
 0x1cf   : > { %5005 = vst [vmem:[#allocation36_spill] sm:$0xff] %v4484_v44  ;;  %1694 = vrot.lane.b32.xlu0 %v4346_v62, %s3408_s28  ;;  %v804_v8 = vadd.f32 %v721_v11, %v4056_v50 }
 0x1d0   : > { %v723_v32 = vpop.permute.xlu1 %722  ;;  %v4491_v42 = vadd.f32 %v4284_v10, %v932_v31 }
 0x1d1   : > { %v4495_v1 = vpop.permute.xlu0 %886  ;;  %v4497_v28 = vpop.f32.mrb[116].mxu0 }
 0x1d2   : > { %v1401_v40 = vpop.f32.mrb[116].mxu1  ;;  %2277 = vrot.lane.b32.xlu1 %v4381_v4, %s3407_s27  ;;  %v3300_v9 = vpop.f32.mrb[117].mxu0 }
 0x1d3   : > { %v3192_v7 = vpop.f32.mrb[117].mxu1  ;;  %2275 = vrot.lane.b32.xlu0 %v4365_v12, %s3407_s27  ;;  %v4505_v10 = vpop.f32.mrb[118].mxu0 }
 0x1d4   : > { %v4507_v14 = vpop.f32.mrb[118].mxu1  ;;  %v849_v45 = vpop.permute.xlu1 %848 }
 0x1d5   : > { %v933_v31 = vadd.f32 %v849_v45, %v803_v43  ;;  %v725_v48 = vpop.permute.xlu0 %724  ;;  %v3193_v40 = vpop.f32.mrb[119].mxu1  ;;  %v4510_v44 = vadd.f32 %v4507_v14, %v944_v20  ;;  %v945_v20 = vadd.f32 %v4324_v27, %v815_v61 }
 0x1d6   : > { %2403 = vrot.lane.b32.xlu1 %v4381_v4, %s3408_s28  ;;  %v3301_v17 = vpop.f32.mrb[119].mxu0 }
 0x1d7   : > { %5006 = vst [vmem:[#allocation37_spill] sm:$0xff] %v4510_v44  ;;  %2401 = vrot.lane.b32.xlu0 %v4365_v12, %s3408_s28  ;;  %v4519_v21 = vadd.f32 %v4297_v36, %v933_v31 }
 0x1d8   : > { %v4522_v9 = vpop.permute.xlu1 %888 }
 0x1d9   : > { %v851_v43 = vpop.permute.xlu0 %850  ;;  %v2108_v7 = vpop.f32.mrb[120].mxu0 }
 0x1da   : > { %v934_v45 = vadd.f32 %v851_v43, %v804_v8  ;;  %v4525_v40 = vpop.f32.mrb[120].mxu1  ;;  %1574 = vrot.lane.b32.xlu1 %v4391_v38, %s3407_s27  ;;  %v3304_v41 = vpop.f32.mrb[121].mxu0 }
 0x1db   : > { %1572 = vrot.lane.b32.xlu0 %v4383_v59, %s3407_s27  ;;  %v3196_v13 = vpop.f32.mrb[121].mxu1  ;;  %v4531_v36 = vpop.f32.mrb[122].mxu0  ;;  %v4534_v50 = vadd.f32 %v4525_v40, %v945_v20  ;;  %v816_v41 = vadd.f32 %v4293_v25, %v3935_v34  ;;  %v805_v20 = vadd.f32 %v723_v32, %v4064_v3 }
 0x1dc   : > { %v727_v11 = vpop.permute.xlu1 %726  ;;  %v1411_v27 = vpop.f32.mrb[122].mxu1  ;;  %v4537_v31 = vadd.f32 %v4319_v26, %v934_v45 }
 0x1dd   : > { %5007 = vst [vmem:[#allocation38_spill] sm:$0xff] %v4534_v50  ;;  %v807_v17 = vadd.f32 %v727_v11, %v4107_v18  ;;  %v729_v61 = vpop.permute.xlu0 %728  ;;  %v3197_v8 = vpop.f32.mrb[123].mxu1  ;;  %v806_v18 = vadd.f32 %v725_v48, %v4087_v51  ;;  %v5009_v11 = vld [vmem:[#allocation23_spill] sm:$0xff]  ;;  %v5011_v48 = vld [vmem:[#allocation29_spill] sm:$0xff] }
 0x1de   : > { %v808_v43 = vadd.f32 %v729_v61, %v4127_v30  ;;  %1700 = vrot.lane.b32.xlu1 %v4391_v38, %s3408_s28  ;;  %v3305_v7 = vpop.f32.mrb[123].mxu0  ;;  %v5008_v30 = vld [vmem:[#allocation2_spill] sm:$0xff] }
 0x1df   : > { %v937_v13 = vadd.f32 %v4176_v56, %v807_v17  ;;  %1698 = vrot.lane.b32.xlu0 %v4383_v59, %s3408_s28  ;;  %v817_v27 = vadd.f32 %v5009_v11, %v5008_v30  ;;  %v5010_v38 = vld [vmem:[#allocation26_spill] sm:$0xff]  ;;  %v5014_v11 = vld [vmem:[#allocation3_spill] sm:$0xff] }
 0x1e0   : > { %v938_v26 = vadd.f32 %v4193_v53, %v808_v43  ;;  %v853_v45 = vpop.permute.xlu1 %852  ;;  %v946_v61 = vadd.f32 %v5010_v38, %v816_v41 }
 0x1e1   : > { %v935_v8 = vadd.f32 %v853_v45, %v805_v20  ;;  %v855_v7 = vpop.permute.xlu0 %854  ;;  %v4554_v34 = vpop.f32.mrb[124].mxu0  ;;  %v4557_v3 = vadd.f32 %v4361_v0, %v937_v13  ;;  %v947_v32 = vadd.f32 %v5011_v48, %v817_v27  ;;  %v5015_v27 = vld [vmem:[#allocation25_spill] sm:$0xff] }
 0x1e2   : > { %v936_v56 = vadd.f32 %v855_v7, %v806_v18  ;;  %v4559_v25 = vpop.f32.mrb[124].mxu1  ;;  %2281 = vrot.lane.b32.xlu1 %v4416_v23, %s3407_s27  ;;  %v3308_v51 = vpop.f32.mrb[125].mxu0  ;;  %v4564_v53 = vadd.f32 %v4383_v59, %v938_v26  ;;  %v818_v38 = vadd.f32 %v5015_v27, %v5014_v11  ;;  %v5017_v11 = vld [vmem:[#allocation4_spill] sm:$0xff] }
 0x1e3   : > { %v3200_v17 = vpop.f32.mrb[125].mxu1  ;;  %2279 = vrot.lane.b32.xlu0 %v4409_v24, %s3407_s27  ;;  %v2118_v43 = vpop.f32.mrb[126].mxu0  ;;  %v4570_v0 = vadd.f32 %v4326_v57, %v935_v8  ;;  %v4573_v41 = vadd.f32 %v4559_v25, %v946_v61  ;;  %v5018_v27 = vld [vmem:[#allocation28_spill] sm:$0xff] }
 0x1e4   : > { %v4575_v20 = vpop.f32.mrb[126].mxu1  ;;  %v1547_v13 = vpop.permute.xlu1 %1546  ;;  %v4578_v18 = vadd.f32 %v4346_v62, %v936_v56  ;;  %v948_v56 = vadd.f32 %v4393_v29, %v818_v38  ;;  %v819_v38 = vadd.f32 %v5018_v27, %v5017_v11 }
 0x1e5   : > { %5012 = vst [vmem:[#allocation2_spill] sm:$0xff] %v4573_v41  ;;  %v1545_v59 = vpop.permute.xlu0 %1544  ;;  %v3201_v26 = vpop.f32.mrb[127].mxu1  ;;  %v4581_v45 = vadd.f32 %v4575_v20, %v947_v32 }
 0x1e6   : > { %2407 = vrot.lane.b32.xlu1 %v4416_v23, %s3408_s28  ;;  %v3309_v30 = vpop.f32.mrb[127].mxu0 }
 0x1e7   : > { %5013 = vst [vmem:[#allocation23_spill] sm:$0xff] %v4581_v45  ;;  %2405 = vrot.lane.b32.xlu0 %v4409_v24, %s3408_s28 }
 0x1e8   : > { %v2254_v57 = vpop.permute.xlu1 %2253 }
 0x1e9   : > { %v2252_v61 = vpop.permute.xlu0 %2251  ;;  %v4589_v8 = vpop.f32.mrb[128].mxu0 }
 0x1ea   : > { %v1423_v62 = vpop.f32.mrb[128].mxu1  ;;  %1578 = vrot.lane.b32.xlu1 %v4438_v63, %s3407_s27  ;;  %v3312_v7 = vpop.f32.mrb[129].mxu0 }
 0x1eb   : > { %v3204_v51 = vpop.f32.mrb[129].mxu1  ;;  %1576 = vrot.lane.b32.xlu0 %v4419_v5, %s3407_s27  ;;  %v4596_v48 = vpop.f32.mrb[130].mxu0  ;;  %v5019_v62 = vld [vmem:[#allocation18_spill] sm:$0xff] }
 0x1ec   : > { %v4598_v32 = vpop.f32.mrb[130].mxu1  ;;  %v4600_v17 = vpop.permute.xlu1 %1550  ;;  %v1641_v7 = vadd.f32 %v1547_v13, %v5019_v62  ;;  %v5020_v51 = vld [vmem:[#allocation16_spill] sm:$0xff]  ;;  %v5021_v13 = vld [vmem:[#allocation10_spill] sm:$0xff]  ;;  %v5024_v62 = vld [vmem:[#allocation5_spill] sm:$0xff] }
 0x1ed   : > { %v4602_v43 = vpop.permute.xlu0 %1548  ;;  %v3205_v26 = vpop.f32.mrb[131].mxu1  ;;  %v4605_v30 = vadd.f32 %v4598_v32, %v948_v56  ;;  %v1640_v41 = vadd.f32 %v1545_v59, %v5020_v51 }
 0x1ee   : > { %1704 = vrot.lane.b32.xlu1 %v4438_v63, %s3408_s28  ;;  %v3313_v29 = vpop.f32.mrb[131].mxu0  ;;  %v949_v26 = vadd.f32 %v4421_v55, %v819_v38 }
 0x1ef   : > { %5016 = vst [vmem:[#allocation26_spill] sm:$0xff] %v4605_v30  ;;  %1702 = vrot.lane.b32.xlu0 %v4419_v5, %s3408_s28 }
 0x1f0   : > { %v1677_v45 = vpop.permute.xlu1 %1676 }
 0x1f1   : > { %v1675_v44 = vpop.permute.xlu0 %1674  ;;  %v1771_v56 = vadd.f32 %v1677_v45, %v1641_v7  ;;  %v2130_v30 = vpop.f32.mrb[132].mxu0  ;;  %v5023_v45 = vld [vmem:[#allocation9_spill] sm:$0xff]  ;;  %v5025_v7 = vld [vmem:[#allocation31_spill] sm:$0xff] }
 0x1f2   : > { %v1770_v50 = vadd.f32 %v1675_v44, %v1640_v41  ;;  %v4616_v24 = vpop.f32.mrb[132].mxu1  ;;  %2285 = vrot.lane.b32.xlu1 %v4466_v60, %s3407_s27  ;;  %v3316_v63 = vpop.f32.mrb[133].mxu0  ;;  %v820_v51 = vadd.f32 %v5025_v7, %v5024_v62 }
 0x1f3   : > { %v2188_v29 = vadd.f32 %v5021_v13, %v1771_v56  ;;  %2283 = vrot.lane.b32.xlu0 %v4445_v37, %s3407_s27  ;;  %v3208_v5 = vpop.f32.mrb[133].mxu1  ;;  %v4623_v59 = vpop.f32.mrb[134].mxu0  ;;  %v4626_v55 = vadd.f32 %v4616_v24, %v949_v26  ;;  %v5026_v63 = vld [vmem:[#allocation6_spill] sm:$0xff] }
 0x1f4   : > { %v2187_v44 = vadd.f32 %v5023_v45, %v1770_v50  ;;  %v4629_v41 = vpop.permute.xlu1 %2257  ;;  %v1433_v30 = vpop.f32.mrb[134].mxu1  ;;  %v821_v13 = vadd.f32 %v4405_v33, %v5026_v63  ;;  %v950_v5 = vadd.f32 %v4450_v15, %v820_v51 }
 0x1f5   : > { %5022 = vst [vmem:[#allocation29_spill] sm:$0xff] %v4626_v55  ;;  %v4631_v11 = vpop.permute.xlu0 %2255  ;;  %v3209_v27 = vpop.f32.mrb[135].mxu1  ;;  %v2348_v26 = vadd.f32 %v2254_v57, %v2188_v29 }
 0x1f6   : > { %2411 = vrot.lane.b32.xlu1 %v4466_v60, %s3408_s28  ;;  %v3317_v38 = vpop.f32.mrb[135].mxu0  ;;  %v2347_v56 = vadd.f32 %v2252_v61, %v2187_v44  ;;  %v951_v15 = vadd.f32 %v4481_v46, %v821_v13  ;;  %v5029_v13 = vld [vmem:[#allocation22_spill] sm:$0xff] }
 0x1f7   : > { %2409 = vrot.lane.b32.xlu0 %v4445_v37, %s3408_s28 }
 0x1f8   : > { %v2384_v50 = vpop.permute.xlu1 %2383 }
 0x1f9   : > { %v2382_v45 = vpop.permute.xlu0 %2381  ;;  %v2478_v30 = vadd.f32 %v2384_v50, %v2348_v26  ;;  %v4643_v27 = vpop.f32.mrb[136].mxu0 }
 0x1fa   : > { %v2477_v38 = vadd.f32 %v2382_v45, %v2347_v56  ;;  %v4650_v57 = vpop.f32.mrb[136].mxu1  ;;  %1582 = vrot.lane.b32.xlu1 %v4479_v2, %s3407_s27  ;;  %v3320_v33 = vpop.f32.mrb[137].mxu0  ;;  %v5030_v45 = vld [vmem:[#allocation21_spill] sm:$0xff] }
 0x1fb   : > { %v2892_v61 = vpack.c.bf16 %v2478_v30, %v2478_v30  ;;  %v3212_v29 = vpop.f32.mrb[137].mxu1  ;;  %1580 = vrot.lane.b32.xlu0 %v4468_v49, %s3407_s27  ;;  %v2140_v44 = vpop.f32.mrb[138].mxu0  ;;  %v4658_v62 = vadd.f32 %v4650_v57, %v950_v5  ;;  %v1643_v5 = vadd.f32 %v4600_v17, %v5029_v13  ;;  %v1642_v30 = vadd.f32 %v4602_v43, %v5030_v45  ;;  %v5031_v33 = vld [vmem:[#allocation7_spill] sm:$0xff] }
 0x1fc   : > { %v2891_v7 = vpack.c.bf16 %v2477_v38, %v2477_v38  ;;  %v4660_v51 = vpop.f32.mrb[138].mxu1  ;;  %v1555_v26 = vpop.permute.xlu1 %1554 }
 0x1fd   : > { %5027 = vst [vmem:[#allocation3_spill] sm:$0xff] %v4658_v62  ;;  %2639 = vst.msk [vmem:[%s4648_s4 + $0x4] sm:$0xf] %vm2637_vm4, %v2892_v61  ;;  %v1553_v56 = vpop.permute.xlu0 %1552  ;;  %v3213_v50 = vpop.f32.mrb[139].mxu1  ;;  %v4665_v63 = vadd.f32 %v4660_v51, %v951_v15  ;;  %v822_v15 = vadd.f32 %v4436_v16, %v5031_v33  ;;  %v5033_v16 = vld [vmem:[#allocation11_spill] sm:$0xff] }
 0x1fe   : > { %2638 = vst.msk [vmem:[%s4648_s4] sm:$0xf] %vm2637_vm4, %v2891_v7  ;;  %1708 = vrot.lane.b32.xlu1 %v4479_v2, %s3408_s28  ;;  %v3321_v46 = vpop.f32.mrb[139].mxu0 }
 0x1ff   : > { %5028 = vst [vmem:[#allocation25_spill] sm:$0xff] %v4665_v63  ;;  %1706 = vrot.lane.b32.xlu0 %v4468_v49, %s3408_s28  ;;  %v952_v50 = vadd.f32 %v4495_v1, %v822_v15  ;;  %v5032_v49 = vld [vmem:[#allocation12_spill] sm:$0xff] }
 0x200   : > { %v1681_v38 = vpop.permute.xlu1 %1680  ;;  %v5035_v15 = vld [vmem:[#allocation8_spill] sm:$0xff] }
 0x201   : > { %v1679_v61 = vpop.permute.xlu0 %1678  ;;  %v1773_v29 = vadd.f32 %v1681_v38, %v1643_v5  ;;  %v4679_v44 = vpop.f32.mrb[140].mxu0 }
 0x202   : > { %v1772_v7 = vadd.f32 %v1679_v61, %v1642_v30  ;;  %v1445_v2 = vpop.f32.mrb[140].mxu1  ;;  %2289 = vrot.lane.b32.xlu1 %v4505_v10, %s3407_s27  ;;  %v3324_v17 = vpop.f32.mrb[141].mxu0 }
 0x203   : > { %v2190_v46 = vadd.f32 %v5032_v49, %v1773_v29  ;;  %v3216_v13 = vpop.f32.mrb[141].mxu1  ;;  %2287 = vrot.lane.b32.xlu0 %v4497_v28, %s3407_s27  ;;  %v4687_v43 = vpop.f32.mrb[142].mxu0  ;;  %v823_v29 = vadd.f32 %v4461_v52, %v5035_v15 }
 0x204   : > { %v2189_v5 = vadd.f32 %v5033_v16, %v1772_v7  ;;  %v4690_v45 = vpop.f32.mrb[142].mxu1  ;;  %v2262_v30 = vpop.permute.xlu1 %2261 }
 0x205   : > { %v2260_v38 = vpop.permute.xlu0 %2259  ;;  %v3217_v33 = vpop.f32.mrb[143].mxu1  ;;  %v4693_v61 = vadd.f32 %v4690_v45, %v952_v50  ;;  %v2350_v7 = vadd.f32 %v4629_v41, %v2190_v46  ;;  %v953_v49 = vadd.f32 %v4522_v9, %v823_v29 }
 0x206   : > { %2415 = vrot.lane.b32.xlu1 %v4505_v10, %s3408_s28  ;;  %v3325_v1 = vpop.f32.mrb[143].mxu0  ;;  %v2349_v2 = vadd.f32 %v4631_v11, %v2189_v5 }
 0x207   : > { %5034 = vst [vmem:[#allocation4_spill] sm:$0xff] %v4693_v61  ;;  %2413 = vrot.lane.b32.xlu0 %v4497_v28, %s3408_s28 }
 0x208   : > { %v2388_v17 = vpop.permute.xlu1 %2387 }
 0x209   : > { %v2386_v50 = vpop.permute.xlu0 %2385  ;;  %v2480_v13 = vadd.f32 %v2388_v17, %v2350_v7  ;;  %v2152_v16 = vpop.f32.mrb[144].mxu0 }
 0x20a   : > { %v2479_v33 = vadd.f32 %v2386_v50, %v2349_v2  ;;  %v4704_v1 = vpop.f32.mrb[144].mxu1  ;;  %1586 = vrot.lane.b32.xlu1 %v4525_v40, %s3407_s27  ;;  %v3328_v52 = vpop.f32.mrb[145].mxu0  ;;  %v5037_v50 = vld [vmem:[#allocation27_spill] sm:$0xff] }
 0x20b   : > { %v2894_v15 = vpack.c.bf16 %v2480_v13, %v2480_v13  ;;  %1584 = vrot.lane.b32.xlu0 %v4507_v14, %s3407_s27  ;;  %v3220_v41 = vpop.f32.mrb[145].mxu1  ;;  %v4710_v11 = vpop.f32.mrb[146].mxu0  ;;  %v4713_v9 = vadd.f32 %v4704_v1, %v953_v49  ;;  %v1645_v13 = vadd.f32 %v1555_v26, %v5037_v50  ;;  %v5038_v49 = vld [vmem:[#allocation24_spill] sm:$0xff] }
 0x20c   : > { %v2893_v46 = vpack.c.bf16 %v2479_v33, %v2479_v33  ;;  %v1559_v5 = vpop.permute.xlu1 %1558  ;;  %v1455_v29 = vpop.f32.mrb[146].mxu1  ;;  %v1644_v16 = vadd.f32 %v1553_v56, %v5038_v49  ;;  %v5040_v56 = vld [vmem:[#allocation13_spill] sm:$0xff] }
 0x20d   : > { %5036 = vst [vmem:[#allocation28_spill] sm:$0xff] %v4713_v9  ;;  %2641 = vst.msk [vmem:[%s4648_s4 + $0xc] sm:$0xf] %vm2637_vm4, %v2894_v15  ;;  %v1557_v7 = vpop.permute.xlu0 %1556  ;;  %v3221_v2 = vpop.f32.mrb[147].mxu1 }
 0x20e   : > { %2640 = vst.msk [vmem:[%s4648_s4 + $0x8] sm:$0xf] %vm2637_vm4, %v2893_v46  ;;  %1712 = vrot.lane.b32.xlu1 %v4525_v40, %s3408_s28  ;;  %v3329_v17 = vpop.f32.mrb[147].mxu0  ;;  %v5039_v40 = vld [vmem:[#allocation14_spill] sm:$0xff] }
 0x20f   : > { %1710 = vrot.lane.b32.xlu0 %v4507_v14, %s3408_s28 }
 0x210   : > { %v1685_v33 = vpop.permute.xlu1 %1684 }
 0x211   : > { %v1683_v52 = vpop.permute.xlu0 %1682  ;;  %v1775_v41 = vadd.f32 %v1685_v33, %v1645_v13  ;;  %v4725_v29 = vpop.f32.mrb[148].mxu0 }
 0x212   : > { %v1774_v15 = vadd.f32 %v1683_v52, %v1644_v16  ;;  %2293 = vrot.lane.b32.xlu1 %v4554_v34, %s3407_s27  ;;  %v3332_v46 = vpop.f32.mrb[149].mxu0  ;;  %v4729_v2 = vpop.f32.mrb[148].mxu1 }
 0x213   : > { %v2192_v17 = vadd.f32 %v5039_v40, %v1775_v41  ;;  %2291 = vrot.lane.b32.xlu0 %v4531_v36, %s3407_s27  ;;  %v2162_v14 = vpop.f32.mrb[150].mxu0  ;;  %v3224_v26 = vpop.f32.mrb[149].mxu1 }
 0x214   : > { %v2191_v50 = vadd.f32 %v5040_v56, %v1774_v15  ;;  %v2266_v49 = vpop.permute.xlu1 %2265  ;;  %v3333_v13 = vpop.f32.mrb[151].mxu0 }
 0x215   : > { %v2264_v33 = vpop.permute.xlu0 %2263  ;;  %v4735_v61 = vpop.f32.mrb[150].mxu1  ;;  %v2352_v52 = vadd.f32 %v2262_v30, %v2192_v17 }
 0x216   : > { %2419 = vrot.lane.b32.xlu1 %v4554_v34, %s3408_s28  ;;  %v3225_v16 = vpop.f32.mrb[151].mxu1  ;;  %v2351_v41 = vadd.f32 %v2260_v38, %v2191_v50 }
 0x217   : > { %2417 = vrot.lane.b32.xlu0 %v4531_v36, %s3408_s28 }
 0x218   : > { %v2392_v46 = vpop.permute.xlu1 %2391 }
 0x219   : > { %v2390_v40 = vpop.permute.xlu0 %2389  ;;  %v2482_v14 = vadd.f32 %v2392_v46, %v2352_v52  ;;  %v4741_v15 = vpop.f32.mrb[152].mxu0 }
 0x21a   : > { %v2481_v26 = vadd.f32 %v2390_v40, %v2351_v41  ;;  %1590 = vrot.lane.b32.xlu1 %v4575_v20, %s3407_s27  ;;  %v1467_v56 = vpop.f32.mrb[152].mxu1  ;;  %v3336_v13 = vpop.f32.mrb[153].mxu0  ;;  %v1647_v40 = vadd.f32 %v1559_v5, %v4403_v58  ;;  %v5043_v5 = vld [vmem:[#allocation15_spill] sm:$0xff] }
 0x21b   : > { %v2896_v9 = vpack.c.bf16 %v2482_v14, %v2482_v14  ;;  %1588 = vrot.lane.b32.xlu0 %v4559_v25, %s3407_s27  ;;  %v3228_v16 = vpop.f32.mrb[153].mxu1  ;;  %v4747_v30 = vpop.f32.mrb[154].mxu0  ;;  %v5041_v14 = vld [vmem:[#allocation30_spill] sm:$0xff] }
 0x21c   : > { %v2895_v38 = vpack.c.bf16 %v2481_v26, %v2481_v26  ;;  %v1563_v17 = vpop.permute.xlu1 %1562  ;;  %v4749_v50 = vpop.f32.mrb[154].mxu1  ;;  %v1646_v26 = vadd.f32 %v1557_v7, %v5041_v14 }
 0x21d   : > { %2643 = vst.msk [vmem:[%s4648_s4 + $0x14] sm:$0xf] %vm2637_vm4, %v2896_v9  ;;  %v1561_v52 = vpop.permute.xlu0 %1560  ;;  %v3229_v41 = vpop.f32.mrb[155].mxu1 }
 0x21e   : > { %2642 = vst.msk [vmem:[%s4648_s4 + $0x10] sm:$0xf] %vm2637_vm4, %v2895_v38  ;;  %1716 = vrot.lane.b32.xlu1 %v4575_v20, %s3408_s28  ;;  %v3337_v46 = vpop.f32.mrb[155].mxu0  ;;  %v5042_v20 = vld [vmem:[#allocation17_spill] sm:$0xff] }
 0x21f   : > { %1714 = vrot.lane.b32.xlu0 %v4559_v25, %s3408_s28 }
 0x220   : > { %v1689_v56 = vpop.permute.xlu1 %1688 }
 0x221   : > { %v1687_v13 = vpop.permute.xlu0 %1686  ;;  %v1777_v16 = vadd.f32 %v1689_v56, %v1647_v40  ;;  %v2174_v62 = vpop.f32.mrb[156].mxu0 }
 0x222   : > { %v1776_v9 = vadd.f32 %v1687_v13, %v1646_v26  ;;  %2297 = vrot.lane.b32.xlu1 %v4596_v48, %s3407_s27  ;;  %v4763_v38 = vpop.f32.mrb[156].mxu1  ;;  %v3340_v41 = vpop.f32.mrb[157].mxu0 }
 0x223   : > { %v2194_v46 = vadd.f32 %v5042_v20, %v1777_v16  ;;  %2295 = vrot.lane.b32.xlu0 %v4589_v8, %s3407_s27  ;;  %v3232_v58 = vpop.f32.mrb[157].mxu1  ;;  %v4768_v25 = vpop.f32.mrb[158].mxu0 }
 0x224   : > { %v2193_v7 = vadd.f32 %v5043_v5, %v1776_v9  ;;  %v2270_v14 = vpop.permute.xlu1 %2269  ;;  %v1477_v40 = vpop.f32.mrb[158].mxu1 }
 0x225   : > { %v2268_v62 = vpop.permute.xlu0 %2267  ;;  %v3233_v26 = vpop.f32.mrb[159].mxu1  ;;  %v2354_v13 = vadd.f32 %v2266_v49, %v2194_v46  ;;  %v1649_v46 = vadd.f32 %v1563_v17, %v4459_v39 }
 0x226   : > { %2423 = vrot.lane.b32.xlu1 %v4596_v48, %s3408_s28  ;;  %v3341_v56 = vpop.f32.mrb[159].mxu0  ;;  %v2353_v16 = vadd.f32 %v2264_v33, %v2193_v7  ;;  %v1648_v7 = vadd.f32 %v1561_v52, %v4433_v6 }
 0x227   : > { %2421 = vrot.lane.b32.xlu0 %v4589_v8, %s3408_s28 }
 0x228   : > { %v2396_v41 = vpop.permute.xlu1 %2395 }
 0x229   : > { %v2394_v20 = vpop.permute.xlu0 %2393  ;;  %v2484_v58 = vadd.f32 %v2396_v41, %v2354_v13  ;;  %v4775_v63 = vpop.f32.mrb[160].mxu0 }
 0x22a   : > { %v2483_v9 = vadd.f32 %v2394_v20, %v2353_v16  ;;  %1594 = vrot.lane.b32.xlu1 %v4616_v24, %s3407_s27  ;;  %v3344_v5 = vpop.f32.mrb[161].mxu0 }
 0x22b   : > { %v2898_v40 = vpack.c.bf16 %v2484_v58, %v2484_v58  ;;  %1592 = vrot.lane.b32.xlu0 %v4598_v32, %s3407_s27  ;;  %v2184_v26 = vpop.f32.mrb[162].mxu0  ;;  %v5044_v58 = vld [vmem:[#allocation20_spill] sm:$0xff] }
 0x22c   : > { %v2897_v56 = vpack.c.bf16 %v2483_v9, %v2483_v9  ;;  %v1567_v55 = vpop.permute.xlu1 %1566  ;;  %v3345_v49 = vpop.f32.mrb[163].mxu0 }
 0x22d   : > { %2645 = vst.msk [vmem:[%s4648_s4 + $0x1c] sm:$0xf] %vm2637_vm4, %v2898_v40  ;;  %v1565_v33 = vpop.permute.xlu0 %1564 }
 0x22e   : > { %2644 = vst.msk [vmem:[%s4648_s4 + $0x18] sm:$0xf] %vm2637_vm4, %v2897_v56  ;;  %1720 = vrot.lane.b32.xlu1 %v4616_v24, %s3408_s28  ;;  %v5045_v24 = vld [vmem:[#allocation19_spill] sm:$0xff] }
 0x22f   : > { %1718 = vrot.lane.b32.xlu0 %v4598_v32, %s3408_s28 }
 0x230   : > { %v1693_v13 = vpop.permute.xlu1 %1692 }
 0x231   : > { %v1691_v16 = vpop.permute.xlu0 %1690  ;;  %v1779_v41 = vadd.f32 %v1693_v13, %v1649_v46 }
 0x232   : > { %v1778_v20 = vadd.f32 %v1691_v16, %v1648_v7  ;;  %2301 = vrot.lane.b32.xlu1 %v4643_v27, %s3407_s27 }
 0x233   : > { %v2196_v9 = vadd.f32 %v5044_v58, %v1779_v41  ;;  %2299 = vrot.lane.b32.xlu0 %v4623_v59, %s3407_s27 }
 0x234   : > { %v2195_v5 = vadd.f32 %v5045_v24, %v1778_v20  ;;  %v2274_v39 = vpop.permute.xlu1 %2273 }
 0x235   : > { %v2272_v17 = vpop.permute.xlu0 %2271  ;;  %v2356_v6 = vadd.f32 %v2270_v14, %v2196_v9  ;;  %v1651_v14 = vadd.f32 %v1567_v55, %v4519_v21 }
 0x236   : > { %2427 = vrot.lane.b32.xlu1 %v4643_v27, %s3408_s28  ;;  %v2355_v32 = vadd.f32 %v2268_v62, %v2195_v5  ;;  %v1650_v62 = vadd.f32 %v1565_v33, %v4491_v42 }
 0x237   : > { %2425 = vrot.lane.b32.xlu0 %v4623_v59, %s3408_s28 }
 0x238   : > { %v2400_v52 = vpop.permute.xlu1 %2399 }
 0x239   : > { %v2398_v40 = vpop.permute.xlu0 %2397  ;;  %v2486_v26 = vadd.f32 %v2400_v52, %v2356_v6 }
 0x23a   : > { %v2485_v56 = vadd.f32 %v2398_v40, %v2355_v32  ;;  %1598 = vrot.lane.b32.xlu1 %v4660_v51, %s3407_s27 }
 0x23b   : > { %v2900_v49 = vpack.c.bf16 %v2486_v26, %v2486_v26  ;;  %1596 = vrot.lane.b32.xlu0 %v4650_v57, %s3407_s27 }
 0x23c   : > { %v2899_v46 = vpack.c.bf16 %v2485_v56, %v2485_v56  ;;  %v1571_v7 = vpop.permute.xlu1 %1570 }
 0x23d   : > { %2647 = vst.msk [vmem:[%s4648_s4 + $0x24] sm:$0xf] %vm2637_vm4, %v2900_v49  ;;  %v1569_v13 = vpop.permute.xlu0 %1568 }
 0x23e   : > { %2646 = vst.msk [vmem:[%s4648_s4 + $0x20] sm:$0xf] %vm2637_vm4, %v2899_v46  ;;  %1724 = vrot.lane.b32.xlu1 %v4660_v51, %s3408_s28 }
 0x23f   : > { %1722 = vrot.lane.b32.xlu0 %v4650_v57, %s3408_s28 }
 0x240   : > { %v1697_v16 = vpop.permute.xlu1 %1696 }
 0x241   : > { %v1695_v41 = vpop.permute.xlu0 %1694  ;;  %v1781_v20 = vadd.f32 %v1697_v16, %v1651_v14 }
 0x242   : > { %v1780_v58 = vadd.f32 %v1695_v41, %v1650_v62  ;;  %2305 = vrot.lane.b32.xlu1 %v4687_v43, %s3407_s27 }
 0x243   : > { %v2198_v9 = vadd.f32 %v4315_v22, %v1781_v20  ;;  %2303 = vrot.lane.b32.xlu0 %v4679_v44, %s3407_s27 }
 0x244   : > { %v2197_v51 = vadd.f32 %v4302_v54, %v1780_v58  ;;  %v2278_v21 = vpop.permute.xlu1 %2277 }
 0x245   : > { %v2276_v55 = vpop.permute.xlu0 %2275  ;;  %v2358_v42 = vadd.f32 %v2274_v39, %v2198_v9  ;;  %v1653_v39 = vadd.f32 %v1571_v7, %v4570_v0 }
 0x246   : > { %2431 = vrot.lane.b32.xlu1 %v4687_v43, %s3408_s28  ;;  %v2357_v57 = vadd.f32 %v2272_v17, %v2197_v51  ;;  %v1652_v17 = vadd.f32 %v1569_v13, %v4537_v31 }
 0x247   : > { %2429 = vrot.lane.b32.xlu0 %v4679_v44, %s3408_s28 }
 0x248   : > { %v2404_v33 = vpop.permute.xlu1 %2403 }
 0x249   : > { %v2402_v24 = vpop.permute.xlu0 %2401  ;;  %v2488_v22 = vadd.f32 %v2404_v33, %v2358_v42 }
 0x24a   : > { %v2487_v5 = vadd.f32 %v2402_v24, %v2357_v57  ;;  %1602 = vrot.lane.b32.xlu1 %v4704_v1, %s3407_s27 }
 0x24b   : > { %v2902_v54 = vpack.c.bf16 %v2488_v22, %v2488_v22  ;;  %1600 = vrot.lane.b32.xlu0 %v4690_v45, %s3407_s27 }
 0x24c   : > { %v2901_v6 = vpack.c.bf16 %v2487_v5, %v2487_v5  ;;  %v1575_v32 = vpop.permute.xlu1 %1574 }
 0x24d   : > { %2649 = vst.msk [vmem:[%s4648_s4 + $0x2c] sm:$0xf] %vm2637_vm4, %v2902_v54  ;;  %v1573_v52 = vpop.permute.xlu0 %1572  ;;  %v1655_v58 = vadd.f32 %v1575_v32, %v4557_v3 }
 0x24e   : > { %2648 = vst.msk [vmem:[%s4648_s4 + $0x28] sm:$0xf] %vm2637_vm4, %v2901_v6  ;;  %1728 = vrot.lane.b32.xlu1 %v4704_v1, %s3408_s28  ;;  %v1654_v9 = vadd.f32 %v1573_v52, %v4578_v18 }
 0x24f   : > { %1726 = vrot.lane.b32.xlu0 %v4690_v45, %s3408_s28 }
 0x250   : > { %v1701_v40 = vpop.permute.xlu1 %1700 }
 0x251   : > { %v1699_v26 = vpop.permute.xlu0 %1698  ;;  %v1783_v56 = vadd.f32 %v1701_v40, %v1653_v39  ;;  %v5046_v40 = vld [vmem:[#allocation32_spill] sm:$0xff] }
 0x252   : > { %v1782_v49 = vadd.f32 %v1699_v26, %v1652_v17  ;;  %2309 = vrot.lane.b32.xlu1 %v4725_v29, %s3407_s27 }
 0x253   : > { %v2200_v46 = vadd.f32 %v4344_v47, %v1783_v56  ;;  %2307 = vrot.lane.b32.xlu0 %v4710_v11, %s3407_s27 }
 0x254   : > { %v2199_v1 = vadd.f32 %v4337_v35, %v1782_v49  ;;  %v2282_v0 = vpop.permute.xlu1 %2281 }
 0x255   : > { %v2280_v7 = vpop.permute.xlu0 %2279  ;;  %v2360_v31 = vadd.f32 %v2278_v21, %v2200_v46 }
 0x256   : > { %2435 = vrot.lane.b32.xlu1 %v4725_v29, %s3408_s28  ;;  %v2359_v45 = vadd.f32 %v2276_v55, %v2199_v1 }
 0x257   : > { %2433 = vrot.lane.b32.xlu0 %v4710_v11, %s3408_s28 }
 0x258   : > { %v2408_v13 = vpop.permute.xlu1 %2407 }
 0x259   : > { %v2406_v14 = vpop.permute.xlu0 %2405  ;;  %v2490_v47 = vadd.f32 %v2408_v13, %v2360_v31  ;;  %v5047_v13 = vld [vmem:[#allocation34_spill] sm:$0xff] }
 0x25a   : > { %v2489_v62 = vadd.f32 %v2406_v14, %v2359_v45  ;;  %1606 = vrot.lane.b32.xlu1 %v4735_v61, %s3407_s27  ;;  %v5048_v14 = vld [vmem:[#allocation33_spill] sm:$0xff] }
 0x25b   : > { %v2904_v35 = vpack.c.bf16 %v2490_v47, %v2490_v47  ;;  %1604 = vrot.lane.b32.xlu0 %v4729_v2, %s3407_s27 }
 0x25c   : > { %v2903_v16 = vpack.c.bf16 %v2489_v62, %v2489_v62  ;;  %v1579_v41 = vpop.permute.xlu1 %1578 }
 0x25d   : > { %2651 = vst.msk [vmem:[%s4648_s4 + $0x34] sm:$0xf] %vm2637_vm4, %v2904_v35  ;;  %v1577_v20 = vpop.permute.xlu0 %1576 }
 0x25e   : > { %2650 = vst.msk [vmem:[%s4648_s4 + $0x30] sm:$0xf] %vm2637_vm4, %v2903_v16  ;;  %1732 = vrot.lane.b32.xlu1 %v4735_v61, %s3408_s28 }
 0x25f   : > { %1730 = vrot.lane.b32.xlu0 %v4729_v2, %s3408_s28 }
 0x260   : > { %v1705_v51 = vpop.permute.xlu1 %1704 }
 0x261   : > { %v1703_v21 = vpop.permute.xlu0 %1702  ;;  %v1785_v55 = vadd.f32 %v1705_v51, %v1655_v58 }
 0x262   : > { %v1784_v42 = vadd.f32 %v1703_v21, %v1654_v9  ;;  %2313 = vrot.lane.b32.xlu1 %v4747_v30, %s3407_s27 }
 0x263   : > { %v2202_v57 = vadd.f32 %v4381_v4, %v1785_v55  ;;  %2311 = vrot.lane.b32.xlu0 %v4741_v15, %s3407_s27 }
 0x264   : > { %v2201_v61 = vadd.f32 %v4365_v12, %v1784_v42  ;;  %v2286_v3 = vpop.permute.xlu1 %2285 }
 0x265   : > { %v2284_v33 = vpop.permute.xlu0 %2283  ;;  %v2362_v18 = vadd.f32 %v2282_v0, %v2202_v57 }
 0x266   : > { %1736 = vrot.lane.b32.xlu1 %v4763_v38, %s3408_s28  ;;  %v2361_v2 = vadd.f32 %v2280_v7, %v2201_v61 }
 0x267   : > { %1734 = vrot.lane.b32.xlu0 %v4749_v50, %s3408_s28  ;;  %v1657_v50 = vadd.f32 %v1579_v41, %v4396_v19 }
 0x268   : > { %v2412_v24 = vpop.permute.xlu1 %2411 }
 0x269   : > { %v2410_v22 = vpop.permute.xlu0 %2409  ;;  %v2492_v4 = vadd.f32 %v2412_v24, %v2362_v18 }
 0x26a   : > { %v2491_v5 = vadd.f32 %v2410_v22, %v2361_v2  ;;  %2439 = vrot.lane.b32.xlu1 %v4747_v30, %s3408_s28  ;;  %v1656_v30 = vadd.f32 %v1577_v20, %v4564_v53  ;;  %v5049_v22 = vld [vmem:[#allocation36_spill] sm:$0xff] }
 0x26b   : > { %v2906_v12 = vpack.c.bf16 %v2492_v4, %v2492_v4  ;;  %2437 = vrot.lane.b32.xlu0 %v4741_v15, %s3408_s28  ;;  %v5050_v4 = vld [vmem:[#allocation35_spill] sm:$0xff] }
 0x26c   : > { %v2905_v54 = vpack.c.bf16 %v2491_v5, %v2491_v5  ;;  %v1583_v6 = vpop.permute.xlu1 %1582 }
 0x26d   : > { %2653 = vst.msk [vmem:[%s4648_s4 + $0x3c] sm:$0xf] %vm2637_vm4, %v2906_v12  ;;  %v1581_v38 = vpop.permute.xlu0 %1580 }
 0x26e   : > { %2652 = vst.msk [vmem:[%s4648_s4 + $0x38] sm:$0xf] %vm2637_vm4, %v2905_v54  ;;  %2443 = vrot.lane.b32.xlu1 %v4775_v63, %s3408_s28  ;;  %v1658_v47 = vadd.f32 %v1581_v38, %v5048_v14 }
 0x26f   : > { %2441 = vrot.lane.b32.xlu0 %v4768_v25, %s3408_s28 }
 0x270   : > { %v1709_v32 = vpop.permute.xlu1 %1708 }
 0x271   : > { %v1707_v52 = vpop.permute.xlu0 %1706  ;;  %v1787_v15 = vadd.f32 %v1709_v32, %v1657_v50 }
 0x272   : > { %v1786_v39 = vadd.f32 %v1707_v52, %v1656_v30 }
 0x273   : > { %v2204_v17 = vadd.f32 %v4416_v23, %v1787_v15  ;;  %v1659_v23 = vadd.f32 %v1583_v6, %v5047_v13 }
 0x274   : > { %v2203_v26 = vadd.f32 %v5046_v40, %v1786_v39  ;;  %v2290_v56 = vpop.permute.xlu1 %2289 }
 0x275   : > { %v2288_v49 = vpop.permute.xlu0 %2287  ;;  %v2364_v63 = vadd.f32 %v2286_v3, %v2204_v17 }
 0x276   : > { %v2363_v46 = vadd.f32 %v2284_v33, %v2203_v26 }
 0x278   : > { %v2416_v19 = vpop.permute.xlu1 %2415 }
 0x279   : > { %v2414_v1 = vpop.permute.xlu0 %2413  ;;  %v2494_v0 = vadd.f32 %v2416_v19, %v2364_v63  ;;  %v5051_v19 = vld [vmem:[#allocation38_spill] sm:$0xff] }
 0x27a   : > { %v2493_v25 = vadd.f32 %v2414_v1, %v2363_v46  ;;  %v5052_v1 = vld [vmem:[#allocation37_spill] sm:$0xff] }
 0x27b   : > { %v2908_v7 = vpack.c.bf16 %v2494_v0, %v2494_v0 }
 0x27c   : > { %v2907_v53 = vpack.c.bf16 %v2493_v25, %v2493_v25  ;;  %v1587_v31 = vpop.permute.xlu1 %1586 }
 0x27d   : > { %2655 = vst.msk [vmem:[%s4648_s4 + $0x44] sm:$0xf] %vm2637_vm4, %v2908_v7  ;;  %v1585_v45 = vpop.permute.xlu0 %1584 }
 0x27e   : > { %2654 = vst.msk [vmem:[%s4648_s4 + $0x40] sm:$0xf] %vm2637_vm4, %v2907_v53 }
 0x280   : > { %v1713_v62 = vpop.permute.xlu1 %1712 }
 0x281   : > { %v1711_v35 = vpop.permute.xlu0 %1710  ;;  %v1789_v16 = vadd.f32 %v1713_v62, %v1659_v23 }
 0x282   : > { %v1788_v41 = vadd.f32 %v1711_v35, %v1658_v47 }
 0x283   : > { %v2206_v20 = vadd.f32 %v4466_v60, %v1789_v16  ;;  %v1661_v60 = vadd.f32 %v1587_v31, %v5049_v22 }
 0x284   : > { %v2205_v58 = vadd.f32 %v4445_v37, %v1788_v41  ;;  %v2294_v9 = vpop.permute.xlu1 %2293  ;;  %v1660_v37 = vadd.f32 %v1585_v45, %v5050_v4 }
 0x285   : > { %v2292_v51 = vpop.permute.xlu0 %2291  ;;  %v2366_v21 = vadd.f32 %v2290_v56, %v2206_v20 }
 0x286   : > { %v2365_v55 = vadd.f32 %v2288_v49, %v2205_v58 }
 0x288   : > { %v2420_v42 = vpop.permute.xlu1 %2419 }
 0x289   : > { %v2418_v57 = vpop.permute.xlu0 %2417  ;;  %v2496_v61 = vadd.f32 %v2420_v42, %v2366_v21  ;;  %v5053_v21 = vld [vmem:[#allocation23_spill] sm:$0xff] }
 0x28a   : > { %v2495_v3 = vadd.f32 %v2418_v57, %v2365_v55  ;;  %v5054_v55 = vld [vmem:[#allocation2_spill] sm:$0xff] }
 0x28b   : > { %v2910_v33 = vpack.c.bf16 %v2496_v61, %v2496_v61 }
 0x28c   : > { %v2909_v18 = vpack.c.bf16 %v2495_v3, %v2495_v3  ;;  %v1591_v2 = vpop.permute.xlu1 %1590 }
 0x28d   : > { %2657 = vst.msk [vmem:[%s4648_s4 + $0x4c] sm:$0xf] %vm2637_vm4, %v2910_v33  ;;  %v1589_v24 = vpop.permute.xlu0 %1588 }
 0x28e   : > { %2656 = vst.msk [vmem:[%s4648_s4 + $0x48] sm:$0xf] %vm2637_vm4, %v2909_v18 }
 0x290   : > { %v1717_v5 = vpop.permute.xlu1 %1716 }
 0x291   : > { %v1715_v12 = vpop.permute.xlu0 %1714  ;;  %v1791_v54 = vadd.f32 %v1717_v5, %v1661_v60 }
 0x292   : > { %v1790_v6 = vadd.f32 %v1715_v12, %v1660_v37 }
 0x293   : > { %v2208_v38 = vadd.f32 %v4505_v10, %v1791_v54  ;;  %v1663_v10 = vadd.f32 %v1591_v2, %v5051_v19 }
 0x294   : > { %v2207_v50 = vadd.f32 %v4497_v28, %v1790_v6  ;;  %v2298_v30 = vpop.permute.xlu1 %2297  ;;  %v1662_v28 = vadd.f32 %v1589_v24, %v5052_v1 }
 0x295   : > { %v2296_v32 = vpop.permute.xlu0 %2295  ;;  %v2368_v52 = vadd.f32 %v2294_v9, %v2208_v38 }
 0x296   : > { %v2367_v15 = vadd.f32 %v2292_v51, %v2207_v50 }
 0x298   : > { %v2424_v39 = vpop.permute.xlu1 %2423 }
 0x299   : > { %v2422_v17 = vpop.permute.xlu0 %2421  ;;  %v2498_v40 = vadd.f32 %v2424_v39, %v2368_v52 }
 0x29a   : > { %v2497_v26 = vadd.f32 %v2422_v17, %v2367_v15 }
 0x29b   : > { %v2912_v56 = vpack.c.bf16 %v2498_v40, %v2498_v40 }
 0x29c   : > { %v2911_v49 = vpack.c.bf16 %v2497_v26, %v2497_v26  ;;  %v1595_v63 = vpop.permute.xlu1 %1594 }
 0x29d   : > { %2659 = vst.msk [vmem:[%s4648_s4 + $0x54] sm:$0xf] %vm2637_vm4, %v2912_v56  ;;  %v1593_v46 = vpop.permute.xlu0 %1592 }
 0x29e   : > { %2658 = vst.msk [vmem:[%s4648_s4 + $0x50] sm:$0xf] %vm2637_vm4, %v2911_v49 }
 0x2a0   : > { %v1721_v0 = vpop.permute.xlu1 %1720 }
 0x2a1   : > { %v1719_v25 = vpop.permute.xlu0 %1718  ;;  %v1793_v7 = vadd.f32 %v1721_v0, %v1663_v10 }
 0x2a2   : > { %v1792_v53 = vadd.f32 %v1719_v25, %v1662_v28 }
 0x2a3   : > { %v2210_v31 = vadd.f32 %v4554_v34, %v1793_v7  ;;  %v1665_v34 = vadd.f32 %v1595_v63, %v5053_v21 }
 0x2a4   : > { %v2209_v45 = vadd.f32 %v4531_v36, %v1792_v53  ;;  %v2302_v13 = vpop.permute.xlu1 %2301  ;;  %v1664_v36 = vadd.f32 %v1593_v46, %v5054_v55 }
 0x2a5   : > { %v2300_v23 = vpop.permute.xlu0 %2299  ;;  %v2370_v14 = vadd.f32 %v2298_v30, %v2210_v31  ;;  %v5055_v30 = vld [vmem:[#allocation29_spill] sm:$0xff] }
 0x2a6   : > { %v2369_v47 = vadd.f32 %v2296_v32, %v2209_v45  ;;  %v5056_v32 = vld [vmem:[#allocation26_spill] sm:$0xff]  ;;  %v5057_v31 = vld [vmem:[#allocation25_spill] sm:$0xff]  ;;  %v5058_v45 = vld [vmem:[#allocation3_spill] sm:$0xff] }
 0x2a8   : > { %v2428_v62 = vpop.permute.xlu1 %2427 }
 0x2a9   : > { %v2426_v35 = vpop.permute.xlu0 %2425  ;;  %v2500_v16 = vadd.f32 %v2428_v62, %v2370_v14 }
 0x2aa   : > { %v2499_v41 = vadd.f32 %v2426_v35, %v2369_v47 }
 0x2ab   : > { %v2914_v20 = vpack.c.bf16 %v2500_v16, %v2500_v16 }
 0x2ac   : > { %v2913_v58 = vpack.c.bf16 %v2499_v41, %v2499_v41  ;;  %v1599_v9 = vpop.permute.xlu1 %1598 }
 0x2ad   : > { %2661 = vst.msk [vmem:[%s4648_s4 + $0x5c] sm:$0xf] %vm2637_vm4, %v2914_v20  ;;  %v1597_v51 = vpop.permute.xlu0 %1596  ;;  %v5059_v20 = vld [vmem:[#allocation28_spill] sm:$0xff] }
 0x2ae   : > { %2660 = vst.msk [vmem:[%s4648_s4 + $0x58] sm:$0xf] %vm2637_vm4, %v2913_v58 }
 0x2b0   : > { %v1725_v42 = vpop.permute.xlu1 %1724 }
 0x2b1   : > { %v1723_v57 = vpop.permute.xlu0 %1722  ;;  %v1795_v61 = vadd.f32 %v1725_v42, %v1665_v34 }
 0x2b2   : > { %v1794_v3 = vadd.f32 %v1723_v57, %v1664_v36 }
 0x2b3   : > { %v2212_v33 = vadd.f32 %v4596_v48, %v1795_v61  ;;  %v1667_v48 = vadd.f32 %v1599_v9, %v5055_v30  ;;  %v5060_v9 = vld [vmem:[#allocation4_spill] sm:$0xff] }
 0x2b4   : > { %v2211_v18 = vadd.f32 %v4589_v8, %v1794_v3  ;;  %v2306_v2 = vpop.permute.xlu1 %2305  ;;  %v1666_v8 = vadd.f32 %v1597_v51, %v5056_v32 }
 0x2b5   : > { %v2304_v24 = vpop.permute.xlu0 %2303  ;;  %v2372_v22 = vadd.f32 %v2302_v13, %v2212_v33 }
 0x2b6   : > { %v2371_v60 = vadd.f32 %v2300_v23, %v2211_v18 }
 0x2b8   : > { %v2432_v4 = vpop.permute.xlu1 %2431 }
 0x2b9   : > { %v2430_v37 = vpop.permute.xlu0 %2429  ;;  %v2502_v5 = vadd.f32 %v2432_v4, %v2372_v22 }
 0x2ba   : > { %v2501_v12 = vadd.f32 %v2430_v37, %v2371_v60 }
 0x2bb   : > { %v2916_v54 = vpack.c.bf16 %v2502_v5, %v2502_v5 }
 0x2bc   : > { %v2915_v6 = vpack.c.bf16 %v2501_v12, %v2501_v12  ;;  %v1603_v38 = vpop.permute.xlu1 %1602 }
 0x2bd   : > { %2663 = vst.msk [vmem:[%s4648_s4 + $0x64] sm:$0xf] %vm2637_vm4, %v2916_v54  ;;  %v1601_v50 = vpop.permute.xlu0 %1600 }
 0x2be   : > { %2662 = vst.msk [vmem:[%s4648_s4 + $0x60] sm:$0xf] %vm2637_vm4, %v2915_v6 }
 0x2c0   : > { %v1729_v52 = vpop.permute.xlu1 %1728 }
 0x2c1   : > { %v1727_v15 = vpop.permute.xlu0 %1726  ;;  %v1797_v39 = vadd.f32 %v1729_v52, %v1667_v48 }
 0x2c2   : > { %v1796_v17 = vadd.f32 %v1727_v15, %v1666_v8 }
 0x2c3   : > { %v2214_v40 = vadd.f32 %v4643_v27, %v1797_v39  ;;  %v1669_v27 = vadd.f32 %v1603_v38, %v5057_v31 }
 0x2c4   : > { %v2213_v26 = vadd.f32 %v4623_v59, %v1796_v17  ;;  %v2310_v56 = vpop.permute.xlu1 %2309  ;;  %v1668_v59 = vadd.f32 %v1601_v50, %v5058_v45 }
 0x2c5   : > { %v2308_v49 = vpop.permute.xlu0 %2307  ;;  %v2374_v63 = vadd.f32 %v2306_v2, %v2214_v40 }
 0x2c6   : > { %v2373_v46 = vadd.f32 %v2304_v24, %v2213_v26 }
 0x2c8   : > { %v2436_v19 = vpop.permute.xlu1 %2435 }
 0x2c9   : > { %v2434_v10 = vpop.permute.xlu0 %2433  ;;  %v2504_v1 = vadd.f32 %v2436_v19, %v2374_v63 }
 0x2ca   : > { %v2503_v28 = vadd.f32 %v2434_v10, %v2373_v46 }
 0x2cb   : > { %v2918_v0 = vpack.c.bf16 %v2504_v1, %v2504_v1 }
 0x2cc   : > { %v2917_v25 = vpack.c.bf16 %v2503_v28, %v2503_v28  ;;  %v1607_v7 = vpop.permute.xlu1 %1606 }
 0x2cd   : > { %2665 = vst.msk [vmem:[%s4648_s4 + $0x6c] sm:$0xf] %vm2637_vm4, %v2918_v0  ;;  %v1605_v53 = vpop.permute.xlu0 %1604  ;;  %v1671_v58 = vadd.f32 %v1607_v7, %v5059_v20 }
 0x2ce   : > { %2664 = vst.msk [vmem:[%s4648_s4 + $0x68] sm:$0xf] %vm2637_vm4, %v2917_v25  ;;  %v1670_v51 = vadd.f32 %v1605_v53, %v5060_v9 }
 0x2d0   : > { %v1733_v13 = vpop.permute.xlu1 %1732 }
 0x2d1   : > { %v1731_v23 = vpop.permute.xlu0 %1730  ;;  %v1799_v14 = vadd.f32 %v1733_v13, %v1669_v27 }
 0x2d2   : > { %v1798_v47 = vadd.f32 %v1731_v23, %v1668_v59 }
 0x2d3   : > { %v2216_v62 = vadd.f32 %v4687_v43, %v1799_v14 }
 0x2d4   : > { %v2215_v35 = vadd.f32 %v4679_v44, %v1798_v47  ;;  %v2314_v16 = vpop.permute.xlu1 %2313 }
 0x2d5   : > { %v2312_v41 = vpop.permute.xlu0 %2311  ;;  %v2376_v57 = vadd.f32 %v2310_v56, %v2216_v62 }
 0x2d6   : > { %v2375_v43 = vadd.f32 %v2308_v49, %v2215_v35 }
 0x2d8   : > { %v1737_v21 = vpop.permute.xlu1 %1736 }
 0x2d9   : > { %v1735_v34 = vpop.permute.xlu0 %1734  ;;  %v1801_v55 = vadd.f32 %v1737_v21, %v1671_v58 }
 0x2da   : > { %v1800_v36 = vadd.f32 %v1735_v34, %v1670_v51 }
 0x2db   : > { %v2218_v42 = vadd.f32 %v4725_v29, %v1801_v55 }
 0x2dc   : > { %v2217_v61 = vadd.f32 %v4710_v11, %v1800_v36  ;;  %v2440_v3 = vpop.permute.xlu1 %2439 }
 0x2dd   : > { %v2438_v44 = vpop.permute.xlu0 %2437  ;;  %v2506_v33 = vadd.f32 %v2440_v3, %v2376_v57  ;;  %v2378_v24 = vadd.f32 %v2314_v16, %v2218_v42 }
 0x2de   : > { %v2505_v18 = vadd.f32 %v2438_v44, %v2375_v43  ;;  %v2377_v60 = vadd.f32 %v2312_v41, %v2217_v61 }
 0x2df   : > { %v2920_v2 = vpack.c.bf16 %v2506_v33, %v2506_v33 }
 0x2e0   : > { %v2919_v22 = vpack.c.bf16 %v2505_v18, %v2505_v18  ;;  %v2444_v4 = vpop.permute.xlu1 %2443 }
 0x2e1   : > { %2667 = vst.msk [vmem:[%s4648_s4 + $0x74] sm:$0xf] %vm2637_vm4, %v2920_v2  ;;  %v2442_v37 = vpop.permute.xlu0 %2441  ;;  %v2508_v29 = vadd.f32 %v2444_v4, %v2378_v24 }
 0x2e2   : > { %2666 = vst.msk [vmem:[%s4648_s4 + $0x70] sm:$0xf] %vm2637_vm4, %v2919_v22  ;;  %v2507_v5 = vadd.f32 %v2442_v37, %v2377_v60 }
 0x2e3   : > { %v2922_v11 = vpack.c.bf16 %v2508_v29, %v2508_v29 }
 0x2e4   : > { %v2921_v12 = vpack.c.bf16 %v2507_v5, %v2507_v5 }
 0x2e5   : > { %2669 = vst.msk [vmem:[%s4648_s4 + $0x7c] sm:$0xf] %vm2637_vm4, %v2922_v11 }
 0x2e6   : > { %2668 = vst.msk [vmem:[%s4648_s4 + $0x78] sm:$0xf] %vm2637_vm4, %v2921_v12 }
 0x2e7 PF: > { %s12_s9 = sadd.s32 1, %s3403_s9  }
 0x2e8   : > { %p9_p4 = scmp.ge.s32.totalorder %s12_s9, 4  }
 0x2ea   :  { %11 = sbr.rel (!%p9_p4) target bundleno = 1 (0x1), region = 60 }

// kernel: forward.35
= control target key start
LH: loop header
LB: loop body
LE: loop exit
PB: predicated region body
PF: predicated region fallthrough
CT: control target
= control target key end

     0   :  { %s485_s12 = smov 0   ;;  %s584_s0 = inlined_call_operand.vmem [shape: bf16[2,8,2,8,64], index: 0, kind: input, shape index: {}]   ;;  %s585_s1 = inlined_call_operand.vmem [shape: f32[1,1,1,64], index: 1, kind: input, shape index: {}]   ;;  %s586_s2 = inlined_call_operand.vmem [shape: f32[1,1,1,64], index: 2, kind: input, shape index: {}]   ;;  %s587_s3 = inlined_call_operand.vmem [shape: bf16[2,8,8,32], index: 3, kind: output, shape index: {}]  }
   0x1 LB: > { %s393_s13 = sadd.s32 4294967295, %s462_s12   ;;  %p397_p0 = scmp.ge.s32.totalorder %s462_s12, 1  ;;  %s462_s12 = sphi %s485_s12, %s13_s12  }
   0x2   : > { %p137_p1 = scmp.lt.s32.totalorder %s462_s12, 3 }
   0x4   : > { %p138_p2 = pnand %p397_p0, %p137_p1 }
   0x5   : > { %p161_p3 = scmp.lt.s32.totalorder (!%p138_p2), %s393_s13, 1  ;;  %v504_v0 = vld [vmem:[%s585_s1] ss:$0 sm:$0xff] (!%p138_p2)  ;;  %s464_s22 = smov (!%p138_p2), 96   ;;  %vm329_vm0 = vcmask (!%p138_p2), 257024  }
   0x6   : > { %141 = sbr.rel (%p138_p2) target bundleno = 162 (0xa2), region = 32  ;;  %v513_v9 = vld [vmem:[%s586_s2] ss:$0 sm:$0xff] (!%p138_p2) }
   0xd   : > { %s589_s13 = smov (!%p161_p3, %s393_s13), 1 }
   0xe   : > { %s406_s14 = sshll.u32 %s589_s13, 6  ;;  %s407_s23 = sshll.u32 %s589_s13, 5 }
   0xf   : > { %s499_s17 = scalar_lea.vmem %s584_s0, %s406_s14  ;;  %s563_s26 = scalar_lea.vmem %s587_s3, %s407_s23 }
  0x10   : > { %v441_v1 = vld [vmem:[%s499_s17 + $0x10] sm:$0xff]   ;;  %v409_v2 = vld [vmem:[%s499_s17] sm:$0xff]   ;;  %v442_v3 = vld [vmem:[%s499_s17 + $0x18] sm:$0xff]  }
  0x11   : > { %v418_v4 = vunpack.c.l.bf16 %v441_v1  ;;  %v419_v5 = vunpack.c.h.bf16 %v441_v1  ;;  %v410_v6 = vunpack.c.l.bf16 %v409_v2  ;;  %v411_v7 = vunpack.c.h.bf16 %v409_v2  ;;  %v440_v8 = vld [vmem:[%s499_s17 + $0x8] sm:$0xff]   ;;  %v443_v35 = vld [vmem:[%s499_s17 + $0x20] sm:$0xff]   ;;  %v446_v40 = vld [vmem:[%s499_s17 + $0x38] sm:$0xff]  }
  0x12   : > { %v422_v10 = vunpack.c.l.bf16 %v442_v3  ;;  %v423_v11 = vunpack.c.h.bf16 %v442_v3  ;;  %v414_v12 = vunpack.c.l.bf16 %v440_v8  ;;  %v415_v13 = vunpack.c.h.bf16 %v440_v8  ;;  %v444_v30 = vld [vmem:[%s499_s17 + $0x28] sm:$0xff]   ;;  %v445_v45 = vld [vmem:[%s499_s17 + $0x30] sm:$0xff]  }
  0x13   : > { %v214_v14 = vmul.f32 %v418_v4, %v504_v0  ;;  %v215_v15 = vmul.f32 %v419_v5, %v504_v0  ;;  %v210_v16 = vmul.f32 %v410_v6, %v504_v0  ;;  %v211_v17 = vmul.f32 %v411_v7, %v504_v0 }
  0x14   : > { %v216_v18 = vmul.f32 %v422_v10, %v504_v0  ;;  %v217_v19 = vmul.f32 %v423_v11, %v504_v0  ;;  %v212_v20 = vmul.f32 %v414_v12, %v504_v0  ;;  %v213_v21 = vmul.f32 %v415_v13, %v504_v0 }
  0x15   : > { %v237_v22 = vadd.f32 %v513_v9, %v214_v14  ;;  %v238_v23 = vadd.f32 %v513_v9, %v215_v15  ;;  %v233_v24 = vadd.f32 %v513_v9, %v210_v16  ;;  %v234_v25 = vadd.f32 %v513_v9, %v211_v17 }
  0x16   : > { %v239_v26 = vadd.f32 %v513_v9, %v216_v18  ;;  %v240_v27 = vadd.f32 %v513_v9, %v217_v19  ;;  %v235_v28 = vadd.f32 %v513_v9, %v212_v20  ;;  %v236_v29 = vadd.f32 %v513_v9, %v213_v21 }
  0x17   : > { %v253_v31 = vmax.f32 %v237_v22, 0.0  ;;  %v254_v32 = vmax.f32 %v238_v23, 0.0  ;;  %v249_v33 = vmax.f32 %v233_v24, 0.0  ;;  %v250_v34 = vmax.f32 %v234_v25, 0.0 }
  0x18   : > { %v255_v36 = vmax.f32 %v239_v26, 0.0  ;;  %v256_v37 = vmax.f32 %v240_v27, 0.0  ;;  %v251_v38 = vmax.f32 %v235_v28, 0.0  ;;  %v252_v39 = vmax.f32 %v236_v29, 0.0 }
  0x19   : > { %v267_v41 = vadd.f32 %v254_v32, %v253_v31  ;;  %v265_v42 = vadd.f32 %v250_v34, %v249_v33  ;;  %v430_v43 = vunpack.c.l.bf16 %v444_v30  ;;  %v431_v44 = vunpack.c.h.bf16 %v444_v30 }
  0x1a   : > { %v268_v46 = vadd.f32 %v256_v37, %v255_v36  ;;  %v266_v47 = vadd.f32 %v252_v39, %v251_v38  ;;  %v426_v48 = vunpack.c.l.bf16 %v443_v35  ;;  %v427_v49 = vunpack.c.h.bf16 %v443_v35 }
  0x1b   : > { %285 = vrot.lane.b32.xlu1 %v267_v41, %s464_s22  ;;  %281 = vrot.lane.b32.xlu0 %v265_v42, %s464_s22  ;;  %v220_v50 = vmul.f32 %v430_v43, %v504_v0  ;;  %v221_v51 = vmul.f32 %v431_v44, %v504_v0  ;;  %v438_v52 = vunpack.c.l.bf16 %v446_v40  ;;  %v439_v53 = vunpack.c.h.bf16 %v446_v40 }
  0x1c   : > { %v218_v54 = vmul.f32 %v426_v48, %v504_v0  ;;  %v219_v55 = vmul.f32 %v427_v49, %v504_v0  ;;  %v434_v56 = vunpack.c.l.bf16 %v445_v45  ;;  %v435_v57 = vunpack.c.h.bf16 %v445_v45 }
  0x1d   : > { %v243_v58 = vadd.f32 %v513_v9, %v220_v50  ;;  %v244_v59 = vadd.f32 %v513_v9, %v221_v51  ;;  %v224_v60 = vmul.f32 %v438_v52, %v504_v0  ;;  %v225_v61 = vmul.f32 %v439_v53, %v504_v0 }
  0x1e   : > { %v241_v62 = vadd.f32 %v513_v9, %v218_v54  ;;  %v242_v63 = vadd.f32 %v513_v9, %v219_v55  ;;  %v222_v1 = vmul.f32 %v434_v56, %v504_v0  ;;  %v223_v2 = vmul.f32 %v435_v57, %v504_v0 }
  0x1f   : > { %287 = vrot.lane.b32.xlu1 %v268_v46, %s464_s22  ;;  %283 = vrot.lane.b32.xlu0 %v266_v47, %s464_s22  ;;  %v259_v3 = vmax.f32 %v243_v58, 0.0  ;;  %v260_v4 = vmax.f32 %v244_v59, 0.0  ;;  %v247_v5 = vadd.f32 %v513_v9, %v224_v60  ;;  %v248_v6 = vadd.f32 %v513_v9, %v225_v61 }
  0x20   : > { %v257_v7 = vmax.f32 %v241_v62, 0.0  ;;  %v258_v8 = vmax.f32 %v242_v63, 0.0  ;;  %v245_v10 = vadd.f32 %v513_v9, %v222_v1  ;;  %v246_v11 = vadd.f32 %v513_v9, %v223_v2 }
  0x21   : > { %v270_v12 = vadd.f32 %v260_v4, %v259_v3  ;;  %v263_v13 = vmax.f32 %v247_v5, 0.0  ;;  %v264_v0 = vmax.f32 %v248_v6, 0.0 }
  0x22   : > { %v269_v14 = vadd.f32 %v258_v8, %v257_v7  ;;  %v261_v15 = vmax.f32 %v245_v10, 0.0  ;;  %v262_v16 = vmax.f32 %v246_v11, 0.0 }
  0x23   : > { %291 = vrot.lane.b32.xlu1 %v270_v12, %s464_s22  ;;  %v272_v17 = vadd.f32 %v264_v0, %v263_v13 }
  0x24   : > { %289 = vrot.lane.b32.xlu0 %v269_v14, %s464_s22  ;;  %v271_v18 = vadd.f32 %v262_v16, %v261_v15 }
  0x27   : > { %295 = vrot.lane.b32.xlu1 %v272_v17, %s464_s22 }
  0x28   : > { %293 = vrot.lane.b32.xlu0 %v271_v18, %s464_s22 }
  0x8d   : > { %v286_v19 = vpop.permute.xlu1 %285  ;;  %v282_v20 = vpop.permute.xlu0 %281 }
  0x8e   : > { %v307_v9 = vadd.f32 %v286_v19, %v267_v41  ;;  %v305_v21 = vadd.f32 %v282_v20, %v265_v42 }
  0x90   : > { %v315_v22 = vmul.f32 0.25, %v307_v9  ;;  %v313_v23 = vmul.f32 0.25, %v305_v21 }
  0x91   : > { %v288_v24 = vpop.permute.xlu1 %287  ;;  %v284_v25 = vpop.permute.xlu0 %283 }
  0x92   : > { %v323_v26 = vpack.c.bf16 %v315_v22, %v315_v22  ;;  %v321_v27 = vpack.c.bf16 %v313_v23, %v313_v23  ;;  %v308_v28 = vadd.f32 %v288_v24, %v268_v46  ;;  %v306_v29 = vadd.f32 %v284_v25, %v266_v47 }
  0x94   : > { %332 = vst.msk [vmem:[%s563_s26 + $0x8] sm:$0xf] %vm329_vm0, %v323_v26  ;;  %330 = vst.msk [vmem:[%s563_s26] sm:$0xf] %vm329_vm0, %v321_v27  ;;  %v316_v30 = vmul.f32 0.25, %v308_v28  ;;  %v314_v31 = vmul.f32 0.25, %v306_v29 }
  0x95   : > { %v292_v32 = vpop.permute.xlu1 %291 }
  0x96   : > { %v324_v33 = vpack.c.bf16 %v316_v30, %v316_v30  ;;  %v322_v34 = vpack.c.bf16 %v314_v31, %v314_v31  ;;  %v310_v35 = vadd.f32 %v292_v32, %v270_v12  ;;  %v290_v36 = vpop.permute.xlu0 %289 }
  0x97   : > { %v309_v37 = vadd.f32 %v290_v36, %v269_v14 }
  0x98   : > { %333 = vst.msk [vmem:[%s563_s26 + $0xc] sm:$0xf] %vm329_vm0, %v324_v33  ;;  %331 = vst.msk [vmem:[%s563_s26 + $0x4] sm:$0xf] %vm329_vm0, %v322_v34  ;;  %v318_v38 = vmul.f32 0.25, %v310_v35 }
  0x99   : > { %v317_v39 = vmul.f32 0.25, %v309_v37  ;;  %v296_v40 = vpop.permute.xlu1 %295 }
  0x9a   : > { %v326_v41 = vpack.c.bf16 %v318_v38, %v318_v38  ;;  %v312_v42 = vadd.f32 %v296_v40, %v272_v17  ;;  %v294_v43 = vpop.permute.xlu0 %293 }
  0x9b   : > { %v325_v44 = vpack.c.bf16 %v317_v39, %v317_v39  ;;  %v311_v45 = vadd.f32 %v294_v43, %v271_v18 }
  0x9c   : > { %335 = vst.msk [vmem:[%s563_s26 + $0x14] sm:$0xf] %vm329_vm0, %v326_v41  ;;  %v320_v46 = vmul.f32 0.25, %v312_v42 }
  0x9d   : > { %334 = vst.msk [vmem:[%s563_s26 + $0x10] sm:$0xf] %vm329_vm0, %v325_v44  ;;  %v319_v47 = vmul.f32 0.25, %v311_v45 }
  0x9e   : > { %v328_v48 = vpack.c.bf16 %v320_v46, %v320_v46 }
  0x9f   : > { %v327_v49 = vpack.c.bf16 %v319_v47, %v319_v47 }
  0xa0   : > { %337 = vst.msk [vmem:[%s563_s26 + $0x1c] sm:$0xf] %vm329_vm0, %v328_v48 }
  0xa1   : > { %336 = vst.msk [vmem:[%s563_s26 + $0x18] sm:$0xf] %vm329_vm0, %v327_v49 }
  0xa2 PF: > { %s13_s12 = sadd.s32 1, %s462_s12  }
  0xa3   : > { %p10_p4 = scmp.ge.s32.totalorder %s13_s12, 4  }
  0xa5   :  { %12 = sbr.rel (!%p10_p4) target bundleno = 1 (0x1), region = 62 }

// kernel: forward.36
= control target key start
LH: loop header
LB: loop body
LE: loop exit
PB: predicated region body
PF: predicated region fallthrough
CT: control target
= control target key end

     0   :  { %vm84_vm0 = vcmask 261120   ;;  %vm270_vm1 = vcmask 125952   ;;  %s502_s1 = inlined_call_operand.vmem [shape: bf16[32,16], index: 1, kind: input, shape index: {}]   ;;  %s503_s0 = inlined_call_operand.vmem [shape: bf16[128,32], index: 0, kind: input, shape index: {}]   ;;  %s504_s2 = inlined_call_operand.vmem [shape: bf16[128,16], index: 2, kind: output, shape index: {}]  }
   0x1   :  { %v375_v0 = vld [vmem:[%s502_s1] sm:$0xff]   ;;  %v376_v1 = vld [vmem:[%s502_s1 + $0x8] sm:$0xff]   ;;  %v381_v6 = vld [vmem:[%s503_s0 + $0x10] sm:$0xff]  }
   0x2   :  { %351 = vmatprep.subr.bf16.mxu0 %v375_v0  ;;  %371 = vmatprep.subr.bf16.mxu1 %v375_v0  ;;  %v377_v2 = vld [vmem:[%s503_s0] sm:$0xff]   ;;  %v379_v4 = vld [vmem:[%s503_s0 + $0x8] sm:$0xff]   ;;  %v382_v7 = vld [vmem:[%s503_s0 + $0x30] sm:$0xff]  }
   0x3   :  { %352 = vmatpush3.bf16.msra.mxu0 %v375_v0  ;;  %373 = vmatpush3.bf16.msra.mxu1 %v375_v0  ;;  %v378_v3 = vld [vmem:[%s503_s0 + $0x20] sm:$0xff]   ;;  %v380_v5 = vld [vmem:[%s503_s0 + $0x28] sm:$0xff]   ;;  %v383_v8 = vld [vmem:[%s503_s0 + $0x18] sm:$0xff]  }
   0x4   :  { %353 = vmatprep.subr.bf16.mxu0 %v376_v1  ;;  %372 = vmatprep.subr.bf16.mxu1 %v376_v1  ;;  %v384_v9 = vld [vmem:[%s503_s0 + $0x38] sm:$0xff]  }
   0x5   :  { %355 = vmatprep.mubr.msk.bf16.mxu0 %vm84_vm0, %v377_v2  ;;  %363 = vmatprep.mubr.msk.bf16.mxu1 %vm84_vm0, %v378_v3 }
   0x7   :  { %354 = vmatpush3.bf16.msra.mxu0 %v376_v1  ;;  %374 = vmatpush3.bf16.msra.mxu1 %v376_v1 }
   0xa   :  { %356 = vmatmul.mubr.msk.bf16.vlgmr.msra.gmra.mrb[0].mxu0 %vm84_vm0, %v379_v4  ;;  %364 = vmatmul.mubr.msk.bf16.vlgmr.msra.gmra.mrb[0].mxu1 %vm84_vm0, %v380_v5 }
   0xb   :  { %359 = vmatprep.mubr.msk.bf16.mxu0 %vm84_vm0, %v381_v6  ;;  %367 = vmatprep.mubr.msk.bf16.mxu1 %vm84_vm0, %v382_v7 }
  0x12   :  { %360 = vmatmul.mubr.msk.bf16.gmra.mrb[4].mxu0 %vm84_vm0, %v383_v8  ;;  %368 = vmatmul.mubr.msk.bf16.gmra.mrb[4].mxu1 %vm84_vm0, %v384_v9 }
  0xdd   :  { %v357_v10 = vpop.f32.mrb[0].mxu0  ;;  %v365_v11 = vpop.f32.mrb[0].mxu1 }
  0xde   :  { %v327_v12 = vpack.c.bf16 %v357_v10, %v357_v10  ;;  %v335_v13 = vpack.c.bf16 %v365_v11, %v365_v11  ;;  %v143_v14 = vpop.f32.mrb[1].mxu0  ;;  %v175_v15 = vpop.f32.mrb[1].mxu1 }
  0xdf   :  { %v325_v16 = vpack.c.bf16 %v143_v14, %v143_v14  ;;  %v333_v17 = vpack.c.bf16 %v175_v15, %v175_v15  ;;  %v358_v18 = vpop.f32.mrb[2].mxu0  ;;  %v366_v19 = vpop.f32.mrb[2].mxu1 }
  0xe0   :  { %273 = vst.msk [vmem:[%s504_s2 + $0x8] sm:$0xf] %vm270_vm1, %v327_v12  ;;  %281 = vst.msk [vmem:[%s504_s2 + $0x28] sm:$0xf] %vm270_vm1, %v335_v13  ;;  %v328_v20 = vpack.c.bf16 %v358_v18, %v358_v18  ;;  %v336_v21 = vpack.c.bf16 %v366_v19, %v366_v19  ;;  %v146_v22 = vpop.f32.mrb[3].mxu0  ;;  %v178_v23 = vpop.f32.mrb[3].mxu1 }
  0xe1   :  { %271 = vst.msk [vmem:[%s504_s2] sm:$0xf] %vm270_vm1, %v325_v16  ;;  %279 = vst.msk [vmem:[%s504_s2 + $0x20] sm:$0xf] %vm270_vm1, %v333_v17  ;;  %v326_v24 = vpack.c.bf16 %v146_v22, %v146_v22  ;;  %v334_v25 = vpack.c.bf16 %v178_v23, %v178_v23 }
  0xe2   :  { %274 = vst.msk [vmem:[%s504_s2 + $0xc] sm:$0xf] %vm270_vm1, %v328_v20  ;;  %282 = vst.msk [vmem:[%s504_s2 + $0x2c] sm:$0xf] %vm270_vm1, %v336_v21 }
  0xe3   :  { %272 = vst.msk [vmem:[%s504_s2 + $0x4] sm:$0xf] %vm270_vm1, %v326_v24  ;;  %280 = vst.msk [vmem:[%s504_s2 + $0x24] sm:$0xf] %vm270_vm1, %v334_v25 }
  0xe5   :  { %v361_v26 = vpop.f32.mrb[4].mxu0  ;;  %v369_v27 = vpop.f32.mrb[4].mxu1 }
  0xe6   :  { %v331_v28 = vpack.c.bf16 %v361_v26, %v361_v26  ;;  %v339_v29 = vpack.c.bf16 %v369_v27, %v369_v27  ;;  %v159_v30 = vpop.f32.mrb[5].mxu0  ;;  %v191_v31 = vpop.f32.mrb[5].mxu1 }
  0xe7   :  { %v329_v32 = vpack.c.bf16 %v159_v30, %v159_v30  ;;  %v337_v33 = vpack.c.bf16 %v191_v31, %v191_v31  ;;  %v362_v34 = vpop.f32.mrb[6].mxu0  ;;  %v370_v35 = vpop.f32.mrb[6].mxu1 }
  0xe8   :  { %277 = vst.msk [vmem:[%s504_s2 + $0x18] sm:$0xf] %vm270_vm1, %v331_v28  ;;  %285 = vst.msk [vmem:[%s504_s2 + $0x38] sm:$0xf] %vm270_vm1, %v339_v29  ;;  %v332_v36 = vpack.c.bf16 %v362_v34, %v362_v34  ;;  %v340_v37 = vpack.c.bf16 %v370_v35, %v370_v35  ;;  %v162_v38 = vpop.f32.mrb[7].mxu0  ;;  %v194_v39 = vpop.f32.mrb[7].mxu1 }
  0xe9   :  { %275 = vst.msk [vmem:[%s504_s2 + $0x10] sm:$0xf] %vm270_vm1, %v329_v32  ;;  %283 = vst.msk [vmem:[%s504_s2 + $0x30] sm:$0xf] %vm270_vm1, %v337_v33  ;;  %v330_v40 = vpack.c.bf16 %v162_v38, %v162_v38  ;;  %v338_v41 = vpack.c.bf16 %v194_v39, %v194_v39 }
  0xea   :  { %278 = vst.msk [vmem:[%s504_s2 + $0x1c] sm:$0xf] %vm270_vm1, %v332_v36  ;;  %286 = vst.msk [vmem:[%s504_s2 + $0x3c] sm:$0xf] %vm270_vm1, %v340_v37 }
  0xeb   :  { %276 = vst.msk [vmem:[%s504_s2 + $0x14] sm:$0xf] %vm270_vm1, %v330_v40  ;;  %284 = vst.msk [vmem:[%s504_s2 + $0x34] sm:$0xf] %vm270_vm1, %v338_v41 }

// kernel: forward.37
= control target key start
LH: loop header
LB: loop body
LE: loop exit
PB: predicated region body
PF: predicated region fallthrough
CT: control target
= control target key end

     0   :  { %vm142_vm0 = vcmask 261120   ;;  %vm390_vm1 = vcmask 257024   ;;  %s753_s3 = inlined_call_operand.vmem [shape: bf16[32,32], index: 3, kind: input, shape index: {}]   ;;  %s754_s0 = inlined_call_operand.vmem [shape: bf16[128,32], index: 0, kind: input, shape index: {}]   ;;  %s755_s1 = inlined_call_operand.vmem [shape: f32[1,32], index: 1, kind: input, shape index: {}]   ;;  %s756_s2 = inlined_call_operand.vmem [shape: f32[1,32], index: 2, kind: input, shape index: {}]   ;;  %s757_s4 = inlined_call_operand.vmem [shape: f32[1,32], index: 4, kind: input, shape index: {}]   ;;  %s758_s5 = inlined_call_operand.vmem [shape: f32[1,32], index: 5, kind: input, shape index: {}]   ;;  %s759_s6 = inlined_call_operand.vmem [shape: bf16[128,32], index: 6, kind: output, shape index: {}]  }
   0x1   :  { %v530_v0 = vld [vmem:[%s753_s3] sm:$0xff]   ;;  %v531_v1 = vld [vmem:[%s753_s3 + $0x8] sm:$0xff]   ;;  %v490_v14 = vld [vmem:[%s754_s0 + $0x10] sm:$0xff]  }
   0x2   :  { %506 = vmatprep.subr.bf16.mxu0 %v530_v0  ;;  %526 = vmatprep.subr.bf16.mxu1 %v530_v0  ;;  %v458_v2 = vld [vmem:[%s754_s0] sm:$0xff]   ;;  %v489_v7 = vld [vmem:[%s754_s0 + $0x8] sm:$0xff]   ;;  %v467_v26 = vunpack.c.l.bf16 %v490_v14  ;;  %v494_v35 = vld [vmem:[%s754_s0 + $0x30] sm:$0xff]   ;;  %v468_v44 = vunpack.c.h.bf16 %v490_v14 }
   0x3   :  { %v579_v3 = vld [vmem:[%s755_s1] ss:$0 sm:$0xff]  ;;  %507 = vmatpush3.bf16.msra.mxu0 %v530_v0  ;;  %528 = vmatpush3.bf16.msra.mxu1 %v530_v0  ;;  %v459_v4 = vunpack.c.l.bf16 %v458_v2  ;;  %v460_v5 = vunpack.c.h.bf16 %v458_v2  ;;  %v493_v8 = vld [vmem:[%s754_s0 + $0x28] sm:$0xff]   ;;  %v463_v12 = vunpack.c.l.bf16 %v489_v7  ;;  %v464_v13 = vunpack.c.h.bf16 %v489_v7  ;;  %v491_v40 = vld [vmem:[%s754_s0 + $0x18] sm:$0xff]  }
   0x4   :  { %v492_v6 = vld [vmem:[%s754_s0 + $0x20] sm:$0xff]   ;;  %508 = vmatprep.subr.bf16.mxu0 %v531_v1  ;;  %527 = vmatprep.subr.bf16.mxu1 %v531_v1  ;;  %v479_v17 = vunpack.c.l.bf16 %v493_v8  ;;  %v480_v18 = vunpack.c.h.bf16 %v493_v8  ;;  %v495_v45 = vld [vmem:[%s754_s0 + $0x38] sm:$0xff]   ;;  %v67_v48 = vmul.f32 %v467_v26, %v579_v3  ;;  %v483_v49 = vunpack.c.l.bf16 %v494_v35 }
   0x5   :  { %v593_v9 = vld [vmem:[%s756_s2] ss:$0 sm:$0xff]  ;;  %v475_v10 = vunpack.c.l.bf16 %v492_v6  ;;  %v476_v11 = vunpack.c.h.bf16 %v492_v6  ;;  %v63_v15 = vmul.f32 %v459_v4, %v579_v3  ;;  %v64_v16 = vmul.f32 %v460_v5, %v579_v3 }
   0x6   :  { %v65_v21 = vmul.f32 %v463_v12, %v579_v3  ;;  %v66_v22 = vmul.f32 %v464_v13, %v579_v3  ;;  %v73_v25 = vmul.f32 %v479_v17, %v579_v3  ;;  %v74_v33 = vmul.f32 %v480_v18, %v579_v3 }
   0x7   :  { %v71_v19 = vmul.f32 %v475_v10, %v579_v3  ;;  %v72_v20 = vmul.f32 %v476_v11, %v579_v3  ;;  %509 = vmatpush3.bf16.msra.mxu0 %v531_v1  ;;  %529 = vmatpush3.bf16.msra.mxu1 %v531_v1  ;;  %v86_v23 = vadd.f32 %v593_v9, %v63_v15  ;;  %v484_v52 = vunpack.c.h.bf16 %v494_v35 }
   0x8   :  { %v87_v24 = vadd.f32 %v593_v9, %v64_v16  ;;  %v88_v29 = vadd.f32 %v593_v9, %v65_v21  ;;  %v89_v30 = vadd.f32 %v593_v9, %v66_v22  ;;  %v96_v34 = vadd.f32 %v593_v9, %v73_v25 }
   0x9   :  { %v94_v27 = vadd.f32 %v593_v9, %v71_v19  ;;  %v95_v28 = vadd.f32 %v593_v9, %v72_v20  ;;  %v102_v31 = vmax.f32 %v86_v23, 0.0  ;;  %v97_v42 = vadd.f32 %v593_v9, %v74_v33 }
   0xa   :  { %v103_v32 = vmax.f32 %v87_v24, 0.0  ;;  %v104_v38 = vmax.f32 %v88_v29, 0.0  ;;  %v105_v39 = vmax.f32 %v89_v30, 0.0  ;;  %v112_v43 = vmax.f32 %v96_v34, 0.0 }
   0xb   :  { %v110_v36 = vmax.f32 %v94_v27, 0.0  ;;  %v111_v37 = vmax.f32 %v95_v28, 0.0  ;;  %v113_v50 = vmax.f32 %v97_v42, 0.0  ;;  %v68_v51 = vmul.f32 %v468_v44, %v579_v3 }
   0xc   :  { %v118_v41 = vpack.c.bf16 %v103_v32, %v102_v31  ;;  %v119_v47 = vpack.c.bf16 %v105_v39, %v104_v38  ;;  %v471_v53 = vunpack.c.l.bf16 %v491_v40  ;;  %v90_v54 = vadd.f32 %v593_v9, %v67_v48 }
   0xd   :  { %v122_v46 = vpack.c.bf16 %v111_v37, %v110_v36  ;;  %v75_v55 = vmul.f32 %v483_v49, %v579_v3  ;;  %v472_v56 = vunpack.c.h.bf16 %v491_v40  ;;  %v487_v57 = vunpack.c.l.bf16 %v495_v45 }
   0xe   :  { %510 = vmatprep.mubr.msk.bf16.mxu0 %vm142_vm0, %v118_v41  ;;  %v123_v58 = vpack.c.bf16 %v113_v50, %v112_v43  ;;  %v91_v59 = vadd.f32 %v593_v9, %v68_v51  ;;  %v76_v60 = vmul.f32 %v484_v52, %v579_v3  ;;  %v69_v61 = vmul.f32 %v471_v53, %v579_v3 }
   0xf   :  { %518 = vmatprep.mubr.msk.bf16.mxu1 %vm142_vm0, %v122_v46  ;;  %511 = vmatmul.mubr.msk.bf16.vlgmr.msra.gmra.mrb[0].mxu0 %vm142_vm0, %v119_v47  ;;  %v106_v62 = vmax.f32 %v90_v54, 0.0  ;;  %v98_v63 = vadd.f32 %v593_v9, %v75_v55  ;;  %v70_v0 = vmul.f32 %v472_v56, %v579_v3  ;;  %v488_v1 = vunpack.c.h.bf16 %v495_v45 }
  0x10   :  { %519 = vmatmul.mubr.msk.bf16.vlgmr.msra.gmra.mrb[0].mxu1 %vm142_vm0, %v123_v58  ;;  %v107_v2 = vmax.f32 %v91_v59, 0.0  ;;  %v99_v4 = vadd.f32 %v593_v9, %v76_v60  ;;  %v92_v5 = vadd.f32 %v593_v9, %v69_v61  ;;  %v77_v6 = vmul.f32 %v487_v57, %v579_v3 }
  0x11   :  { %v114_v7 = vmax.f32 %v98_v63, 0.0  ;;  %v93_v8 = vadd.f32 %v593_v9, %v70_v0  ;;  %v78_v10 = vmul.f32 %v488_v1, %v579_v3  ;;  %v650_v3 = vld [vmem:[%s757_s4] ss:$0 sm:$0xff] }
  0x12   :  { %v120_v11 = vpack.c.bf16 %v107_v2, %v106_v62  ;;  %v115_v12 = vmax.f32 %v99_v4, 0.0  ;;  %v108_v13 = vmax.f32 %v92_v5, 0.0  ;;  %v100_v14 = vadd.f32 %v593_v9, %v77_v6 }
  0x13   :  { %v109_v15 = vmax.f32 %v93_v8, 0.0  ;;  %v101_v16 = vadd.f32 %v593_v9, %v78_v10  ;;  %v655_v9 = vld [vmem:[%s758_s5] ss:$0 sm:$0xff] }
  0x14   :  { %514 = vmatprep.mubr.msk.bf16.mxu0 %vm142_vm0, %v120_v11  ;;  %v124_v17 = vpack.c.bf16 %v115_v12, %v114_v7  ;;  %v116_v18 = vmax.f32 %v100_v14, 0.0 }
  0x15   :  { %v121_v19 = vpack.c.bf16 %v109_v15, %v108_v13  ;;  %v117_v20 = vmax.f32 %v101_v16, 0.0 }
  0x16   :  { %522 = vmatprep.mubr.msk.bf16.mxu1 %vm142_vm0, %v124_v17 }
  0x17   :  { %515 = vmatmul.mubr.msk.bf16.gmra.mrb[4].mxu0 %vm142_vm0, %v121_v19  ;;  %v125_v21 = vpack.c.bf16 %v117_v20, %v116_v18 }
  0x19   :  { %523 = vmatmul.mubr.msk.bf16.gmra.mrb[4].mxu1 %vm142_vm0, %v125_v21 }
  0xe2   :  { %v512_v22 = vpop.f32.mrb[0].mxu0 }
  0xe3   :  { %v273_v23 = vmul.f32 %v512_v22, %v650_v3  ;;  %v201_v24 = vpop.f32.mrb[1].mxu0  ;;  %v520_v28 = vpop.f32.mrb[0].mxu1 }
  0xe4   :  { %v271_v25 = vmul.f32 %v650_v3, %v201_v24  ;;  %v513_v26 = vpop.f32.mrb[2].mxu0  ;;  %v281_v31 = vmul.f32 %v520_v28, %v650_v3  ;;  %v233_v33 = vpop.f32.mrb[1].mxu1 }
  0xe5   :  { %v296_v27 = vadd.f32 %v655_v9, %v273_v23  ;;  %v274_v29 = vmul.f32 %v513_v26, %v650_v3  ;;  %v204_v30 = vpop.f32.mrb[3].mxu0  ;;  %v279_v36 = vmul.f32 %v650_v3, %v233_v33  ;;  %v521_v38 = vpop.f32.mrb[2].mxu1 }
  0xe6   :  { %v294_v32 = vadd.f32 %v655_v9, %v271_v25  ;;  %v272_v34 = vmul.f32 %v650_v3, %v204_v30  ;;  %v304_v39 = vadd.f32 %v655_v9, %v281_v31  ;;  %v282_v41 = vmul.f32 %v521_v38, %v650_v3  ;;  %v236_v43 = vpop.f32.mrb[3].mxu1 }
  0xe7   :  { %v312_v35 = vmax.f32 %v296_v27, 0.0  ;;  %v297_v37 = vadd.f32 %v655_v9, %v274_v29  ;;  %v302_v45 = vadd.f32 %v655_v9, %v279_v36  ;;  %v280_v47 = vmul.f32 %v650_v3, %v236_v43 }
  0xe8   :  { %v310_v40 = vmax.f32 %v294_v32, 0.0  ;;  %v295_v42 = vadd.f32 %v655_v9, %v272_v34  ;;  %v320_v48 = vmax.f32 %v304_v39, 0.0  ;;  %v305_v50 = vadd.f32 %v655_v9, %v282_v41 }
  0xe9   :  { %v443_v44 = vpack.c.bf16 %v312_v35, %v312_v35  ;;  %v313_v46 = vmax.f32 %v297_v37, 0.0  ;;  %v318_v52 = vmax.f32 %v302_v45, 0.0  ;;  %v303_v54 = vadd.f32 %v655_v9, %v280_v47 }
  0xea   :  { %v441_v49 = vpack.c.bf16 %v310_v40, %v310_v40  ;;  %v311_v51 = vmax.f32 %v295_v42, 0.0  ;;  %v451_v55 = vpack.c.bf16 %v320_v48, %v320_v48  ;;  %v321_v56 = vmax.f32 %v305_v50, 0.0  ;;  %v516_v58 = vpop.f32.mrb[4].mxu0 }
  0xeb   :  { %393 = vst.msk [vmem:[%s759_s6 + $0x8] sm:$0xf] %vm390_vm1, %v443_v44  ;;  %v444_v53 = vpack.c.bf16 %v313_v46, %v313_v46  ;;  %v449_v59 = vpack.c.bf16 %v318_v52, %v318_v52  ;;  %v319_v60 = vmax.f32 %v303_v54, 0.0  ;;  %v277_v61 = vmul.f32 %v516_v58, %v650_v3  ;;  %v217_v62 = vpop.f32.mrb[5].mxu0 }
  0xec   :  { %391 = vst.msk [vmem:[%s759_s6] sm:$0xf] %vm390_vm1, %v441_v49  ;;  %v442_v57 = vpack.c.bf16 %v311_v51, %v311_v51  ;;  %401 = vst.msk [vmem:[%s759_s6 + $0x28] sm:$0xf] %vm390_vm1, %v451_v55  ;;  %v452_v63 = vpack.c.bf16 %v321_v56, %v321_v56  ;;  %v524_v0 = vpop.f32.mrb[4].mxu1  ;;  %v275_v1 = vmul.f32 %v650_v3, %v217_v62  ;;  %v517_v2 = vpop.f32.mrb[6].mxu0 }
  0xed   :  { %394 = vst.msk [vmem:[%s759_s6 + $0xc] sm:$0xf] %vm390_vm1, %v444_v53  ;;  %399 = vst.msk [vmem:[%s759_s6 + $0x20] sm:$0xf] %vm390_vm1, %v449_v59  ;;  %v450_v4 = vpack.c.bf16 %v319_v60, %v319_v60  ;;  %v300_v5 = vadd.f32 %v655_v9, %v277_v61  ;;  %v285_v6 = vmul.f32 %v524_v0, %v650_v3  ;;  %v249_v7 = vpop.f32.mrb[5].mxu1  ;;  %v220_v10 = vpop.f32.mrb[7].mxu0 }
  0xee   :  { %392 = vst.msk [vmem:[%s759_s6 + $0x4] sm:$0xf] %vm390_vm1, %v442_v57  ;;  %v278_v8 = vmul.f32 %v517_v2, %v650_v3  ;;  %402 = vst.msk [vmem:[%s759_s6 + $0x2c] sm:$0xf] %vm390_vm1, %v452_v63  ;;  %v298_v11 = vadd.f32 %v655_v9, %v275_v1  ;;  %v283_v12 = vmul.f32 %v650_v3, %v249_v7  ;;  %v525_v13 = vpop.f32.mrb[6].mxu1 }
  0xef   :  { %v276_v14 = vmul.f32 %v650_v3, %v220_v10  ;;  %400 = vst.msk [vmem:[%s759_s6 + $0x24] sm:$0xf] %vm390_vm1, %v450_v4  ;;  %v316_v15 = vmax.f32 %v300_v5, 0.0  ;;  %v308_v16 = vadd.f32 %v655_v9, %v285_v6  ;;  %v286_v18 = vmul.f32 %v525_v13, %v650_v3  ;;  %v252_v19 = vpop.f32.mrb[7].mxu1 }
  0xf0   :  { %v301_v17 = vadd.f32 %v655_v9, %v278_v8  ;;  %v314_v20 = vmax.f32 %v298_v11, 0.0  ;;  %v306_v21 = vadd.f32 %v655_v9, %v283_v12  ;;  %v284_v23 = vmul.f32 %v650_v3, %v252_v19 }
  0xf1   :  { %v299_v22 = vadd.f32 %v655_v9, %v276_v14  ;;  %v447_v24 = vpack.c.bf16 %v316_v15, %v316_v15  ;;  %v324_v25 = vmax.f32 %v308_v16, 0.0  ;;  %v309_v27 = vadd.f32 %v655_v9, %v286_v18 }
  0xf2   :  { %v317_v26 = vmax.f32 %v301_v17, 0.0  ;;  %v445_v28 = vpack.c.bf16 %v314_v20, %v314_v20  ;;  %v322_v29 = vmax.f32 %v306_v21, 0.0  ;;  %v307_v31 = vadd.f32 %v655_v9, %v284_v23 }
  0xf3   :  { %v315_v30 = vmax.f32 %v299_v22, 0.0  ;;  %397 = vst.msk [vmem:[%s759_s6 + $0x18] sm:$0xf] %vm390_vm1, %v447_v24  ;;  %v455_v32 = vpack.c.bf16 %v324_v25, %v324_v25  ;;  %v325_v34 = vmax.f32 %v309_v27, 0.0 }
  0xf4   :  { %v448_v33 = vpack.c.bf16 %v317_v26, %v317_v26  ;;  %395 = vst.msk [vmem:[%s759_s6 + $0x10] sm:$0xf] %vm390_vm1, %v445_v28  ;;  %v453_v3 = vpack.c.bf16 %v322_v29, %v322_v29  ;;  %v323_v36 = vmax.f32 %v307_v31, 0.0 }
  0xf5   :  { %v446_v35 = vpack.c.bf16 %v315_v30, %v315_v30  ;;  %405 = vst.msk [vmem:[%s759_s6 + $0x38] sm:$0xf] %vm390_vm1, %v455_v32  ;;  %v456_v9 = vpack.c.bf16 %v325_v34, %v325_v34 }
  0xf6   :  { %398 = vst.msk [vmem:[%s759_s6 + $0x1c] sm:$0xf] %vm390_vm1, %v448_v33  ;;  %403 = vst.msk [vmem:[%s759_s6 + $0x30] sm:$0xf] %vm390_vm1, %v453_v3  ;;  %v454_v37 = vpack.c.bf16 %v323_v36, %v323_v36 }
  0xf7   :  { %396 = vst.msk [vmem:[%s759_s6 + $0x14] sm:$0xf] %vm390_vm1, %v446_v35  ;;  %406 = vst.msk [vmem:[%s759_s6 + $0x3c] sm:$0xf] %vm390_vm1, %v456_v9 }
  0xf8   :  { %404 = vst.msk [vmem:[%s759_s6 + $0x34] sm:$0xf] %vm390_vm1, %v454_v37 }

// kernel: forward.38
= control target key start
LH: loop header
LB: loop body
LE: loop exit
PB: predicated region body
PF: predicated region fallthrough
CT: control target
= control target key end

     0   :  { %s1304_s9 = smov 0   ;;  %s1622_s0 = inlined_call_operand.vmem [shape: bf16[2,11,16,32], index: 0, kind: input, shape index: {}]   ;;  %s1623_s1 = inlined_call_operand.vmem [shape: bf16[3,32,24], index: 1, kind: input, shape index: {}]   ;;  %s1624_s2 = inlined_call_operand.vmem [shape: bf16[2,8,8,8], index: 2, kind: output, shape index: {}]  }
   0x1 LB: > { %s1073_s10 = sadd.s32 4294967295, %s1285_s9   ;;  %p1077_p0 = scmp.ge.s32.totalorder %s1285_s9, 1  ;;  %s1285_s9 = sphi %s1304_s9, %s12_s9  }
   0x2   : > { %p112_p1 = scmp.lt.s32.totalorder %s1285_s9, 3 }
   0x4   : > { %p113_p2 = pnand %p1077_p0, %p112_p1 }
   0x5   : > { %v1262_v0 = vld [vmem:[%s1623_s1] sm:$0xff] (!%p113_p2)   ;;  %p134_p3 = scmp.lt.s32.totalorder (!%p113_p2), %s1073_s10, 1  ;;  %v1263_v1 = vld [vmem:[%s1623_s1 + $0x8] sm:$0xff] (!%p113_p2)   ;;  %v1269_v2 = vld [vmem:[%s1623_s1 + $0x10] sm:$0xff] (!%p113_p2)   ;;  %vm232_vm0 = vcmask (!%p113_p2), 261120   ;;  %vm753_vm2 = vcmask (!%p113_p2), 1046528  }
   0x6   : > { %116 = sbr.rel (%p113_p2) target bundleno = 443 (0x1bb), region = 28  ;;  %1175 = vmatprep.subr.bf16.mxu0 (!%p113_p2), %v1262_v0  ;;  %1247 = vmatprep.subr.bf16.mxu1 (!%p113_p2), %v1262_v0  ;;  %v1271_v3 = vld [vmem:[%s1623_s1 + $0x20] sm:$0xff] (!%p113_p2)   ;;  %vm447_vm1 = vsmask.f32 (!%p113_p2), 7424  ;;  %v1274_v6 = vld [vmem:[%s1623_s1 + $0x18] sm:$0xff] (!%p113_p2)   ;;  %v1277_v7 = vld [vmem:[%s1623_s1 + $0x28] sm:$0xff] (!%p113_p2)  }
   0x7   : > { %1176 = vmatpush3.bf16.msra.mxu0 (!%p113_p2), %v1262_v0  ;;  %1249 = vmatpush3.bf16.msra.mxu1 (!%p113_p2), %v1262_v0  ;;  %s1287_s27 = smov (!%p113_p2), 120   ;;  %s1288_s28 = smov (!%p113_p2), 112   ;;  %vm1009_vm3 = vcmask (!%p113_p2), 60416  }
   0x8   : > { %1177 = vmatprep.subr.bf16.mxu0 (!%p113_p2), %v1263_v1  ;;  %1248 = vmatprep.subr.bf16.mxu1 (!%p113_p2), %v1263_v1 }
   0xb   : > { %1178 = vmatpush3.bf16.msra.mxu0 (!%p113_p2), %v1263_v1  ;;  %1250 = vmatpush3.bf16.msra.mxu1 (!%p113_p2), %v1263_v1 }
   0xc   : > { %1199 = vmatprep.subr.bf16.mxu1 (!%p113_p2), %v1269_v2  ;;  %1223 = vmatprep.subr.bf16.mxu0 (!%p113_p2), %v1271_v3 }
   0xd   : > { %s1626_s10 = smov (!%p134_p3, %s1073_s10), 1 }
   0xe   : > { %s1251_s17 = smul.u32 88, %s1626_s10  ;;  %s1138_s29 = sshll.u32 %s1626_s10, 5 }
   0xf   : > { %s1593_s4 = scalar_lea.vmem %s1624_s2, %s1138_s29 }
  0x10   : > { %s1330_s22 = scalar_lea.vmem %s1622_s0, %s1251_s17 }
  0x11   : > { %v1264_v4 = vld [vmem:[%s1330_s22] sm:$0xff]   ;;  %v1334_v5 = vld [vmem:[%s1330_s22 + $0x30] sm:$0xff]   ;;  %v1266_v8 = vld [vmem:[%s1330_s22 + $0x8] sm:$0xff]  }
  0x12   : > { %1179 = vmatprep.mubr.msk.bf16.mxu0 %vm232_vm0, %v1264_v4  ;;  %v448_v9 = vshrl.u32 %v1264_v4, 16  ;;  %1191 = vmatprep.mubr.msk.bf16.mxu1 %vm232_vm0, %v1334_v5  ;;  %v1347_v10 = vld [vmem:[%s1330_s22 + $0x38] sm:$0xff]   ;;  %v450_v11 = vshll.u32 %v1264_v4, 16  ;;  %v1268_v12 = vld [vmem:[%s1330_s22 + $0x10] sm:$0xff]   ;;  %v454_v13 = vshll.u32 %v1266_v8, 16  ;;  %v1355_v15 = vld [vmem:[%s1330_s22 + $0x40] sm:$0xff]  }
  0x13   : > { %1180 = vmatmul.mubr.msk.bf16.vlgmr.msra.gmra.mrb[0].mxu0 %vm232_vm0, %v1266_v8  ;;  %1192 = vmatmul.mubr.msk.bf16.vlgmr.msra.gmra.mrb[0].mxu1 %vm232_vm0, %v1347_v10  ;;  %v1358_v16 = vld [vmem:[%s1330_s22 + $0x18] sm:$0xff]   ;;  %v1363_v19 = vld [vmem:[%s1330_s22 + $0x48] sm:$0xff]   ;;  %v1275_v20 = vld [vmem:[%s1330_s22 + $0x20] sm:$0xff]   ;;  %v461_v21 = vshll.u32 %v1268_v12, 16  ;;  %v458_v22 = vshrl.u32 %v1266_v8, 16  ;;  %v465_v24 = vshrl.u32 %v1268_v12, 16 }
  0x14   : > { %1224 = vmatpush3.bf16.msra.mxu0 %v1271_v3  ;;  %v452_v14 = vrot.slane %v450_v11, 1  ;;  %1183 = vmatprep.mubr.msk.bf16.mxu0 %vm232_vm0, %v1268_v12  ;;  %v456_v18 = vrot.slane %v454_v13, 1  ;;  %v468_v25 = vshll.u32 %v1358_v16, 16  ;;  %v754_v28 = vrot.slane %v1264_v4, 1  ;;  %v1276_v32 = vld [vmem:[%s1330_s22 + $0x28] sm:$0xff]  }
  0x15   : > { %1200 = vmatpush3.bf16.msra.mxu1 %v1269_v2  ;;  %1225 = vmatprep.subr.bf16.mxu0 %v1277_v7  ;;  %v463_v26 = vrot.slane %v461_v21, 1  ;;  %v755_v29 = vrot.slane %v1266_v8, 1  ;;  %v475_v33 = vshll.u32 %v1275_v20, 16  ;;  %v472_v35 = vshrl.u32 %v1358_v16, 16  ;;  %v1278_v8 = vld [vmem:[%s1330_s22 + $0x50] ss:$0 sps:$4 sm:$0xff]  }
  0x16   : > { %1201 = vmatprep.subr.bf16.mxu1 %v1274_v6  ;;  %v453_v17 = vor.u32 %v452_v14, %v448_v9  ;;  %1195 = vmatprep.mubr.msk.bf16.mxu1 %vm232_vm0, %v1355_v15  ;;  %v460_v27 = vor.u32 %v458_v22, %v456_v18  ;;  %v470_v31 = vrot.slane %v468_v25, 1  ;;  %v479_v38 = vshrl.u32 %v1275_v20, 16 }
  0x17   : > { %v467_v30 = vor.u32 %v465_v24, %v463_v26  ;;  %v756_v36 = vsel %vm753_vm2, %v754_v28, %v755_v29  ;;  %v482_v39 = vshll.u32 %v1276_v32, 16  ;;  %v477_v40 = vrot.slane %v475_v33, 1 }
  0x18   : > { %1226 = vmatpush3.bf16.msra.mxu0 %v1277_v7  ;;  %v457_v23 = vsel %vm447_vm1, %v453_v17, %v456_v18  ;;  %v464_v34 = vsel %vm447_vm1, %v460_v27, %v463_v26  ;;  %v757_v41 = vrot.slane %v1268_v12, 1  ;;  %v474_v42 = vor.u32 %v472_v35, %v470_v31 }
  0x19   : > { %1202 = vmatpush3.bf16.msra.mxu1 %v1274_v6  ;;  %v471_v37 = vsel %vm447_vm1, %v467_v30, %v470_v31  ;;  %v759_v43 = vrot.slane %v1358_v16, 1  ;;  %v481_v44 = vor.u32 %v479_v38, %v477_v40  ;;  %v484_v45 = vrot.slane %v482_v39, 1 }
  0x1a   : > { %v758_v46 = vsel %vm753_vm2, %v755_v29, %v757_v41  ;;  %v489_v47 = vshll.u32 %v1334_v5, 16  ;;  %v478_v48 = vsel %vm447_vm1, %v474_v42, %v477_v40  ;;  %v486_v49 = vshrl.u32 %v1276_v32, 16 }
  0x1b   : > { %1184 = vmatmul.mubr.msk.bf16.gmra.mrb[4].mxu0 %vm232_vm0, %v1358_v16  ;;  %1196 = vmatmul.mubr.msk.bf16.gmra.mrb[4].mxu1 %vm232_vm0, %v1363_v19  ;;  %v760_v50 = vsel %vm753_vm2, %v757_v41, %v759_v43  ;;  %v485_v51 = vsel %vm447_vm1, %v481_v44, %v484_v45  ;;  %v493_v52 = vshrl.u32 %v1334_v5, 16  ;;  %v496_v53 = vshll.u32 %v1347_v10, 16 }
  0x1c   : > { %1187 = vmatprep.mubr.msk.bf16.mxu0 %vm232_vm0, %v1275_v20  ;;  %1203 = vmatprep.mubr.msk.bf16.mxu1 %vm232_vm0, %v457_v23  ;;  %v491_v54 = vrot.slane %v489_v47, 1  ;;  %v761_v55 = vrot.slane %v1275_v20, 1  ;;  %v488_v56 = vor.u32 %v486_v49, %v484_v45  ;;  %v763_v57 = vrot.slane %v1276_v32, 1 }
  0x1d   : > { %v498_v59 = vrot.slane %v496_v53, 1  ;;  %v503_v61 = vshll.u32 %v1355_v15, 16  ;;  %v500_v63 = vshrl.u32 %v1347_v10, 16  ;;  %v507_v2 = vshrl.u32 %v1355_v15, 16 }
  0x1e   : > { %v495_v58 = vor.u32 %v493_v52, %v491_v54  ;;  %v762_v60 = vsel %vm753_vm2, %v759_v43, %v761_v55  ;;  %v492_v62 = vsel %vm447_vm1, %v488_v56, %v491_v54  ;;  %v764_v0 = vsel %vm753_vm2, %v761_v55, %v763_v57 }
  0x1f   : > { %v510_v3 = vshll.u32 %v1363_v19, 16  ;;  %v505_v4 = vrot.slane %v503_v61, 1  ;;  %v765_v6 = vrot.slane %v1334_v5, 1  ;;  %v502_v7 = vor.u32 %v500_v63, %v498_v59 }
  0x20   : > { %v499_v1 = vsel %vm447_vm1, %v495_v58, %v498_v59  ;;  %v767_v9 = vrot.slane %v1347_v10, 1  ;;  %v514_v16 = vshrl.u32 %v1363_v19, 16  ;;  %v518_v17 = vshll.u32 %v1278_v8, 16 }
  0x21   : > { %v509_v11 = vor.u32 %v507_v2, %v505_v4  ;;  %v512_v12 = vrot.slane %v510_v3, 1  ;;  %v766_v13 = vsel %vm753_vm2, %v763_v57, %v765_v6  ;;  %v506_v14 = vsel %vm447_vm1, %v502_v7, %v505_v4 }
  0x22   : > { %v768_v18 = vsel %vm753_vm2, %v765_v6, %v767_v9  ;;  %v769_v5 = vrot.slane %v1355_v15, 1  ;;  %v520_v21 = vrot.slane %v518_v17, 1  ;;  %v771_v22 = vrot.slane %v1363_v19, 1 }
  0x23   : > { %1188 = vmatmul.mubr.msk.bf16.gmra.mrb[8].mxu0 %vm232_vm0, %v1276_v32  ;;  %1204 = vmatmul.mubr.msk.bf16.vlgmr.msra.gmra.mrb[8].mxu1 %vm232_vm0, %v464_v34  ;;  %v513_v20 = vsel %vm447_vm1, %v509_v11, %v512_v12  ;;  %v516_v10 = vor.u32 %v514_v16, %v512_v12  ;;  %v773_v26 = vrot.slane %v1278_v8, 1 }
  0x24   : > { %1227 = vmatprep.mubr.msk.bf16.mxu0 %vm232_vm0, %v756_v36  ;;  %1207 = vmatprep.mubr.msk.bf16.mxu1 %vm232_vm0, %v471_v37  ;;  %v770_v23 = vsel %vm753_vm2, %v767_v9, %v769_v5  ;;  %v772_v25 = vsel %vm753_vm2, %v769_v5, %v771_v22 }
  0x25   : > { %v521_v24 = vsel %vm447_vm1, %v516_v10, %v520_v21  ;;  %v774_v15 = vsel %vm753_vm2, %v771_v22, %v773_v26 }
  0x2b   : > { %1228 = vmatmul.mubr.msk.bf16.vlgmr.msra.gmra.mrb[12].mxu0 %vm232_vm0, %v758_v46  ;;  %1208 = vmatmul.mubr.msk.bf16.gmra.mrb[12].mxu1 %vm232_vm0, %v478_v48 }
  0x2c   : > { %1231 = vmatprep.mubr.msk.bf16.mxu0 %vm232_vm0, %v760_v50  ;;  %1211 = vmatprep.mubr.msk.bf16.mxu1 %vm232_vm0, %v485_v51 }
  0x33   : > { %1232 = vmatmul.mubr.msk.bf16.gmra.mrb[16].mxu0 %vm232_vm0, %v762_v60  ;;  %1212 = vmatmul.mubr.msk.bf16.gmra.mrb[16].mxu1 %vm232_vm0, %v492_v62 }
  0x34   : > { %1235 = vmatprep.mubr.msk.bf16.mxu0 %vm232_vm0, %v764_v0  ;;  %1215 = vmatprep.mubr.msk.bf16.mxu1 %vm232_vm0, %v499_v1 }
  0x3b   : > { %1236 = vmatmul.mubr.msk.bf16.gmra.mrb[20].mxu0 %vm232_vm0, %v766_v13  ;;  %1216 = vmatmul.mubr.msk.bf16.gmra.mrb[20].mxu1 %vm232_vm0, %v506_v14 }
  0x3c   : > { %1239 = vmatprep.mubr.msk.bf16.mxu0 %vm232_vm0, %v768_v18  ;;  %1219 = vmatprep.mubr.msk.bf16.mxu1 %vm232_vm0, %v513_v20 }
  0x43   : > { %1240 = vmatmul.mubr.msk.bf16.gmra.mrb[24].mxu0 %vm232_vm0, %v770_v23  ;;  %1220 = vmatmul.mubr.msk.bf16.gmra.mrb[24].mxu1 %vm232_vm0, %v521_v24 }
  0x44   : > { %1243 = vmatprep.mubr.msk.bf16.mxu0 %vm232_vm0, %v772_v25 }
  0x4b   : > { %1244 = vmatmul.mubr.msk.bf16.gmra.mrb[28].mxu0 %vm232_vm0, %v774_v15 }
  0xe6   : > { %v1429_v27 = vpop.f32.mrb[0].mxu0  ;;  %v1431_v19 = vpop.f32.mrb[0].mxu1 }
  0xe7   : > { %374 = vrot.lane.b32.xlu0 %v1429_v27, %s1287_s27  ;;  %v1435_v28 = vpop.f32.mrb[1].mxu0  ;;  %417 = vrot.lane.b32.xlu1 %v1431_v19, %s1288_s28  ;;  %v1439_v29 = vpop.f32.mrb[1].mxu1 }
  0xe8   : > { %v1182_v30 = vpop.f32.mrb[2].mxu0  ;;  %v1194_v31 = vpop.f32.mrb[2].mxu1 }
  0xe9   : > { %v300_v32 = vpop.f32.mrb[3].mxu0  ;;  %v342_v33 = vpop.f32.mrb[3].mxu1 }
  0xeb   : > { %386 = vrot.lane.b32.xlu0 %v1431_v19, %s1287_s27  ;;  %384 = vrot.lane.b32.xlu1 %v1439_v29, %s1287_s27 }
  0xee   : > { %v1445_v34 = vpop.f32.mrb[4].mxu0  ;;  %v1197_v36 = vpop.f32.mrb[4].mxu1 }
  0xef   : > { %415 = vrot.lane.b32.xlu0 %v1439_v29, %s1288_s28  ;;  %v1449_v35 = vpop.f32.mrb[5].mxu0  ;;  %378 = vrot.lane.b32.xlu1 %v1445_v34, %s1287_s27  ;;  %v353_v38 = vpop.f32.mrb[5].mxu1 }
  0xf0   : > { %v1186_v37 = vpop.f32.mrb[6].mxu0  ;;  %v1198_v40 = vpop.f32.mrb[6].mxu1 }
  0xf1   : > { %v314_v39 = vpop.f32.mrb[7].mxu0  ;;  %v356_v41 = vpop.f32.mrb[7].mxu1 }
  0xf3   : > { %376 = vrot.lane.b32.xlu0 %v1449_v35, %s1287_s27  ;;  %409 = vrot.lane.b32.xlu1 %v1445_v34, %s1288_s28 }
  0xf6   : > { %v1457_v42 = vpop.f32.mrb[8].mxu0  ;;  %v1461_v43 = vpop.f32.mrb[8].mxu1 }
  0xf7   : > { %407 = vrot.lane.b32.xlu0 %v1449_v35, %s1288_s28  ;;  %v1463_v44 = vpop.f32.mrb[9].mxu0  ;;  %421 = vrot.lane.b32.xlu1 %v1197_v36, %s1288_s28  ;;  %v1466_v45 = vpop.f32.mrb[9].mxu1 }
  0xf8   : > { %v1190_v46 = vpop.f32.mrb[10].mxu0  ;;  %v1206_v47 = vpop.f32.mrb[10].mxu1 }
  0xf9   : > { %v328_v48 = vpop.f32.mrb[11].mxu0  ;;  %v601_v49 = vpop.f32.mrb[11].mxu1 }
  0xfb   : > { %419 = vrot.lane.b32.xlu0 %v353_v38, %s1288_s28  ;;  %388 = vrot.lane.b32.xlu1 %v353_v38, %s1287_s27 }
  0xfe   : > { %v1470_v50 = vpop.f32.mrb[12].mxu0  ;;  %v1474_v51 = vpop.f32.mrb[12].mxu1 }
  0xff   : > { %382 = vrot.lane.b32.xlu0 %v1457_v42, %s1287_s27  ;;  %v1476_v52 = vpop.f32.mrb[13].mxu0  ;;  %413 = vrot.lane.b32.xlu1 %v1457_v42, %s1288_s28  ;;  %v1480_v53 = vpop.f32.mrb[13].mxu1 }
 0x100   : > { %v1230_v54 = vpop.f32.mrb[14].mxu0  ;;  %v1210_v55 = vpop.f32.mrb[14].mxu1 }
 0x101   : > { %v854_v56 = vpop.f32.mrb[15].mxu0  ;;  %v615_v57 = vpop.f32.mrb[15].mxu1 }
 0x103   : > { %683 = vrot.lane.b32.xlu0 %v1461_v43, %s1287_s27  ;;  %380 = vrot.lane.b32.xlu1 %v1463_v44, %s1287_s27 }
 0x106   : > { %v1486_v58 = vpop.f32.mrb[16].mxu0  ;;  %v1490_v59 = vpop.f32.mrb[16].mxu1 }
 0x107   : > { %411 = vrot.lane.b32.xlu0 %v1463_v44, %s1288_s28  ;;  %v1492_v60 = vpop.f32.mrb[17].mxu0  ;;  %718 = vrot.lane.b32.xlu1 %v1474_v51, %s1288_s28  ;;  %v1496_v61 = vpop.f32.mrb[17].mxu1 }
 0x108   : > { %v1234_v62 = vpop.f32.mrb[18].mxu0  ;;  %v1214_v63 = vpop.f32.mrb[18].mxu1 }
 0x109   : > { %v868_v0 = vpop.f32.mrb[19].mxu0  ;;  %v629_v1 = vpop.f32.mrb[19].mxu1 }
 0x10b   : > { %687 = vrot.lane.b32.xlu0 %v1474_v51, %s1287_s27  ;;  %685 = vrot.lane.b32.xlu1 %v1480_v53, %s1287_s27 }
 0x10e   : > { %v1502_v2 = vpop.f32.mrb[20].mxu0  ;;  %v1506_v3 = vpop.f32.mrb[20].mxu1 }
 0x10f   : > { %936 = vrot.lane.b32.xlu0 %v1470_v50, %s1287_s27  ;;  %v1508_v4 = vpop.f32.mrb[21].mxu0  ;;  %722 = vrot.lane.b32.xlu1 %v1490_v59, %s1288_s28  ;;  %v1512_v6 = vpop.f32.mrb[21].mxu1 }
 0x110   : > { %v1238_v7 = vpop.f32.mrb[22].mxu0  ;;  %v1218_v8 = vpop.f32.mrb[22].mxu1 }
 0x111   : > { %v882_v9 = vpop.f32.mrb[23].mxu0  ;;  %v643_v11 = vpop.f32.mrb[23].mxu1 }
 0x113   : > { %716 = vrot.lane.b32.xlu0 %v1480_v53, %s1288_s28  ;;  %971 = vrot.lane.b32.xlu1 %v1486_v58, %s1288_s28 }
 0x116   : > { %v1518_v12 = vpop.f32.mrb[24].mxu0  ;;  %v1221_v13 = vpop.f32.mrb[24].mxu1 }
 0x117   : > { %691 = vrot.lane.b32.xlu0 %v1490_v59, %s1287_s27  ;;  %v1522_v14 = vpop.f32.mrb[25].mxu0  ;;  %689 = vrot.lane.b32.xlu1 %v1496_v61, %s1287_s27  ;;  %v654_v16 = vpop.f32.mrb[25].mxu1 }
 0x118   : > { %v1242_v17 = vpop.f32.mrb[26].mxu0  ;;  %v1222_v18 = vpop.f32.mrb[26].mxu1 }
 0x119   : > { %v896_v20 = vpop.f32.mrb[27].mxu0  ;;  %v657_v5 = vpop.f32.mrb[27].mxu1 }
 0x11b   : > { %940 = vrot.lane.b32.xlu0 %v1486_v58, %s1287_s27  ;;  %938 = vrot.lane.b32.xlu1 %v1492_v60, %s1287_s27 }
 0x11e   : > { %v1245_v10 = vpop.f32.mrb[28].mxu0 }
 0x11f   : > { %720 = vrot.lane.b32.xlu0 %v1496_v61, %s1288_s28  ;;  %v907_v21 = vpop.f32.mrb[29].mxu0  ;;  %726 = vrot.lane.b32.xlu1 %v1506_v3, %s1288_s28 }
 0x120   : > { %v1246_v22 = vpop.f32.mrb[30].mxu0 }
 0x121   : > { %v910_v23 = vpop.f32.mrb[31].mxu0 }
 0x123   : > { %969 = vrot.lane.b32.xlu0 %v1492_v60, %s1288_s28  ;;  %975 = vrot.lane.b32.xlu1 %v1502_v2, %s1288_s28 }
 0x127   : > { %695 = vrot.lane.b32.xlu0 %v1506_v3, %s1287_s27  ;;  %693 = vrot.lane.b32.xlu1 %v1512_v6, %s1287_s27 }
 0x12b   : > { %944 = vrot.lane.b32.xlu0 %v1502_v2, %s1287_s27  ;;  %942 = vrot.lane.b32.xlu1 %v1508_v4, %s1287_s27 }
 0x12f   : > { %724 = vrot.lane.b32.xlu0 %v1512_v6, %s1288_s28  ;;  %730 = vrot.lane.b32.xlu1 %v1221_v13, %s1288_s28 }
 0x133   : > { %973 = vrot.lane.b32.xlu0 %v1508_v4, %s1288_s28  ;;  %979 = vrot.lane.b32.xlu1 %v1518_v12, %s1288_s28 }
 0x137   : > { %948 = vrot.lane.b32.xlu0 %v1518_v12, %s1287_s27  ;;  %697 = vrot.lane.b32.xlu1 %v654_v16, %s1287_s27 }
 0x13b   : > { %728 = vrot.lane.b32.xlu0 %v654_v16, %s1288_s28  ;;  %946 = vrot.lane.b32.xlu1 %v1522_v14, %s1287_s27 }
 0x13f   : > { %977 = vrot.lane.b32.xlu0 %v1522_v14, %s1288_s28  ;;  %950 = vrot.lane.b32.xlu1 %v907_v21, %s1287_s27 }
 0x143   : > { %981 = vrot.lane.b32.xlu0 %v907_v21, %s1288_s28  ;;  %983 = vrot.lane.b32.xlu1 %v1245_v10, %s1288_s28 }
 0x159   : > { %v375_v24 = vpop.permute.xlu0 %374  ;;  %v418_v25 = vpop.permute.xlu1 %417 }
 0x15a   : > { %v398_v41 = vadd.f32 %v375_v24, %v1435_v28 }
 0x15d   : > { %v387_v26 = vpop.permute.xlu0 %386  ;;  %v385_v15 = vpop.permute.xlu1 %384 }
 0x15e   : > { %v404_v30 = vadd.f32 %v387_v26, %v1439_v29  ;;  %v403_v31 = vadd.f32 %v1457_v42, %v385_v15 }
 0x160   : > { %v436_v32 = vadd.f32 %v418_v25, %v403_v31 }
 0x161   : > { %v416_v33 = vpop.permute.xlu0 %415  ;;  %v379_v36 = vpop.permute.xlu1 %378 }
 0x162   : > { %v1567_v37 = vadd.f32 %v1490_v59, %v436_v32 }
 0x165   : > { %v377_v38 = vpop.permute.xlu0 %376  ;;  %v410_v39 = vpop.permute.xlu1 %409 }
 0x166   : > { %v399_v40 = vadd.f32 %v1429_v27, %v377_v38 }
 0x168   : > { %v432_v46 = vadd.f32 %v410_v39, %v399_v40 }
 0x169   : > { %v408_v47 = vpop.permute.xlu0 %407  ;;  %v422_v48 = vpop.permute.xlu1 %421 }
 0x16a   : > { %v431_v49 = vadd.f32 %v408_v47, %v398_v41  ;;  %v668_v29 = vadd.f32 %v1461_v43, %v432_v46 }
 0x16c   : > { %v667_v42 = vadd.f32 %v1466_v45, %v431_v49 }
 0x16d   : > { %v420_v54 = vpop.permute.xlu0 %419  ;;  %v389_v55 = vpop.permute.xlu1 %388 }
 0x16e   : > { %v437_v56 = vadd.f32 %v420_v54, %v404_v30  ;;  %v405_v57 = vadd.f32 %v1431_v19, %v389_v55  ;;  %v400_v19 = vadd.f32 %v379_v36, %v1449_v35 }
 0x170   : > { %v1575_v59 = vadd.f32 %v1512_v6, %v437_v56  ;;  %v438_v62 = vadd.f32 %v422_v48, %v405_v57 }
 0x171   : > { %v383_v27 = vpop.permute.xlu0 %382  ;;  %v414_v63 = vpop.permute.xlu1 %413 }
 0x172   : > { %v402_v28 = vadd.f32 %v383_v27, %v1463_v44  ;;  %v1579_v0 = vadd.f32 %v1506_v3, %v438_v62 }
 0x174   : > { %v435_v1 = vadd.f32 %v416_v33, %v402_v28 }
 0x175   : > { %v684_v43 = vpop.permute.xlu0 %683  ;;  %v381_v7 = vpop.permute.xlu1 %380 }
 0x176   : > { %v671_v45 = vadd.f32 %v1496_v61, %v435_v1  ;;  %v401_v8 = vadd.f32 %v1445_v34, %v381_v7  ;;  %v707_v34 = vadd.f32 %v684_v43, %v667_v42 }
 0x178   : > { %v434_v9 = vadd.f32 %v414_v63, %v401_v8 }
 0x179   : > { %v412_v6 = vpop.permute.xlu0 %411  ;;  %v719_v13 = vpop.permute.xlu1 %718 }
 0x17a   : > { %v433_v11 = vadd.f32 %v412_v6, %v400_v19  ;;  %v670_v16 = vadd.f32 %v1474_v51, %v434_v9 }
 0x17c   : > { %v669_v44 = vadd.f32 %v1480_v53, %v433_v11 }
 0x17d   : > { %v688_v17 = vpop.permute.xlu0 %687  ;;  %v686_v3 = vpop.permute.xlu1 %685 }
 0x17e   : > { %v708_v18 = vadd.f32 %v686_v3, %v668_v29  ;;  %v709_v32 = vadd.f32 %v688_v17, %v669_v44 }
 0x180   : > { %v741_v20 = vadd.f32 %v719_v13, %v708_v18 }
 0x181   : > { %v937_v5 = vpop.permute.xlu0 %936  ;;  %v723_v10 = vpop.permute.xlu1 %722 }
 0x182   : > { %v921_v61 = vadd.f32 %v1470_v50, %v741_v20 }
 0x185   : > { %v717_v21 = vpop.permute.xlu0 %716  ;;  %v972_v22 = vpop.permute.xlu1 %971 }
 0x186   : > { %v740_v35 = vadd.f32 %v717_v21, %v707_v34 }
 0x188   : > { %v920_v23 = vadd.f32 %v1476_v52, %v740_v35 }
 0x189   : > { %v692_v24 = vpop.permute.xlu0 %691  ;;  %v690_v25 = vpop.permute.xlu1 %689 }
 0x18a   : > { %v710_v51 = vadd.f32 %v690_v25, %v670_v16  ;;  %v960_v40 = vadd.f32 %v937_v5, %v920_v23  ;;  %v711_v57 = vadd.f32 %v692_v24, %v671_v45 }
 0x18c   : > { %v743_v26 = vadd.f32 %v723_v10, %v710_v51 }
 0x18d   : > { %v941_v53 = vpop.permute.xlu0 %940  ;;  %v939_v15 = vpop.permute.xlu1 %938 }
 0x18e   : > { %v961_v30 = vadd.f32 %v939_v15, %v921_v61  ;;  %v923_v31 = vadd.f32 %v1486_v58, %v743_v26 }
 0x190   : > { %v994_v33 = vadd.f32 %v972_v22, %v961_v30 }
 0x191   : > { %v721_v36 = vpop.permute.xlu0 %720  ;;  %v727_v52 = vpop.permute.xlu1 %726 }
 0x192   : > { %v742_v50 = vadd.f32 %v721_v36, %v709_v32  ;;  %v1002_v38 = vpack.c.bf16 %v994_v33, %v994_v33 }
 0x194   : > { %v922_v39 = vadd.f32 %v1492_v60, %v742_v50  ;;  %1011 = vst.msk [vmem:[%s1593_s4 + $0x4] sm:$0xf] %vm1009_vm3, %v1002_v38 }
 0x195   : > { %v970_v58 = vpop.permute.xlu0 %969  ;;  %v976_v46 = vpop.permute.xlu1 %975 }
 0x196   : > { %v993_v41 = vadd.f32 %v970_v58, %v960_v40  ;;  %v962_v7 = vadd.f32 %v941_v53, %v922_v39 }
 0x198   : > { %v1001_v47 = vpack.c.bf16 %v993_v41, %v993_v41 }
 0x199   : > { %v696_v48 = vpop.permute.xlu0 %695  ;;  %v694_v49 = vpop.permute.xlu1 %693 }
 0x19a   : > { %1010 = vst.msk [vmem:[%s1593_s4] sm:$0xf] %vm1009_vm3, %v1001_v47  ;;  %v712_v29 = vadd.f32 %v694_v49, %v1567_v37  ;;  %v713_v45 = vadd.f32 %v696_v48, %v1575_v59 }
 0x19c   : > { %v745_v42 = vadd.f32 %v727_v52, %v712_v29 }
 0x19d   : > { %v945_v54 = vpop.permute.xlu0 %944  ;;  %v943_v55 = vpop.permute.xlu1 %942 }
 0x19e   : > { %v963_v56 = vadd.f32 %v943_v55, %v923_v31  ;;  %v925_v60 = vadd.f32 %v1502_v2, %v745_v42 }
 0x1a0   : > { %v996_v62 = vadd.f32 %v976_v46, %v963_v56 }
 0x1a1   : > { %v725_v27 = vpop.permute.xlu0 %724  ;;  %v731_v28 = vpop.permute.xlu1 %730 }
 0x1a2   : > { %v744_v63 = vadd.f32 %v725_v27, %v711_v57  ;;  %v1004_v1 = vpack.c.bf16 %v996_v62, %v996_v62 }
 0x1a4   : > { %v924_v43 = vadd.f32 %v1508_v4, %v744_v63  ;;  %1013 = vst.msk [vmem:[%s1593_s4 + $0xc] sm:$0xf] %vm1009_vm3, %v1004_v1 }
 0x1a5   : > { %v974_v8 = vpop.permute.xlu0 %973  ;;  %v980_v19 = vpop.permute.xlu1 %979 }
 0x1a6   : > { %v995_v37 = vadd.f32 %v974_v8, %v962_v7  ;;  %v964_v20 = vadd.f32 %v945_v54, %v924_v43 }
 0x1a8   : > { %v1003_v9 = vpack.c.bf16 %v995_v37, %v995_v37 }
 0x1a9   : > { %v949_v6 = vpop.permute.xlu0 %948  ;;  %v698_v11 = vpop.permute.xlu1 %697 }
 0x1aa   : > { %1012 = vst.msk [vmem:[%s1593_s4 + $0x8] sm:$0xf] %vm1009_vm3, %v1003_v9  ;;  %v714_v2 = vadd.f32 %v698_v11, %v1579_v0 }
 0x1ac   : > { %v747_v13 = vadd.f32 %v731_v28, %v714_v2 }
 0x1ad   : > { %v729_v16 = vpop.permute.xlu0 %728  ;;  %v947_v4 = vpop.permute.xlu1 %946 }
 0x1ae   : > { %v746_v44 = vadd.f32 %v729_v16, %v713_v45  ;;  %v965_v17 = vadd.f32 %v947_v4, %v925_v60  ;;  %v927_v3 = vadd.f32 %v1518_v12, %v747_v13 }
 0x1b0   : > { %v926_v18 = vadd.f32 %v1522_v14, %v746_v44  ;;  %v998_v5 = vadd.f32 %v980_v19, %v965_v17 }
 0x1b1   : > { %v978_v10 = vpop.permute.xlu0 %977  ;;  %v951_v0 = vpop.permute.xlu1 %950 }
 0x1b2   : > { %v997_v61 = vadd.f32 %v978_v10, %v964_v20  ;;  %v1006_v34 = vpack.c.bf16 %v998_v5, %v998_v5  ;;  %v966_v21 = vadd.f32 %v949_v6, %v926_v18  ;;  %v967_v35 = vadd.f32 %v951_v0, %v927_v3 }
 0x1b4   : > { %v1005_v59 = vpack.c.bf16 %v997_v61, %v997_v61  ;;  %1015 = vst.msk [vmem:[%s1593_s4 + $0x14] sm:$0xf] %vm1009_vm3, %v1006_v34 }
 0x1b5   : > { %v982_v22 = vpop.permute.xlu0 %981  ;;  %v984_v12 = vpop.permute.xlu1 %983 }
 0x1b6   : > { %1014 = vst.msk [vmem:[%s1593_s4 + $0x10] sm:$0xf] %vm1009_vm3, %v1005_v59  ;;  %v999_v23 = vadd.f32 %v982_v22, %v966_v21  ;;  %v1000_v24 = vadd.f32 %v984_v12, %v967_v35 }
 0x1b8   : > { %v1007_v14 = vpack.c.bf16 %v999_v23, %v999_v23  ;;  %v1008_v25 = vpack.c.bf16 %v1000_v24, %v1000_v24 }
 0x1ba   : > { %1016 = vst.msk [vmem:[%s1593_s4 + $0x18] sm:$0xf] %vm1009_vm3, %v1007_v14  ;;  %1017 = vst.msk [vmem:[%s1593_s4 + $0x1c] sm:$0xf] %vm1009_vm3, %v1008_v25 }
 0x1bb PF: > { %s12_s9 = sadd.s32 1, %s1285_s9  }
 0x1bc   : > { %p9_p4 = scmp.ge.s32.totalorder %s12_s9, 4  }
 0x1be   :  { %11 = sbr.rel (!%p9_p4) target bundleno = 1 (0x1), region = 60 }

// kernel: forward.42
= control target key start
LH: loop header
LB: loop body
LE: loop exit
PB: predicated region body
PF: predicated region fallthrough
CT: control target
= control target key end

     0   :  { %vm42_vm0 = vcmask 261120   ;;  %vm114_vm1 = vcmask 125952   ;;  %s192_s1 = inlined_call_operand.vmem [shape: bf16[32,16], index: 1, kind: input, shape index: {}]   ;;  %s193_s0 = inlined_call_operand.vmem [shape: bf16[32,32], index: 0, kind: input, shape index: {}]   ;;  %s194_s2 = inlined_call_operand.vmem [shape: bf16[32,16], index: 2, kind: output, shape index: {}]  }
   0x1   :  { %v149_v0 = vld [vmem:[%s192_s1] sm:$0xff]   ;;  %v150_v1 = vld [vmem:[%s192_s1 + $0x8] sm:$0xff]  }
   0x2   :  { %141 = vmatprep.subr.bf16.mxu0 %v149_v0  ;;  %v151_v2 = vld [vmem:[%s193_s0] sm:$0xff]   ;;  %v152_v3 = vld [vmem:[%s193_s0 + $0x8] sm:$0xff]  }
   0x3   :  { %142 = vmatpush3.bf16.msra.mxu0 %v149_v0  ;;  %145 = vmatprep.mubr.msk.bf16.mxu0 %vm42_vm0, %v151_v2 }
   0x4   :  { %143 = vmatprep.subr.bf16.mxu0 %v150_v1 }
   0x7   :  { %144 = vmatpush3.bf16.msra.mxu0 %v150_v1 }
   0xa   :  { %146 = vmatmul.mubr.msk.bf16.vlgmr.msra.gmra.mrb[0].mxu0 %vm42_vm0, %v152_v3 }
  0xdd   :  { %v147_v4 = vpop.f32.mrb[0].mxu0 }
  0xde   :  { %v135_v5 = vpack.c.bf16 %v147_v4, %v147_v4  ;;  %v83_v6 = vpop.f32.mrb[1].mxu0 }
  0xdf   :  { %v133_v7 = vpack.c.bf16 %v83_v6, %v83_v6  ;;  %v148_v8 = vpop.f32.mrb[2].mxu0 }
  0xe0   :  { %117 = vst.msk [vmem:[%s194_s2 + $0x8] sm:$0xf] %vm114_vm1, %v135_v5  ;;  %v136_v9 = vpack.c.bf16 %v148_v8, %v148_v8  ;;  %v86_v10 = vpop.f32.mrb[3].mxu0 }
  0xe1   :  { %115 = vst.msk [vmem:[%s194_s2] sm:$0xf] %vm114_vm1, %v133_v7  ;;  %v134_v11 = vpack.c.bf16 %v86_v10, %v86_v10 }
  0xe2   :  { %118 = vst.msk [vmem:[%s194_s2 + $0xc] sm:$0xf] %vm114_vm1, %v136_v9 }
  0xe3   :  { %116 = vst.msk [vmem:[%s194_s2 + $0x4] sm:$0xf] %vm114_vm1, %v134_v11 }

// kernel: forward.41
= control target key start
LH: loop header
LB: loop body
LE: loop exit
PB: predicated region body
PF: predicated region fallthrough
CT: control target
= control target key end

     0   :  { %8 = vsyncpa [#allocation3], 0  ;;  %s607_s0 = inlined_call_operand.vmem [shape: bf16[2,4,2,4,64], index: 0, kind: input, shape index: {}]   ;;  %s608_s1 = inlined_call_operand.hbm [shape: f32[1,1,1,64], index: 1, kind: input, shape index: {}]   ;;  %s609_s2 = inlined_call_operand.hbm [shape: f32[1,1,1,64], index: 2, kind: input, shape index: {}]   ;;  %s610_s3 = inlined_call_operand.vmem [shape: bf16[2,4,4,32], index: 3, kind: output, shape index: {}]  }
   0x1   :  { %9 = vsyncpa [#allocation5], 0  ;;  %s509_s12 = smov 0  }
   0x2 LB: > { %s515_s13 = sadd.s32 4294967295, %s484_s12   ;;  %p367_p0 = scmp.ge.s32.totalorder %s484_s12, 1  ;;  %s484_s12 = sphi %s509_s12, %s15_s12  }
   0x3   : > { %p114_p1 = scmp.lt.s32.totalorder %s484_s12, 3  ;;  %p611_p2 = scmp.eq.s32.totalorder %s515_s13, 0 }
   0x4   : > { %s486_s15 = smov [#allocation2]   ;;  %s487_s17 = smov [#allocation4]  }
   0x5   : > { %p520_p3 = pnand %p367_p0, %p114_p1  ;;  %s127_s16 = sshll.u32 %s486_s15, 4  ;;  %s128_s16 = int_to_ptr.vmem [resolvable:$true] %s127_s16 }
   0x6   : > { %s138_s18 = sshll.u32 %s487_s17, 4  ;;  %s414_s22 = scalar_lea.hbm %s608_s1, 16  ;;  %s532_s18 = int_to_ptr.vmem [resolvable:$true] %s138_s18 }
   0x7   : > { %s613_s14 = scalar_select %p520_p3, 1, 0 }
   0x8   : > { %p392_p4 = pneg %p520_p3  ;;  %p415_p6 = scmp.ne.s32.totalorder %s608_s1, %s414_s22 }
   0x9   : > { %p421_p10 = scmp.lt.u32.totalorder %s414_s22, %s608_s1 }
   0xa   : > { %p528_p5 = pnand %p611_p2, %p392_p4 }
   0xc   : > { %p416_p7 = pneg %p528_p5 }
   0xe   : > { %p417_p8 = pnand %p416_p7, %p415_p6 }
  0x10   : > { %p418_p9 = pneg %p417_p8 }
  0x12   : > { %p423_p11 = pnand %p421_p10, %p418_p9 }
  0x14   : > { %426 = shalt.err (!%p423_p11)
}
  0x15   : > { %s427_s27 = scalar_lea.vmem %s128_s16, 16  ;;  %s434_s28 = scalar_lea.vmem %s128_s16, 32 }
  0x16   : > { %p428_p12 = scmp.ne.s32.totalorder %s128_s16, %s427_s27  ;;  %p435_p1 = scmp.lt.s32.totalorder %s128_s16, %s128_s16 }
  0x17   : > { %p436_p4 = scmp.lt.s32.totalorder %s434_s28, %s427_s27 }
  0x18   : > { %p430_p13 = pnand %p428_p12, %p416_p7 }
  0x19   : > { %p437_p2 = por %p436_p4, %p435_p1 }
  0x1a   : > { %p431_p0 = pneg %p430_p13 }
  0x1c   : > { %p438_p3 = pnand %p437_p2, %p431_p0 }
  0x1e   : > { %441 = shalt.err (!%p438_p3)
}
  0x1f   : > { %395 = dma.hbm_to_vmem [thread:$0]  (!%p528_p5), %s608_s1, 16, %s128_s16, [#allocation3]  }
  0x20   : > { %s442_s6 = scalar_lea.hbm %s609_s2, 16 }
  0x21   : > { %p443_p6 = scmp.ne.s32.totalorder %s609_s2, %s442_s6  ;;  %p449_p3 = scmp.lt.u32.totalorder %s442_s6, %s609_s2 }
  0x23   : > { %p445_p8 = pnand %p443_p6, %p416_p7 }
  0x25   : > { %p446_p2 = pneg %p445_p8 }
  0x27   : > { %p451_p9 = pnand %p449_p3, %p446_p2 }
  0x29   : > { %454 = shalt.err (!%p451_p9)
}
  0x2a   : > { %s455_s11 = scalar_lea.vmem %s532_s18, 16  ;;  %s462_s15 = scalar_lea.vmem %s532_s18, 32 }
  0x2b   : > { %p456_p10 = scmp.ne.s32.totalorder %s532_s18, %s455_s11  ;;  %p463_p13 = scmp.lt.s32.totalorder %s532_s18, %s532_s18 }
  0x2c   : > { %p464_p0 = scmp.lt.s32.totalorder %s462_s15, %s455_s11 }
  0x2d   : > { %p458_p11 = pnand %p456_p10, %p416_p7 }
  0x2e   : > { %p465_p1 = por %p464_p0, %p463_p13 }
  0x2f   : > { %p459_p12 = pneg %p458_p11 }
  0x31   : > { %p466_p4 = pnand %p465_p1, %p459_p12 }
  0x33   : > { %469 = shalt.err (!%p466_p4)
}
  0x34   : > { %398 = dma.hbm_to_vmem [thread:$0]  (!%p528_p5), %s609_s2, 16, %s532_s18, [#allocation5]  }
  0x35   : > { %p615_p6 = scmp.ne.s32.totalorder %s613_s14, 0 }
  0x36   : > { %p616_p7 = scmp.eq.s32.totalorder (!%p615_p6), %s515_s13, 0 }
  0x37   : > { %159 = sbr.rel (%p615_p6) target bundleno = 209 (0xd1), region = 32 }
  0x3e   : > { %475 = dma.done.wait (%p616_p7), [#allocation3], 16   ;;  %p617_p8 = pmov %p616_p7 }
  0x3f   : > { %p618_p2 = pmov %p616_p7 }
  0x40   : > { %477 = vsyncadd (%p617_p8), [#allocation3], 4294967280 }
  0x41   : > { %479 = dma.done.wait (%p618_p2), [#allocation5], 16   ;;  %p619_p3 = pmov %p618_p2 }
  0x42   : > { %p187_p9 = scmp.lt.s32.totalorder %s515_s13, 1  ;;  %v378_v2 = vld [vmem:[#allocation2] ss:$0 sm:$0xff]  ;;  %v379_v5 = vld [vmem:[#allocation4] ss:$0 sm:$0xff]  ;;  %s488_s21 = smov 96  }
  0x43   : > { %481 = vsyncadd (%p619_p3), [#allocation5], 4294967280  ;;  %vm283_vm0 = vcmask 254976  }
  0x44   : > { %s621_s13 = smov (!%p187_p9, %s515_s13), 1 }
  0x45   : > { %s382_s14 = sshll.u32 %s621_s13, 4  ;;  %s383_s22 = sshll.u32 %s621_s13, 3 }
  0x46   : > { %s191_s20 = scalar_lea.vmem %s607_s0, %s382_s14  ;;  %s196_s25 = scalar_lea.vmem %s610_s3, %s383_s22 }
  0x47   : > { %v201_v0 = vld [vmem:[%s191_s20 + $0x8] sm:$0x3]  ;;  %v202_v1 = vld [vmem:[%s191_s20 + $0xa] sm:$0x3]  ;;  %v197_v6 = vld [vmem:[%s191_s20] sm:$0x3] }
  0x48   : > { %v209_v3 = vunpack.c.l.bf16 %v201_v0  ;;  %v210_v4 = vunpack.c.l.bf16 %v202_v1  ;;  %v198_v7 = vld [vmem:[%s191_s20 + $0x2] sm:$0x3]  ;;  %v205_v8 = vunpack.c.l.bf16 %v197_v6  ;;  %v203_v10 = vld [vmem:[%s191_s20 + $0xc] sm:$0x3]  ;;  %v204_v11 = vld [vmem:[%s191_s20 + $0xe] sm:$0x3] }
  0x49   : > { %v206_v9 = vunpack.c.l.bf16 %v198_v7  ;;  %v199_v12 = vld [vmem:[%s191_s20 + $0x4] sm:$0x3]  ;;  %v211_v15 = vunpack.c.l.bf16 %v203_v10  ;;  %v212_v16 = vunpack.c.l.bf16 %v204_v11  ;;  %v200_v17 = vld [vmem:[%s191_s20 + $0x6] sm:$0x3] }
  0x4a   : > { %v224_v13 = vmul.f32 %v378_v2, %v209_v3  ;;  %v225_v14 = vmul.f32 %v378_v2, %v210_v4  ;;  %v220_v18 = vmul.f32 %v378_v2, %v205_v8  ;;  %v207_v20 = vunpack.c.l.bf16 %v199_v12 }
  0x4b   : > { %v221_v19 = vmul.f32 %v378_v2, %v206_v9  ;;  %v208_v21 = vunpack.c.l.bf16 %v200_v17  ;;  %v226_v24 = vmul.f32 %v378_v2, %v211_v15  ;;  %v227_v25 = vmul.f32 %v378_v2, %v212_v16 }
  0x4c   : > { %v239_v22 = vadd.f32 %v379_v5, %v224_v13  ;;  %v240_v23 = vadd.f32 %v379_v5, %v225_v14  ;;  %v235_v26 = vadd.f32 %v379_v5, %v220_v18  ;;  %v222_v28 = vmul.f32 %v378_v2, %v207_v20 }
  0x4d   : > { %v236_v27 = vadd.f32 %v379_v5, %v221_v19  ;;  %v223_v29 = vmul.f32 %v378_v2, %v208_v21  ;;  %v241_v32 = vadd.f32 %v379_v5, %v226_v24  ;;  %v242_v33 = vadd.f32 %v379_v5, %v227_v25 }
  0x4e   : > { %v247_v30 = vmax.f32 %v239_v22, 0.0  ;;  %v248_v31 = vmax.f32 %v240_v23, 0.0  ;;  %v243_v34 = vmax.f32 %v235_v26, 0.0  ;;  %v237_v36 = vadd.f32 %v379_v5, %v222_v28 }
  0x4f   : > { %v244_v35 = vmax.f32 %v236_v27, 0.0  ;;  %v238_v37 = vadd.f32 %v379_v5, %v223_v29  ;;  %v249_v39 = vmax.f32 %v241_v32, 0.0  ;;  %v250_v40 = vmax.f32 %v242_v33, 0.0 }
  0x50   : > { %v253_v38 = vadd.f32 %v248_v31, %v247_v30  ;;  %v245_v42 = vmax.f32 %v237_v36, 0.0 }
  0x51   : > { %v251_v41 = vadd.f32 %v244_v35, %v243_v34  ;;  %v246_v43 = vmax.f32 %v238_v37, 0.0  ;;  %v254_v44 = vadd.f32 %v250_v40, %v249_v39 }
  0x52   : > { %263 = vrot.lane.b32.xlu1 %v253_v38, %s488_s21 }
  0x53   : > { %259 = vrot.lane.b32.xlu0 %v251_v41, %s488_s21  ;;  %v252_v45 = vadd.f32 %v246_v43, %v245_v42 }
  0x56   : > { %265 = vrot.lane.b32.xlu1 %v254_v44, %s488_s21 }
  0x57   : > { %261 = vrot.lane.b32.xlu0 %v252_v45, %s488_s21 }
  0xc4   : > { %v264_v46 = vpop.permute.xlu1 %263 }
  0xc5   : > { %v273_v47 = vadd.f32 %v264_v46, %v253_v38  ;;  %v260_v48 = vpop.permute.xlu0 %259 }
  0xc6   : > { %v271_v49 = vadd.f32 %v260_v48, %v251_v41 }
  0xc7   : > { %v277_v50 = vmul.f32 0.25, %v273_v47 }
  0xc8   : > { %v275_v51 = vmul.f32 0.25, %v271_v49  ;;  %v266_v52 = vpop.permute.xlu1 %265 }
  0xc9   : > { %v281_v53 = vpack.c.bf16 %v277_v50, %v277_v50  ;;  %v274_v54 = vadd.f32 %v266_v52, %v254_v44  ;;  %v262_v55 = vpop.permute.xlu0 %261 }
  0xca   : > { %v279_v56 = vpack.c.bf16 %v275_v51, %v275_v51  ;;  %v272_v57 = vadd.f32 %v262_v55, %v252_v45 }
  0xcb   : > { %286 = vst.msk [vmem:[%s196_s25 + $0x4] sm:$0x3] %vm283_vm0, %v281_v53  ;;  %v278_v58 = vmul.f32 0.25, %v274_v54 }
  0xcc   : > { %284 = vst.msk [vmem:[%s196_s25] sm:$0x3] %vm283_vm0, %v279_v56  ;;  %v276_v59 = vmul.f32 0.25, %v272_v57 }
  0xcd   : > { %v282_v60 = vpack.c.bf16 %v278_v58, %v278_v58 }
  0xce   : > { %v280_v61 = vpack.c.bf16 %v276_v59, %v276_v59 }
  0xcf   : > { %287 = vst.msk [vmem:[%s196_s25 + $0x6] sm:$0x3] %vm283_vm0, %v282_v60 }
  0xd0   : > { %285 = vst.msk [vmem:[%s196_s25 + $0x2] sm:$0x3] %vm283_vm0, %v280_v61 }
  0xd1 PF: > { %s15_s12 = sadd.s32 1, %s484_s12  }
  0xd2   : > { %p12_p5 = scmp.ge.s32.totalorder %s15_s12, 4  }
  0xd4   :  { %14 = sbr.rel (!%p12_p5) target bundleno = 2 (0x2), region = 71 }
  0xdb   :  { %309 = vsyncpa [#allocation3], 1 }
  0xdc   :  { %311 = vsyncpa [#allocation3 + $0x1], 1 }
  0xdd   :  { %312 = vsyncpa [#allocation5], 1 }

// kernel: forward.44
= control target key start
LH: loop header
LB: loop body
LE: loop exit
PB: predicated region body
PF: predicated region fallthrough
CT: control target
= control target key end

     0   :  { %s791_s9 = smov 0   ;;  %s935_s0 = inlined_call_operand.vmem [shape: bf16[2,7,8,32], index: 0, kind: input, shape index: {}]   ;;  %s936_s1 = inlined_call_operand.vmem [shape: bf16[3,32,24], index: 1, kind: input, shape index: {}]   ;;  %s937_s2 = inlined_call_operand.vmem [shape: bf16[2,4,4,8], index: 2, kind: output, shape index: {}]  }
   0x1 LB: > { %s636_s10 = sadd.s32 4294967295, %s770_s9   ;;  %p640_p0 = scmp.ge.s32.totalorder %s770_s9, 1  ;;  %s770_s9 = sphi %s791_s9, %s12_s9  }
   0x2   : > { %p112_p1 = scmp.lt.s32.totalorder %s770_s9, 3 }
   0x4   : > { %p113_p2 = pnand %p640_p0, %p112_p1 }
   0x5   : > { %v754_v0 = vld [vmem:[%s936_s1] sm:$0xff] (!%p113_p2)   ;;  %v772_v1 = vmov (!%p113_p2), 0.0   ;;  %v755_v2 = vld [vmem:[%s936_s1 + $0x8] sm:$0xff] (!%p113_p2)   ;;  %p134_p3 = scmp.lt.s32.totalorder (!%p113_p2), %s636_s10, 1  ;;  %vm773_vm0 = vmmov (!%p113_p2), 0   ;;  %vm183_vm1 = vcmask (!%p113_p2), 261120  }
   0x6   : > { %116 = sbr.rel (%p113_p2) target bundleno = 398 (0x18e), region = 28  ;;  %737 = vmatprep.subr.bf16.mxu1 (!%p113_p2), %v772_v1  ;;  %689 = vmatprep.subr.bf16.mxu0 (!%p113_p2), %v772_v1  ;;  %v757_v3 = vld [vmem:[%s936_s1 + $0x10] sm:$0xff] (!%p113_p2)   ;;  %v759_v4 = vld [vmem:[%s936_s1 + $0x20] sm:$0xff] (!%p113_p2)   ;;  %v762_v7 = vld [vmem:[%s936_s1 + $0x18] sm:$0xff] (!%p113_p2)   ;;  %vm445_vm2 = vcmask (!%p113_p2), 1046528   ;;  %s774_s27 = smov (!%p113_p2), 120  }
   0x7   : > { %739 = vmatpush3.bf16.msra.mxu1 (!%p113_p2), %v754_v0  ;;  %690 = vmatpush3.bf16.msra.mxu0 (!%p113_p2), %v754_v0  ;;  %v760_v9 = vld [vmem:[%s936_s1 + $0x28] sm:$0xff] (!%p113_p2)   ;;  %vm295_vm3 = vsmask.f32 (!%p113_p2), 7424  ;;  %s775_s28 = smov (!%p113_p2), 112   ;;  %vm576_vm4 = vcmask (!%p113_p2), 58368  }
   0x8   : > { %738 = vmatprep.subr.bf16.mxu1 (!%p113_p2), %v772_v1  ;;  %691 = vmatprep.subr.bf16.mxu0 (!%p113_p2), %v772_v1 }
   0x9   : > { %697 = vmatprep.mubr.msk.bf16.mxu1 (!%p113_p2), %vm773_vm0, %v772_v1  ;;  %693 = vmatprep.mubr.msk.bf16.mxu0 (!%p113_p2), %vm773_vm0, %v772_v1 }
   0xb   : > { %740 = vmatpush3.bf16.msra.mxu1 (!%p113_p2), %v755_v2  ;;  %692 = vmatpush3.bf16.msra.mxu0 (!%p113_p2), %v755_v2 }
   0xc   : > { %705 = vmatprep.subr.bf16.mxu1 (!%p113_p2), %v772_v1  ;;  %721 = vmatprep.subr.bf16.mxu0 (!%p113_p2), %v772_v1 }
   0xd   : > { %s939_s10 = smov (!%p134_p3, %s636_s10), 1 }
   0xe   : > { %s741_s15 = smul.u32 28, %s939_s10  ;;  %s673_s29 = sshll.u32 %s939_s10, 3 }
   0xf   : > { %s143_s4 = scalar_lea.vmem %s937_s2, %s673_s29 }
  0x10   : > { %s821_s18 = scalar_lea.vmem %s935_s0, %s741_s15 }
  0x11   : > { %v756_v5 = vld [vmem:[%s821_s18 + $0x8] sm:$0xff]   ;;  %v758_v6 = vld [vmem:[%s821_s18] sm:$0xff]   ;;  %v761_v12 = vld [vmem:[%s821_s18 + $0x10] sm:$0xff]  }
  0x12   : > { %698 = vmatmul.mubr.msk.bf16.vlgmr.msra.gmra.mrb[0].mxu1 %vm183_vm1, %v756_v5  ;;  %694 = vmatmul.mubr.msk.bf16.vlgmr.msra.gmra.mrb[0].mxu0 %vm183_vm1, %v758_v6  ;;  %v298_v8 = vshll.u32 %v758_v6, 16  ;;  %v446_v10 = vrot.slane %v758_v6, 1  ;;  %v447_v11 = vrot.slane %v756_v5, 1  ;;  %v296_v13 = vshrl.u32 %v758_v6, 16  ;;  %v763_v24 = vld [vmem:[%s821_s18 + $0x18] ss:$0 sps:$4 sm:$0xff]  }
  0x13   : > { %706 = vmatpush3.bf16.msra.mxu1 %v757_v3  ;;  %722 = vmatpush3.bf16.msra.mxu0 %v759_v4  ;;  %v302_v15 = vshll.u32 %v756_v5, 16  ;;  %v449_v19 = vrot.slane %v761_v12, 1  ;;  %v306_v21 = vshrl.u32 %v756_v5, 16  ;;  %v309_v22 = vshll.u32 %v761_v12, 16 }
  0x14   : > { %701 = vmatprep.mubr.msk.bf16.mxu1 %vm773_vm0, %v772_v1  ;;  %723 = vmatprep.subr.bf16.mxu0 %v772_v1  ;;  %v300_v14 = vrot.slane %v298_v8, 1  ;;  %v448_v16 = vsel %vm445_vm2, %v446_v10, %v447_v11  ;;  %v451_v27 = vrot.slane %v763_v24, 1  ;;  %v313_v29 = vshrl.u32 %v761_v12, 16 }
  0x15   : > { %707 = vmatprep.subr.bf16.mxu1 %v772_v1  ;;  %725 = vmatprep.mubr.msk.bf16.mxu0 %vm773_vm0, %v772_v1  ;;  %v304_v18 = vrot.slane %v302_v15, 1  ;;  %v450_v23 = vsel %vm445_vm2, %v447_v11, %v449_v19  ;;  %v311_v26 = vrot.slane %v309_v22, 1  ;;  %v317_v30 = vshll.u32 %v763_v24, 16 }
  0x16   : > { %v301_v17 = vor.u32 %v300_v14, %v296_v13  ;;  %v452_v31 = vsel %vm445_vm2, %v449_v19, %v451_v27 }
  0x17   : > { %708 = vmatpush3.bf16.msra.mxu1 %v762_v7  ;;  %724 = vmatpush3.bf16.msra.mxu0 %v760_v9  ;;  %v308_v25 = vor.u32 %v306_v21, %v304_v18  ;;  %v315_v32 = vor.u32 %v313_v29, %v311_v26  ;;  %v319_v33 = vrot.slane %v317_v30, 1 }
  0x18   : > { %v305_v20 = vsel %vm295_vm3, %v301_v17, %v304_v18 }
  0x19   : > { %v312_v28 = vsel %vm295_vm3, %v308_v25, %v311_v26  ;;  %v320_v34 = vsel %vm295_vm3, %v315_v32, %v319_v33 }
  0x1a   : > { %702 = vmatmul.mubr.msk.bf16.gmra.mrb[4].mxu1 %vm183_vm1, %v761_v12  ;;  %726 = vmatmul.mubr.msk.bf16.vlgmr.msra.gmra.mrb[4].mxu0 %vm183_vm1, %v448_v16 }
  0x1b   : > { %709 = vmatprep.mubr.msk.bf16.mxu1 %vm773_vm0, %v772_v1  ;;  %729 = vmatprep.mubr.msk.bf16.mxu0 %vm773_vm0, %v772_v1 }
  0x22   : > { %710 = vmatmul.mubr.msk.bf16.vlgmr.msra.gmra.mrb[8].mxu1 %vm183_vm1, %v305_v20  ;;  %730 = vmatmul.mubr.msk.bf16.gmra.mrb[8].mxu0 %vm183_vm1, %v450_v23 }
  0x23   : > { %713 = vmatprep.mubr.msk.bf16.mxu1 %vm773_vm0, %v772_v1  ;;  %733 = vmatprep.mubr.msk.bf16.mxu0 %vm773_vm0, %v772_v1 }
  0x2a   : > { %714 = vmatmul.mubr.msk.bf16.gmra.mrb[12].mxu1 %vm183_vm1, %v312_v28  ;;  %734 = vmatmul.mubr.msk.bf16.gmra.mrb[12].mxu0 %vm183_vm1, %v452_v31 }
  0x2b   : > { %717 = vmatprep.mubr.msk.bf16.mxu1 %vm773_vm0, %v772_v1 }
  0x32   : > { %718 = vmatmul.mubr.msk.bf16.gmra.mrb[16].mxu1 %vm183_vm1, %v320_v34 }
  0xe5   : > { %v870_v35 = vpop.f32.mrb[0].mxu1  ;;  %v874_v37 = vpop.f32.mrb[0].mxu0 }
  0xe6   : > { %256 = vrot.lane.b32.xlu0 %v870_v35, %s774_s27  ;;  %v699_v36 = vpop.f32.mrb[1].mxu1  ;;  %v695_v39 = vpop.f32.mrb[1].mxu0 }
  0xe7   : > { %v876_v38 = vpop.f32.mrb[2].mxu1  ;;  %v230_v41 = vpop.f32.mrb[2].mxu0 }
  0xe8   : > { %258 = vrot.lane.b32.xlu1 %v876_v38, %s774_s27  ;;  %v700_v40 = vpop.f32.mrb[3].mxu1  ;;  %v696_v42 = vpop.f32.mrb[3].mxu0 }
  0xea   : > { %271 = vrot.lane.b32.xlu0 %v870_v35, %s775_s28 }
  0xec   : > { %273 = vrot.lane.b32.xlu1 %v876_v38, %s775_s28 }
  0xed   : > { %v243_v43 = vpop.f32.mrb[4].mxu1  ;;  %v885_v45 = vpop.f32.mrb[4].mxu0 }
  0xee   : > { %v703_v44 = vpop.f32.mrb[5].mxu1  ;;  %254 = vrot.lane.b32.xlu0 %v230_v41, %s774_s27  ;;  %v727_v47 = vpop.f32.mrb[5].mxu0 }
  0xef   : > { %v246_v46 = vpop.f32.mrb[6].mxu1  ;;  %v888_v49 = vpop.f32.mrb[6].mxu0 }
  0xf0   : > { %260 = vrot.lane.b32.xlu1 %v243_v43, %s774_s27  ;;  %v704_v48 = vpop.f32.mrb[7].mxu1  ;;  %v728_v50 = vpop.f32.mrb[7].mxu0 }
  0xf2   : > { %275 = vrot.lane.b32.xlu0 %v243_v43, %s775_s28 }
  0xf4   : > { %277 = vrot.lane.b32.xlu1 %v246_v46, %s775_s28 }
  0xf5   : > { %v376_v51 = vpop.f32.mrb[8].mxu1  ;;  %v894_v53 = vpop.f32.mrb[8].mxu0 }
  0xf6   : > { %v711_v52 = vpop.f32.mrb[9].mxu1  ;;  %539 = vrot.lane.b32.xlu0 %v888_v49, %s774_s27  ;;  %v731_v55 = vpop.f32.mrb[9].mxu0 }
  0xf7   : > { %v379_v54 = vpop.f32.mrb[10].mxu1  ;;  %v896_v57 = vpop.f32.mrb[10].mxu0 }
  0xf8   : > { %v712_v56 = vpop.f32.mrb[11].mxu1  ;;  %541 = vrot.lane.b32.xlu1 %v894_v53, %s774_s27  ;;  %v732_v58 = vpop.f32.mrb[11].mxu0 }
  0xfa   : > { %407 = vrot.lane.b32.xlu0 %v379_v54, %s774_s27 }
  0xfd   : > { %v384_v59 = vpop.f32.mrb[12].mxu1  ;;  %v524_v61 = vpop.f32.mrb[12].mxu0 }
  0xfe   : > { %v715_v60 = vpop.f32.mrb[13].mxu1  ;;  %409 = vrot.lane.b32.xlu1 %v384_v59, %s774_s27  ;;  %543 = vrot.lane.b32.xlu0 %v896_v57, %s774_s27  ;;  %v735_v63 = vpop.f32.mrb[13].mxu0 }
  0xff   : > { %v387_v62 = vpop.f32.mrb[14].mxu1  ;;  %v527_v1 = vpop.f32.mrb[14].mxu0 }
 0x100   : > { %v716_v0 = vpop.f32.mrb[15].mxu1  ;;  %v736_v2 = vpop.f32.mrb[15].mxu0 }
 0x102   : > { %424 = vrot.lane.b32.xlu0 %v384_v59, %s775_s28  ;;  %545 = vrot.lane.b32.xlu1 %v524_v61, %s774_s27 }
 0x105   : > { %v392_v3 = vpop.f32.mrb[16].mxu1 }
 0x106   : > { %411 = vrot.lane.b32.xlu0 %v387_v62, %s774_s27  ;;  %426 = vrot.lane.b32.xlu1 %v387_v62, %s775_s28  ;;  %v719_v4 = vpop.f32.mrb[17].mxu1 }
 0x107   : > { %v395_v5 = vpop.f32.mrb[18].mxu1 }
 0x108   : > { %v720_v6 = vpop.f32.mrb[19].mxu1 }
 0x10a   : > { %428 = vrot.lane.b32.xlu0 %v392_v3, %s775_s28  ;;  %413 = vrot.lane.b32.xlu1 %v392_v3, %s774_s27 }
 0x10e   : > { %556 = vrot.lane.b32.xlu0 %v894_v53, %s775_s28  ;;  %430 = vrot.lane.b32.xlu1 %v395_v5, %s775_s28 }
 0x112   : > { %560 = vrot.lane.b32.xlu0 %v524_v61, %s775_s28  ;;  %558 = vrot.lane.b32.xlu1 %v896_v57, %s775_s28 }
 0x116   : > { %562 = vrot.lane.b32.xlu1 %v527_v1, %s775_s28 }
 0x158   : > { %v257_v7 = vpop.permute.xlu0 %256 }
 0x159   : > { %v267_v10 = vadd.f32 %v257_v7, %v230_v41 }
 0x15a   : > { %v259_v8 = vpop.permute.xlu1 %258 }
 0x15b   : > { %v268_v17 = vadd.f32 %v259_v8, %v870_v35 }
 0x15c   : > { %v272_v9 = vpop.permute.xlu0 %271 }
 0x15e   : > { %v274_v11 = vpop.permute.xlu1 %273 }
 0x15f   : > { %v284_v12 = vadd.f32 %v274_v11, %v267_v10 }
 0x160   : > { %v255_v13 = vpop.permute.xlu0 %254 }
 0x161   : > { %v266_v14 = vadd.f32 %v255_v13, %v874_v37  ;;  %v400_v15 = vadd.f32 %v379_v54, %v284_v12 }
 0x162   : > { %v261_v16 = vpop.permute.xlu1 %260 }
 0x163   : > { %v283_v18 = vadd.f32 %v272_v9, %v266_v14  ;;  %v269_v20 = vadd.f32 %v261_v16, %v876_v38 }
 0x164   : > { %v276_v19 = vpop.permute.xlu0 %275 }
 0x165   : > { %v285_v21 = vadd.f32 %v276_v19, %v268_v17  ;;  %v399_v22 = vadd.f32 %v376_v51, %v283_v18 }
 0x166   : > { %v278_v23 = vpop.permute.xlu1 %277 }
 0x167   : > { %v286_v24 = vadd.f32 %v278_v23, %v269_v20  ;;  %v401_v25 = vadd.f32 %v384_v59, %v285_v21 }
 0x168   : > { %v540_v26 = vpop.permute.xlu0 %539 }
 0x169   : > { %v402_v27 = vadd.f32 %v387_v62, %v286_v24 }
 0x16a   : > { %v542_v28 = vpop.permute.xlu1 %541 }
 0x16c   : > { %v408_v29 = vpop.permute.xlu0 %407 }
 0x16d   : > { %v419_v32 = vadd.f32 %v408_v29, %v399_v22 }
 0x170   : > { %v410_v30 = vpop.permute.xlu1 %409  ;;  %v544_v31 = vpop.permute.xlu0 %543 }
 0x171   : > { %v420_v36 = vadd.f32 %v410_v30, %v400_v15 }
 0x174   : > { %v425_v33 = vpop.permute.xlu0 %424  ;;  %v546_v34 = vpop.permute.xlu1 %545 }
 0x175   : > { %v436_v35 = vadd.f32 %v425_v33, %v419_v32 }
 0x177   : > { %v531_v37 = vadd.f32 %v885_v45, %v436_v35 }
 0x178   : > { %v412_v38 = vpop.permute.xlu0 %411  ;;  %v427_v39 = vpop.permute.xlu1 %426 }
 0x179   : > { %v437_v40 = vadd.f32 %v427_v39, %v420_v36  ;;  %v421_v41 = vadd.f32 %v412_v38, %v401_v25  ;;  %v551_v50 = vadd.f32 %v540_v26, %v531_v37 }
 0x17b   : > { %v532_v42 = vadd.f32 %v888_v49, %v437_v40 }
 0x17c   : > { %v429_v43 = vpop.permute.xlu0 %428  ;;  %v414_v44 = vpop.permute.xlu1 %413 }
 0x17d   : > { %v438_v46 = vadd.f32 %v429_v43, %v421_v41  ;;  %v422_v48 = vadd.f32 %v414_v44, %v402_v27  ;;  %v552_v58 = vadd.f32 %v542_v28, %v532_v42 }
 0x17f   : > { %v533_v47 = vadd.f32 %v894_v53, %v438_v46 }
 0x180   : > { %v557_v51 = vpop.permute.xlu0 %556  ;;  %v431_v52 = vpop.permute.xlu1 %430 }
 0x181   : > { %v568_v54 = vadd.f32 %v557_v51, %v551_v50  ;;  %v439_v55 = vadd.f32 %v431_v52, %v422_v48  ;;  %v553_v56 = vadd.f32 %v544_v31, %v533_v47 }
 0x183   : > { %v572_v45 = vpack.c.bf16 %v568_v54, %v568_v54  ;;  %v534_v49 = vadd.f32 %v896_v57, %v439_v55 }
 0x184   : > { %v561_v59 = vpop.permute.xlu0 %560  ;;  %v559_v60 = vpop.permute.xlu1 %558 }
 0x185   : > { %577 = vst.msk [vmem:[%s143_s4] sm:$0x3] %vm576_vm4, %v572_v45  ;;  %v570_v53 = vadd.f32 %v561_v59, %v553_v56  ;;  %v569_v61 = vadd.f32 %v559_v60, %v552_v58  ;;  %v554_v0 = vadd.f32 %v546_v34, %v534_v49 }
 0x187   : > { %v574_v62 = vpack.c.bf16 %v570_v53, %v570_v53  ;;  %v573_v63 = vpack.c.bf16 %v569_v61, %v569_v61 }
 0x188   : > { %v563_v1 = vpop.permute.xlu1 %562 }
 0x189   : > { %579 = vst.msk [vmem:[%s143_s4 + $0x4] sm:$0x3] %vm576_vm4, %v574_v62  ;;  %578 = vst.msk [vmem:[%s143_s4 + $0x2] sm:$0x3] %vm576_vm4, %v573_v63  ;;  %v571_v2 = vadd.f32 %v563_v1, %v554_v0 }
 0x18b   : > { %v575_v3 = vpack.c.bf16 %v571_v2, %v571_v2 }
 0x18d   : > { %580 = vst.msk [vmem:[%s143_s4 + $0x6] sm:$0x3] %vm576_vm4, %v575_v3 }
 0x18e PF: > { %s12_s9 = sadd.s32 1, %s770_s9  }
 0x18f   : > { %p9_p4 = scmp.ge.s32.totalorder %s12_s9, 4  }
 0x191   :  { %11 = sbr.rel (!%p9_p4) target bundleno = 1 (0x1), region = 60 }

// kernel: forward.43
= control target key start
LH: loop header
LB: loop body
LE: loop exit
PB: predicated region body
PF: predicated region fallthrough
CT: control target
= control target key end

     0   :  { %vm84_vm0 = vcmask 392192   ;;  %vm182_vm1 = vcmask 257024   ;;  %s309_s3 = inlined_call_operand.vmem [shape: bf16[48,32], index: 3, kind: input, shape index: {}]   ;;  %s310_s0 = inlined_call_operand.vmem [shape: bf16[32,48], index: 0, kind: input, shape index: {}]   ;;  %s311_s1 = inlined_call_operand.vmem [shape: f32[1,48], index: 1, kind: input, shape index: {}]   ;;  %s312_s2 = inlined_call_operand.vmem [shape: f32[1,48], index: 2, kind: input, shape index: {}]   ;;  %s313_s4 = inlined_call_operand.vmem [shape: f32[1,32], index: 4, kind: input, shape index: {}]   ;;  %s314_s5 = inlined_call_operand.vmem [shape: f32[1,32], index: 5, kind: input, shape index: {}]   ;;  %s315_s6 = inlined_call_operand.vmem [shape: bf16[32,32], index: 6, kind: output, shape index: {}]  }
   0x1   :  { %v232_v0 = vld [vmem:[%s309_s3] sm:$0xff]   ;;  %v233_v1 = vld [vmem:[%s309_s3 + $0x8] sm:$0xff]   ;;  %v234_v5 = vld [vmem:[%s309_s3 + $0x10] sm:$0xff]  }
   0x2   :  { %222 = vmatprep.subr.bf16.mxu0 %v232_v0  ;;  %v209_v2 = vld [vmem:[%s310_s0] sm:$0xff]   ;;  %v216_v3 = vld [vmem:[%s310_s0 + $0x8] sm:$0xff]  }
   0x3   :  { %223 = vmatpush3.bf16.msra.mxu0 %v232_v0  ;;  %v191_v4 = vld [vmem:[%s311_s1] ss:$0 sm:$0xff]  ;;  %v210_v6 = vunpack.c.l.bf16 %v209_v2  ;;  %v211_v7 = vunpack.c.h.bf16 %v209_v2  ;;  %v214_v8 = vunpack.c.l.bf16 %v216_v3  ;;  %v215_v9 = vunpack.c.h.bf16 %v216_v3 }
   0x4   :  { %224 = vmatprep.subr.bf16.mxu0 %v233_v1  ;;  %v192_v10 = vld [vmem:[%s312_s2] ss:$0 sm:$0xff] }
   0x5   :  { %v39_v11 = vmul.f32 %v210_v6, %v191_v4  ;;  %v40_v12 = vmul.f32 %v211_v7, %v191_v4  ;;  %v41_v13 = vmul.f32 %v214_v8, %v191_v4  ;;  %v42_v14 = vmul.f32 %v215_v9, %v191_v4  ;;  %v198_v25 = vld [vmem:[%s313_s4] ss:$0 sm:$0xff] }
   0x6   :  { %v199_v27 = vld [vmem:[%s314_s5] ss:$0 sm:$0xff] }
   0x7   :  { %225 = vmatpush3.bf16.msra.mxu0 %v233_v1  ;;  %v50_v15 = vadd.f32 %v192_v10, %v39_v11  ;;  %v51_v16 = vadd.f32 %v192_v10, %v40_v12  ;;  %v52_v17 = vadd.f32 %v192_v10, %v41_v13  ;;  %v53_v18 = vadd.f32 %v192_v10, %v42_v14 }
   0x8   :  { %226 = vmatprep.subr.bf16.mxu0 %v234_v5 }
   0x9   :  { %v54_v19 = vmax.f32 %v50_v15, 0.0  ;;  %v55_v20 = vmax.f32 %v51_v16, 0.0  ;;  %v56_v21 = vmax.f32 %v52_v17, 0.0  ;;  %v57_v22 = vmax.f32 %v53_v18, 0.0 }
   0xb   :  { %227 = vmatpush3.bf16.msra.mxu0 %v234_v5  ;;  %v58_v23 = vpack.c.bf16 %v55_v20, %v54_v19  ;;  %v59_v24 = vpack.c.bf16 %v57_v22, %v56_v21 }
   0xd   :  { %228 = vmatprep.mubr.msk.bf16.mxu0 %vm84_vm0, %v58_v23 }
   0xe   :  { %229 = vmatmul.mubr.msk.bf16.vlgmr.msra.gmra.mrb[0].mxu0 %vm84_vm0, %v59_v24 }
  0xe1   :  { %v230_v26 = vpop.f32.mrb[0].mxu0 }
  0xe2   :  { %v149_v28 = vmul.f32 %v230_v26, %v198_v25  ;;  %v125_v29 = vpop.f32.mrb[1].mxu0 }
  0xe3   :  { %v147_v30 = vmul.f32 %v198_v25, %v125_v29  ;;  %v231_v31 = vpop.f32.mrb[2].mxu0 }
  0xe4   :  { %v160_v32 = vadd.f32 %v199_v27, %v149_v28  ;;  %v150_v33 = vmul.f32 %v231_v31, %v198_v25  ;;  %v128_v34 = vpop.f32.mrb[3].mxu0 }
  0xe5   :  { %v158_v35 = vadd.f32 %v199_v27, %v147_v30  ;;  %v148_v36 = vmul.f32 %v198_v25, %v128_v34 }
  0xe6   :  { %v164_v37 = vmax.f32 %v160_v32, 0.0  ;;  %v161_v38 = vadd.f32 %v199_v27, %v150_v33 }
  0xe7   :  { %v162_v39 = vmax.f32 %v158_v35, 0.0  ;;  %v159_v40 = vadd.f32 %v199_v27, %v148_v36 }
  0xe8   :  { %v206_v41 = vpack.c.bf16 %v164_v37, %v164_v37  ;;  %v165_v42 = vmax.f32 %v161_v38, 0.0 }
  0xe9   :  { %v204_v43 = vpack.c.bf16 %v162_v39, %v162_v39  ;;  %v163_v44 = vmax.f32 %v159_v40, 0.0 }
  0xea   :  { %185 = vst.msk [vmem:[%s315_s6 + $0x8] sm:$0xf] %vm182_vm1, %v206_v41  ;;  %v207_v45 = vpack.c.bf16 %v165_v42, %v165_v42 }
  0xeb   :  { %183 = vst.msk [vmem:[%s315_s6] sm:$0xf] %vm182_vm1, %v204_v43  ;;  %v205_v46 = vpack.c.bf16 %v163_v44, %v163_v44 }
  0xec   :  { %186 = vst.msk [vmem:[%s315_s6 + $0xc] sm:$0xf] %vm182_vm1, %v207_v45 }
  0xed   :  { %184 = vst.msk [vmem:[%s315_s6 + $0x4] sm:$0xf] %vm182_vm1, %v205_v46 }

// kernel: forward.45
= control target key start
LH: loop header
LB: loop body
LE: loop exit
PB: predicated region body
PF: predicated region fallthrough
CT: control target
= control target key end

     0   :  { %11 = vsyncpa [#allocation3], 0  ;;  %s273_s21 = smov [#allocation2]   ;;  %s357_s0 = inlined_call_operand.vmem [shape: bf16[32,48], index: 0, kind: input, shape index: {}]   ;;  %s358_s1 = inlined_call_operand.vmem [shape: f32[1,48], index: 1, kind: input, shape index: {}]   ;;  %s359_s2 = inlined_call_operand.vmem [shape: f32[1,48], index: 2, kind: input, shape index: {}]   ;;  %s360_s3 = inlined_call_operand.vmem [shape: bf16[48,32], index: 3, kind: input, shape index: {}]   ;;  %s361_s4 = inlined_call_operand.vmem [shape: f32[1,32], index: 4, kind: input, shape index: {}]   ;;  %s362_s5 = inlined_call_operand.hbm [shape: f32[1,32], index: 5, kind: input, shape index: {}]   ;;  %s363_s6 = inlined_call_operand.vmem [shape: bf16[32,32], index: 6, kind: output, shape index: {}]  }
   0x1   :  { %s28_s22 = sshll.u32 %s273_s21, 4  ;;  %s249_s25 = scalar_lea.hbm %s362_s5, 16  ;;  %s29_s22 = int_to_ptr.vmem [resolvable:$true] %s28_s22 }
   0x2   :  { %p250_p0 = scmp.ne.s32.totalorder %s362_s5, %s249_s25  ;;  %p253_p1 = scmp.lt.u32.totalorder %s249_s25, %s362_s5 }
   0x4   :  { %p255_p2 = pnand %p253_p1, %p250_p0 }
   0x6   :  { %258 = shalt.err (!%p255_p2)
}
   0x7   :  { %s259_s30 = scalar_lea.vmem %s29_s22, 16  ;;  %s263_s7 = scalar_lea.vmem %s29_s22, 32 }
   0x8   :  { %p260_p3 = scmp.ne.s32.totalorder %s29_s22, %s259_s30  ;;  %p264_p4 = scmp.lt.s32.totalorder %s29_s22, %s29_s22 }
   0x9   :  { %p265_p5 = scmp.lt.s32.totalorder %s263_s7, %s259_s30 }
   0xb   :  { %p266_p6 = por %p265_p5, %p264_p4 }
   0xd   :  { %p267_p7 = pnand %p266_p6, %p260_p3 }
   0xf   :  { %270 = shalt.err (!%p267_p7)
}
  0x10   :  { %31 = dma.hbm_to_vmem [thread:$0]  %s362_s5, 16, %s29_s22, [#allocation3]  }
  0x11   :  { %271 = dma.done.wait [#allocation3], 16  }
  0x12   :  { %272 = vsyncadd [#allocation3], 4294967280  ;;  %v246_v0 = vld [vmem:[%s360_s3] sm:$0xff]   ;;  %v247_v1 = vld [vmem:[%s360_s3 + $0x8] sm:$0xff]   ;;  %vm96_vm0 = vcmask 392192   ;;  %vm194_vm1 = vcmask 257024  }
  0x13   :  { %235 = vmatprep.subr.bf16.mxu0 %v246_v0  ;;  %v222_v2 = vld [vmem:[%s357_s0] sm:$0xff]   ;;  %v248_v4 = vld [vmem:[%s360_s3 + $0x10] sm:$0xff]   ;;  %v229_v7 = vld [vmem:[%s357_s0 + $0x8] sm:$0xff]  }
  0x14   :  { %236 = vmatpush3.bf16.msra.mxu0 %v246_v0  ;;  %v204_v3 = vld [vmem:[%s358_s1] ss:$0 sm:$0xff]  ;;  %v223_v5 = vunpack.c.l.bf16 %v222_v2  ;;  %v224_v6 = vunpack.c.h.bf16 %v222_v2  ;;  %v227_v9 = vunpack.c.l.bf16 %v229_v7  ;;  %v228_v10 = vunpack.c.h.bf16 %v229_v7 }
  0x15   :  { %237 = vmatprep.subr.bf16.mxu0 %v247_v1  ;;  %v205_v8 = vld [vmem:[%s359_s2] ss:$0 sm:$0xff] }
  0x16   :  { %v51_v11 = vmul.f32 %v223_v5, %v204_v3  ;;  %v52_v12 = vmul.f32 %v224_v6, %v204_v3  ;;  %v53_v13 = vmul.f32 %v227_v9, %v204_v3  ;;  %v54_v14 = vmul.f32 %v228_v10, %v204_v3  ;;  %v211_v25 = vld [vmem:[%s361_s4] ss:$0 sm:$0xff] }
  0x17   :  { %v212_v27 = vld [vmem:[#allocation2] ss:$0 sm:$0xff] }
  0x18   :  { %238 = vmatpush3.bf16.msra.mxu0 %v247_v1  ;;  %v62_v15 = vadd.f32 %v205_v8, %v51_v11  ;;  %v63_v16 = vadd.f32 %v205_v8, %v52_v12  ;;  %v64_v17 = vadd.f32 %v205_v8, %v53_v13  ;;  %v65_v18 = vadd.f32 %v205_v8, %v54_v14 }
  0x19   :  { %239 = vmatprep.subr.bf16.mxu0 %v248_v4 }
  0x1a   :  { %v66_v19 = vmax.f32 %v62_v15, 0.0  ;;  %v67_v20 = vmax.f32 %v63_v16, 0.0  ;;  %v68_v21 = vmax.f32 %v64_v17, 0.0  ;;  %v69_v22 = vmax.f32 %v65_v18, 0.0 }
  0x1c   :  { %240 = vmatpush3.bf16.msra.mxu0 %v248_v4  ;;  %v70_v23 = vpack.c.bf16 %v67_v20, %v66_v19  ;;  %v71_v24 = vpack.c.bf16 %v69_v22, %v68_v21 }
  0x1e   :  { %241 = vmatprep.mubr.msk.bf16.mxu0 %vm96_vm0, %v70_v23 }
  0x1f   :  { %242 = vmatmul.mubr.msk.bf16.vlgmr.msra.gmra.mrb[0].mxu0 %vm96_vm0, %v71_v24 }
  0xf2   :  { %v243_v26 = vpop.f32.mrb[0].mxu0 }
  0xf3   :  { %v161_v28 = vmul.f32 %v243_v26, %v211_v25  ;;  %v137_v29 = vpop.f32.mrb[1].mxu0 }
  0xf4   :  { %v159_v30 = vmul.f32 %v211_v25, %v137_v29  ;;  %v244_v31 = vpop.f32.mrb[2].mxu0 }
  0xf5   :  { %v172_v32 = vadd.f32 %v212_v27, %v161_v28  ;;  %v162_v33 = vmul.f32 %v244_v31, %v211_v25  ;;  %v140_v34 = vpop.f32.mrb[3].mxu0 }
  0xf6   :  { %v170_v35 = vadd.f32 %v212_v27, %v159_v30  ;;  %v160_v36 = vmul.f32 %v211_v25, %v140_v34 }
  0xf7   :  { %v176_v37 = vmax.f32 %v172_v32, 0.0  ;;  %v173_v38 = vadd.f32 %v212_v27, %v162_v33 }
  0xf8   :  { %v174_v39 = vmax.f32 %v170_v35, 0.0  ;;  %v171_v40 = vadd.f32 %v212_v27, %v160_v36 }
  0xf9   :  { %v219_v41 = vpack.c.bf16 %v176_v37, %v176_v37  ;;  %v177_v42 = vmax.f32 %v173_v38, 0.0 }
  0xfa   :  { %v217_v43 = vpack.c.bf16 %v174_v39, %v174_v39  ;;  %v175_v44 = vmax.f32 %v171_v40, 0.0 }
  0xfb   :  { %197 = vst.msk [vmem:[%s363_s6 + $0x8] sm:$0xf] %vm194_vm1, %v219_v41  ;;  %v220_v45 = vpack.c.bf16 %v177_v42, %v177_v42 }
  0xfc   :  { %195 = vst.msk [vmem:[%s363_s6] sm:$0xf] %vm194_vm1, %v217_v43  ;;  %v218_v46 = vpack.c.bf16 %v175_v44, %v175_v44 }
  0xfd   :  { %198 = vst.msk [vmem:[%s363_s6 + $0xc] sm:$0xf] %vm194_vm1, %v220_v45 }
  0xfe   :  { %196 = vst.msk [vmem:[%s363_s6 + $0x4] sm:$0xf] %vm194_vm1, %v218_v46 }
  0xff   :  { %203 = vsyncpa [#allocation3], 1 }

// kernel: forward.47
= control target key start
LH: loop header
LB: loop body
LE: loop exit
PB: predicated region body
PF: predicated region fallthrough
CT: control target
= control target key end

     0   :  { %11 = vsyncpa [#allocation3], 0  ;;  %s497_s0 = inlined_call_operand.vmem [shape: bf16[32,48], index: 0, kind: input, shape index: {}]   ;;  %s498_s1 = inlined_call_operand.hbm [shape: f32[1,48], index: 1, kind: input, shape index: {}]   ;;  %s499_s2 = inlined_call_operand.hbm [shape: f32[1,48], index: 2, kind: input, shape index: {}]   ;;  %s500_s3 = inlined_call_operand.vmem [shape: bf16[48,32], index: 3, kind: input, shape index: {}]   ;;  %s501_s4 = inlined_call_operand.hbm [shape: f32[1,32], index: 4, kind: input, shape index: {}]   ;;  %s502_s5 = inlined_call_operand.hbm [shape: f32[1,32], index: 5, kind: input, shape index: {}]   ;;  %s503_s6 = inlined_call_operand.vmem [shape: bf16[32,32], index: 6, kind: output, shape index: {}]  }
   0x1   :  { %12 = vsyncpa [#allocation5], 0 }
   0x2   :  { %13 = vsyncpa [#allocation8], 0  ;;  %s383_s21 = smov [#allocation4]   ;;  %s384_s23 = smov [#allocation2]  }
   0x3   :  { %s32_s22 = sshll.u32 %s383_s21, 4  ;;  %s22_s24 = sshll.u32 %s384_s23, 4  ;;  %s33_s22 = int_to_ptr.vmem [resolvable:$true] %s32_s22  ;;  %s23_s24 = int_to_ptr.vmem [resolvable:$true] %s22_s24 }
   0x4   :  { %s289_s27 = scalar_lea.hbm %s499_s2, 16 }
   0x5   :  { %p290_p0 = scmp.ne.s32.totalorder %s499_s2, %s289_s27  ;;  %p293_p1 = scmp.lt.u32.totalorder %s289_s27, %s499_s2 }
   0x7   :  { %p295_p2 = pnand %p293_p1, %p290_p0 }
   0x9   :  { %298 = shalt.err (!%p295_p2)
}
   0xa   :  { %s299_s8 = scalar_lea.vmem %s33_s22, 16  ;;  %s303_s9 = scalar_lea.vmem %s33_s22, 32 }
   0xb   :  { %p300_p3 = scmp.ne.s32.totalorder %s33_s22, %s299_s8  ;;  %p304_p4 = scmp.lt.s32.totalorder %s33_s22, %s33_s22 }
   0xc   :  { %p305_p5 = scmp.lt.s32.totalorder %s303_s9, %s299_s8 }
   0xe   :  { %p306_p6 = por %p305_p5, %p304_p4 }
  0x10   :  { %p307_p7 = pnand %p306_p6, %p300_p3 }
  0x12   :  { %310 = shalt.err (!%p307_p7)
}
  0x13   :  { %35 = dma.hbm_to_vmem [thread:$0]  %s499_s2, 16, %s33_s22, [#allocation5]  }
  0x14   :  { %s311_s14 = scalar_lea.hbm %s498_s1, 16 }
  0x15   :  { %p312_p8 = scmp.ne.s32.totalorder %s498_s1, %s311_s14  ;;  %p315_p9 = scmp.lt.u32.totalorder %s311_s14, %s498_s1 }
  0x17   :  { %p317_p10 = pnand %p315_p9, %p312_p8 }
  0x19   :  { %320 = shalt.err (!%p317_p10)
}
  0x1a   :  { %s321_s19 = scalar_lea.vmem %s23_s24, 16  ;;  %s325_s20 = scalar_lea.vmem %s23_s24, 32 }
  0x1b   :  { %p322_p11 = scmp.ne.s32.totalorder %s23_s24, %s321_s19  ;;  %p326_p12 = scmp.lt.s32.totalorder %s23_s24, %s23_s24 }
  0x1c   :  { %p327_p13 = scmp.lt.s32.totalorder %s325_s20, %s321_s19 }
  0x1e   :  { %p328_p0 = por %p327_p13, %p326_p12 }
  0x20   :  { %p329_p1 = pnand %p328_p0, %p322_p11 }
  0x22   :  { %332 = shalt.err (!%p329_p1)
}
  0x23   :  { %25 = dma.hbm_to_vmem [thread:$0]  %s498_s1, 16, %s23_s24, [#allocation3]  }
  0x24   :  { %s385_s22 = smov [#allocation6]   ;;  %s386_s25 = smov [#allocation7]  }
  0x25   :  { %s44_s23 = sshll.u32 %s385_s22, 4  ;;  %s54_s26 = sshll.u32 %s386_s25, 4  ;;  %s45_s23 = int_to_ptr.vmem [resolvable:$true] %s44_s23  ;;  %s55_s26 = int_to_ptr.vmem [resolvable:$true] %s54_s26 }
  0x26   :  { %s333_s29 = scalar_lea.hbm %s501_s4, 16 }
  0x27   :  { %p334_p2 = scmp.ne.s32.totalorder %s501_s4, %s333_s29  ;;  %p337_p3 = scmp.lt.u32.totalorder %s333_s29, %s501_s4 }
  0x29   :  { %p339_p4 = pnand %p337_p3, %p334_p2 }
  0x2b   :  { %342 = shalt.err (!%p339_p4)
}
  0x2c   :  { %s343_s1 = scalar_lea.vmem %s45_s23, 16  ;;  %s347_s24 = scalar_lea.vmem %s45_s23, 32 }
  0x2d   :  { %p344_p5 = scmp.ne.s32.totalorder %s45_s23, %s343_s1  ;;  %p348_p6 = scmp.lt.s32.totalorder %s45_s23, %s45_s23 }
  0x2e   :  { %p349_p7 = scmp.lt.s32.totalorder %s347_s24, %s343_s1 }
  0x30   :  { %p350_p8 = por %p349_p7, %p348_p6 }
  0x32   :  { %p351_p9 = pnand %p350_p8, %p344_p5 }
  0x34   :  { %354 = shalt.err (!%p351_p9)
}
  0x35   :  { %47 = dma.hbm_to_vmem [thread:$0]  %s501_s4, 16, %s45_s23, [#allocation5]  }
  0x36   :  { %s355_s14 = scalar_lea.hbm %s502_s5, 16 }
  0x37   :  { %p356_p10 = scmp.ne.s32.totalorder %s502_s5, %s355_s14  ;;  %p359_p11 = scmp.lt.u32.totalorder %s355_s14, %s502_s5 }
  0x39   :  { %p361_p12 = pnand %p359_p11, %p356_p10 }
  0x3b   :  { %364 = shalt.err (!%p361_p12)
}
  0x3c   :  { %s365_s19 = scalar_lea.vmem %s55_s26, 16  ;;  %s369_s20 = scalar_lea.vmem %s55_s26, 32 }
  0x3d   :  { %p366_p13 = scmp.ne.s32.totalorder %s55_s26, %s365_s19  ;;  %p370_p0 = scmp.lt.s32.totalorder %s55_s26, %s55_s26 }
  0x3e   :  { %p371_p1 = scmp.lt.s32.totalorder %s369_s20, %s365_s19 }
  0x40   :  { %p372_p2 = por %p371_p1, %p370_p0 }
  0x42   :  { %p373_p3 = pnand %p372_p2, %p366_p13 }
  0x44   :  { %376 = shalt.err (!%p373_p3)
}
  0x45   :  { %57 = dma.hbm_to_vmem [thread:$0]  %s502_s5, 16, %s55_s26, [#allocation8]  }
  0x46   :  { %377 = dma.done.wait [#allocation3], 16  }
  0x47   :  { %378 = vsyncadd [#allocation3], 4294967280 }
  0x48   :  { %379 = dma.done.wait [#allocation5], 32  }
  0x49   :  { %380 = vsyncadd [#allocation5], 4294967264 }
  0x4a   :  { %381 = dma.done.wait [#allocation8], 16  }
  0x4b   :  { %382 = vsyncadd [#allocation8], 4294967280  ;;  %v286_v0 = vld [vmem:[%s500_s3] sm:$0xff]   ;;  %v287_v1 = vld [vmem:[%s500_s3 + $0x8] sm:$0xff]   ;;  %vm131_vm0 = vcmask 392192   ;;  %vm229_vm1 = vcmask 257024  }
  0x4c   :  { %272 = vmatprep.subr.bf16.mxu0 %v286_v0  ;;  %v259_v2 = vld [vmem:[%s497_s0] sm:$0xff]   ;;  %v288_v4 = vld [vmem:[%s500_s3 + $0x10] sm:$0xff]   ;;  %v266_v7 = vld [vmem:[%s497_s0 + $0x8] sm:$0xff]  }
  0x4d   :  { %273 = vmatpush3.bf16.msra.mxu0 %v286_v0  ;;  %v241_v3 = vld [vmem:[#allocation2] ss:$0 sm:$0xff]  ;;  %v260_v5 = vunpack.c.l.bf16 %v259_v2  ;;  %v261_v6 = vunpack.c.h.bf16 %v259_v2  ;;  %v242_v8 = vld [vmem:[#allocation4] ss:$0 sm:$0xff]  ;;  %v264_v9 = vunpack.c.l.bf16 %v266_v7  ;;  %v265_v10 = vunpack.c.h.bf16 %v266_v7  ;;  %v248_v25 = vld [vmem:[#allocation6] ss:$0 sm:$0xff] }
  0x4e   :  { %274 = vmatprep.subr.bf16.mxu0 %v287_v1  ;;  %v249_v27 = vld [vmem:[#allocation7] ss:$0 sm:$0xff] }
  0x4f   :  { %v86_v11 = vmul.f32 %v260_v5, %v241_v3  ;;  %v87_v12 = vmul.f32 %v261_v6, %v241_v3  ;;  %v88_v13 = vmul.f32 %v264_v9, %v241_v3  ;;  %v89_v14 = vmul.f32 %v265_v10, %v241_v3 }
  0x51   :  { %275 = vmatpush3.bf16.msra.mxu0 %v287_v1  ;;  %v97_v15 = vadd.f32 %v242_v8, %v86_v11  ;;  %v98_v16 = vadd.f32 %v242_v8, %v87_v12  ;;  %v99_v17 = vadd.f32 %v242_v8, %v88_v13  ;;  %v100_v18 = vadd.f32 %v242_v8, %v89_v14 }
  0x52   :  { %276 = vmatprep.subr.bf16.mxu0 %v288_v4 }
  0x53   :  { %v101_v19 = vmax.f32 %v97_v15, 0.0  ;;  %v102_v20 = vmax.f32 %v98_v16, 0.0  ;;  %v103_v21 = vmax.f32 %v99_v17, 0.0  ;;  %v104_v22 = vmax.f32 %v100_v18, 0.0 }
  0x55   :  { %277 = vmatpush3.bf16.msra.mxu0 %v288_v4  ;;  %v105_v23 = vpack.c.bf16 %v102_v20, %v101_v19  ;;  %v106_v24 = vpack.c.bf16 %v104_v22, %v103_v21 }
  0x57   :  { %278 = vmatprep.mubr.msk.bf16.mxu0 %vm131_vm0, %v105_v23 }
  0x58   :  { %279 = vmatmul.mubr.msk.bf16.vlgmr.msra.gmra.mrb[0].mxu0 %vm131_vm0, %v106_v24 }
 0x12b   :  { %v280_v26 = vpop.f32.mrb[0].mxu0 }
 0x12c   :  { %v196_v28 = vmul.f32 %v280_v26, %v248_v25  ;;  %v172_v29 = vpop.f32.mrb[1].mxu0 }
 0x12d   :  { %v194_v30 = vmul.f32 %v248_v25, %v172_v29  ;;  %v281_v31 = vpop.f32.mrb[2].mxu0 }
 0x12e   :  { %v207_v32 = vadd.f32 %v249_v27, %v196_v28  ;;  %v197_v33 = vmul.f32 %v281_v31, %v248_v25  ;;  %v175_v34 = vpop.f32.mrb[3].mxu0 }
 0x12f   :  { %v205_v35 = vadd.f32 %v249_v27, %v194_v30  ;;  %v195_v36 = vmul.f32 %v248_v25, %v175_v34 }
 0x130   :  { %v211_v37 = vmax.f32 %v207_v32, 0.0  ;;  %v208_v38 = vadd.f32 %v249_v27, %v197_v33 }
 0x131   :  { %v209_v39 = vmax.f32 %v205_v35, 0.0  ;;  %v206_v40 = vadd.f32 %v249_v27, %v195_v36 }
 0x132   :  { %v256_v41 = vpack.c.bf16 %v211_v37, %v211_v37  ;;  %v212_v42 = vmax.f32 %v208_v38, 0.0 }
 0x133   :  { %v254_v43 = vpack.c.bf16 %v209_v39, %v209_v39  ;;  %v210_v44 = vmax.f32 %v206_v40, 0.0 }
 0x134   :  { %232 = vst.msk [vmem:[%s503_s6 + $0x8] sm:$0xf] %vm229_vm1, %v256_v41  ;;  %v257_v45 = vpack.c.bf16 %v212_v42, %v212_v42 }
 0x135   :  { %230 = vst.msk [vmem:[%s503_s6] sm:$0xf] %vm229_vm1, %v254_v43  ;;  %v255_v46 = vpack.c.bf16 %v210_v44, %v210_v44 }
 0x136   :  { %233 = vst.msk [vmem:[%s503_s6 + $0xc] sm:$0xf] %vm229_vm1, %v257_v45 }
 0x137   :  { %231 = vst.msk [vmem:[%s503_s6 + $0x4] sm:$0xf] %vm229_vm1, %v255_v46 }
 0x138   :  { %238 = vsyncpa [#allocation3], 1 }
 0x139   :  { %239 = vsyncpa [#allocation5], 1 }
 0x13a   :  { %240 = vsyncpa [#allocation8], 1 }

// kernel: forward.51
= control target key start
LH: loop header
LB: loop body
LE: loop exit
PB: predicated region body
PF: predicated region fallthrough
CT: control target
= control target key end

     0   :  { %8 = vsyncpa [#allocation3], 0  ;;  %s558_s0 = inlined_call_operand.vmem [shape: bf16[2,2,2,2,96], index: 0, kind: input, shape index: {}]   ;;  %s559_s1 = inlined_call_operand.hbm [shape: f32[1,1,1,96], index: 1, kind: input, shape index: {}]   ;;  %s560_s2 = inlined_call_operand.hbm [shape: f32[1,1,1,96], index: 2, kind: input, shape index: {}]   ;;  %s561_s3 = inlined_call_operand.vmem [shape: bf16[2,2,2,48], index: 3, kind: output, shape index: {}]  }
   0x1   :  { %9 = vsyncpa [#allocation5], 0  ;;  %s460_s12 = smov 0  }
   0x2 LB: > { %s466_s13 = sadd.s32 4294967295, %s435_s12   ;;  %p322_p0 = scmp.ge.s32.totalorder %s435_s12, 1  ;;  %s435_s12 = sphi %s460_s12, %s15_s12  }
   0x3   : > { %p114_p1 = scmp.lt.s32.totalorder %s435_s12, 3  ;;  %p562_p2 = scmp.eq.s32.totalorder %s466_s13, 0 }
   0x4   : > { %s437_s15 = smov [#allocation2]   ;;  %s438_s17 = smov [#allocation4]  }
   0x5   : > { %p471_p3 = pnand %p322_p0, %p114_p1  ;;  %s127_s16 = sshll.u32 %s437_s15, 4  ;;  %s128_s16 = int_to_ptr.vmem [resolvable:$true] %s127_s16 }
   0x6   : > { %s138_s18 = sshll.u32 %s438_s17, 4  ;;  %s365_s22 = scalar_lea.hbm %s559_s1, 16  ;;  %s483_s18 = int_to_ptr.vmem [resolvable:$true] %s138_s18 }
   0x7   : > { %s564_s14 = scalar_select %p471_p3, 1, 0 }
   0x8   : > { %p343_p4 = pneg %p471_p3  ;;  %p366_p6 = scmp.ne.s32.totalorder %s559_s1, %s365_s22 }
   0x9   : > { %p372_p10 = scmp.lt.u32.totalorder %s365_s22, %s559_s1 }
   0xa   : > { %p479_p5 = pnand %p562_p2, %p343_p4 }
   0xc   : > { %p367_p7 = pneg %p479_p5 }
   0xe   : > { %p368_p8 = pnand %p367_p7, %p366_p6 }
  0x10   : > { %p369_p9 = pneg %p368_p8 }
  0x12   : > { %p374_p11 = pnand %p372_p10, %p369_p9 }
  0x14   : > { %377 = shalt.err (!%p374_p11)
}
  0x15   : > { %s378_s27 = scalar_lea.vmem %s128_s16, 16  ;;  %s385_s28 = scalar_lea.vmem %s128_s16, 32 }
  0x16   : > { %p379_p12 = scmp.ne.s32.totalorder %s128_s16, %s378_s27  ;;  %p386_p1 = scmp.lt.s32.totalorder %s128_s16, %s128_s16 }
  0x17   : > { %p387_p4 = scmp.lt.s32.totalorder %s385_s28, %s378_s27 }
  0x18   : > { %p381_p13 = pnand %p379_p12, %p367_p7 }
  0x19   : > { %p388_p2 = por %p387_p4, %p386_p1 }
  0x1a   : > { %p382_p0 = pneg %p381_p13 }
  0x1c   : > { %p389_p3 = pnand %p388_p2, %p382_p0 }
  0x1e   : > { %392 = shalt.err (!%p389_p3)
}
  0x1f   : > { %346 = dma.hbm_to_vmem [thread:$0]  (!%p479_p5), %s559_s1, 16, %s128_s16, [#allocation3]  }
  0x20   : > { %s393_s6 = scalar_lea.hbm %s560_s2, 16 }
  0x21   : > { %p394_p6 = scmp.ne.s32.totalorder %s560_s2, %s393_s6  ;;  %p400_p3 = scmp.lt.u32.totalorder %s393_s6, %s560_s2 }
  0x23   : > { %p396_p8 = pnand %p394_p6, %p367_p7 }
  0x25   : > { %p397_p2 = pneg %p396_p8 }
  0x27   : > { %p402_p9 = pnand %p400_p3, %p397_p2 }
  0x29   : > { %405 = shalt.err (!%p402_p9)
}
  0x2a   : > { %s406_s11 = scalar_lea.vmem %s483_s18, 16  ;;  %s413_s15 = scalar_lea.vmem %s483_s18, 32 }
  0x2b   : > { %p407_p10 = scmp.ne.s32.totalorder %s483_s18, %s406_s11  ;;  %p414_p13 = scmp.lt.s32.totalorder %s483_s18, %s483_s18 }
  0x2c   : > { %p415_p0 = scmp.lt.s32.totalorder %s413_s15, %s406_s11 }
  0x2d   : > { %p409_p11 = pnand %p407_p10, %p367_p7 }
  0x2e   : > { %p416_p1 = por %p415_p0, %p414_p13 }
  0x2f   : > { %p410_p12 = pneg %p409_p11 }
  0x31   : > { %p417_p4 = pnand %p416_p1, %p410_p12 }
  0x33   : > { %420 = shalt.err (!%p417_p4)
}
  0x34   : > { %349 = dma.hbm_to_vmem [thread:$0]  (!%p479_p5), %s560_s2, 16, %s483_s18, [#allocation5]  }
  0x35   : > { %p566_p6 = scmp.ne.s32.totalorder %s564_s14, 0 }
  0x36   : > { %p567_p7 = scmp.eq.s32.totalorder (!%p566_p6), %s466_s13, 0 }
  0x37   : > { %158 = sbr.rel (%p566_p6) target bundleno = 208 (0xd0), region = 32 }
  0x3e   : > { %426 = dma.done.wait (%p567_p7), [#allocation3], 16   ;;  %p568_p8 = pmov %p567_p7 }
  0x3f   : > { %p569_p2 = pmov %p567_p7 }
  0x40   : > { %428 = vsyncadd (%p568_p8), [#allocation3], 4294967280 }
  0x41   : > { %430 = dma.done.wait (%p569_p2), [#allocation5], 16   ;;  %p570_p3 = pmov %p569_p2 }
  0x42   : > { %p184_p9 = scmp.lt.s32.totalorder %s466_s13, 1  ;;  %v331_v2 = vld [vmem:[#allocation2] ss:$0 sm:$0xff]  ;;  %v332_v7 = vld [vmem:[#allocation4] ss:$0 sm:$0xff]  ;;  %s439_s21 = smov 80  }
  0x43   : > { %432 = vsyncadd (%p570_p3), [#allocation5], 4294967280  ;;  %vm242_vm0 = vcmask 385024  }
  0x44   : > { %s572_s13 = smov (!%p184_p9, %s466_s13), 1 }
  0x45   : > { %s329_s14 = sshll.u32 %s572_s13, 2  ;;  %s330_s22 = sshll.u32 %s572_s13, 1 }
  0x46   : > { %s187_s20 = scalar_lea.vmem %s558_s0, %s329_s14  ;;  %s191_s25 = scalar_lea.vmem %s561_s3, %s330_s22 }
  0x47   : > { %v192_v0 = vld [vmem:[%s187_s20] sm:$0x1]  ;;  %v193_v1 = vld [vmem:[%s187_s20 + $0x1] sm:$0x1]  ;;  %v194_v5 = vld [vmem:[%s187_s20 + $0x2] sm:$0x1] }
  0x48   : > { %v196_v3 = vunpack.c.l.bf16 %v192_v0  ;;  %v197_v4 = vunpack.c.l.bf16 %v193_v1  ;;  %v195_v6 = vld [vmem:[%s187_s20 + $0x3] sm:$0x1]  ;;  %v198_v8 = vunpack.c.l.bf16 %v194_v5 }
  0x49   : > { %v199_v9 = vunpack.c.l.bf16 %v195_v6 }
  0x4a   : > { %v207_v10 = vmul.f32 %v331_v2, %v196_v3  ;;  %v208_v11 = vmul.f32 %v331_v2, %v197_v4  ;;  %v209_v12 = vmul.f32 %v331_v2, %v198_v8 }
  0x4b   : > { %v210_v13 = vmul.f32 %v331_v2, %v199_v9 }
  0x4c   : > { %v218_v14 = vadd.f32 %v332_v7, %v207_v10  ;;  %v219_v15 = vadd.f32 %v332_v7, %v208_v11  ;;  %v220_v16 = vadd.f32 %v332_v7, %v209_v12 }
  0x4d   : > { %v221_v17 = vadd.f32 %v332_v7, %v210_v13 }
  0x4e   : > { %v222_v18 = vmax.f32 %v218_v14, 0.0  ;;  %v223_v19 = vmax.f32 %v219_v15, 0.0  ;;  %v224_v20 = vmax.f32 %v220_v16, 0.0 }
  0x4f   : > { %v225_v21 = vmax.f32 %v221_v17, 0.0 }
  0x50   : > { %v226_v22 = vadd.f32 %v223_v19, %v222_v18 }
  0x51   : > { %v227_v23 = vadd.f32 %v225_v21, %v224_v20 }
  0x52   : > { %230 = vrot.lane.b32.xlu0 %v226_v22, %s439_s21 }
  0x56   : > { %232 = vrot.lane.b32.xlu0 %v227_v23, %s439_s21 }
  0xc4   : > { %v231_v24 = vpop.permute.xlu0 %230 }
  0xc5   : > { %v236_v25 = vadd.f32 %v231_v24, %v226_v22 }
  0xc7   : > { %v238_v26 = vmul.f32 0.25, %v236_v25 }
  0xc8   : > { %v233_v27 = vpop.permute.xlu0 %232 }
  0xc9   : > { %v240_v28 = vpack.c.bf16 %v238_v26, %v238_v26  ;;  %v237_v29 = vadd.f32 %v233_v27, %v227_v23 }
  0xcb   : > { %243 = vst.msk [vmem:[%s191_s25] sm:$0x1] %vm242_vm0, %v240_v28  ;;  %v239_v30 = vmul.f32 0.25, %v237_v29 }
  0xcd   : > { %v241_v31 = vpack.c.bf16 %v239_v30, %v239_v30 }
  0xcf   : > { %244 = vst.msk [vmem:[%s191_s25 + $0x1] sm:$0x1] %vm242_vm0, %v241_v31 }
  0xd0 PF: > { %s15_s12 = sadd.s32 1, %s435_s12  }
  0xd1   : > { %p12_p5 = scmp.ge.s32.totalorder %s15_s12, 4  }
  0xd3   :  { %14 = sbr.rel (!%p12_p5) target bundleno = 2 (0x2), region = 71 }
  0xda   :  { %264 = vsyncpa [#allocation3], 1 }
  0xdb   :  { %266 = vsyncpa [#allocation3 + $0x1], 1 }
  0xdc   :  { %267 = vsyncpa [#allocation5], 1 }

// kernel: forward.52
= control target key start
LH: loop header
LB: loop body
LE: loop exit
PB: predicated region body
PF: predicated region fallthrough
CT: control target
= control target key end

     0   :  { %v111_v0 = vmov 0.0   ;;  %vm112_vm0 = vmmov 0   ;;  %vm37_vm1 = vcmask 392192   ;;  %vm82_vm2 = vcmask 191488   ;;  %s143_s1 = inlined_call_operand.vmem [shape: bf16[48,24], index: 1, kind: input, shape index: {}]   ;;  %s144_s0 = inlined_call_operand.vmem [shape: bf16[8,48], index: 0, kind: input, shape index: {}]   ;;  %s145_s2 = inlined_call_operand.vmem [shape: bf16[8,24], index: 2, kind: output, shape index: {}]  }
   0x1   :  { %96 = vmatprep.subr.bf16.mxu0 %v111_v0  ;;  %v108_v1 = vld [vmem:[%s143_s1] sm:$0xff]   ;;  %102 = vmatprep.mubr.msk.bf16.mxu0 %vm112_vm0, %v111_v0  ;;  %v109_v2 = vld [vmem:[%s143_s1 + $0x8] sm:$0xff]   ;;  %v110_v3 = vld [vmem:[%s143_s1 + $0x10] sm:$0xff]  }
   0x2   :  { %97 = vmatpush3.bf16.msra.mxu0 %v108_v1  ;;  %v12_v4 = vld [vmem:[%s144_s0] sm:$0xf] }
   0x3   :  { %98 = vmatprep.subr.bf16.mxu0 %v111_v0 }
   0x6   :  { %99 = vmatpush3.bf16.msra.mxu0 %v109_v2 }
   0x7   :  { %100 = vmatprep.subr.bf16.mxu0 %v111_v0 }
   0xa   :  { %101 = vmatpush3.bf16.msra.mxu0 %v110_v3 }
   0xd   :  { %103 = vmatmul.mubr.msk.bf16.vlgmr.msra.gmra.mrb[0].mxu0 %vm37_vm1, %v12_v4 }
  0xe0   :  { %v75_v5 = vpop.f32.mrb[0].mxu0 }
  0xe1   :  { %v81_v6 = vpack.c.bf16 %v75_v5, %v75_v5  ;;  %v104_v7 = vpop.f32.mrb[1].mxu0 }
  0xe2   :  { %v78_v8 = vpop.f32.mrb[2].mxu0 }
  0xe3   :  { %83 = vst.msk [vmem:[%s145_s2] sm:$0xf] %vm82_vm2, %v81_v6  ;;  %v105_v9 = vpop.f32.mrb[3].mxu0 }

// kernel: forward.53
= control target key start
LH: loop header
LB: loop body
LE: loop exit
PB: predicated region body
PF: predicated region fallthrough
CT: control target
= control target key end

     0   :  { %11 = vsyncpa [#allocation3], 0  ;;  %s415_s0 = inlined_call_operand.vmem [shape: bf16[8,40], index: 0, kind: input, shape index: {}]   ;;  %s416_s1 = inlined_call_operand.hbm [shape: f32[1,40], index: 1, kind: input, shape index: {}]   ;;  %s417_s2 = inlined_call_operand.hbm [shape: f32[1,40], index: 2, kind: input, shape index: {}]   ;;  %s418_s3 = inlined_call_operand.vmem [shape: bf16[40,32], index: 3, kind: input, shape index: {}]   ;;  %s419_s4 = inlined_call_operand.hbm [shape: f32[1,32], index: 4, kind: input, shape index: {}]   ;;  %s420_s5 = inlined_call_operand.hbm [shape: f32[1,32], index: 5, kind: input, shape index: {}]   ;;  %s421_s6 = inlined_call_operand.vmem [shape: bf16[8,32], index: 6, kind: output, shape index: {}]  }
   0x1   :  { %12 = vsyncpa [#allocation5], 0 }
   0x2   :  { %13 = vsyncpa [#allocation8], 0  ;;  %s311_s21 = smov [#allocation4]   ;;  %s312_s23 = smov [#allocation2]  }
   0x3   :  { %s32_s22 = sshll.u32 %s311_s21, 4  ;;  %s22_s24 = sshll.u32 %s312_s23, 4  ;;  %s33_s22 = int_to_ptr.vmem [resolvable:$true] %s32_s22  ;;  %s23_s24 = int_to_ptr.vmem [resolvable:$true] %s22_s24 }
   0x4   :  { %s217_s27 = scalar_lea.hbm %s417_s2, 16 }
   0x5   :  { %p218_p0 = scmp.ne.s32.totalorder %s417_s2, %s217_s27  ;;  %p221_p1 = scmp.lt.u32.totalorder %s217_s27, %s417_s2 }
   0x7   :  { %p223_p2 = pnand %p221_p1, %p218_p0 }
   0x9   :  { %226 = shalt.err (!%p223_p2)
}
   0xa   :  { %s227_s8 = scalar_lea.vmem %s33_s22, 16  ;;  %s231_s9 = scalar_lea.vmem %s33_s22, 32 }
   0xb   :  { %p228_p3 = scmp.ne.s32.totalorder %s33_s22, %s227_s8  ;;  %p232_p4 = scmp.lt.s32.totalorder %s33_s22, %s33_s22 }
   0xc   :  { %p233_p5 = scmp.lt.s32.totalorder %s231_s9, %s227_s8 }
   0xe   :  { %p234_p6 = por %p233_p5, %p232_p4 }
  0x10   :  { %p235_p7 = pnand %p234_p6, %p228_p3 }
  0x12   :  { %238 = shalt.err (!%p235_p7)
}
  0x13   :  { %35 = dma.hbm_to_vmem [thread:$0]  %s417_s2, 16, %s33_s22, [#allocation5]  }
  0x14   :  { %s239_s14 = scalar_lea.hbm %s416_s1, 16 }
  0x15   :  { %p240_p8 = scmp.ne.s32.totalorder %s416_s1, %s239_s14  ;;  %p243_p9 = scmp.lt.u32.totalorder %s239_s14, %s416_s1 }
  0x17   :  { %p245_p10 = pnand %p243_p9, %p240_p8 }
  0x19   :  { %248 = shalt.err (!%p245_p10)
}
  0x1a   :  { %s249_s19 = scalar_lea.vmem %s23_s24, 16  ;;  %s253_s20 = scalar_lea.vmem %s23_s24, 32 }
  0x1b   :  { %p250_p11 = scmp.ne.s32.totalorder %s23_s24, %s249_s19  ;;  %p254_p12 = scmp.lt.s32.totalorder %s23_s24, %s23_s24 }
  0x1c   :  { %p255_p13 = scmp.lt.s32.totalorder %s253_s20, %s249_s19 }
  0x1e   :  { %p256_p0 = por %p255_p13, %p254_p12 }
  0x20   :  { %p257_p1 = pnand %p256_p0, %p250_p11 }
  0x22   :  { %260 = shalt.err (!%p257_p1)
}
  0x23   :  { %25 = dma.hbm_to_vmem [thread:$0]  %s416_s1, 16, %s23_s24, [#allocation3]  }
  0x24   :  { %s313_s22 = smov [#allocation6]   ;;  %s314_s25 = smov [#allocation7]  }
  0x25   :  { %s44_s23 = sshll.u32 %s313_s22, 4  ;;  %s54_s26 = sshll.u32 %s314_s25, 4  ;;  %s45_s23 = int_to_ptr.vmem [resolvable:$true] %s44_s23  ;;  %s55_s26 = int_to_ptr.vmem [resolvable:$true] %s54_s26 }
  0x26   :  { %s261_s29 = scalar_lea.hbm %s419_s4, 16 }
  0x27   :  { %p262_p2 = scmp.ne.s32.totalorder %s419_s4, %s261_s29  ;;  %p265_p3 = scmp.lt.u32.totalorder %s261_s29, %s419_s4 }
  0x29   :  { %p267_p4 = pnand %p265_p3, %p262_p2 }
  0x2b   :  { %270 = shalt.err (!%p267_p4)
}
  0x2c   :  { %s271_s1 = scalar_lea.vmem %s45_s23, 16  ;;  %s275_s24 = scalar_lea.vmem %s45_s23, 32 }
  0x2d   :  { %p272_p5 = scmp.ne.s32.totalorder %s45_s23, %s271_s1  ;;  %p276_p6 = scmp.lt.s32.totalorder %s45_s23, %s45_s23 }
  0x2e   :  { %p277_p7 = scmp.lt.s32.totalorder %s275_s24, %s271_s1 }
  0x30   :  { %p278_p8 = por %p277_p7, %p276_p6 }
  0x32   :  { %p279_p9 = pnand %p278_p8, %p272_p5 }
  0x34   :  { %282 = shalt.err (!%p279_p9)
}
  0x35   :  { %47 = dma.hbm_to_vmem [thread:$0]  %s419_s4, 16, %s45_s23, [#allocation5]  }
  0x36   :  { %s283_s14 = scalar_lea.hbm %s420_s5, 16 }
  0x37   :  { %p284_p10 = scmp.ne.s32.totalorder %s420_s5, %s283_s14  ;;  %p287_p11 = scmp.lt.u32.totalorder %s283_s14, %s420_s5 }
  0x39   :  { %p289_p12 = pnand %p287_p11, %p284_p10 }
  0x3b   :  { %292 = shalt.err (!%p289_p12)
}
  0x3c   :  { %s293_s19 = scalar_lea.vmem %s55_s26, 16  ;;  %s297_s20 = scalar_lea.vmem %s55_s26, 32 }
  0x3d   :  { %p294_p13 = scmp.ne.s32.totalorder %s55_s26, %s293_s19  ;;  %p298_p0 = scmp.lt.s32.totalorder %s55_s26, %s55_s26 }
  0x3e   :  { %p299_p1 = scmp.lt.s32.totalorder %s297_s20, %s293_s19 }
  0x40   :  { %p300_p2 = por %p299_p1, %p298_p0 }
  0x42   :  { %p301_p3 = pnand %p300_p2, %p294_p13 }
  0x44   :  { %304 = shalt.err (!%p301_p3)
}
  0x45   :  { %57 = dma.hbm_to_vmem [thread:$0]  %s420_s5, 16, %s55_s26, [#allocation8]  }
  0x46   :  { %305 = dma.done.wait [#allocation3], 16  }
  0x47   :  { %306 = vsyncadd [#allocation3], 4294967280 }
  0x48   :  { %307 = dma.done.wait [#allocation5], 32  }
  0x49   :  { %308 = vsyncadd [#allocation5], 4294967264 }
  0x4a   :  { %309 = dma.done.wait [#allocation8], 16  }
  0x4b   :  { %310 = vsyncadd [#allocation8], 4294967280  ;;  %v315_v0 = vmov 0.0   ;;  %vm316_vm0 = vmmov 0   ;;  %v214_v1 = vld [vmem:[%s418_s3] sm:$0xff]   ;;  %v215_v2 = vld [vmem:[%s418_s3 + $0x8] sm:$0xff]  }
  0x4c   :  { %198 = vmatprep.subr.bf16.mxu0 %v315_v0  ;;  %204 = vmatprep.mubr.msk.bf16.mxu0 %vm316_vm0, %v315_v0  ;;  %v71_v3 = vld [vmem:[%s415_s0] sm:$0xf]  ;;  %v216_v4 = vld [vmem:[%s418_s3 + $0x10] ss:$0 sps:$4 sm:$0xff]   ;;  %vm115_vm1 = vcmask 1043456   ;;  %vm111_vm2 = vcmask 326656  }
  0x4d   :  { %199 = vmatpush3.bf16.msra.mxu0 %v214_v1  ;;  %v186_v5 = vld [vmem:[#allocation2] ss:$0 sm:$0xff]  ;;  %v73_v6 = vunpack.c.l.bf16 %v71_v3  ;;  %v187_v7 = vld [vmem:[#allocation4] ss:$0 sm:$0xff]  ;;  %v117_v9 = vsel %vm115_vm1, %v216_v4, 0  ;;  %vm177_vm3 = vcmask 257024  }
  0x4e   :  { %200 = vmatprep.subr.bf16.mxu0 %v315_v0  ;;  %v192_v13 = vld [vmem:[#allocation6] ss:$0 sm:$0xff]  ;;  %v193_v15 = vld [vmem:[#allocation7] ss:$0 sm:$0xff] }
  0x4f   :  { %v80_v8 = vmul.f32 %v186_v5, %v73_v6 }
  0x51   :  { %201 = vmatpush3.bf16.msra.mxu0 %v215_v2  ;;  %v88_v10 = vadd.f32 %v187_v7, %v80_v8 }
  0x52   :  { %202 = vmatprep.subr.bf16.mxu0 %v315_v0 }
  0x53   :  { %v89_v11 = vmax.f32 %v88_v10, 0.0 }
  0x55   :  { %203 = vmatpush3.bf16.msra.mxu0 %v117_v9  ;;  %v90_v12 = vpack.c.bf16 %v89_v11, %v89_v11 }
  0x58   :  { %205 = vmatmul.mubr.msk.bf16.vlgmr.msra.gmra.mrb[0].mxu0 %vm111_vm2, %v90_v12 }
 0x12b   :  { %v153_v14 = vpop.f32.mrb[0].mxu0 }
 0x12c   :  { %v166_v16 = vmul.f32 %v192_v13, %v153_v14  ;;  %v206_v17 = vpop.f32.mrb[1].mxu0 }
 0x12d   :  { %v156_v18 = vpop.f32.mrb[2].mxu0 }
 0x12e   :  { %v174_v19 = vadd.f32 %v193_v15, %v166_v16  ;;  %v207_v20 = vpop.f32.mrb[3].mxu0 }
 0x130   :  { %v175_v21 = vmax.f32 %v174_v19, 0.0 }
 0x132   :  { %v176_v22 = vpack.c.bf16 %v175_v21, %v175_v21 }
 0x134   :  { %178 = vst.msk [vmem:[%s421_s6] sm:$0xf] %vm177_vm3, %v176_v22 }
 0x135   :  { %183 = vsyncpa [#allocation3], 1 }
 0x136   :  { %184 = vsyncpa [#allocation5], 1 }
 0x137   :  { %185 = vsyncpa [#allocation8], 1 }

// kernel: forward.54
= control target key start
LH: loop header
LB: loop body
LE: loop exit
PB: predicated region body
PF: predicated region fallthrough
CT: control target
= control target key end

     0   :  { %s634_s9 = smov 0   ;;  %s681_s0 = inlined_call_operand.vmem [shape: bf16[2,5,8,32], index: 0, kind: input, shape index: {}]   ;;  %s682_s1 = inlined_call_operand.vmem [shape: bf16[3,32,24], index: 1, kind: input, shape index: {}]   ;;  %s683_s2 = inlined_call_operand.vmem [shape: bf16[2,2,2,8], index: 2, kind: output, shape index: {}]  }
   0x1 LB: > { %s521_s10 = sadd.s32 4294967295, %s615_s9   ;;  %p525_p0 = scmp.ge.s32.totalorder %s615_s9, 1  ;;  %s615_s9 = sphi %s634_s9, %s12_s9  }
   0x2   : > { %p112_p1 = scmp.lt.s32.totalorder %s615_s9, 3 }
   0x4   : > { %p113_p2 = pnand %p525_p0, %p112_p1 }
   0x5   : > { %v600_v0 = vld [vmem:[%s682_s1] sm:$0xff] (!%p113_p2)   ;;  %p133_p3 = scmp.lt.s32.totalorder (!%p113_p2), %s521_s10, 1  ;;  %v601_v1 = vld [vmem:[%s682_s1 + $0x8] sm:$0xff] (!%p113_p2)   ;;  %v603_v2 = vld [vmem:[%s682_s1 + $0x10] sm:$0xff] (!%p113_p2)   ;;  %vm174_vm0 = vcmask (!%p113_p2), 261120   ;;  %vm369_vm1 = vcmask (!%p113_p2), 1046528  }
   0x6   : > { %116 = sbr.rel (%p113_p2) target bundleno = 371 (0x173), region = 28  ;;  %565 = vmatprep.subr.bf16.mxu0 (!%p113_p2), %v600_v0  ;;  %v605_v3 = vld [vmem:[%s682_s1 + $0x20] sm:$0xff] (!%p113_p2)   ;;  %573 = vmatprep.subr.bf16.mxu1 (!%p113_p2), %v603_v2  ;;  %v606_v4 = vld [vmem:[%s682_s1 + $0x18] sm:$0xff] (!%p113_p2)   ;;  %v607_v5 = vld [vmem:[%s682_s1 + $0x28] sm:$0xff] (!%p113_p2)   ;;  %vm257_vm2 = vsmask.f32 (!%p113_p2), 7424 }
   0x7   : > { %566 = vmatpush3.bf16.msra.mxu0 (!%p113_p2), %v600_v0  ;;  %574 = vmatpush3.bf16.msra.mxu1 (!%p113_p2), %v603_v2  ;;  %s617_s27 = smov (!%p113_p2), 112   ;;  %s618_s28 = smov (!%p113_p2), 120   ;;  %vm465_vm3 = vcmask (!%p113_p2), 57344  }
   0x8   : > { %567 = vmatprep.subr.bf16.mxu0 (!%p113_p2), %v601_v1  ;;  %575 = vmatprep.subr.bf16.mxu1 (!%p113_p2), %v606_v4 }
   0xb   : > { %568 = vmatpush3.bf16.msra.mxu0 (!%p113_p2), %v601_v1  ;;  %576 = vmatpush3.bf16.msra.mxu1 (!%p113_p2), %v606_v4 }
   0xc   : > { %581 = vmatprep.subr.bf16.mxu0 (!%p113_p2), %v605_v3 }
   0xd   : > { %s685_s10 = smov (!%p133_p3, %s521_s10), 1 }
   0xe   : > { %s589_s19 = smul.u32 20, %s685_s10  ;;  %s527_s29 = sshll.u32 %s685_s10, 1 }
   0xf   : > { %s141_s4 = scalar_lea.vmem %s683_s2, %s527_s29 }
  0x10   : > { %s137_s24 = scalar_lea.vmem %s681_s0, %s589_s19 }
  0x11   : > { %v602_v6 = vld [vmem:[%s137_s24] sm:$0xff]   ;;  %v604_v7 = vld [vmem:[%s137_s24 + $0x8] sm:$0xff]   ;;  %v608_v10 = vld [vmem:[%s137_s24 + $0x10] ss:$0 sps:$4 sm:$0xff]  }
  0x12   : > { %569 = vmatprep.mubr.msk.bf16.mxu0 %vm174_vm0, %v602_v6  ;;  %v258_v8 = vshrl.u32 %v602_v6, 16  ;;  %v260_v9 = vshll.u32 %v602_v6, 16  ;;  %v264_v11 = vshll.u32 %v604_v7, 16  ;;  %v268_v12 = vshrl.u32 %v604_v7, 16 }
  0x13   : > { %570 = vmatmul.mubr.msk.bf16.vlgmr.msra.gmra.mrb[0].mxu0 %vm174_vm0, %v604_v7  ;;  %v370_v13 = vrot.slane %v602_v6, 1  ;;  %v371_v14 = vrot.slane %v604_v7, 1  ;;  %v272_v16 = vshll.u32 %v608_v10, 16  ;;  %v373_v17 = vrot.slane %v608_v10, 1 }
  0x14   : > { %582 = vmatpush3.bf16.msra.mxu0 %v605_v3  ;;  %v262_v15 = vrot.slane %v260_v9, 1  ;;  %v266_v18 = vrot.slane %v264_v11, 1 }
  0x15   : > { %583 = vmatprep.subr.bf16.mxu0 %v607_v5  ;;  %v372_v19 = vsel %vm369_vm1, %v370_v13, %v371_v14  ;;  %v274_v21 = vrot.slane %v272_v16, 1  ;;  %v374_v24 = vsel %vm369_vm1, %v371_v14, %v373_v17 }
  0x16   : > { %v263_v20 = vor.u32 %v262_v15, %v258_v8  ;;  %585 = vmatprep.mubr.msk.bf16.mxu0 %vm174_vm0, %v372_v19  ;;  %v270_v22 = vor.u32 %v268_v12, %v266_v18 }
  0x18   : > { %v267_v23 = vsel %vm257_vm2, %v263_v20, %v266_v18  ;;  %584 = vmatpush3.bf16.msra.mxu0 %v607_v5  ;;  %v275_v25 = vsel %vm257_vm2, %v270_v22, %v274_v21 }
  0x19   : > { %577 = vmatprep.mubr.msk.bf16.mxu1 %vm174_vm0, %v267_v23 }
  0x1a   : > { %578 = vmatmul.mubr.msk.bf16.vlgmr.msra.gmra.mrb[0].mxu1 %vm174_vm0, %v275_v25 }
  0x1b   : > { %586 = vmatmul.mubr.msk.bf16.vlgmr.msra.gmra.mrb[4].mxu0 %vm174_vm0, %v374_v24 }
  0xe6   : > { %v571_v26 = vpop.f32.mrb[0].mxu0 }
  0xe7   : > { %241 = vrot.lane.b32.xlu1 %v571_v26, %s617_s27  ;;  %234 = vrot.lane.b32.xlu0 %v571_v26, %s618_s28  ;;  %v215_v27 = vpop.f32.mrb[1].mxu0 }
  0xe8   : > { %v572_v28 = vpop.f32.mrb[2].mxu0 }
  0xe9   : > { %v218_v29 = vpop.f32.mrb[3].mxu0 }
  0xeb   : > { %243 = vrot.lane.b32.xlu1 %v572_v28, %s617_s27  ;;  %232 = vrot.lane.b32.xlu0 %v218_v29, %s618_s28 }
  0xed   : > { %v579_v30 = vpop.f32.mrb[0].mxu1 }
  0xee   : > { %v328_v31 = vpop.f32.mrb[1].mxu1  ;;  %v587_v32 = vpop.f32.mrb[4].mxu0 }
  0xef   : > { %v580_v33 = vpop.f32.mrb[2].mxu1  ;;  %349 = vrot.lane.b32.xlu1 %v579_v30, %s618_s28  ;;  %356 = vrot.lane.b32.xlu0 %v579_v30, %s617_s27  ;;  %v427_v34 = vpop.f32.mrb[5].mxu0 }
  0xf0   : > { %v331_v35 = vpop.f32.mrb[3].mxu1  ;;  %v588_v36 = vpop.f32.mrb[6].mxu0 }
  0xf1   : > { %v430_v37 = vpop.f32.mrb[7].mxu0 }
  0xf3   : > { %358 = vrot.lane.b32.xlu1 %v580_v33, %s617_s27  ;;  %347 = vrot.lane.b32.xlu0 %v331_v35, %s618_s28 }
  0xf7   : > { %448 = vrot.lane.b32.xlu1 %v587_v32, %s618_s28  ;;  %446 = vrot.lane.b32.xlu0 %v430_v37, %s618_s28 }
  0xfb   : > { %457 = vrot.lane.b32.xlu1 %v588_v36, %s617_s27  ;;  %455 = vrot.lane.b32.xlu0 %v587_v32, %s617_s27 }
 0x159   : > { %v242_v38 = vpop.permute.xlu1 %241  ;;  %v235_v39 = vpop.permute.xlu0 %234 }
 0x15a   : > { %v239_v40 = vadd.f32 %v235_v39, %v218_v29 }
 0x15d   : > { %v244_v41 = vpop.permute.xlu1 %243  ;;  %v233_v42 = vpop.permute.xlu0 %232 }
 0x15e   : > { %v248_v43 = vadd.f32 %v244_v41, %v239_v40  ;;  %v238_v44 = vadd.f32 %v233_v42, %v215_v27 }
 0x160   : > { %v247_v45 = vadd.f32 %v242_v38, %v238_v44  ;;  %v344_v46 = vadd.f32 %v331_v35, %v248_v43 }
 0x161   : > { %v350_v47 = vpop.permute.xlu1 %349  ;;  %v357_v48 = vpop.permute.xlu0 %356 }
 0x162   : > { %v343_v49 = vadd.f32 %v328_v31, %v247_v45  ;;  %v354_v50 = vadd.f32 %v350_v47, %v344_v46 }
 0x165   : > { %v359_v51 = vpop.permute.xlu1 %358  ;;  %v348_v52 = vpop.permute.xlu0 %347 }
 0x166   : > { %v363_v53 = vadd.f32 %v359_v51, %v354_v50  ;;  %v353_v54 = vadd.f32 %v348_v52, %v343_v49 }
 0x168   : > { %v362_v55 = vadd.f32 %v357_v48, %v353_v54  ;;  %v443_v56 = vadd.f32 %v430_v37, %v363_v53 }
 0x169   : > { %v449_v57 = vpop.permute.xlu1 %448  ;;  %v447_v58 = vpop.permute.xlu0 %446 }
 0x16a   : > { %v442_v59 = vadd.f32 %v427_v34, %v362_v55  ;;  %v453_v60 = vadd.f32 %v449_v57, %v443_v56 }
 0x16c   : > { %v452_v61 = vadd.f32 %v447_v58, %v442_v59 }
 0x16d   : > { %v458_v62 = vpop.permute.xlu1 %457  ;;  %v456_v63 = vpop.permute.xlu0 %455 }
 0x16e   : > { %v462_v0 = vadd.f32 %v458_v62, %v453_v60  ;;  %v461_v1 = vadd.f32 %v456_v63, %v452_v61 }
 0x170   : > { %v464_v2 = vpack.c.bf16 %v462_v0, %v462_v0  ;;  %v463_v3 = vpack.c.bf16 %v461_v1, %v461_v1 }
 0x172   : > { %467 = vst.msk [vmem:[%s141_s4 + $0x1] sm:$0x1] %vm465_vm3, %v464_v2  ;;  %466 = vst.msk [vmem:[%s141_s4] sm:$0x1] %vm465_vm3, %v463_v3 }
 0x173 PF: > { %s12_s9 = sadd.s32 1, %s615_s9  }
 0x174   : > { %p9_p4 = scmp.ge.s32.totalorder %s12_s9, 4  }
 0x176   :  { %11 = sbr.rel (!%p9_p4) target bundleno = 1 (0x1), region = 60 }

// kernel: forward.57
= control target key start
LH: loop header
LB: loop body
LE: loop exit
PB: predicated region body
PF: predicated region fallthrough
CT: control target
= control target key end

     0   :  { %v1394_v7 = vmov 0   ;;  %vm245_vm0 = vcmask 1043456   ;;  %vm52_vm1 = vcmask 322560   ;;  %vm138_vm2 = vcmask 1041409   ;;  %s1778_s0 = inlined_call_operand.vmem [shape: bf16[2,4,40], index: 0, kind: input, shape index: {}]   ;;  %s1779_s1 = inlined_call_operand.vmem [shape: f32[1,1,40], index: 1, kind: input, shape index: {}]   ;;  %s1780_s2 = inlined_call_operand.vmem [shape: f32[1,1,40], index: 2, kind: input, shape index: {}]   ;;  %s1781_s3 = inlined_call_operand.vmem [shape: bf16[40,1000], index: 3, kind: input, shape index: {}]   ;;  %s1782_s4 = inlined_call_operand.vmem [shape: f32[1,1000], index: 4, kind: input, shape index: {}]   ;;  %s1783_s5 = inlined_call_operand.vmem [shape: bf16[1000,4], index: 5, kind: input, shape index: {}]   ;;  %s1784_s6 = inlined_call_operand.vmem [shape: f32[1,4], index: 6, kind: input, shape index: {}]   ;;  %s1785_s7 = inlined_call_operand.hbm [shape: f32[2,4], index: 7, kind: output, shape index: {}]  }
   0x1   :  { %v72_v0 = vld [vmem:[%s1781_s3] sm:$0xff]  ;;  %302 = vmatprep.mubr.bf16.mxu0 %v1394_v7  ;;  %425 = vmatprep.mubr.bf16.mxu1 %v1394_v7  ;;  %v1468_v18 = vld [vmem:[%s1781_s3 + $0x8] sm:$0xff]  ;;  %v75_v22 = vld [vmem:[%s1781_s3 + $0x18] sm:$0xff]  ;;  %vm241_vm3 = vcmask 326656  }
   0x2   :  { %v76_v1 = vld [vmem:[%s1781_s3 + $0x20] sm:$0xff]  ;;  %v1473_v19 = vld [vmem:[%s1781_s3 + $0x28] sm:$0xff]  ;;  %v79_v23 = vld [vmem:[%s1781_s3 + $0x38] sm:$0xff] }
   0x3   :  { %v80_v2 = vld [vmem:[%s1781_s3 + $0x40] sm:$0xff]  ;;  %v1135_v3 = vcombine.high %v72_v0, %v76_v1  ;;  %v1134_v4 = vcombine.low %v72_v0, %v76_v1  ;;  %v83_v26 = vld [vmem:[%s1781_s3 + $0x58] sm:$0xff]  ;;  %v1137_v29 = vcombine.high %v1468_v18, %v1473_v19  ;;  %v1141_v30 = vcombine.high %v75_v22, %v79_v23  ;;  %v89_v55 = vld [vmem:[%s1781_s3 + $0x88] sm:$0xff] }
   0x4   :  { %v84_v5 = vld [vmem:[%s1781_s3 + $0x60] sm:$0xff]  ;;  %v87_v27 = vld [vmem:[%s1781_s3 + $0x78] sm:$0xff]  ;;  %v1140_v34 = vcombine.low %v75_v22, %v79_v23  ;;  %v90_v56 = vld [vmem:[%s1781_s3 + $0x90] sm:$0xff]  ;;  %v1152_v61 = vcombine.low %v89_v55, %v89_v55 }
   0x5   :  { %v88_v6 = vld [vmem:[%s1781_s3 + $0x80] sm:$0xff]  ;;  %v1143_v8 = vcombine.high %v80_v2, %v84_v5  ;;  %270 = vmatprep.subr.bf16.mxu0 %v1135_v3  ;;  %v1142_v14 = vcombine.low %v80_v2, %v84_v5  ;;  %v91_v31 = vld [vmem:[%s1781_s3 + $0x98] sm:$0xff]  ;;  %v1149_v35 = vcombine.high %v83_v26, %v87_v27  ;;  %393 = vmatprep.subr.bf16.mxu1 %v1141_v30  ;;  %v81_v63 = vld [vmem:[%s1781_s3 + $0x48] sm:$0xff] }
   0x6   :  { %v28_v9 = vld [vmem:[%s1778_s0] sm:$0x3]  ;;  %v29_v10 = vld [vmem:[%s1778_s0 + $0x2] sm:$0x3]  ;;  %271 = vmatpush1.bf16.msra.mxu0 %v1134_v4  ;;  %v1150_v15 = vcombine.low %v88_v6, %v88_v6  ;;  %v1151_v17 = vcombine.high %v88_v6, %v88_v6  ;;  %394 = vmatpush1.bf16.msra.mxu1 %v1140_v34  ;;  %v1148_v38 = vcombine.low %v83_v26, %v87_v27  ;;  %v85_v2 = vld [vmem:[%s1781_s3 + $0x68] sm:$0xff]  ;;  %v253_v5 = vsel %vm245_vm0, %v1152_v61, 0 }
   0x7   :  { %v30_v11 = vunpack.c.l.bf16 %v28_v9  ;;  %v31_v12 = vunpack.c.l.bf16 %v29_v10  ;;  %v1132_v13 = vld [vmem:[%s1779_s1] ss:$0 sm:$0xff]  ;;  %272 = vmatprep.subr.bf16.mxu0 %v1143_v8  ;;  %395 = vmatprep.subr.bf16.mxu1 %v1149_v35  ;;  %v1157_v41 = vcombine.high %v91_v31, %v91_v31  ;;  %v1156_v42 = vcombine.low %v91_v31, %v91_v31  ;;  %v1317_v9 = vld [vmem:[%s1783_s5 + $0xc8] sm:$0xff]   ;;  %v1327_v23 = vld [vmem:[%s1783_s5 + $0x98] sm:$0xff]  }
   0x8   :  { %v1133_v16 = vld [vmem:[%s1780_s2] ss:$0 sm:$0xff]  ;;  %v247_v28 = vsel %vm245_vm0, %v1150_v15, 0  ;;  %v1154_v62 = vcombine.low %v90_v56, %v90_v56  ;;  %v1136_v3 = vcombine.low %v1468_v18, %v1473_v19  ;;  %v78_v15 = vld [vmem:[%s1781_s3 + $0x30] sm:$0xff]  ;;  %v1155_v27 = vcombine.high %v90_v56, %v90_v56  ;;  %v1309_v30 = vld [vmem:[%s1783_s5 + $0x48] sm:$0xff]  }
   0x9   :  { %v39_v20 = vmul.f32 %v1132_v13, %v30_v11  ;;  %v40_v21 = vmul.f32 %v1132_v13, %v31_v12  ;;  %v265_v47 = vsel %vm245_vm0, %v1156_v42, 0  ;;  %v1313_v48 = vld [vmem:[%s1783_s5 + $0xc0] sm:$0xff]   ;;  %v1145_v11 = vcombine.high %v81_v63, %v85_v2  ;;  %v1319_v12 = vld [vmem:[%s1783_s5 + $0x88] sm:$0xff]   ;;  %v1323_v18 = vld [vmem:[%s1783_s5 + $0x90] sm:$0xff]  }
   0xa   :  { %273 = vmatpush1.bf16.msra.mxu0 %v1142_v14  ;;  %396 = vmatpush1.bf16.msra.mxu1 %v1148_v38  ;;  %v259_v6 = vsel %vm245_vm0, %v1154_v62, 0  ;;  %v1315_v8 = vld [vmem:[%s1783_s5 + $0x80] sm:$0xff]   ;;  %v1144_v13 = vcombine.low %v81_v63, %v85_v2  ;;  %v74_v14 = vld [vmem:[%s1781_s3 + $0x10] sm:$0xff]  ;;  %v1310_v31 = vld [vmem:[%s1783_s5 + $0x8] sm:$0xff]  }
   0xb   :  { %v48_v24 = vadd.f32 %v1133_v16, %v39_v20  ;;  %v49_v25 = vadd.f32 %v1133_v16, %v40_v21  ;;  %1158 = vmatprep.subr.msk.bf16.mxu0 %vm245_vm0, %v1151_v17  ;;  %1164 = vmatprep.subr.msk.bf16.mxu1 %vm245_vm0, %v1157_v41  ;;  %v1321_v16 = vld [vmem:[%s1783_s5 + $0xd0] sm:$0xff]   ;;  %v1153_v17 = vcombine.high %v89_v55, %v89_v55  ;;  %v1325_v21 = vld [vmem:[%s1783_s5 + $0xd8] sm:$0xff]  }
   0xc   :  { %v82_v19 = vld [vmem:[%s1781_s3 + $0x50] sm:$0xff]  ;;  %v1139_v22 = vcombine.high %v74_v14, %v78_v15 }
   0xd   :  { %v50_v32 = vmax.f32 %v48_v24, 0.0  ;;  %v51_v33 = vmax.f32 %v49_v25, 0.0  ;;  %v86_v20 = vld [vmem:[%s1781_s3 + $0x70] sm:$0xff]  ;;  %v1138_v24 = vcombine.low %v74_v14, %v78_v15 }
   0xe   :  { %275 = vmatpush1.bf16.msra.mxu0 %v247_v28  ;;  %398 = vmatpush1.bf16.msra.mxu1 %v265_v47  ;;  %v1147_v25 = vcombine.high %v82_v19, %v86_v20  ;;  %v1146_v26 = vcombine.low %v82_v19, %v86_v20  ;;  %v1307_v28 = vld [vmem:[%s1783_s5 + $0x40] sm:$0xff]  }
   0xf   :  { %v53_v36 = vsel %vm52_vm1, %v50_v32, 0.0  ;;  %v60_v37 = vsel %vm52_vm1, %v51_v33, 0.0  ;;  %311 = vmatprep.subr.bf16.mxu0 %v1137_v29  ;;  %1253 = vmatprep.subr.bf16.mxu1 %v1313_v48  ;;  %v1308_v29 = vld [vmem:[%s1783_s5] sm:$0xff]  }
  0x10   :  { %v54_v39 = vrot.slane %v53_v36, 4  ;;  %v61_v40 = vrot.slane %v60_v37, 4 }
  0x12   :  { %v55_v43 = vadd.f32 %v54_v39, %v53_v36  ;;  %v62_v44 = vadd.f32 %v61_v40, %v60_v37 }
  0x14   :  { %v56_v45 = vrot.slane %v55_v43, 2  ;;  %v63_v46 = vrot.slane %v62_v44, 2 }
  0x16   :  { %v57_v49 = vadd.f32 %v56_v45, %v55_v43  ;;  %v64_v50 = vadd.f32 %v63_v46, %v62_v44 }
  0x18   :  { %v58_v51 = vrot.slane %v57_v49, 1  ;;  %v65_v52 = vrot.slane %v64_v50, 1 }
  0x1a   :  { %v59_v53 = vadd.f32 %v58_v51, %v57_v49  ;;  %v66_v54 = vadd.f32 %v65_v52, %v64_v50 }
  0x1c   :  { %v68_v57 = vmul.f32 0.25, %v59_v53  ;;  %v69_v58 = vmul.f32 0.25, %v66_v54 }
  0x1e   :  { %v70_v59 = vpack.c.bf16 %v68_v57, %v68_v57  ;;  %v71_v60 = vpack.c.bf16 %v69_v58, %v69_v58 }
  0x20   :  { %v136_v0 = vunpack.c.l.b16 %v70_v59  ;;  %v137_v1 = vunpack.c.l.b16 %v71_v60 }
  0x22   :  { %v139_v4 = vsel %vm138_vm2, %v137_v1, %v136_v0 }
  0x23   :  { %v140_v10 = vpack.c.b16 %v139_v4, %v139_v4 }
  0x25   :  { %1159 = vmatmul.mubr.msk.bf16.vlgmr.msra.gmra.mrb[0].mxu0 %vm241_vm3, %v140_v10  ;;  %1165 = vmatmul.mubr.msk.bf16.vlgmr.msra.gmra.mrb[0].mxu1 %vm241_vm3, %v140_v10 }
  0x26   :  { %312 = vmatpush1.bf16.msra.mxu0 %v1136_v3  ;;  %343 = vmatprep.mubr.bf16.mxu0 %v1394_v7 }
  0x27   :  { %313 = vmatprep.subr.bf16.mxu0 %v1145_v11  ;;  %1254 = vmatpush3.bf16.msra.mxu1 %v1315_v8 }
  0x28   :  { %1255 = vmatprep.subr.bf16.mxu1 %v1317_v9 }
  0x2a   :  { %314 = vmatpush1.bf16.msra.mxu0 %v1144_v13 }
  0x2b   :  { %1160 = vmatprep.subr.msk.bf16.mxu0 %vm245_vm0, %v1153_v17  ;;  %1256 = vmatpush3.bf16.msra.mxu1 %v1319_v12 }
  0x2c   :  { %1257 = vmatprep.subr.bf16.mxu1 %v1321_v16 }
  0x2e   :  { %316 = vmatpush1.bf16.msra.mxu0 %v253_v5 }
  0x2f   :  { %352 = vmatprep.subr.bf16.mxu0 %v1139_v22  ;;  %1258 = vmatpush3.bf16.msra.mxu1 %v1323_v18 }
  0x30   :  { %1259 = vmatprep.subr.bf16.mxu1 %v1325_v21 }
  0x31   :  { %1161 = vmatmul.mubr.msk.bf16.vlgmr.msra.gmra.mrb[4].mxu0 %vm241_vm3, %v140_v10 }
  0x32   :  { %353 = vmatpush1.bf16.msra.mxu0 %v1138_v24  ;;  %384 = vmatprep.mubr.bf16.mxu0 %v1394_v7 }
  0x33   :  { %354 = vmatprep.subr.bf16.mxu0 %v1147_v25  ;;  %1260 = vmatpush3.bf16.msra.mxu1 %v1327_v23 }
  0x36   :  { %355 = vmatpush1.bf16.msra.mxu0 %v1146_v26 }
  0x37   :  { %1162 = vmatprep.subr.msk.bf16.mxu0 %vm245_vm0, %v1155_v27 }
  0x3a   :  { %357 = vmatpush1.bf16.msra.mxu0 %v259_v6 }
  0x3b   :  { %1231 = vmatprep.subr.bf16.mxu0 %v1307_v28 }
  0x3d   :  { %1163 = vmatmul.mubr.msk.bf16.vlgmr.msra.gmra.mrb[8].mxu0 %vm241_vm3, %v140_v10 }
  0x3e   :  { %1232 = vmatpush3.bf16.msra.mxu0 %v1308_v29 }
  0x3f   :  { %12 = vsyncpa [#allocation3], 0  ;;  %1233 = vmatprep.subr.bf16.mxu0 %v1309_v30  ;;  %v1311_v32 = vld [vmem:[%s1783_s5 + $0x50] sm:$0xff]   ;;  %v1314_v34 = vld [vmem:[%s1783_s5 + $0x58] sm:$0xff]   ;;  %v94_v53 = vlaneseq  ;;  %vm949_vm4 = vcmask 850944   ;;  %vm1116_vm5 = vcmask 25600  }
  0x40   :  { %v1312_v33 = vld [vmem:[%s1783_s5 + $0x10] sm:$0xff]   ;;  %v1316_v35 = vld [vmem:[%s1783_s5 + $0x18] sm:$0xff]   ;;  %v1318_v36 = vld [vmem:[%s1783_s5 + $0x60] sm:$0xff]  }
  0x41   :  { %v1320_v37 = vld [vmem:[%s1783_s5 + $0x20] sm:$0xff]   ;;  %v1322_v38 = vld [vmem:[%s1783_s5 + $0x68] sm:$0xff]   ;;  %v1326_v40 = vld [vmem:[%s1783_s5 + $0x70] sm:$0xff]   ;;  %v1632_v54 = vshrl.u32 %v94_v53, 7 }
  0x42   :  { %1234 = vmatpush3.bf16.msra.mxu0 %v1310_v31  ;;  %v1324_v39 = vld [vmem:[%s1783_s5 + $0x28] sm:$0xff]   ;;  %v1328_v41 = vld [vmem:[%s1783_s5 + $0x30] sm:$0xff]   ;;  %v1329_v42 = vld [vmem:[%s1783_s5 + $0xe0] sm:$0xff]  }
  0x43   :  { %1235 = vmatprep.subr.bf16.mxu0 %v1311_v32  ;;  %v1330_v43 = vld [vmem:[%s1783_s5 + $0x78] sm:$0xff]   ;;  %v1331_v44 = vld [vmem:[%s1783_s5 + $0xa0] sm:$0xff]   ;;  %1261 = vmatprep.subr.bf16.mxu1 %v1329_v42  ;;  %v1333_v46 = vld [vmem:[%s1783_s5 + $0xe8] sm:$0xff]   ;;  %v96_v55 = vsub.s32 0, %v1632_v54  ;;  %v100_v57 = vsub.s32 1, %v1632_v54  ;;  %v104_v11 = vsub.s32 2, %v1632_v54 }
  0x44   :  { %v1332_v45 = vld [vmem:[%s1783_s5 + $0x38] sm:$0xff]   ;;  %1262 = vmatpush3.bf16.msra.mxu1 %v1331_v44  ;;  %v1334_v47 = vld [vmem:[%s1783_s5 + $0xa8] sm:$0xff]   ;;  %v1335_v48 = vld [vmem:[%s1783_s5 + $0x140] sm:$0xff]   ;;  %v108_v12 = vsub.s32 3, %v1632_v54  ;;  %v124_v13 = vsub.s32 7, %v1632_v54 }
  0x45   :  { %1263 = vmatprep.subr.bf16.mxu1 %v1333_v46  ;;  %v1337_v49 = vld [vmem:[%s1783_s5 + $0xf0] sm:$0xff]   ;;  %v1341_v51 = vld [vmem:[%s1783_s5 + $0xf8] sm:$0xff]   ;;  %v1638_v56 = vld [vmem:[%s1782_s4] sm:$0xff] }
  0x46   :  { %1236 = vmatpush3.bf16.msra.mxu0 %v1312_v33  ;;  %v1338_v50 = vld [vmem:[%s1783_s5 + $0xb0] sm:$0xff]   ;;  %v1342_v52 = vld [vmem:[%s1783_s5 + $0xb8] sm:$0xff]   ;;  %v97_v58 = vrot.slane %v1638_v56, %v96_v55  ;;  %v101_v59 = vrot.slane %v1638_v56, %v100_v57  ;;  %v1336_v8 = vld [vmem:[%s1783_s5 + $0x100] sm:$0xff]   ;;  %v105_v15 = vrot.slane %v1638_v56, %v104_v11  ;;  %v109_v17 = vrot.slane %v1638_v56, %v108_v12 }
  0x47   :  { %1237 = vmatprep.subr.bf16.mxu0 %v1314_v34  ;;  %v1339_v10 = vld [vmem:[%s1783_s5 + $0x148] sm:$0xff]   ;;  %v1343_v16 = vld [vmem:[%s1783_s5 + $0x150] sm:$0xff]   ;;  %v125_v18 = vrot.slane %v1638_v56, %v124_v13  ;;  %v1345_v23 = vld [vmem:[%s1783_s5 + $0x158] sm:$0xff]   ;;  %v116_v33 = vsub.s32 5, %v1632_v54 }
  0x48   :  { %1264 = vmatpush3.bf16.msra.mxu1 %v1334_v47  ;;  %v1340_v14 = vld [vmem:[%s1783_s5 + $0x108] sm:$0xff]   ;;  %v1344_v20 = vld [vmem:[%s1783_s5 + $0x110] sm:$0xff]   ;;  %v1346_v29 = vld [vmem:[%s1783_s5 + $0x180] sm:$0xff]  }
  0x49   :  { %1265 = vmatprep.subr.bf16.mxu1 %v1337_v49  ;;  %v1347_v30 = vld [vmem:[%s1783_s5 + $0x118] sm:$0xff]   ;;  %v1348_v32 = vld [vmem:[%s1783_s5 + $0x160] sm:$0xff]  }
  0x4a   :  { %1238 = vmatpush3.bf16.msra.mxu0 %v1316_v35  ;;  %v1349_v35 = vld [vmem:[%s1783_s5 + $0x188] sm:$0xff]   ;;  %v1355_v49 = vld [vmem:[%s1783_s5 + $0x198] sm:$0xff]   ;;  %v1358_v55 = vld [vmem:[%s1783_s5 + $0x1a0] sm:$0xff]  }
  0x4b   :  { %1239 = vmatprep.subr.bf16.mxu0 %v1318_v36  ;;  %v1350_v36 = vld [vmem:[%s1783_s5 + $0x120] sm:$0xff]   ;;  %v1359_v57 = vld [vmem:[%s1783_s5 + $0x138] sm:$0xff]  }
  0x4c   :  { %1266 = vmatpush3.bf16.msra.mxu1 %v1338_v50  ;;  %v1356_v50 = vld [vmem:[%s1783_s5 + $0x130] sm:$0xff]  }
  0x4d   :  { %1267 = vmatprep.subr.bf16.mxu1 %v1341_v51 }
  0x4e   :  { %1240 = vmatpush3.bf16.msra.mxu0 %v1320_v37  ;;  %v1351_v37 = vld [vmem:[%s1783_s5 + $0x168] sm:$0xff]  }
  0x4f   :  { %1241 = vmatprep.subr.bf16.mxu0 %v1322_v38  ;;  %v117_v38 = vrot.slane %v1638_v56, %v116_v33 }
  0x50   :  { %1268 = vmatpush3.bf16.msra.mxu1 %v1342_v52  ;;  %v1357_v52 = vld [vmem:[%s1783_s5 + $0x178] sm:$0xff]  }
  0x51   :  { %1076 = vmatprep.subr.bf16.mxu1 %v1394_v7 }
  0x52   :  { %1242 = vmatpush3.bf16.msra.mxu0 %v1324_v39  ;;  %v112_v39 = vsub.s32 4, %v1632_v54 }
  0x53   :  { %1243 = vmatprep.subr.bf16.mxu0 %v1326_v40  ;;  %v1352_v40 = vld [vmem:[%s1783_s5 + $0x190] sm:$0xff]  }
  0x54   :  { %v113_v47 = vrot.slane %v1638_v56, %v112_v39 }
  0x56   :  { %1244 = vmatpush3.bf16.msra.mxu0 %v1328_v41  ;;  %v1353_v41 = vld [vmem:[%s1783_s5 + $0x128] sm:$0xff]  }
  0x57   :  { %1245 = vmatprep.subr.bf16.mxu0 %v1330_v43  ;;  %v1354_v43 = vld [vmem:[%s1783_s5 + $0x170] sm:$0xff]  }
  0x5a   :  { %1246 = vmatpush3.bf16.msra.mxu0 %v1332_v45 }
  0x5b   :  { %1275 = vmatprep.subr.bf16.mxu0 %v1335_v48 }
  0xf8   :  { %v304_v60 = vpop.f32.mrb[0].mxu0  ;;  %v1643_v61 = vpop.f32.mrb[0].mxu1 }
  0xf9   :  { %v305_v62 = vadd.f32 %v304_v60, %v97_v58  ;;  %v306_v63 = vpop.f32.mrb[1].mxu0  ;;  %v429_v0 = vpop.f32.mrb[1].mxu1  ;;  %v1361_v60 = vld [vmem:[%s1783_s5 + $0x1b0] sm:$0xff]  }
  0xfa   :  { %v307_v1 = vadd.f32 %v306_v63, %v101_v59  ;;  %v308_v2 = vpop.f32.mrb[2].mxu0  ;;  %v431_v3 = vpop.f32.mrb[2].mxu1  ;;  %v430_v26 = vadd.f32 %v429_v0, %v125_v18  ;;  %v1360_v59 = vld [vmem:[%s1783_s5 + $0x1a8] sm:$0xff]   ;;  %v1363_v63 = vld [vmem:[%s1783_s5 + $0x1c0] sm:$0xff]  }
  0xfb   :  { %v309_v4 = vpop.f32.mrb[3].mxu0  ;;  %v432_v5 = vpop.f32.mrb[3].mxu1  ;;  %v434_v9 = vpack.c.bf16 %v305_v62, %v305_v62  ;;  %v1362_v62 = vld [vmem:[%s1783_s5 + $0x1b8] sm:$0xff]   ;;  %v1364_v0 = vld [vmem:[%s1783_s5 + $0x1c8] sm:$0xff]   ;;  %v1367_v3 = vld [vmem:[%s1783_s5 + $0x1e0] sm:$0xff]  }
  0xfc   :  { %v435_v6 = vpack.c.bf16 %v307_v1, %v307_v1  ;;  %v441_v34 = vpack.c.bf16 %v430_v26, %v430_v26  ;;  %v1365_v1 = vld [vmem:[%s1783_s5 + $0x1d0] sm:$0xff]   ;;  %v1366_v2 = vld [vmem:[%s1783_s5 + $0x1d8] sm:$0xff]   ;;  %v120_v4 = vsub.s32 6, %v1632_v54  ;;  %v1368_v5 = vld [vmem:[%s1783_s5 + $0x1e8] sm:$0xff]  }
  0xfe   :  { %988 = vmatprep.mubr.bf16.mxu0 %v435_v6  ;;  %v121_v6 = vrot.slane %v1638_v56, %v120_v4 }
  0xff   :  { %989 = vmatmul.mubr.bf16.vlgmr.msra.gmra.mrb[12].mxu0 %v434_v9 }
 0x100   :  { %1276 = vmatpush3.bf16.msra.mxu0 %v1336_v8  ;;  %v1369_v8 = vld [vmem:[%s1783_s5 + $0x1f0] ss:$0 sps:$4 sm:$0xff]   ;;  %v428_v9 = vadd.f32 %v1643_v61, %v121_v6  ;;  %s1395_s5 = smov [#allocation2]  }
 0x101   :  { %1277 = vmatprep.subr.bf16.mxu0 %v1339_v10  ;;  %v954_v54 = vsel %vm245_vm0, %v1369_v8, 0  ;;  %s1124_s15 = sshll.u32 %s1395_s5, 4  ;;  %s1125_s15 = int_to_ptr.vmem [resolvable:$true] %s1124_s15 }
 0x102   :  { %v440_v10 = vpack.c.bf16 %v428_v9, %v428_v9  ;;  %p1375_p1 = scmp.lt.s32.totalorder %s1125_s15, %s1125_s15 }
 0x104   :  { %v345_v19 = vpop.f32.mrb[4].mxu0  ;;  %1278 = vmatpush3.bf16.msra.mxu0 %v1340_v14 }
 0x105   :  { %v346_v21 = vadd.f32 %v345_v19, %v105_v15  ;;  %v347_v22 = vpop.f32.mrb[5].mxu0  ;;  %1279 = vmatprep.subr.bf16.mxu0 %v1343_v16  ;;  %v1166_v15 = vld [vmem:[%s1784_s6] ss:$0 sm:$0xff]  ;;  %s1370_s6 = scalar_lea.vmem %s1125_s15, 32 }
 0x106   :  { %v348_v24 = vadd.f32 %v347_v22, %v109_v17  ;;  %v349_v25 = vpop.f32.mrb[6].mxu0  ;;  %p1371_p0 = scmp.ne.s32.totalorder %s1125_s15, %s1370_s6  ;;  %p1376_p2 = scmp.lt.s32.totalorder %s1370_s6, %s1370_s6 }
 0x107   :  { %v350_v27 = vpop.f32.mrb[7].mxu0  ;;  %v436_v31 = vpack.c.bf16 %v346_v21, %v346_v21 }
 0x108   :  { %v437_v28 = vpack.c.bf16 %v348_v24, %v348_v24  ;;  %1280 = vmatpush3.bf16.msra.mxu0 %v1344_v20  ;;  %p1377_p3 = por %p1376_p2, %p1375_p1 }
 0x109   :  { %1281 = vmatprep.subr.bf16.mxu0 %v1345_v23 }
 0x10a   :  { %1028 = vmatprep.mubr.bf16.mxu1 %v437_v28  ;;  %p1378_p4 = pnand %p1377_p3, %p1371_p0 }
 0x10b   :  { %1029 = vmatmul.mubr.bf16.vlgmr.msra.gmra.mrb[4].mxu1 %v436_v31 }
 0x10c   :  { %1077 = vmatpush1.bf16.msra.mxu1 %v1346_v29  ;;  %1282 = vmatpush3.bf16.msra.mxu0 %v1347_v30 }
 0x10d   :  { %1078 = vmatprep.subr.bf16.mxu1 %v1394_v7  ;;  %1283 = vmatprep.subr.bf16.mxu0 %v1348_v32 }
 0x10e   :  { %1230 = vmatprep.mubr.msk.bf16.mxu1 %vm949_vm4, %v441_v34 }
 0x110   :  { %1079 = vmatpush1.bf16.msra.mxu1 %v1349_v35  ;;  %1284 = vmatpush3.bf16.msra.mxu0 %v1350_v36  ;;  %v386_v42 = vpop.f32.mrb[8].mxu0 }
 0x111   :  { %1080 = vmatprep.subr.bf16.mxu1 %v1394_v7  ;;  %1285 = vmatprep.subr.bf16.mxu0 %v1351_v37  ;;  %v388_v44 = vpop.f32.mrb[9].mxu0  ;;  %v387_v53 = vadd.f32 %v386_v42, %v113_v47 }
 0x112   :  { %v389_v45 = vadd.f32 %v388_v44, %v117_v38  ;;  %v390_v46 = vpop.f32.mrb[10].mxu0 }
 0x113   :  { %v391_v48 = vpop.f32.mrb[11].mxu0  ;;  %v438_v58 = vpack.c.bf16 %v387_v53, %v387_v53 }
 0x114   :  { %1081 = vmatpush1.bf16.msra.mxu1 %v1352_v40  ;;  %1286 = vmatpush3.bf16.msra.mxu0 %v1353_v41  ;;  %v439_v51 = vpack.c.bf16 %v389_v45, %v389_v45 }
 0x115   :  { %1082 = vmatprep.subr.bf16.mxu1 %v1394_v7  ;;  %1287 = vmatprep.subr.bf16.mxu0 %v1354_v43 }
 0x116   :  { %1068 = vmatprep.mubr.bf16.mxu0 %v439_v51 }
 0x118   :  { %1083 = vmatpush1.bf16.msra.mxu1 %v1355_v49  ;;  %1288 = vmatpush3.bf16.msra.mxu0 %v1356_v50 }
 0x119   :  { %1084 = vmatprep.subr.bf16.mxu1 %v1394_v7  ;;  %1289 = vmatprep.subr.bf16.mxu0 %v1357_v52 }
 0x11c   :  { %1085 = vmatpush1.bf16.msra.mxu1 %v1358_v55  ;;  %1290 = vmatpush3.bf16.msra.mxu0 %v1359_v57 }
 0x11d   :  { %1086 = vmatprep.subr.bf16.mxu1 %v1394_v7 }
 0x11f   :  { %1069 = vmatmul.mubr.bf16.vlgmr.msra.gmra.mrb[16].mxu0 %v438_v58 }
 0x120   :  { %1087 = vmatpush1.bf16.msra.mxu1 %v1360_v59 }
 0x121   :  { %1088 = vmatprep.subr.bf16.mxu1 %v1394_v7 }
 0x124   :  { %1089 = vmatpush1.bf16.msra.mxu1 %v1361_v60 }
 0x125   :  { %1090 = vmatprep.subr.bf16.mxu1 %v1394_v7 }
 0x128   :  { %1091 = vmatpush1.bf16.msra.mxu1 %v1362_v62 }
 0x129   :  { %1092 = vmatprep.subr.bf16.mxu1 %v1394_v7 }
 0x12c   :  { %1093 = vmatpush1.bf16.msra.mxu1 %v1363_v63 }
 0x12d   :  { %1094 = vmatprep.subr.bf16.mxu1 %v1394_v7 }
 0x130   :  { %1095 = vmatpush1.bf16.msra.mxu1 %v1364_v0 }
 0x131   :  { %1096 = vmatprep.subr.bf16.mxu1 %v1394_v7 }
 0x134   :  { %1097 = vmatpush1.bf16.msra.mxu1 %v1365_v1 }
 0x135   :  { %1098 = vmatprep.subr.bf16.mxu1 %v1394_v7 }
 0x138   :  { %1099 = vmatpush1.bf16.msra.mxu1 %v1366_v2 }
 0x139   :  { %1100 = vmatprep.subr.bf16.mxu1 %v1394_v7 }
 0x13c   :  { %1101 = vmatpush1.bf16.msra.mxu1 %v1367_v3 }
 0x13d   :  { %1102 = vmatprep.subr.bf16.mxu1 %v1394_v7 }
 0x140   :  { %1103 = vmatpush1.bf16.msra.mxu1 %v1368_v5 }
 0x141   :  { %1104 = vmatprep.subr.bf16.mxu1 %v1394_v7 }
 0x144   :  { %1105 = vmatpush1.bf16.msra.mxu1 %v954_v54 }
 0x147   :  { %1109 = vmatmul.mubr.bf16.vlgmr.msra.gmra.mrb[8].mxu1 %v440_v10 }
 0x1d2   :  { %v1247_v11 = vpop.f32.mrb[12].mxu0 }
 0x1d3   :  { %v1248_v12 = vpop.f32.mrb[13].mxu0 }
 0x1d4   :  { %v1249_v13 = vadd.f32 %v1248_v12, %v1247_v11  ;;  %v1250_v56 = vpop.f32.mrb[14].mxu0 }
 0x1d5   :  { %v1251_v14 = vpop.f32.mrb[15].mxu0 }
 0x1d6   :  { %v991_v18 = vadd.f32 %v1249_v13, %v1166_v15 }
 0x1de   :  { %v1269_v16 = vpop.f32.mrb[4].mxu1 }
 0x1df   :  { %v1270_v17 = vpop.f32.mrb[5].mxu1 }
 0x1e0   :  { %v1271_v61 = vadd.f32 %v1270_v17, %v1269_v16  ;;  %v1272_v19 = vpop.f32.mrb[6].mxu1 }
 0x1e1   :  { %v1273_v7 = vpop.f32.mrb[7].mxu1 }
 0x1e2   :  { %v1031_v20 = vadd.f32 %v1271_v61, %v991_v18 }
 0x1f2   :  { %v1291_v21 = vpop.f32.mrb[16].mxu0 }
 0x1f3   :  { %v1292_v22 = vpop.f32.mrb[17].mxu0 }
 0x1f4   :  { %v1293_v23 = vadd.f32 %v1292_v22, %v1291_v21  ;;  %v1294_v24 = vpop.f32.mrb[18].mxu0 }
 0x1f5   :  { %v1295_v25 = vpop.f32.mrb[19].mxu0 }
 0x1f6   :  { %v1071_v26 = vadd.f32 %v1293_v23, %v1031_v20 }
 0x21a   :  { %v1110_v27 = vpop.f32.mrb[8].mxu1 }
 0x21b   :  { %v1111_v28 = vadd.f32 %v1110_v27, %v1071_v26  ;;  %v1112_v29 = vpop.f32.mrb[9].mxu1 }
 0x21c   :  { %v1113_v30 = vpop.f32.mrb[10].mxu1 }
 0x21d   :  { %v1114_v31 = vpop.f32.mrb[11].mxu1  ;;  %1117 = vst.msk [vmem:[#allocation2] sm:$0x3] %vm1116_vm5, %v1111_v28 }
 0x21e   :  { %1381 = shalt.err (!%p1378_p4)
}
 0x21f   :  { %s1382_s18 = scalar_lea.hbm %s1785_s7, 32 }
 0x220   :  { %p1383_p5 = scmp.ne.s32.totalorder %s1785_s7, %s1382_s18  ;;  %p1386_p6 = scmp.lt.u32.totalorder %s1382_s18, %s1785_s7 }
 0x222   :  { %p1388_p7 = pnand %p1386_p6, %p1383_p5 }
 0x224   :  { %1391 = shalt.err (!%p1388_p7)
}
 0x225   :  { %1127 = dma.vmem_to_hbm [thread:$0]  %s1125_s15, 32, %s1785_s7, [#allocation3]  }
 0x226   :  { %1392 = dma.done.wait [#allocation3], 32  }
 0x227   :  { %1393 = vsyncadd [#allocation3], 4294967264 }
 0x228   :  { %1131 = vsyncpa [#allocation3], 1 }

</bundles_post_ra>
